<compile_context>
chip_gen: v7x
topology: tpu7x:2x2x1
jax: 0.10.0
libtpu: 0.0.40
codegen_flags: <defaults>
</compile_context>

<pallas_src>
import functools

import jax
import jax.numpy as jnp
from jax.experimental import pallas as pl
from jax.experimental.pallas import tpu as pltpu


def _linear_act_kernel(x_ref, w_ref, b_ref, o_ref, *, activation):
    """One N-tile of y = act(x @ w + b); x is fully resident, w is a (K, tn) panel."""
    y = jnp.dot(x_ref[...], w_ref[...], preferred_element_type=jnp.float32)
    y = y + b_ref[...]
    if activation == "leaky_relu":
        y = jnp.where(y > 0, y, 0.2 * y)
    elif activation == "sigmoid":
        y = 1.0 / (1.0 + jnp.exp(-y))
    o_ref[...] = y.astype(o_ref.dtype)


def _pick_tn(K, N, max_panel_bytes):
    """Largest power-of-two-multiple-of-128 tn dividing N with K*tn*4 <= budget,
    keeping >= 2 grid steps (megacore) whenever N > 128."""
    if N % 128 != 0:
        return N  # fall back to full width (block equals full array dim)
    best = 128
    j = 128
    while j <= N:
        if N % j == 0:
            panel_bytes = K * j * 4
            if panel_bytes <= max_panel_bytes and (N // j >= 2 or N <= 128):
                best = j
        j *= 2
    return best


def pallas_linear(x, w, b, activation=None, *, max_panel_bytes=8 * 1024 * 1024):
    """y = activation(x @ w + b) via a weight-streaming Pallas TPU kernel.

    x: [B, K] float32 (B a multiple of 8), w: [K, N] float32, b: [N] float32.
    """
    B, K = x.shape
    Kw, N = w.shape
    assert Kw == K
    tn = _pick_tn(K, N, max_panel_bytes)
    assert N % tn == 0
    grid = (N // tn,)

    b2d = b.reshape(1, N)
    kernel = functools.partial(_linear_act_kernel, activation=activation)

    return pl.pallas_call(
        kernel,
        out_shape=jax.ShapeDtypeStruct((B, N), jnp.float32),
        grid_spec=pltpu.PrefetchScalarGridSpec(
            num_scalar_prefetch=0,
            grid=grid,
            in_specs=[
                pl.BlockSpec((B, K), lambda j: (0, 0)),    # x: fully resident
                pl.BlockSpec((K, tn), lambda j: (0, j)),   # w: full-K column panel
                pl.BlockSpec((1, tn), lambda j: (0, j)),   # bias tile
            ],
            out_specs=pl.BlockSpec((B, tn), lambda j: (0, j)),
        ),
        compiler_params=pltpu.CompilerParams(
            dimension_semantics=("parallel",),
            vmem_limit_bytes=48 * 1024 * 1024,
        ),
        cost_estimate=pl.CostEstimate(
            flops=2 * B * K * N,
            transcendentals=0,
            bytes_accessed=K * N * 4 + B * K * 4 + B * N * 4 + N * 4,
        ),
    )(x, w, b2d)


def init_params(key, img_shape):
    """Deterministic PyTorch-Linear-style init: U(-1/sqrt(fan_in), 1/sqrt(fan_in))."""
    in_dim = 1
    for d in img_shape:
        in_dim *= d
    dims = [in_dim, 4096, 2048, 1024, 1]
    params = []
    for i in range(len(dims) - 1):
        fan_in, fan_out = dims[i], dims[i + 1]
        key, kw, kb = jax.random.split(key, 3)
        bound = 1.0 / (fan_in ** 0.5)
        w = jax.random.uniform(kw, (fan_in, fan_out), jnp.float32, -bound, bound)
        b = jax.random.uniform(kb, (fan_out,), jnp.float32, -bound, bound)
        params.append((w, b))
    return params


def discriminator_basic_forward(params, img):
    """img: [B, C, H, W] -> validity: [B, 1]."""
    B = img.shape[0]
    x = img.reshape(B, -1).astype(jnp.float32)

    # Pad batch to a full sublane group (8) so Pallas loads/stores are unmasked.
    B_pad = ((B + 7) // 8) * 8
    if B_pad != B:
        x = jnp.pad(x, ((0, B_pad - B), (0, 0)))

    (w1, b1), (w2, b2), (w3, b3), (w4, b4) = params

    x = pallas_linear(x, w1, b1, activation="leaky_relu")   # [B_pad, 4096]
    # Dropout(0.25): identity in eval mode.
    x = pallas_linear(x, w2, b2, activation="leaky_relu")   # [B_pad, 2048]
    # Dropout(0.25): identity in eval mode.
    x = pallas_linear(x, w3, b3, activation="leaky_relu")   # [B_pad, 1024]

    # Final [1024 -> 1] layer in plain JAX: a width-1 Pallas output would be
    # pure masked-store / launch overhead for ~4 KB of weights.
    x = jax.nn.sigmoid(x @ w4 + b4)                          # [B_pad, 1]
    return x[:B]


if __name__ == "__main__":
    key = jax.random.PRNGKey(0)
    img_shape = (4, 16, 16)   # C, H, W  -> flat dim 1024
    batch = 2

    key, k_img = jax.random.split(key)
    img = jax.random.normal(k_img, (batch,) + img_shape, jnp.float32)

    params = init_params(jax.random.PRNGKey(0), img_shape)

    out = discriminator_basic_forward(params, img)
    out = jax.block_until_ready(out)

    assert out.shape == (batch, 1), out.shape
    assert bool(jnp.all((out >= 0.0) & (out <= 1.0)))
    print("KERNEL_OK")
</pallas_src>

<mosaic_0001>
module attributes {stable_mosaic.version = 11 : i64} {
  func.func @_linear_act_kernel(%arg0: i32, %arg1: memref<8x1024xf32, #tpu.memory_space<vmem>>, %arg2: memref<1024x2048xf32, #tpu.memory_space<vmem>>, %arg3: memref<1x2048xf32, #tpu.memory_space<vmem>>, %arg4: memref<8x2048xf32, #tpu.memory_space<vmem>>) attributes {dimension_semantics = [#tpu.dimension_semantics<parallel>], iteration_bounds = array<i64: 2>, scalar_prefetch = 0 : i64, scratch_operands = 0 : i64, tpu.core_type = #tpu.core_type<tc>, window_params = [{pipeline_mode = #tpu.pipeline_mode<synchronous>, transform_indices = @transform_0, window_bounds = array<i64: 8, 1024>}, {transform_indices = @transform_1, window_bounds = array<i64: 1024, 2048>}, {transform_indices = @transform_2, window_bounds = array<i64: 1, 2048>}, {transform_indices = @transform_3, window_bounds = array<i64: 8, 2048>}]} {
    %c0 = arith.constant 0 : index
    %c0_0 = arith.constant 0 : index
    %0 = vector.load %arg1[%c0, %c0_0] : memref<8x1024xf32, #tpu.memory_space<vmem>>, vector<8x1024xf32>
    %c0_1 = arith.constant 0 : index
    %c0_2 = arith.constant 0 : index
    %1 = vector.load %arg2[%c0_1, %c0_2] : memref<1024x2048xf32, #tpu.memory_space<vmem>>, vector<1024x2048xf32>
    %cst = arith.constant dense<0.000000e+00> : vector<8x2048xf32>
    %2 = tpu.matmul %0, %1, %cst {dimension_numbers = #tpu.dot_dimension_numbers<[1], [0], [0], [1], [0, 0, 1, 1], [], []>} : vector<8x1024xf32>, vector<1024x2048xf32>, vector<8x2048xf32> -> vector<8x2048xf32>
    %c0_3 = arith.constant 0 : index
    %c0_4 = arith.constant 0 : index
    %3 = vector.load %arg3[%c0_3, %c0_4] : memref<1x2048xf32, #tpu.memory_space<vmem>>, vector<1x2048xf32>
    %4 = vector.broadcast %3 : vector<1x2048xf32> to vector<8x2048xf32>
    %5 = arith.addf %2, %4 : vector<8x2048xf32>
    %cst_5 = arith.constant 0.000000e+00 : f32
    %6 = vector.broadcast %cst_5 : f32 to vector<8x2048xf32>
    %7 = arith.cmpf ogt, %5, %6 : vector<8x2048xf32>
    %cst_6 = arith.constant 2.000000e-01 : f32
    %8 = vector.broadcast %cst_6 : f32 to vector<8x2048xf32>
    %9 = arith.mulf %8, %5 : vector<8x2048xf32>
    %10 = arith.select %7, %5, %9 : vector<8x2048xi1>, vector<8x2048xf32>
    %c0_7 = arith.constant 0 : index
    %c0_8 = arith.constant 0 : index
    %11 = vector.load %arg4[%c0_7, %c0_8] : memref<8x2048xf32, #tpu.memory_space<vmem>>, vector<8x2048xf32>
    tpu.vector_store %arg4[%c0_7, %c0_8], %10 {strides = array<i32>} : memref<8x2048xf32, #tpu.memory_space<vmem>>, vector<8x2048xf32>,
    return
  }
  func.func @transform_0(%arg0: i32) -> (i32, i32) {
    %c0_i32 = arith.constant 0 : i32
    %c0_i32_0 = arith.constant 0 : i32
    %c0_i32_1 = arith.constant 0 : i32
    return %c0_i32, %c0_i32_0 : i32, i32
  }
  func.func @transform_1(%arg0: i32) -> (i32, i32) {
    %c0_i32 = arith.constant 0 : i32
    %c0_i32_0 = arith.constant 0 : i32
    return %c0_i32, %arg0 : i32, i32
  }
  func.func @transform_2(%arg0: i32) -> (i32, i32) {
    %c0_i32 = arith.constant 0 : i32
    %c0_i32_0 = arith.constant 0 : i32
    return %c0_i32, %arg0 : i32, i32
  }
  func.func @transform_3(%arg0: i32) -> (i32, i32) {
    %c0_i32 = arith.constant 0 : i32
    %c0_i32_0 = arith.constant 0 : i32
    return %c0_i32, %arg0 : i32, i32
  }
}

</mosaic_0001>

<bundles_post_ra>
// kernel: tpu_custom_call.1
= control target key start
LH: loop header
LB: loop body
LE: loop exit
PB: predicated region body
PF: predicated region fallthrough
CT: control target
= control target key end

     0   :  { %8 = vsyncpa [#allocation3], 0  ;;  %s9608_s0 = inlined_call_operand.hbm [shape: f32[8,1024], index: 0, kind: input, shape index: {}]   ;;  %s9609_s1 = inlined_call_operand.hbm [shape: f32[1024,4096], index: 1, kind: input, shape index: {}]   ;;  %s9610_s2 = inlined_call_operand.hbm [shape: f32[1,4096], index: 2, kind: input, shape index: {}]   ;;  %s9611_s3 = inlined_call_operand.hbm [shape: f32[8,4096], index: 3, kind: output, shape index: {}]  }
   0x1   :  { %9 = vsyncpa [#allocation6], 0 }
   0x2   :  { %11 = vsyncpa [#allocation6 + $0x1], 0 }
   0x3   :  { %12 = vsyncpa [#allocation4], 0 }
   0x4   :  { %14 = vsyncpa [#allocation4 + $0x1], 0  ;;  %s7245_s12 = smov 0   ;;  %s7247_s13 = smov 0  }
   0x5   :  { %s7249_s14 = smov 0   ;;  %s7251_s15 = smov 0  }
   0x6 LB: > { %s7266_s16 = sadd.s32 1, %s7216_s15   ;;  %s48_s17 = sadd.s32 1, %s7212_s14  ;;  %s7216_s15 = sphi %s7251_s15, %s9638_s15   ;;  %s7212_s14 = sphi %s7249_s14, %s9637_s14   ;;  %s7208_s13 = sphi %s7247_s13, %s9636_s13   ;;  %s7204_s12 = sphi %s7245_s12, %s9635_s12  }
   0x7   : > { %s45_s18 = ssub.s32 %s7216_s15, %s7266_s16  ;;  %p55_p0 = scmp.ne.s32.totalorder %s7212_s14, %s7208_s13 }
   0x8   : > { %p46_p1 = scmp.eq.s32.totalorder %s45_s18, 0  ;;  %p56_p2 = scmp.eq.s32.totalorder %s7216_s15, 0 }
   0x9   : > { %p6994_p4 = scmp.lt.s32.totalorder %s7216_s15, 2  ;;  %s148_s20 = sand.u32 1, %s7216_s15  }
   0xa   : > { %s7277_s19 = scalar_select %p46_p1, %s7212_s14, %s48_s17  }
   0xb   : > { %p57_p5 = por %p56_p2, %p55_p0  ;;  %s150_s21 = sand.u32 1, %s7212_s14  }
   0xc   : > { %s4837_s22 = sshll.u32 %s150_s21, 14  ;;  %s4853_s23 = sshll.u32 %s7216_s15, 11 }
   0xd   : > { %s7290_s26 = scalar_lea.hbm %s9609_s1, %s4853_s23  ;;  %s152_s27 = scalar_lea.vmem [#allocation5], %s4837_s22 }
   0xe   : > { %s159_s28 = sshll.u32 %s152_s27, 4  ;;  %p7292_p6 = pnand %p6994_p4, %p57_p5  ;;  %s7296_s28 = int_to_ptr.vmem [resolvable:$true] %s159_s28 }
   0xf   : > { %s7298_s30 = scalar_lea.sflag [#allocation6], %s148_s20  ;;  %s7058_s4 = scalar_lea.hbm %s7290_s26, 262144 }
  0x10   : > { %s9619_s29 = scalar_select %p7292_p6, 1, 0 }
  0x11   : > { %p7059_p7 = scmp.ne.s32.totalorder %s7290_s26, %s7058_s4  ;;  %p9613_p8 = pneg %p7292_p6 }
  0x12   : > { %s7063_s7 = scalar_lea.hbm %s9609_s1, 524288  ;;  %p7064_p11 = scmp.lt.u32.totalorder %s7290_s26, %s9609_s1 }
  0x13   : > { %p7061_p9 = pnand %p9613_p8, %p7059_p7  ;;  %p7065_p12 = scmp.lt.u32.totalorder %s7063_s7, %s7058_s4 }
  0x14   : > { %p7067_p1 = scmp.lt.u32.totalorder %s7058_s4, %s7290_s26 }
  0x15   : > { %p7062_p10 = pneg %p7061_p9  ;;  %p7066_p13 = por %p7065_p12, %p7064_p11 }
  0x17   : > { %p7068_p2 = por %p7067_p1, %p7066_p13 }
  0x19   : > { %p7069_p4 = pnand %p7068_p2, %p7062_p10 }
  0x1b   : > { %7072 = shalt.err (!%p7069_p4)
}
  0x1c   : > { %s7073_s10 = scalar_lea.vmem %s7296_s28, 262144  ;;  %s7218_s11 = smov [#allocation5]  }
  0x1d   : > { %p7074_p5 = scmp.ne.s32.totalorder %s7296_s28, %s7073_s10  ;;  %s7078_s17 = sshll.u32 %s7218_s11, 4  ;;  %s7079_s17 = int_to_ptr.vmem [resolvable:$false] %s7078_s17 }
  0x1e   : > { %s7080_s18 = scalar_lea.vmem %s7079_s17, 524288  ;;  %p7081_p3 = scmp.lt.s32.totalorder %s7296_s28, %s7079_s17 }
  0x1f   : > { %p7076_p7 = pnand %p7074_p5, %p9613_p8  ;;  %p7082_p11 = scmp.lt.s32.totalorder %s7080_s18, %s7073_s10 }
  0x21   : > { %p7077_p9 = pneg %p7076_p7  ;;  %p7083_p12 = por %p7082_p11, %p7081_p3 }
  0x23   : > { %p7084_p13 = pnand %p7083_p12, %p7077_p9 }
  0x25   : > { %7087 = shalt.err (!%p7084_p13)
}
  0x26   : > { %s7219_s20 = smov 4096   ;;  %s7220_s22 = smov 2048  }
  0x27   : > { %s7221_s23 = smov 128   ;;  %s7327_s24 = sadd.s32 4294967295, %s7216_s15  }
  0x28   : > { %6985 = dma.hbm_to_vmem [thread:$0]  (!%p7292_p6), %s7290_s26, 262144, %s7296_s28, %s7298_s30, %s7219_s20, %s7220_s22, %s7221_s23  }
  0x29   : > { %s4833_s25 = sadd.s32 4294967294, %s7216_s15   ;;  %p61_p3 = scmp.ne.s32.totalorder %s7208_s13, %s7204_s12 }
  0x2a   : > { %p9612_p10 = scmp.eq.s32.totalorder %s7327_s24, 0  ;;  %p111_p1 = scmp.eq.s32.totalorder %s7327_s24, 1 }
  0x2b   : > { %p117_p2 = scmp.eq.s32.totalorder %s4833_s25, 1  ;;  %p4834_p4 = scmp.ge.s32.totalorder %s7216_s15, 1 }
  0x2c   : > { %p7337_p5 = por %p9612_p10, %p61_p3  ;;  %p7344_p7 = por %p111_p1, %p55_p0 }
  0x2d   : > { %p7348_p9 = por %p117_p2, %p61_p3  ;;  %p124_p11 = scmp.lt.s32.totalorder %s7216_s15, 3 }
  0x2e   : > { %s9620_s27 = scalar_select %p7337_p5, 1, 0 }
  0x2f   : > { %s9621_s26 = scalar_select %p7344_p7, 1, 0 }
  0x30   : > { %s9622_s28 = scalar_select %p7348_p9, 1, 0 }
  0x31   : > { %p7353_p12 = pnand %p4834_p4, %p124_p11  ;;  %s7222_s5 = smov [#allocation2]  }
  0x32   : > { %s137_s6 = sshll.u32 %s7222_s5, 4  ;;  %s4840_s7 = sshll.u32 %s150_s21, 4  ;;  %s138_s6 = int_to_ptr.vmem [resolvable:$true] %s137_s6 }
  0x33   : > { %s9623_s4 = scalar_select %p7353_p12, 1, 0 }
  0x34   : > { %p6978_p13 = pneg %p7353_p12  ;;  %s4854_s8 = sshll.u32 %s7216_s15, 8 }
  0x35   : > { %s173_s9 = scalar_lea.vmem [#allocation7], %s4840_s7  ;;  %s7371_s20 = scalar_lea.hbm %s9610_s2, %s4854_s8 }
  0x36   : > { %s181_s10 = sshll.u32 %s173_s9, 4  ;;  %p7364_p0 = pnand %p6978_p13, %p9612_p10  ;;  %s7373_s10 = int_to_ptr.vmem [resolvable:$true] %s181_s10 }
  0x37   : > { %s7088_s23 = scalar_lea.hbm %s9608_s0, 1024 }
  0x38   : > { %p7089_p3 = scmp.ne.s32.totalorder %s9608_s0, %s7088_s23  ;;  %p7090_p1 = pneg %p7364_p0 }
  0x39   : > { %p7095_p11 = scmp.lt.u32.totalorder %s7088_s23, %s9608_s0 }
  0x3a   : > { %p7091_p2 = pnand %p7090_p1, %p7089_p3 }
  0x3c   : > { %p7092_p4 = pneg %p7091_p2 }
  0x3e   : > { %p7097_p13 = pnand %p7095_p11, %p7092_p4 }
  0x40   : > { %7100 = shalt.err (!%p7097_p13)
}
  0x41   : > { %s7101_s8 = scalar_lea.vmem %s138_s6, 1024  ;;  %p7109_p7 = scmp.lt.s32.totalorder %s138_s6, %s138_s6 }
  0x42   : > { %p7102_p10 = scmp.ne.s32.totalorder %s138_s6, %s7101_s8  ;;  %p7110_p5 = scmp.lt.s32.totalorder %s7101_s8, %s7101_s8 }
  0x44   : > { %p7104_p8 = pnand %p7102_p10, %p7090_p1  ;;  %p7111_p12 = por %p7110_p5, %p7109_p7 }
  0x46   : > { %p7105_p9 = pneg %p7104_p8 }
  0x48   : > { %p7112_p6 = pnand %p7111_p12, %p7105_p9 }
  0x4a   : > { %7115 = shalt.err (!%p7112_p6)
}
  0x4b   : > { %6981 = dma.hbm_to_vmem [thread:$0]  (!%p7364_p0), %s9608_s0, 1024, %s138_s6, [#allocation3]  }
  0x4c   : > { %s7116_s21 = scalar_lea.hbm %s7371_s20, 256  ;;  %p9625_p10 = scmp.ne.s32.totalorder %s9619_s29, 0 }
  0x4d   : > { %p7117_p3 = scmp.ne.s32.totalorder %s7371_s20, %s7116_s21  ;;  %s7121_s25 = scalar_lea.hbm %s9610_s2, 512 }
  0x4e   : > { %p9626_p8 = pneg %p9625_p10  ;;  %p7122_p6 = scmp.lt.u32.totalorder %s7371_s20, %s9610_s2 }
  0x4f   : > { %p7123_p5 = scmp.lt.u32.totalorder %s7121_s25, %s7116_s21  ;;  %p7125_p9 = scmp.lt.u32.totalorder %s7116_s21, %s7371_s20 }
  0x50   : > { %p7119_p1 = pnand %p7117_p3, %p9626_p8 }
  0x51   : > { %p7124_p7 = por %p7123_p5, %p7122_p6 }
  0x52   : > { %p7120_p2 = pneg %p7119_p1 }
  0x53   : > { %p7126_p12 = por %p7125_p9, %p7124_p7 }
  0x55   : > { %p7127_p4 = pnand %p7126_p12, %p7120_p2 }
  0x57   : > { %7130 = shalt.err (!%p7127_p4)
}
  0x58   : > { %s7131_s6 = scalar_lea.vmem %s7373_s10, 256  ;;  %p9627_p11 = pmov %p9626_p8 }
  0x59   : > { %p7132_p0 = scmp.ne.s32.totalorder %s7373_s10, %s7131_s6  ;;  %s7223_s7 = smov [#allocation7]  }
  0x5a   : > { %s7136_s9 = sshll.u32 %s7223_s7, 4  ;;  %s7137_s9 = int_to_ptr.vmem [resolvable:$false] %s7136_s9 }
  0x5b   : > { %p7134_p13 = pnand %p7132_p0, %p9627_p11  ;;  %s7138_s8 = scalar_lea.vmem %s7137_s9, 512 }
  0x5c   : > { %p7139_p8 = scmp.lt.s32.totalorder %s7373_s10, %s7137_s9  ;;  %p7140_p1 = scmp.lt.s32.totalorder %s7138_s8, %s7131_s6 }
  0x5d   : > { %p7135_p3 = pneg %p7134_p13 }
  0x5e   : > { %p7141_p6 = por %p7140_p1, %p7139_p8 }
  0x60   : > { %p7142_p5 = pnand %p7141_p6, %p7135_p3 }
  0x62   : > { %7145 = shalt.err (!%p7142_p5)
}
  0x63   : > { %6988 = dma.hbm_to_vmem [thread:$0]  (!%p9625_p10), %s7371_s20, 256, %s7373_s10, %s7298_s30  }
  0x64   : > { %p9628_p2 = scmp.ne.s32.totalorder %s9623_s4, 0 }
  0x65   : > { %p9629_p7 = scmp.eq.s32.totalorder (!%p9628_p2), %s7327_s24, 0 }
  0x66   : > { %190 = sbr.rel (%p9628_p2) target bundleno = 1376 (0x560), region = 32 }
  0x6d   : > { %7191 = dma.done.wait (%p9629_p7), [#allocation3], 1024   ;;  %p9630_p9 = pmov %p9629_p7 }
  0x6e   : > { %s196_s17 = sand.u32 1, %s7327_s24   ;;  %s7423_s18 = sand.u32 1, %s7208_s13  }
  0x6f   : > { %7193 = vsyncadd (%p9630_p9), [#allocation3], 4294966272  ;;  %s4845_s29 = sshll.u32 %s7423_s18, 14  ;;  %s197_s21 = scalar_lea.sflag [#allocation6], %s196_s17 }
  0x70   : > { %s7426_s22 = scalar_lea.vmem [#allocation5], %s4845_s29  ;;  %p9631_p10 = scmp.ne.s32.totalorder %s9620_s27, 0 }
  0x72   : > { %7195 = dma.done.wait (%p9631_p10), %s197_s21, 262400  }
  0x73   : > { %7197 = vsyncadd (%p9631_p10), %s197_s21, 4294704896  ;;  %v249_v0 = vld [vmem:[%s7426_s22 + $0x8] sm:$0xff]  ;;  %v251_v2 = vld [vmem:[%s7426_s22 + $0x18] sm:$0xff]  ;;  %s4846_s30 = sshll.u32 %s7423_s18, 4  ;;  %s4847_s4 = sshll.u32 %s7423_s18, 7 }
  0x74   : > { %v265_v1 = vld [vmem:[%s7426_s22 + $0x88] sm:$0xff]  ;;  %v267_v4 = vld [vmem:[%s7426_s22 + $0x98] sm:$0xff]  ;;  %v248_v5 = vld [vmem:[%s7426_s22] sm:$0xff]  ;;  %s8376_s27 = scalar_lea.vmem [#allocation7], %s4846_s30  ;;  %s8417_s10 = scalar_lea.vmem [#allocation8], %s4847_s4 }
  0x75   : > { %v4856_v3 = vpack.c.bf16 %v265_v1, %v249_v0  ;;  %v264_v6 = vld [vmem:[%s7426_s22 + $0x80] sm:$0xff]  ;;  %v5112_v7 = vpack.c.bf16 %v267_v4, %v251_v2  ;;  %v250_v9 = vld [vmem:[%s7426_s22 + $0x10] sm:$0xff]  ;;  %v281_v11 = vld [vmem:[%s7426_s22 + $0x108] sm:$0xff]  ;;  %s4855_s20 = sshll.u32 %s7327_s24, 11  ;;  %s4731_s23 = sshll.u32 %s8417_s10, 4  ;;  %s9563_s23 = int_to_ptr.vmem [resolvable:$true] %s4731_s23 }
  0x76   : > { %v4858_v8 = vpack.c.bf16 %v264_v6, %v248_v5  ;;  %v266_v10 = vld [vmem:[%s7426_s22 + $0x90] sm:$0xff]  ;;  %v297_v13 = vld [vmem:[%s7426_s22 + $0x188] sm:$0xff]  ;;  %v283_v14 = vld [vmem:[%s7426_s22 + $0x118] sm:$0xff]  ;;  %s9561_s5 = scalar_lea.hbm %s9611_s3, %s4855_s20  ;;  %s4717_s24 = scalar_lea.sflag [#allocation4], %s7423_s18 }
  0x77   : > { %4857 = vmatprep.subr.bf16.mxu0 %v4856_v3  ;;  %v5114_v12 = vpack.c.bf16 %v266_v10, %v250_v9  ;;  %v299_v15 = vld [vmem:[%s7426_s22 + $0x198] sm:$0xff]  ;;  %5113 = vmatprep.subr.bf16.mxu1 %v5112_v7  ;;  %v4860_v16 = vpack.c.bf16 %v297_v13, %v281_v11  ;;  %v280_v18 = vld [vmem:[%s7426_s22 + $0x100] sm:$0xff]  ;;  %v282_v20 = vld [vmem:[%s7426_s22 + $0x110] sm:$0xff]  ;;  %s7146_s6 = scalar_lea.vmem %s9563_s23, 2048  ;;  %p9632_p4 = scmp.ne.s32.totalorder %s9621_s26, 0 }
  0x78   : > { %4859 = vmatpush1.bf16.msra.mxu0 %v4858_v8  ;;  %v5116_v17 = vpack.c.bf16 %v299_v15, %v283_v14  ;;  %v296_v19 = vld [vmem:[%s7426_s22 + $0x180] sm:$0xff]  ;;  %v298_v22 = vld [vmem:[%s7426_s22 + $0x190] sm:$0xff]  ;;  %v313_v23 = vld [vmem:[%s7426_s22 + $0x208] sm:$0xff]  ;;  %p7147_p12 = scmp.ne.s32.totalorder %s9563_s23, %s7146_s6  ;;  %s7224_s7 = smov [#allocation8]  }
  0x79   : > { %5115 = vmatpush1.bf16.msra.mxu1 %v5114_v12  ;;  %v4862_v21 = vpack.c.bf16 %v296_v19, %v280_v18  ;;  %v329_v24 = vld [vmem:[%s7426_s22 + $0x288] sm:$0xff]  ;;  %4861 = vmatprep.subr.bf16.mxu0 %v4860_v16  ;;  %v5118_v25 = vpack.c.bf16 %v298_v22, %v282_v20  ;;  %v315_v27 = vld [vmem:[%s7426_s22 + $0x218] sm:$0xff]  ;;  %v312_v29 = vld [vmem:[%s7426_s22 + $0x200] sm:$0xff]  ;;  %s7150_s9 = sshll.u32 %s7224_s7, 4  ;;  %s7151_s9 = int_to_ptr.vmem [resolvable:$false] %s7150_s9 }
  0x7a   : > { %5117 = vmatprep.subr.bf16.mxu1 %v5116_v17  ;;  %v4864_v26 = vpack.c.bf16 %v329_v24, %v313_v23  ;;  %v331_v28 = vld [vmem:[%s7426_s22 + $0x298] sm:$0xff]  ;;  %v328_v31 = vld [vmem:[%s7426_s22 + $0x280] sm:$0xff]  ;;  %v314_v32 = vld [vmem:[%s7426_s22 + $0x210] sm:$0xff]  ;;  %p7148_p0 = pnand %p7147_p12, %p9632_p4  ;;  %s7152_s8 = scalar_lea.vmem %s7151_s9, 4096 }
  0x7b   : > { %v5120_v30 = vpack.c.bf16 %v331_v28, %v315_v27  ;;  %v330_v33 = vld [vmem:[%s7426_s22 + $0x290] sm:$0xff]  ;;  %v4866_v34 = vpack.c.bf16 %v328_v31, %v312_v29  ;;  %v345_v35 = vld [vmem:[%s7426_s22 + $0x308] sm:$0xff]  ;;  %v347_v37 = vld [vmem:[%s7426_s22 + $0x318] sm:$0xff]  ;;  %p7153_p13 = scmp.lt.s32.totalorder %s9563_s23, %s7151_s9  ;;  %p7154_p3 = scmp.lt.s32.totalorder %s7152_s8, %s7146_s6 }
  0x7c   : > { %4863 = vmatpush1.bf16.msra.mxu0 %v4862_v21  ;;  %v361_v36 = vld [vmem:[%s7426_s22 + $0x388] sm:$0xff]  ;;  %v5122_v38 = vpack.c.bf16 %v330_v33, %v314_v32  ;;  %v363_v40 = vld [vmem:[%s7426_s22 + $0x398] sm:$0xff]  ;;  %v344_v41 = vld [vmem:[%s7426_s22 + $0x300] sm:$0xff]  ;;  %p7149_p11 = pneg %p7148_p0 }
  0x7d   : > { %5119 = vmatpush1.bf16.msra.mxu1 %v5118_v25  ;;  %4865 = vmatprep.subr.bf16.mxu0 %v4864_v26  ;;  %v4868_v39 = vpack.c.bf16 %v361_v36, %v345_v35  ;;  %v360_v42 = vld [vmem:[%s7426_s22 + $0x380] sm:$0xff]  ;;  %v5124_v43 = vpack.c.bf16 %v363_v40, %v347_v37  ;;  %v346_v44 = vld [vmem:[%s7426_s22 + $0x310] sm:$0xff]  ;;  %v377_v46 = vld [vmem:[%s7426_s22 + $0x408] sm:$0xff]  ;;  %p7155_p8 = por %p7154_p3, %p7153_p13 }
  0x7e   : > { %5121 = vmatprep.subr.bf16.mxu1 %v5120_v30  ;;  %v362_v45 = vld [vmem:[%s7426_s22 + $0x390] sm:$0xff]  ;;  %v393_v47 = vld [vmem:[%s7426_s22 + $0x488] sm:$0xff]  ;;  %v379_v48 = vld [vmem:[%s7426_s22 + $0x418] sm:$0xff]  ;;  %v4870_v50 = vpack.c.bf16 %v360_v42, %v344_v41 }
  0x7f   : > { %v395_v49 = vld [vmem:[%s7426_s22 + $0x498] sm:$0xff]  ;;  %v5126_v51 = vpack.c.bf16 %v362_v45, %v346_v44  ;;  %v4872_v52 = vpack.c.bf16 %v393_v47, %v377_v46  ;;  %v376_v53 = vld [vmem:[%s7426_s22 + $0x400] sm:$0xff]  ;;  %v378_v55 = vld [vmem:[%s7426_s22 + $0x410] sm:$0xff]  ;;  %p7156_p1 = pnand %p7155_p8, %p7149_p11 }
  0x80   : > { %4867 = vmatpush1.bf16.msra.mxu0 %v4866_v34  ;;  %v392_v54 = vld [vmem:[%s7426_s22 + $0x480] sm:$0xff]  ;;  %v5128_v56 = vpack.c.bf16 %v395_v49, %v379_v48  ;;  %v394_v57 = vld [vmem:[%s7426_s22 + $0x490] sm:$0xff]  ;;  %v409_v58 = vld [vmem:[%s7426_s22 + $0x508] sm:$0xff] }
  0x81   : > { %5123 = vmatpush1.bf16.msra.mxu1 %v5122_v38  ;;  %4869 = vmatprep.subr.bf16.mxu0 %v4868_v39  ;;  %v425_v59 = vld [vmem:[%s7426_s22 + $0x588] sm:$0xff]  ;;  %v411_v60 = vld [vmem:[%s7426_s22 + $0x518] sm:$0xff]  ;;  %v4874_v62 = vpack.c.bf16 %v392_v54, %v376_v53  ;;  %v5130_v63 = vpack.c.bf16 %v394_v57, %v378_v55  ;;  %v408_v1 = vld [vmem:[%s7426_s22 + $0x500] sm:$0xff] }
  0x82   : > { %5125 = vmatprep.subr.bf16.mxu1 %v5124_v43  ;;  %v427_v61 = vld [vmem:[%s7426_s22 + $0x598] sm:$0xff]  ;;  %v4876_v0 = vpack.c.bf16 %v425_v59, %v409_v58  ;;  %v424_v2 = vld [vmem:[%s7426_s22 + $0x580] sm:$0xff]  ;;  %v410_v3 = vld [vmem:[%s7426_s22 + $0x510] sm:$0xff] }
  0x83   : > { %v5132_v4 = vpack.c.bf16 %v427_v61, %v411_v60  ;;  %v426_v5 = vld [vmem:[%s7426_s22 + $0x590] sm:$0xff]  ;;  %v441_v6 = vld [vmem:[%s7426_s22 + $0x608] sm:$0xff]  ;;  %v443_v8 = vld [vmem:[%s7426_s22 + $0x618] sm:$0xff]  ;;  %v4878_v10 = vpack.c.bf16 %v424_v2, %v408_v1 }
  0x84   : > { %4871 = vmatpush1.bf16.msra.mxu0 %v4870_v50  ;;  %v457_v7 = vld [vmem:[%s7426_s22 + $0x688] sm:$0xff]  ;;  %v459_v9 = vld [vmem:[%s7426_s22 + $0x698] sm:$0xff]  ;;  %v5134_v11 = vpack.c.bf16 %v426_v5, %v410_v3  ;;  %v440_v13 = vld [vmem:[%s7426_s22 + $0x600] sm:$0xff] }
  0x85   : > { %5127 = vmatpush1.bf16.msra.mxu1 %v5126_v51  ;;  %4873 = vmatprep.subr.bf16.mxu0 %v4872_v52  ;;  %v4880_v12 = vpack.c.bf16 %v457_v7, %v441_v6  ;;  %v456_v14 = vld [vmem:[%s7426_s22 + $0x680] sm:$0xff]  ;;  %v442_v15 = vld [vmem:[%s7426_s22 + $0x610] sm:$0xff]  ;;  %v5136_v16 = vpack.c.bf16 %v459_v9, %v443_v8  ;;  %v473_v18 = vld [vmem:[%s7426_s22 + $0x708] sm:$0xff] }
  0x86   : > { %5129 = vmatprep.subr.bf16.mxu1 %v5128_v56  ;;  %v458_v17 = vld [vmem:[%s7426_s22 + $0x690] sm:$0xff]  ;;  %v489_v19 = vld [vmem:[%s7426_s22 + $0x788] sm:$0xff]  ;;  %v475_v20 = vld [vmem:[%s7426_s22 + $0x718] sm:$0xff]  ;;  %v4882_v22 = vpack.c.bf16 %v456_v14, %v440_v13 }
  0x87   : > { %v491_v21 = vld [vmem:[%s7426_s22 + $0x798] sm:$0xff]  ;;  %v5138_v23 = vpack.c.bf16 %v458_v17, %v442_v15  ;;  %v4884_v24 = vpack.c.bf16 %v489_v19, %v473_v18  ;;  %v472_v25 = vld [vmem:[%s7426_s22 + $0x700] sm:$0xff]  ;;  %v474_v27 = vld [vmem:[%s7426_s22 + $0x710] sm:$0xff] }
  0x88   : > { %4875 = vmatpush1.bf16.msra.mxu0 %v4874_v62  ;;  %v488_v26 = vld [vmem:[%s7426_s22 + $0x780] sm:$0xff]  ;;  %v5140_v28 = vpack.c.bf16 %v491_v21, %v475_v20  ;;  %v490_v29 = vld [vmem:[%s7426_s22 + $0x790] sm:$0xff]  ;;  %v505_v30 = vld [vmem:[%s7426_s22 + $0x808] sm:$0xff] }
  0x89   : > { %5131 = vmatpush1.bf16.msra.mxu1 %v5130_v63  ;;  %4877 = vmatprep.subr.bf16.mxu0 %v4876_v0  ;;  %v521_v31 = vld [vmem:[%s7426_s22 + $0x888] sm:$0xff]  ;;  %v507_v32 = vld [vmem:[%s7426_s22 + $0x818] sm:$0xff]  ;;  %v4886_v34 = vpack.c.bf16 %v488_v26, %v472_v25  ;;  %v5142_v35 = vpack.c.bf16 %v490_v29, %v474_v27  ;;  %v504_v37 = vld [vmem:[%s7426_s22 + $0x800] sm:$0xff] }
  0x8a   : > { %5133 = vmatprep.subr.bf16.mxu1 %v5132_v4  ;;  %v523_v33 = vld [vmem:[%s7426_s22 + $0x898] sm:$0xff]  ;;  %v4888_v36 = vpack.c.bf16 %v521_v31, %v505_v30  ;;  %v520_v38 = vld [vmem:[%s7426_s22 + $0x880] sm:$0xff]  ;;  %v506_v39 = vld [vmem:[%s7426_s22 + $0x810] sm:$0xff] }
  0x8b   : > { %v5144_v40 = vpack.c.bf16 %v523_v33, %v507_v32  ;;  %v522_v41 = vld [vmem:[%s7426_s22 + $0x890] sm:$0xff]  ;;  %v537_v42 = vld [vmem:[%s7426_s22 + $0x908] sm:$0xff]  ;;  %v539_v44 = vld [vmem:[%s7426_s22 + $0x918] sm:$0xff]  ;;  %v4890_v46 = vpack.c.bf16 %v520_v38, %v504_v37 }
  0x8c   : > { %4879 = vmatpush1.bf16.msra.mxu0 %v4878_v10  ;;  %v553_v43 = vld [vmem:[%s7426_s22 + $0x988] sm:$0xff]  ;;  %v555_v45 = vld [vmem:[%s7426_s22 + $0x998] sm:$0xff]  ;;  %v5146_v47 = vpack.c.bf16 %v522_v41, %v506_v39  ;;  %v536_v49 = vld [vmem:[%s7426_s22 + $0x900] sm:$0xff] }
  0x8d   : > { %5135 = vmatpush1.bf16.msra.mxu1 %v5134_v11  ;;  %4881 = vmatprep.subr.bf16.mxu0 %v4880_v12  ;;  %v4892_v48 = vpack.c.bf16 %v553_v43, %v537_v42  ;;  %v552_v50 = vld [vmem:[%s7426_s22 + $0x980] sm:$0xff]  ;;  %v538_v51 = vld [vmem:[%s7426_s22 + $0x910] sm:$0xff]  ;;  %v5148_v52 = vpack.c.bf16 %v555_v45, %v539_v44  ;;  %v569_v54 = vld [vmem:[%s7426_s22 + $0xa08] sm:$0xff] }
  0x8e   : > { %5137 = vmatprep.subr.bf16.mxu1 %v5136_v16  ;;  %v554_v53 = vld [vmem:[%s7426_s22 + $0x990] sm:$0xff]  ;;  %v585_v55 = vld [vmem:[%s7426_s22 + $0xa88] sm:$0xff]  ;;  %v571_v56 = vld [vmem:[%s7426_s22 + $0xa18] sm:$0xff]  ;;  %v4894_v58 = vpack.c.bf16 %v552_v50, %v536_v49 }
  0x8f   : > { %v587_v57 = vld [vmem:[%s7426_s22 + $0xa98] sm:$0xff]  ;;  %v5150_v59 = vpack.c.bf16 %v554_v53, %v538_v51  ;;  %v4896_v60 = vpack.c.bf16 %v585_v55, %v569_v54  ;;  %v568_v61 = vld [vmem:[%s7426_s22 + $0xa00] sm:$0xff]  ;;  %v570_v63 = vld [vmem:[%s7426_s22 + $0xa10] sm:$0xff] }
  0x90   : > { %4883 = vmatpush1.bf16.msra.mxu0 %v4882_v22  ;;  %v584_v62 = vld [vmem:[%s7426_s22 + $0xa80] sm:$0xff]  ;;  %v5152_v0 = vpack.c.bf16 %v587_v57, %v571_v56  ;;  %v586_v1 = vld [vmem:[%s7426_s22 + $0xa90] sm:$0xff]  ;;  %v601_v2 = vld [vmem:[%s7426_s22 + $0xb08] sm:$0xff] }
  0x91   : > { %5139 = vmatpush1.bf16.msra.mxu1 %v5138_v23  ;;  %4885 = vmatprep.subr.bf16.mxu0 %v4884_v24  ;;  %v617_v3 = vld [vmem:[%s7426_s22 + $0xb88] sm:$0xff]  ;;  %v603_v4 = vld [vmem:[%s7426_s22 + $0xb18] sm:$0xff]  ;;  %v4898_v6 = vpack.c.bf16 %v584_v62, %v568_v61  ;;  %v600_v7 = vld [vmem:[%s7426_s22 + $0xb00] sm:$0xff]  ;;  %v5154_v8 = vpack.c.bf16 %v586_v1, %v570_v63 }
  0x92   : > { %5141 = vmatprep.subr.bf16.mxu1 %v5140_v28  ;;  %v619_v5 = vld [vmem:[%s7426_s22 + $0xb98] sm:$0xff]  ;;  %v4900_v9 = vpack.c.bf16 %v617_v3, %v601_v2  ;;  %v616_v10 = vld [vmem:[%s7426_s22 + $0xb80] sm:$0xff]  ;;  %v602_v11 = vld [vmem:[%s7426_s22 + $0xb10] sm:$0xff] }
  0x93   : > { %v618_v12 = vld [vmem:[%s7426_s22 + $0xb90] sm:$0xff]  ;;  %v5156_v13 = vpack.c.bf16 %v619_v5, %v603_v4  ;;  %v633_v14 = vld [vmem:[%s7426_s22 + $0xc08] sm:$0xff]  ;;  %v635_v17 = vld [vmem:[%s7426_s22 + $0xc18] sm:$0xff]  ;;  %v4902_v19 = vpack.c.bf16 %v616_v10, %v600_v7 }
  0x94   : > { %4887 = vmatpush1.bf16.msra.mxu0 %v4886_v34  ;;  %v649_v15 = vld [vmem:[%s7426_s22 + $0xc88] sm:$0xff]  ;;  %v651_v18 = vld [vmem:[%s7426_s22 + $0xc98] sm:$0xff]  ;;  %v5158_v20 = vpack.c.bf16 %v618_v12, %v602_v11  ;;  %v632_v22 = vld [vmem:[%s7426_s22 + $0xc00] sm:$0xff] }
  0x95   : > { %5143 = vmatpush1.bf16.msra.mxu1 %v5142_v35  ;;  %4889 = vmatprep.subr.bf16.mxu0 %v4888_v36  ;;  %v241_v16 = vld [vmem:[#allocation2 + $0x8] sm:$0xff]  ;;  %v4904_v21 = vpack.c.bf16 %v649_v15, %v633_v14  ;;  %v648_v23 = vld [vmem:[%s7426_s22 + $0xc80] sm:$0xff]  ;;  %v634_v24 = vld [vmem:[%s7426_s22 + $0xc10] sm:$0xff]  ;;  %v5160_v25 = vpack.c.bf16 %v651_v18, %v635_v17 }
  0x96   : > { %5145 = vmatprep.subr.bf16.mxu1 %v5144_v40  ;;  %2444 = vmatprep.mubr.f32.mxu0 %v241_v16  ;;  %v650_v26 = vld [vmem:[%s7426_s22 + $0xc90] sm:$0xff]  ;;  %v665_v27 = vld [vmem:[%s7426_s22 + $0xd08] sm:$0xff]  ;;  %v667_v29 = vld [vmem:[%s7426_s22 + $0xd18] sm:$0xff]  ;;  %v4906_v31 = vpack.c.bf16 %v648_v23, %v632_v22 }
  0x97   : > { %2728 = vmatprep.mubr.f32.mxu1 %v241_v16  ;;  %v681_v28 = vld [vmem:[%s7426_s22 + $0xd88] sm:$0xff]  ;;  %v683_v30 = vld [vmem:[%s7426_s22 + $0xd98] sm:$0xff]  ;;  %v5162_v32 = vpack.c.bf16 %v650_v26, %v634_v24  ;;  %v664_v34 = vld [vmem:[%s7426_s22 + $0xd00] sm:$0xff] }
  0x98   : > { %4891 = vmatpush1.bf16.msra.mxu0 %v4890_v46  ;;  %v4908_v33 = vpack.c.bf16 %v681_v28, %v665_v27  ;;  %v680_v35 = vld [vmem:[%s7426_s22 + $0xd80] sm:$0xff]  ;;  %v666_v36 = vld [vmem:[%s7426_s22 + $0xd10] sm:$0xff]  ;;  %v5164_v37 = vpack.c.bf16 %v683_v30, %v667_v29  ;;  %v697_v39 = vld [vmem:[%s7426_s22 + $0xe08] sm:$0xff] }
  0x99   : > { %5147 = vmatpush1.bf16.msra.mxu1 %v5146_v47  ;;  %4893 = vmatprep.subr.bf16.mxu0 %v4892_v48  ;;  %v682_v38 = vld [vmem:[%s7426_s22 + $0xd90] sm:$0xff]  ;;  %v713_v40 = vld [vmem:[%s7426_s22 + $0xe88] sm:$0xff]  ;;  %v699_v41 = vld [vmem:[%s7426_s22 + $0xe18] sm:$0xff]  ;;  %v4910_v43 = vpack.c.bf16 %v680_v35, %v664_v34 }
  0x9a   : > { %5149 = vmatprep.subr.bf16.mxu1 %v5148_v52  ;;  %v715_v42 = vld [vmem:[%s7426_s22 + $0xe98] sm:$0xff]  ;;  %v5166_v44 = vpack.c.bf16 %v682_v38, %v666_v36  ;;  %v4912_v45 = vpack.c.bf16 %v713_v40, %v697_v39  ;;  %v696_v46 = vld [vmem:[%s7426_s22 + $0xe00] sm:$0xff]  ;;  %v698_v48 = vld [vmem:[%s7426_s22 + $0xe10] sm:$0xff] }
  0x9b   : > { %v712_v47 = vld [vmem:[%s7426_s22 + $0xe80] sm:$0xff]  ;;  %v5168_v49 = vpack.c.bf16 %v715_v42, %v699_v41  ;;  %v714_v50 = vld [vmem:[%s7426_s22 + $0xe90] sm:$0xff]  ;;  %v729_v51 = vld [vmem:[%s7426_s22 + $0xf08] sm:$0xff] }
  0x9c   : > { %4895 = vmatpush1.bf16.msra.mxu0 %v4894_v58  ;;  %v745_v52 = vld [vmem:[%s7426_s22 + $0xf88] sm:$0xff]  ;;  %v731_v53 = vld [vmem:[%s7426_s22 + $0xf18] sm:$0xff]  ;;  %v4914_v55 = vpack.c.bf16 %v712_v47, %v696_v46  ;;  %v5170_v56 = vpack.c.bf16 %v714_v50, %v698_v48  ;;  %v728_v58 = vld [vmem:[%s7426_s22 + $0xf00] sm:$0xff] }
  0x9d   : > { %5151 = vmatpush1.bf16.msra.mxu1 %v5150_v59  ;;  %4897 = vmatprep.subr.bf16.mxu0 %v4896_v60  ;;  %v747_v54 = vld [vmem:[%s7426_s22 + $0xf98] sm:$0xff]  ;;  %v4916_v57 = vpack.c.bf16 %v745_v52, %v729_v51  ;;  %v744_v59 = vld [vmem:[%s7426_s22 + $0xf80] sm:$0xff]  ;;  %v730_v60 = vld [vmem:[%s7426_s22 + $0xf10] sm:$0xff] }
  0x9e   : > { %5153 = vmatprep.subr.bf16.mxu1 %v5152_v0  ;;  %v5172_v61 = vpack.c.bf16 %v747_v54, %v731_v53  ;;  %v746_v62 = vld [vmem:[%s7426_s22 + $0xf90] sm:$0xff]  ;;  %v761_v63 = vld [vmem:[%s7426_s22 + $0x1008] sm:$0xff]  ;;  %v763_v1 = vld [vmem:[%s7426_s22 + $0x1018] sm:$0xff]  ;;  %v4918_v3 = vpack.c.bf16 %v744_v59, %v728_v58 }
  0x9f   : > { %v777_v0 = vld [vmem:[%s7426_s22 + $0x1088] sm:$0xff]  ;;  %v779_v2 = vld [vmem:[%s7426_s22 + $0x1098] sm:$0xff]  ;;  %v5174_v4 = vpack.c.bf16 %v746_v62, %v730_v60  ;;  %v776_v7 = vld [vmem:[%s7426_s22 + $0x1080] sm:$0xff] }
  0xa0   : > { %4899 = vmatpush1.bf16.msra.mxu0 %v4898_v6  ;;  %v4920_v5 = vpack.c.bf16 %v777_v0, %v761_v63  ;;  %v760_v6 = vld [vmem:[%s7426_s22 + $0x1000] sm:$0xff]  ;;  %v778_v10 = vld [vmem:[%s7426_s22 + $0x1090] sm:$0xff]  ;;  %v793_v11 = vld [vmem:[%s7426_s22 + $0x1108] sm:$0xff] }
  0xa1   : > { %5155 = vmatpush1.bf16.msra.mxu1 %v5154_v8  ;;  %4901 = vmatprep.subr.bf16.mxu0 %v4900_v9  ;;  %v762_v8 = vld [vmem:[%s7426_s22 + $0x1010] sm:$0xff]  ;;  %v5176_v9 = vpack.c.bf16 %v779_v2, %v763_v1  ;;  %v809_v12 = vld [vmem:[%s7426_s22 + $0x1188] sm:$0xff]  ;;  %v811_v14 = vld [vmem:[%s7426_s22 + $0x1198] sm:$0xff]  ;;  %v4922_v16 = vpack.c.bf16 %v776_v7, %v760_v6 }
  0xa2   : > { %5157 = vmatprep.subr.bf16.mxu1 %v5156_v13  ;;  %v795_v13 = vld [vmem:[%s7426_s22 + $0x1118] sm:$0xff]  ;;  %v240_v15 = vld [vmem:[#allocation2] sm:$0xff]  ;;  %v5178_v17 = vpack.c.bf16 %v778_v10, %v762_v8  ;;  %v4924_v18 = vpack.c.bf16 %v809_v12, %v793_v11  ;;  %v810_v23 = vld [vmem:[%s7426_s22 + $0x1190] sm:$0xff] }
  0xa3   : > { %v5180_v22 = vpack.c.bf16 %v811_v14, %v795_v13  ;;  %v825_v24 = vld [vmem:[%s7426_s22 + $0x1208] sm:$0xff]  ;;  %v827_v26 = vld [vmem:[%s7426_s22 + $0x1218] sm:$0xff]  ;;  %v842_v35 = vld [vmem:[%s7426_s22 + $0x1290] sm:$0xff] }
  0xa4   : > { %4903 = vmatpush1.bf16.msra.mxu0 %v4902_v19  ;;  %v792_v19 = vld [vmem:[%s7426_s22 + $0x1100] sm:$0xff]  ;;  %v843_v27 = vld [vmem:[%s7426_s22 + $0x1298] sm:$0xff]  ;;  %v857_v36 = vld [vmem:[%s7426_s22 + $0x1308] sm:$0xff] }
  0xa5   : > { %5159 = vmatpush1.bf16.msra.mxu1 %v5158_v20  ;;  %4905 = vmatprep.subr.bf16.mxu0 %v4904_v21  ;;  %v808_v20 = vld [vmem:[%s7426_s22 + $0x1180] sm:$0xff]  ;;  %v794_v21 = vld [vmem:[%s7426_s22 + $0x1110] sm:$0xff]  ;;  %v5184_v34 = vpack.c.bf16 %v843_v27, %v827_v26  ;;  %v859_v38 = vld [vmem:[%s7426_s22 + $0x1318] sm:$0xff] }
  0xa6   : > { %5161 = vmatprep.subr.bf16.mxu1 %v5160_v25  ;;  %v841_v25 = vld [vmem:[%s7426_s22 + $0x1288] sm:$0xff]  ;;  %v4926_v28 = vpack.c.bf16 %v808_v20, %v792_v19  ;;  %v5182_v29 = vpack.c.bf16 %v810_v23, %v794_v21  ;;  %v875_v39 = vld [vmem:[%s7426_s22 + $0x1398] sm:$0xff]  ;;  %v874_v47 = vld [vmem:[%s7426_s22 + $0x1390] sm:$0xff] }
  0xa7   : > { %v4928_v30 = vpack.c.bf16 %v841_v25, %v825_v24  ;;  %v5188_v46 = vpack.c.bf16 %v875_v39, %v859_v38  ;;  %v889_v48 = vld [vmem:[%s7426_s22 + $0x1408] sm:$0xff]  ;;  %v891_v50 = vld [vmem:[%s7426_s22 + $0x1418] sm:$0xff]  ;;  %v906_v59 = vld [vmem:[%s7426_s22 + $0x1490] sm:$0xff] }
  0xa8   : > { %4907 = vmatpush1.bf16.msra.mxu0 %v4906_v31  ;;  %v824_v31 = vld [vmem:[%s7426_s22 + $0x1200] sm:$0xff]  ;;  %v907_v51 = vld [vmem:[%s7426_s22 + $0x1498] sm:$0xff]  ;;  %v921_v60 = vld [vmem:[%s7426_s22 + $0x1508] sm:$0xff] }
  0xa9   : > { %5163 = vmatpush1.bf16.msra.mxu1 %v5162_v32  ;;  %4909 = vmatprep.subr.bf16.mxu0 %v4908_v33  ;;  %v840_v32 = vld [vmem:[%s7426_s22 + $0x1280] sm:$0xff]  ;;  %v826_v33 = vld [vmem:[%s7426_s22 + $0x1210] sm:$0xff]  ;;  %v5192_v58 = vpack.c.bf16 %v907_v51, %v891_v50  ;;  %v923_v62 = vld [vmem:[%s7426_s22 + $0x1518] sm:$0xff] }
  0xaa   : > { %5165 = vmatprep.subr.bf16.mxu1 %v5164_v37  ;;  %v873_v37 = vld [vmem:[%s7426_s22 + $0x1388] sm:$0xff]  ;;  %v4930_v40 = vpack.c.bf16 %v840_v32, %v824_v31  ;;  %v5186_v41 = vpack.c.bf16 %v842_v35, %v826_v33  ;;  %v939_v63 = vld [vmem:[%s7426_s22 + $0x1598] sm:$0xff]  ;;  %v938_v7 = vld [vmem:[%s7426_s22 + $0x1590] sm:$0xff] }
  0xab   : > { %v4932_v42 = vpack.c.bf16 %v873_v37, %v857_v36  ;;  %v5196_v6 = vpack.c.bf16 %v939_v63, %v923_v62  ;;  %v953_v8 = vld [vmem:[%s7426_s22 + $0x1608] sm:$0xff]  ;;  %v955_v10 = vld [vmem:[%s7426_s22 + $0x1618] sm:$0xff]  ;;  %v952_v13 = vld [vmem:[%s7426_s22 + $0x1600] sm:$0xff] }
  0xac   : > { %4911 = vmatpush1.bf16.msra.mxu0 %v4910_v43  ;;  %v856_v43 = vld [vmem:[%s7426_s22 + $0x1300] sm:$0xff]  ;;  %v971_v11 = vld [vmem:[%s7426_s22 + $0x1698] sm:$0xff]  ;;  %v985_v20 = vld [vmem:[%s7426_s22 + $0x1708] sm:$0xff] }
  0xad   : > { %5167 = vmatpush1.bf16.msra.mxu1 %v5166_v44  ;;  %4913 = vmatprep.subr.bf16.mxu0 %v4912_v45  ;;  %v872_v44 = vld [vmem:[%s7426_s22 + $0x1380] sm:$0xff]  ;;  %v858_v45 = vld [vmem:[%s7426_s22 + $0x1310] sm:$0xff]  ;;  %v5200_v19 = vpack.c.bf16 %v971_v11, %v955_v10  ;;  %v1001_v21 = vld [vmem:[%s7426_s22 + $0x1788] sm:$0xff] }
  0xae   : > { %5169 = vmatprep.subr.bf16.mxu1 %v5168_v49  ;;  %v905_v49 = vld [vmem:[%s7426_s22 + $0x1488] sm:$0xff]  ;;  %v4934_v52 = vpack.c.bf16 %v872_v44, %v856_v43  ;;  %v5190_v53 = vpack.c.bf16 %v874_v47, %v858_v45  ;;  %v987_v23 = vld [vmem:[%s7426_s22 + $0x1718] sm:$0xff]  ;;  %v4948_v27 = vpack.c.bf16 %v1001_v21, %v985_v20  ;;  %v1002_v32 = vld [vmem:[%s7426_s22 + $0x1790] sm:$0xff] }
  0xaf   : > { %v4936_v54 = vpack.c.bf16 %v905_v49, %v889_v48  ;;  %v1003_v24 = vld [vmem:[%s7426_s22 + $0x1798] sm:$0xff]  ;;  %v1017_v33 = vld [vmem:[%s7426_s22 + $0x1808] sm:$0xff]  ;;  %v1034_v44 = vld [vmem:[%s7426_s22 + $0x1890] sm:$0xff] }
  0xb0   : > { %4915 = vmatpush1.bf16.msra.mxu0 %v4914_v55  ;;  %v888_v55 = vld [vmem:[%s7426_s22 + $0x1400] sm:$0xff]  ;;  %v5204_v31 = vpack.c.bf16 %v1003_v24, %v987_v23  ;;  %v1019_v35 = vld [vmem:[%s7426_s22 + $0x1818] sm:$0xff]  ;;  %v1049_v45 = vld [vmem:[%s7426_s22 + $0x1908] sm:$0xff] }
  0xb1   : > { %5171 = vmatpush1.bf16.msra.mxu1 %v5170_v56  ;;  %4917 = vmatprep.subr.bf16.mxu0 %v4916_v57  ;;  %v904_v56 = vld [vmem:[%s7426_s22 + $0x1480] sm:$0xff]  ;;  %v890_v57 = vld [vmem:[%s7426_s22 + $0x1410] sm:$0xff]  ;;  %v1035_v36 = vld [vmem:[%s7426_s22 + $0x1898] sm:$0xff] }
  0xb2   : > { %5173 = vmatprep.subr.bf16.mxu1 %v5172_v61  ;;  %v937_v61 = vld [vmem:[%s7426_s22 + $0x1588] sm:$0xff]  ;;  %v4938_v0 = vpack.c.bf16 %v904_v56, %v888_v55  ;;  %v5194_v1 = vpack.c.bf16 %v906_v59, %v890_v57  ;;  %v5208_v43 = vpack.c.bf16 %v1035_v36, %v1019_v35  ;;  %v1051_v47 = vld [vmem:[%s7426_s22 + $0x1918] sm:$0xff]  ;;  %v1066_v56 = vld [vmem:[%s7426_s22 + $0x1990] sm:$0xff] }
  0xb3   : > { %v4940_v2 = vpack.c.bf16 %v937_v61, %v921_v60  ;;  %v1067_v48 = vld [vmem:[%s7426_s22 + $0x1998] sm:$0xff]  ;;  %v1081_v57 = vld [vmem:[%s7426_s22 + $0x1a08] sm:$0xff]  ;;  %v1144_v24 = vld [vmem:[%s7426_s22 + $0x1c00] sm:$0xff] }
  0xb4   : > { %4919 = vmatpush1.bf16.msra.mxu0 %v4918_v3  ;;  %v920_v3 = vld [vmem:[%s7426_s22 + $0x1500] sm:$0xff]  ;;  %v5212_v55 = vpack.c.bf16 %v1067_v48, %v1051_v47  ;;  %v1083_v59 = vld [vmem:[%s7426_s22 + $0x1a18] sm:$0xff] }
  0xb5   : > { %5175 = vmatpush1.bf16.msra.mxu1 %v5174_v4  ;;  %4921 = vmatprep.subr.bf16.mxu0 %v4920_v5  ;;  %v936_v4 = vld [vmem:[%s7426_s22 + $0x1580] sm:$0xff]  ;;  %v922_v5 = vld [vmem:[%s7426_s22 + $0x1510] sm:$0xff]  ;;  %v1099_v60 = vld [vmem:[%s7426_s22 + $0x1a98] sm:$0xff] }
  0xb6   : > { %5177 = vmatprep.subr.bf16.mxu1 %v5176_v9  ;;  %v969_v9 = vld [vmem:[%s7426_s22 + $0x1688] sm:$0xff]  ;;  %v4942_v12 = vpack.c.bf16 %v936_v4, %v920_v3  ;;  %v5198_v14 = vpack.c.bf16 %v938_v7, %v922_v5  ;;  %v5216_v3 = vpack.c.bf16 %v1099_v60, %v1083_v59  ;;  %v1098_v4 = vld [vmem:[%s7426_s22 + $0x1a90] sm:$0xff]  ;;  %v1115_v7 = vld [vmem:[%s7426_s22 + $0x1b18] sm:$0xff] }
  0xb7   : > { %2445 = vmatmul.mubr.f32.vlgmr.msra.gmra.mrb[0].mxu0 %v240_v15  ;;  %v1113_v5 = vld [vmem:[%s7426_s22 + $0x1b08] sm:$0xff]  ;;  %v1163_v20 = vld [vmem:[%s7426_s22 + $0x1c98] sm:$0xff]  ;;  %v1176_v36 = vld [vmem:[%s7426_s22 + $0x1d00] sm:$0xff] }
  0xb8   : > { %4923 = vmatpush1.bf16.msra.mxu0 %v4922_v16  ;;  %2729 = vmatmul.mubr.f32.vlgmr.msra.gmra.mrb[0].mxu1 %v240_v15  ;;  %v4944_v15 = vpack.c.bf16 %v969_v9, %v953_v8  ;;  %v968_v16 = vld [vmem:[%s7426_s22 + $0x1680] sm:$0xff]  ;;  %v1131_v8 = vld [vmem:[%s7426_s22 + $0x1b98] sm:$0xff] }
  0xb9   : > { %5179 = vmatpush1.bf16.msra.mxu1 %v5178_v17  ;;  %4925 = vmatprep.subr.bf16.mxu0 %v4924_v18  ;;  %v954_v17 = vld [vmem:[%s7426_s22 + $0x1610] sm:$0xff]  ;;  %v4946_v25 = vpack.c.bf16 %v968_v16, %v952_v13  ;;  %v1128_v13 = vld [vmem:[%s7426_s22 + $0x1b80] sm:$0xff] }
  0xba   : > { %5181 = vmatprep.subr.bf16.mxu1 %v5180_v22  ;;  %v970_v18 = vld [vmem:[%s7426_s22 + $0x1690] sm:$0xff]  ;;  %v243_v22 = vld [vmem:[#allocation2 + $0x18] sm:$0xff]  ;;  %v1208_v48 = vld [vmem:[%s7426_s22 + $0x1e00] sm:$0xff] }
  0xbb   : > { %2515 = vmatprep.mubr.f32.mxu0 %v243_v22  ;;  %2799 = vmatprep.mubr.f32.mxu1 %v243_v22  ;;  %v5202_v26 = vpack.c.bf16 %v970_v18, %v954_v17  ;;  %v1130_v16 = vld [vmem:[%s7426_s22 + $0x1b90] sm:$0xff]  ;;  %v1145_v17 = vld [vmem:[%s7426_s22 + $0x1c08] sm:$0xff]  ;;  %v1240_v60 = vld [vmem:[%s7426_s22 + $0x1f00] sm:$0xff] }
  0xbc   : > { %4927 = vmatpush1.bf16.msra.mxu0 %v4926_v28  ;;  %v984_v28 = vld [vmem:[%s7426_s22 + $0x1700] sm:$0xff]  ;;  %v1161_v18 = vld [vmem:[%s7426_s22 + $0x1c88] sm:$0xff] }
  0xbd   : > { %5183 = vmatpush1.bf16.msra.mxu1 %v5182_v29  ;;  %4929 = vmatprep.subr.bf16.mxu0 %v4928_v30  ;;  %v1000_v29 = vld [vmem:[%s7426_s22 + $0x1780] sm:$0xff]  ;;  %v986_v30 = vld [vmem:[%s7426_s22 + $0x1710] sm:$0xff]  ;;  %v4968_v23 = vpack.c.bf16 %v1161_v18, %v1145_v17 }
  0xbe   : > { %5185 = vmatprep.subr.bf16.mxu1 %v5184_v34  ;;  %v1033_v34 = vld [vmem:[%s7426_s22 + $0x1888] sm:$0xff]  ;;  %v4950_v37 = vpack.c.bf16 %v1000_v29, %v984_v28  ;;  %v5206_v38 = vpack.c.bf16 %v1002_v32, %v986_v30  ;;  %v1162_v28 = vld [vmem:[%s7426_s22 + $0x1c90] sm:$0xff]  ;;  %v1195_v32 = vld [vmem:[%s7426_s22 + $0x1d98] sm:$0xff] }
  0xbf   : > { %v4952_v39 = vpack.c.bf16 %v1033_v34, %v1017_v33  ;;  %v1177_v29 = vld [vmem:[%s7426_s22 + $0x1d08] sm:$0xff]  ;;  %v242_v17 = vld [vmem:[#allocation2 + $0x10] sm:$0xff] }
  0xc0   : > { %4931 = vmatpush1.bf16.msra.mxu0 %v4930_v40  ;;  %v1016_v40 = vld [vmem:[%s7426_s22 + $0x1800] sm:$0xff]  ;;  %v1193_v30 = vld [vmem:[%s7426_s22 + $0x1d88] sm:$0xff] }
  0xc1   : > { %5187 = vmatpush1.bf16.msra.mxu1 %v5186_v41  ;;  %4933 = vmatprep.subr.bf16.mxu0 %v4932_v42  ;;  %v1032_v41 = vld [vmem:[%s7426_s22 + $0x1880] sm:$0xff]  ;;  %v1018_v42 = vld [vmem:[%s7426_s22 + $0x1810] sm:$0xff]  ;;  %v4972_v35 = vpack.c.bf16 %v1193_v30, %v1177_v29  ;;  %v1355_v29 = vld [vmem:[%s7426_s22 + $0x2298] sm:$0xff] }
  0xc2   : > { %5189 = vmatprep.subr.bf16.mxu1 %v5188_v46  ;;  %v1065_v46 = vld [vmem:[%s7426_s22 + $0x1988] sm:$0xff]  ;;  %v4954_v49 = vpack.c.bf16 %v1032_v41, %v1016_v40  ;;  %v5210_v50 = vpack.c.bf16 %v1034_v44, %v1018_v42  ;;  %v1194_v40 = vld [vmem:[%s7426_s22 + $0x1d90] sm:$0xff]  ;;  %v1227_v44 = vld [vmem:[%s7426_s22 + $0x1e98] sm:$0xff] }
  0xc3   : > { %v4956_v51 = vpack.c.bf16 %v1065_v46, %v1049_v45  ;;  %v1209_v41 = vld [vmem:[%s7426_s22 + $0x1e08] sm:$0xff] }
  0xc4   : > { %4935 = vmatpush1.bf16.msra.mxu0 %v4934_v52  ;;  %v1048_v52 = vld [vmem:[%s7426_s22 + $0x1900] sm:$0xff]  ;;  %v1225_v42 = vld [vmem:[%s7426_s22 + $0x1e88] sm:$0xff] }
  0xc5   : > { %5191 = vmatpush1.bf16.msra.mxu1 %v5190_v53  ;;  %4937 = vmatprep.subr.bf16.mxu0 %v4936_v54  ;;  %v1064_v53 = vld [vmem:[%s7426_s22 + $0x1980] sm:$0xff]  ;;  %v1050_v54 = vld [vmem:[%s7426_s22 + $0x1910] sm:$0xff]  ;;  %v4976_v47 = vpack.c.bf16 %v1225_v42, %v1209_v41  ;;  %v245_v30 = vld [vmem:[#allocation2 + $0x28] sm:$0xff] }
  0xc6   : > { %5193 = vmatprep.subr.bf16.mxu1 %v5192_v58  ;;  %v1097_v58 = vld [vmem:[%s7426_s22 + $0x1a88] sm:$0xff]  ;;  %v4958_v61 = vpack.c.bf16 %v1064_v53, %v1048_v52  ;;  %v5214_v62 = vpack.c.bf16 %v1066_v56, %v1050_v54  ;;  %v1226_v52 = vld [vmem:[%s7426_s22 + $0x1e90] sm:$0xff]  ;;  %v1259_v56 = vld [vmem:[%s7426_s22 + $0x1f98] sm:$0xff] }
  0xc7   : > { %v4960_v63 = vpack.c.bf16 %v1097_v58, %v1081_v57  ;;  %v1241_v53 = vld [vmem:[%s7426_s22 + $0x1f08] sm:$0xff]  ;;  %v1371_v41 = vld [vmem:[%s7426_s22 + $0x2318] sm:$0xff] }
  0xc8   : > { %4939 = vmatpush1.bf16.msra.mxu0 %v4938_v0  ;;  %v1080_v0 = vld [vmem:[%s7426_s22 + $0x1a00] sm:$0xff]  ;;  %v1257_v54 = vld [vmem:[%s7426_s22 + $0x1f88] sm:$0xff]  ;;  %v1387_v42 = vld [vmem:[%s7426_s22 + $0x2398] sm:$0xff] }
  0xc9   : > { %5195 = vmatpush1.bf16.msra.mxu1 %v5194_v1  ;;  %4941 = vmatprep.subr.bf16.mxu0 %v4940_v2  ;;  %v1096_v1 = vld [vmem:[%s7426_s22 + $0x1a80] sm:$0xff]  ;;  %v1082_v2 = vld [vmem:[%s7426_s22 + $0x1a10] sm:$0xff]  ;;  %v4980_v59 = vpack.c.bf16 %v1257_v54, %v1241_v53  ;;  %v1403_v53 = vld [vmem:[%s7426_s22 + $0x2418] sm:$0xff] }
  0xca   : > { %5197 = vmatprep.subr.bf16.mxu1 %v5196_v6  ;;  %v1129_v6 = vld [vmem:[%s7426_s22 + $0x1b88] sm:$0xff]  ;;  %v4962_v9 = vpack.c.bf16 %v1096_v1, %v1080_v0  ;;  %v5218_v10 = vpack.c.bf16 %v1098_v4, %v1082_v2  ;;  %v1258_v0 = vld [vmem:[%s7426_s22 + $0x1f90] sm:$0xff]  ;;  %v1291_v4 = vld [vmem:[%s7426_s22 + $0x2098] sm:$0xff] }
  0xcb   : > { %v4964_v11 = vpack.c.bf16 %v1129_v6, %v1113_v5  ;;  %v1273_v1 = vld [vmem:[%s7426_s22 + $0x2008] sm:$0xff]  ;;  %v1419_v54 = vld [vmem:[%s7426_s22 + $0x2498] sm:$0xff] }
  0xcc   : > { %4943 = vmatpush1.bf16.msra.mxu0 %v4942_v12  ;;  %v1112_v12 = vld [vmem:[%s7426_s22 + $0x1b00] sm:$0xff]  ;;  %v1289_v2 = vld [vmem:[%s7426_s22 + $0x2088] sm:$0xff] }
  0xcd   : > { %5199 = vmatpush1.bf16.msra.mxu1 %v5198_v14  ;;  %4945 = vmatprep.subr.bf16.mxu0 %v4944_v15  ;;  %v1114_v14 = vld [vmem:[%s7426_s22 + $0x1b10] sm:$0xff]  ;;  %v5220_v15 = vpack.c.bf16 %v1131_v8, %v1115_v7  ;;  %v4966_v21 = vpack.c.bf16 %v1128_v13, %v1112_v12  ;;  %v4984_v7 = vpack.c.bf16 %v1289_v2, %v1273_v1  ;;  %v1272_v8 = vld [vmem:[%s7426_s22 + $0x2000] sm:$0xff]  ;;  %v1305_v13 = vld [vmem:[%s7426_s22 + $0x2108] sm:$0xff] }
  0xce   : > { %5201 = vmatprep.subr.bf16.mxu1 %v5200_v19  ;;  %v1147_v19 = vld [vmem:[%s7426_s22 + $0x1c18] sm:$0xff]  ;;  %v5222_v22 = vpack.c.bf16 %v1130_v16, %v1114_v14  ;;  %v1290_v12 = vld [vmem:[%s7426_s22 + $0x2090] sm:$0xff]  ;;  %v1321_v14 = vld [vmem:[%s7426_s22 + $0x2188] sm:$0xff] }
  0xcf   : > { %v1323_v16 = vld [vmem:[%s7426_s22 + $0x2198] sm:$0xff] }
  0xd0   : > { %4947 = vmatpush1.bf16.msra.mxu0 %v4946_v25  ;;  %v1160_v25 = vld [vmem:[%s7426_s22 + $0x1c80] sm:$0xff]  ;;  %v1435_v1 = vld [vmem:[%s7426_s22 + $0x2518] sm:$0xff] }
  0xd1   : > { %5203 = vmatpush1.bf16.msra.mxu1 %v5202_v26  ;;  %4949 = vmatprep.subr.bf16.mxu0 %v4948_v27  ;;  %v1146_v26 = vld [vmem:[%s7426_s22 + $0x1c10] sm:$0xff]  ;;  %v5224_v27 = vpack.c.bf16 %v1163_v20, %v1147_v19  ;;  %v4970_v33 = vpack.c.bf16 %v1160_v25, %v1144_v24  ;;  %v4988_v20 = vpack.c.bf16 %v1321_v14, %v1305_v13  ;;  %v1451_v2 = vld [vmem:[%s7426_s22 + $0x2598] sm:$0xff] }
  0xd2   : > { %5205 = vmatprep.subr.bf16.mxu1 %v5204_v31  ;;  %v1179_v31 = vld [vmem:[%s7426_s22 + $0x1d18] sm:$0xff]  ;;  %v5226_v34 = vpack.c.bf16 %v1162_v28, %v1146_v26  ;;  %v1322_v25 = vld [vmem:[%s7426_s22 + $0x2190] sm:$0xff]  ;;  %v1337_v26 = vld [vmem:[%s7426_s22 + $0x2208] sm:$0xff] }
  0xd3   : > { %v1339_v28 = vld [vmem:[%s7426_s22 + $0x2218] sm:$0xff] }
  0xd4   : > { %4951 = vmatpush1.bf16.msra.mxu0 %v4950_v37  ;;  %v1192_v37 = vld [vmem:[%s7426_s22 + $0x1d80] sm:$0xff]  ;;  %v1467_v13 = vld [vmem:[%s7426_s22 + $0x2618] sm:$0xff] }
  0xd5   : > { %5207 = vmatpush1.bf16.msra.mxu1 %v5206_v38  ;;  %4953 = vmatprep.subr.bf16.mxu0 %v4952_v39  ;;  %v1178_v38 = vld [vmem:[%s7426_s22 + $0x1d10] sm:$0xff]  ;;  %v5228_v39 = vpack.c.bf16 %v1195_v32, %v1179_v31  ;;  %v4974_v45 = vpack.c.bf16 %v1192_v37, %v1176_v36  ;;  %v5248_v37 = vpack.c.bf16 %v1355_v29, %v1339_v28  ;;  %v1483_v14 = vld [vmem:[%s7426_s22 + $0x2698] sm:$0xff] }
  0xd6   : > { %5209 = vmatprep.subr.bf16.mxu1 %v5208_v43  ;;  %v1211_v43 = vld [vmem:[%s7426_s22 + $0x1e18] sm:$0xff]  ;;  %v5230_v46 = vpack.c.bf16 %v1194_v40, %v1178_v38  ;;  %v1338_v36 = vld [vmem:[%s7426_s22 + $0x2210] sm:$0xff]  ;;  %v1385_v40 = vld [vmem:[%s7426_s22 + $0x2388] sm:$0xff] }
  0xd7   : > { %v1354_v38 = vld [vmem:[%s7426_s22 + $0x2290] sm:$0xff] }
  0xd8   : > { %4955 = vmatpush1.bf16.msra.mxu0 %v4954_v49  ;;  %v1224_v49 = vld [vmem:[%s7426_s22 + $0x1e80] sm:$0xff] }
  0xd9   : > { %5211 = vmatpush1.bf16.msra.mxu1 %v5210_v50  ;;  %4957 = vmatprep.subr.bf16.mxu0 %v4956_v51  ;;  %v1210_v50 = vld [vmem:[%s7426_s22 + $0x1e10] sm:$0xff]  ;;  %v5232_v51 = vpack.c.bf16 %v1227_v44, %v1211_v43  ;;  %v4978_v57 = vpack.c.bf16 %v1224_v49, %v1208_v48  ;;  %v5250_v44 = vpack.c.bf16 %v1354_v38, %v1338_v36  ;;  %v1545_v36 = vld [vmem:[%s7426_s22 + $0x2888] sm:$0xff]  ;;  %v1547_v38 = vld [vmem:[%s7426_s22 + $0x2898] sm:$0xff] }
  0xda   : > { %5213 = vmatprep.subr.bf16.mxu1 %v5212_v55  ;;  %v1243_v55 = vld [vmem:[%s7426_s22 + $0x1f18] sm:$0xff]  ;;  %v5234_v58 = vpack.c.bf16 %v1226_v52, %v1210_v50  ;;  %v1370_v48 = vld [vmem:[%s7426_s22 + $0x2310] sm:$0xff]  ;;  %v5252_v49 = vpack.c.bf16 %v1387_v42, %v1371_v41  ;;  %v1417_v52 = vld [vmem:[%s7426_s22 + $0x2488] sm:$0xff] }
  0xdb   : > { %v1386_v50 = vld [vmem:[%s7426_s22 + $0x2390] sm:$0xff]  ;;  %v1528_v42 = vld [vmem:[%s7426_s22 + $0x2800] sm:$0xff] }
  0xdc   : > { %4959 = vmatpush1.bf16.msra.mxu0 %v4958_v61  ;;  %v1256_v61 = vld [vmem:[%s7426_s22 + $0x1f80] sm:$0xff] }
  0xdd   : > { %5215 = vmatpush1.bf16.msra.mxu1 %v5214_v62  ;;  %4961 = vmatprep.subr.bf16.mxu0 %v4960_v63  ;;  %v1242_v62 = vld [vmem:[%s7426_s22 + $0x1f10] sm:$0xff]  ;;  %v5236_v63 = vpack.c.bf16 %v1259_v56, %v1243_v55  ;;  %v4982_v5 = vpack.c.bf16 %v1256_v61, %v1240_v60  ;;  %v5254_v56 = vpack.c.bf16 %v1386_v50, %v1370_v48  ;;  %v1577_v48 = vld [vmem:[%s7426_s22 + $0x2988] sm:$0xff]  ;;  %v1579_v50 = vld [vmem:[%s7426_s22 + $0x2998] sm:$0xff] }
  0xde   : > { %5217 = vmatprep.subr.bf16.mxu1 %v5216_v3  ;;  %v1275_v3 = vld [vmem:[%s7426_s22 + $0x2018] sm:$0xff]  ;;  %v5238_v6 = vpack.c.bf16 %v1258_v0, %v1242_v62  ;;  %v1402_v60 = vld [vmem:[%s7426_s22 + $0x2410] sm:$0xff]  ;;  %v5256_v61 = vpack.c.bf16 %v1419_v54, %v1403_v53  ;;  %v1449_v0 = vld [vmem:[%s7426_s22 + $0x2588] sm:$0xff] }
  0xdf   : > { %v1418_v62 = vld [vmem:[%s7426_s22 + $0x2490] sm:$0xff]  ;;  %v1560_v54 = vld [vmem:[%s7426_s22 + $0x2900] sm:$0xff] }
  0xe0   : > { %4963 = vmatpush1.bf16.msra.mxu0 %v4962_v9  ;;  %v1288_v9 = vld [vmem:[%s7426_s22 + $0x2080] sm:$0xff] }
  0xe1   : > { %5219 = vmatpush1.bf16.msra.mxu1 %v5218_v10  ;;  %4965 = vmatprep.subr.bf16.mxu0 %v4964_v11  ;;  %v1274_v10 = vld [vmem:[%s7426_s22 + $0x2010] sm:$0xff]  ;;  %v5240_v11 = vpack.c.bf16 %v1291_v4, %v1275_v3  ;;  %v4986_v18 = vpack.c.bf16 %v1288_v9, %v1272_v8  ;;  %v5258_v4 = vpack.c.bf16 %v1418_v62, %v1402_v60  ;;  %v1609_v60 = vld [vmem:[%s7426_s22 + $0x2a88] sm:$0xff]  ;;  %v1611_v62 = vld [vmem:[%s7426_s22 + $0x2a98] sm:$0xff] }
  0xe2   : > { %5221 = vmatprep.subr.bf16.mxu1 %v5220_v15  ;;  %v1307_v15 = vld [vmem:[%s7426_s22 + $0x2118] sm:$0xff]  ;;  %v5242_v19 = vpack.c.bf16 %v1290_v12, %v1274_v10  ;;  %v1434_v8 = vld [vmem:[%s7426_s22 + $0x2510] sm:$0xff]  ;;  %v5260_v9 = vpack.c.bf16 %v1451_v2, %v1435_v1  ;;  %v1481_v12 = vld [vmem:[%s7426_s22 + $0x2688] sm:$0xff] }
  0xe3   : > { %v5244_v24 = vpack.c.bf16 %v1323_v16, %v1307_v15  ;;  %v1450_v10 = vld [vmem:[%s7426_s22 + $0x2590] sm:$0xff]  ;;  %v1592_v2 = vld [vmem:[%s7426_s22 + $0x2a00] sm:$0xff] }
  0xe4   : > { %4967 = vmatpush1.bf16.msra.mxu0 %v4966_v21  ;;  %v1304_v21 = vld [vmem:[%s7426_s22 + $0x2100] sm:$0xff]  ;;  %v5262_v16 = vpack.c.bf16 %v1450_v10, %v1434_v8  ;;  %v1641_v8 = vld [vmem:[%s7426_s22 + $0x2b88] sm:$0xff]  ;;  %v1643_v10 = vld [vmem:[%s7426_s22 + $0x2b98] sm:$0xff] }
  0xe5   : > { %5223 = vmatpush1.bf16.msra.mxu1 %v5222_v22  ;;  %4969 = vmatprep.subr.bf16.mxu0 %v4968_v23  ;;  %v1320_v22 = vld [vmem:[%s7426_s22 + $0x2180] sm:$0xff]  ;;  %v1306_v23 = vld [vmem:[%s7426_s22 + $0x2110] sm:$0xff] }
  0xe6   : > { %5225 = vmatprep.subr.bf16.mxu1 %v5224_v27  ;;  %v1353_v27 = vld [vmem:[%s7426_s22 + $0x2288] sm:$0xff]  ;;  %v4990_v31 = vpack.c.bf16 %v1320_v22, %v1304_v21  ;;  %v5246_v32 = vpack.c.bf16 %v1322_v25, %v1306_v23  ;;  %v5264_v21 = vpack.c.bf16 %v1483_v14, %v1467_v13  ;;  %v1482_v22 = vld [vmem:[%s7426_s22 + $0x2690] sm:$0xff]  ;;  %v1499_v25 = vld [vmem:[%s7426_s22 + $0x2718] sm:$0xff] }
  0xe7   : > { %v1497_v23 = vld [vmem:[%s7426_s22 + $0x2708] sm:$0xff]  ;;  %v1624_v14 = vld [vmem:[%s7426_s22 + $0x2b00] sm:$0xff] }
  0xe8   : > { %4971 = vmatpush1.bf16.msra.mxu0 %v4970_v33  ;;  %v4992_v33 = vpack.c.bf16 %v1353_v27, %v1337_v26  ;;  %v1515_v26 = vld [vmem:[%s7426_s22 + $0x2798] sm:$0xff] }
  0xe9   : > { %5227 = vmatpush1.bf16.msra.mxu1 %v5226_v34  ;;  %4973 = vmatprep.subr.bf16.mxu0 %v4972_v35  ;;  %v1336_v34 = vld [vmem:[%s7426_s22 + $0x2200] sm:$0xff] }
  0xea   : > { %5229 = vmatprep.subr.bf16.mxu1 %v5228_v39  ;;  %v1352_v35 = vld [vmem:[%s7426_s22 + $0x2280] sm:$0xff]  ;;  %v1369_v39 = vld [vmem:[%s7426_s22 + $0x2308] sm:$0xff] }
  0xeb   : > { %v4994_v43 = vpack.c.bf16 %v1352_v35, %v1336_v34  ;;  %v1514_v34 = vld [vmem:[%s7426_s22 + $0x2790] sm:$0xff]  ;;  %v1529_v35 = vld [vmem:[%s7426_s22 + $0x2808] sm:$0xff] }
  0xec   : > { %4975 = vmatpush1.bf16.msra.mxu0 %v4974_v45  ;;  %v4996_v45 = vpack.c.bf16 %v1385_v40, %v1369_v39  ;;  %v5016_v41 = vpack.c.bf16 %v1545_v36, %v1529_v35 }
  0xed   : > { %5231 = vmatpush1.bf16.msra.mxu1 %v5230_v46  ;;  %4977 = vmatprep.subr.bf16.mxu0 %v4976_v47  ;;  %v1368_v46 = vld [vmem:[%s7426_s22 + $0x2300] sm:$0xff] }
  0xee   : > { %5233 = vmatprep.subr.bf16.mxu1 %v5232_v51  ;;  %v1384_v47 = vld [vmem:[%s7426_s22 + $0x2380] sm:$0xff]  ;;  %v1401_v51 = vld [vmem:[%s7426_s22 + $0x2408] sm:$0xff] }
  0xef   : > { %v4998_v55 = vpack.c.bf16 %v1384_v47, %v1368_v46  ;;  %v1546_v46 = vld [vmem:[%s7426_s22 + $0x2890] sm:$0xff]  ;;  %v1561_v47 = vld [vmem:[%s7426_s22 + $0x2908] sm:$0xff] }
  0xf0   : > { %4979 = vmatpush1.bf16.msra.mxu0 %v4978_v57  ;;  %v5000_v57 = vpack.c.bf16 %v1417_v52, %v1401_v51  ;;  %v5020_v53 = vpack.c.bf16 %v1577_v48, %v1561_v47 }
  0xf1   : > { %5235 = vmatpush1.bf16.msra.mxu1 %v5234_v58  ;;  %4981 = vmatprep.subr.bf16.mxu0 %v4980_v59  ;;  %v1400_v58 = vld [vmem:[%s7426_s22 + $0x2400] sm:$0xff] }
  0xf2   : > { %5237 = vmatprep.subr.bf16.mxu1 %v5236_v63  ;;  %v1416_v59 = vld [vmem:[%s7426_s22 + $0x2480] sm:$0xff]  ;;  %v1433_v63 = vld [vmem:[%s7426_s22 + $0x2508] sm:$0xff] }
  0xf3   : > { %v5002_v3 = vpack.c.bf16 %v1416_v59, %v1400_v58  ;;  %v1578_v58 = vld [vmem:[%s7426_s22 + $0x2990] sm:$0xff]  ;;  %v1593_v59 = vld [vmem:[%s7426_s22 + $0x2a08] sm:$0xff] }
  0xf4   : > { %4983 = vmatpush1.bf16.msra.mxu0 %v4982_v5  ;;  %v5004_v5 = vpack.c.bf16 %v1449_v0, %v1433_v63  ;;  %v5024_v1 = vpack.c.bf16 %v1609_v60, %v1593_v59 }
  0xf5   : > { %5239 = vmatpush1.bf16.msra.mxu1 %v5238_v6  ;;  %4985 = vmatprep.subr.bf16.mxu0 %v4984_v7  ;;  %v1432_v6 = vld [vmem:[%s7426_s22 + $0x2500] sm:$0xff] }
  0xf6   : > { %5241 = vmatprep.subr.bf16.mxu1 %v5240_v11  ;;  %v1448_v7 = vld [vmem:[%s7426_s22 + $0x2580] sm:$0xff]  ;;  %v1465_v11 = vld [vmem:[%s7426_s22 + $0x2608] sm:$0xff] }
  0xf7   : > { %2516 = vmatmul.mubr.f32.vlgmr.msra.gmra.mrb[0].mxu0 %v242_v17  ;;  %v5006_v15 = vpack.c.bf16 %v1448_v7, %v1432_v6  ;;  %v1610_v6 = vld [vmem:[%s7426_s22 + $0x2a90] sm:$0xff]  ;;  %v1625_v7 = vld [vmem:[%s7426_s22 + $0x2b08] sm:$0xff] }
  0xf8   : > { %4987 = vmatpush1.bf16.msra.mxu0 %v4986_v18  ;;  %2800 = vmatmul.mubr.f32.vlgmr.msra.gmra.mrb[0].mxu1 %v242_v17  ;;  %v5008_v17 = vpack.c.bf16 %v1481_v12, %v1465_v11  ;;  %v1464_v18 = vld [vmem:[%s7426_s22 + $0x2600] sm:$0xff]  ;;  %v5028_v13 = vpack.c.bf16 %v1641_v8, %v1625_v7 }
  0xf9   : > { %5243 = vmatpush1.bf16.msra.mxu1 %v5242_v19  ;;  %4989 = vmatprep.subr.bf16.mxu0 %v4988_v20  ;;  %v1480_v19 = vld [vmem:[%s7426_s22 + $0x2680] sm:$0xff]  ;;  %v1466_v20 = vld [vmem:[%s7426_s22 + $0x2610] sm:$0xff] }
  0xfa   : > { %5245 = vmatprep.subr.bf16.mxu1 %v5244_v24  ;;  %2586 = vmatprep.mubr.f32.mxu0 %v245_v30  ;;  %v1513_v24 = vld [vmem:[%s7426_s22 + $0x2788] sm:$0xff]  ;;  %v5010_v27 = vpack.c.bf16 %v1480_v19, %v1464_v18  ;;  %v5266_v28 = vpack.c.bf16 %v1482_v22, %v1466_v20  ;;  %v1642_v18 = vld [vmem:[%s7426_s22 + $0x2b90] sm:$0xff]  ;;  %v1675_v22 = vld [vmem:[%s7426_s22 + $0x2c98] sm:$0xff] }
  0xfb   : > { %2870 = vmatprep.mubr.f32.mxu1 %v245_v30  ;;  %v5012_v29 = vpack.c.bf16 %v1513_v24, %v1497_v23  ;;  %v1496_v30 = vld [vmem:[%s7426_s22 + $0x2700] sm:$0xff]  ;;  %v1657_v19 = vld [vmem:[%s7426_s22 + $0x2c08] sm:$0xff] }
  0xfc   : > { %4991 = vmatpush1.bf16.msra.mxu0 %v4990_v31  ;;  %v1512_v31 = vld [vmem:[%s7426_s22 + $0x2780] sm:$0xff]  ;;  %v1673_v20 = vld [vmem:[%s7426_s22 + $0x2c88] sm:$0xff] }
  0xfd   : > { %5247 = vmatpush1.bf16.msra.mxu1 %v5246_v32  ;;  %4993 = vmatprep.subr.bf16.mxu0 %v4992_v33  ;;  %v1498_v32 = vld [vmem:[%s7426_s22 + $0x2710] sm:$0xff]  ;;  %v5268_v33 = vpack.c.bf16 %v1515_v26, %v1499_v25  ;;  %v5014_v39 = vpack.c.bf16 %v1512_v31, %v1496_v30  ;;  %v5032_v25 = vpack.c.bf16 %v1673_v20, %v1657_v19  ;;  %v1656_v26 = vld [vmem:[%s7426_s22 + $0x2c00] sm:$0xff]  ;;  %v1689_v31 = vld [vmem:[%s7426_s22 + $0x2d08] sm:$0xff] }
  0xfe   : > { %5249 = vmatprep.subr.bf16.mxu1 %v5248_v37  ;;  %v1531_v37 = vld [vmem:[%s7426_s22 + $0x2818] sm:$0xff]  ;;  %v5270_v40 = vpack.c.bf16 %v1514_v34, %v1498_v32  ;;  %v1674_v30 = vld [vmem:[%s7426_s22 + $0x2c90] sm:$0xff]  ;;  %v1705_v32 = vld [vmem:[%s7426_s22 + $0x2d88] sm:$0xff] }
  0xff   : > { %v1707_v34 = vld [vmem:[%s7426_s22 + $0x2d98] sm:$0xff]  ;;  %v244_v19 = vld [vmem:[#allocation2 + $0x20] sm:$0xff] }
 0x100   : > { %4995 = vmatpush1.bf16.msra.mxu0 %v4994_v43  ;;  %v1544_v43 = vld [vmem:[%s7426_s22 + $0x2880] sm:$0xff] }
 0x101   : > { %5251 = vmatpush1.bf16.msra.mxu1 %v5250_v44  ;;  %4997 = vmatprep.subr.bf16.mxu0 %v4996_v45  ;;  %v1530_v44 = vld [vmem:[%s7426_s22 + $0x2810] sm:$0xff]  ;;  %v5272_v45 = vpack.c.bf16 %v1547_v38, %v1531_v37  ;;  %v5018_v51 = vpack.c.bf16 %v1544_v43, %v1528_v42  ;;  %v5036_v37 = vpack.c.bf16 %v1705_v32, %v1689_v31  ;;  %v1688_v38 = vld [vmem:[%s7426_s22 + $0x2d00] sm:$0xff]  ;;  %v1721_v43 = vld [vmem:[%s7426_s22 + $0x2e08] sm:$0xff] }
 0x102   : > { %5253 = vmatprep.subr.bf16.mxu1 %v5252_v49  ;;  %v1563_v49 = vld [vmem:[%s7426_s22 + $0x2918] sm:$0xff]  ;;  %v5274_v52 = vpack.c.bf16 %v1546_v46, %v1530_v44  ;;  %v1706_v42 = vld [vmem:[%s7426_s22 + $0x2d90] sm:$0xff]  ;;  %v1737_v44 = vld [vmem:[%s7426_s22 + $0x2e88] sm:$0xff] }
 0x103   : > { %v1739_v46 = vld [vmem:[%s7426_s22 + $0x2e98] sm:$0xff] }
 0x104   : > { %4999 = vmatpush1.bf16.msra.mxu0 %v4998_v55  ;;  %v1576_v55 = vld [vmem:[%s7426_s22 + $0x2980] sm:$0xff]  ;;  %v1867_v31 = vld [vmem:[%s7426_s22 + $0x3298] sm:$0xff] }
 0x105   : > { %5255 = vmatpush1.bf16.msra.mxu1 %v5254_v56  ;;  %5001 = vmatprep.subr.bf16.mxu0 %v5000_v57  ;;  %v1562_v56 = vld [vmem:[%s7426_s22 + $0x2910] sm:$0xff]  ;;  %v5276_v57 = vpack.c.bf16 %v1579_v50, %v1563_v49  ;;  %v5022_v63 = vpack.c.bf16 %v1576_v55, %v1560_v54  ;;  %v5040_v49 = vpack.c.bf16 %v1737_v44, %v1721_v43  ;;  %v1720_v50 = vld [vmem:[%s7426_s22 + $0x2e00] sm:$0xff]  ;;  %v1753_v55 = vld [vmem:[%s7426_s22 + $0x2f08] sm:$0xff] }
 0x106   : > { %5257 = vmatprep.subr.bf16.mxu1 %v5256_v61  ;;  %v1595_v61 = vld [vmem:[%s7426_s22 + $0x2a18] sm:$0xff]  ;;  %v5278_v0 = vpack.c.bf16 %v1578_v58, %v1562_v56  ;;  %v1738_v54 = vld [vmem:[%s7426_s22 + $0x2e90] sm:$0xff]  ;;  %v1769_v56 = vld [vmem:[%s7426_s22 + $0x2f88] sm:$0xff] }
 0x107   : > { %v1771_v58 = vld [vmem:[%s7426_s22 + $0x2f98] sm:$0xff] }
 0x108   : > { %5003 = vmatpush1.bf16.msra.mxu0 %v5002_v3  ;;  %v1608_v3 = vld [vmem:[%s7426_s22 + $0x2a80] sm:$0xff]  ;;  %v247_v32 = vld [vmem:[#allocation2 + $0x38] sm:$0xff] }
 0x109   : > { %5259 = vmatpush1.bf16.msra.mxu1 %v5258_v4  ;;  %5005 = vmatprep.subr.bf16.mxu0 %v5004_v5  ;;  %v1594_v4 = vld [vmem:[%s7426_s22 + $0x2a10] sm:$0xff]  ;;  %v5280_v5 = vpack.c.bf16 %v1611_v62, %v1595_v61  ;;  %v5026_v11 = vpack.c.bf16 %v1608_v3, %v1592_v2  ;;  %v5044_v61 = vpack.c.bf16 %v1769_v56, %v1753_v55  ;;  %v1752_v62 = vld [vmem:[%s7426_s22 + $0x2f00] sm:$0xff]  ;;  %v1785_v3 = vld [vmem:[%s7426_s22 + $0x3008] sm:$0xff] }
 0x10a   : > { %5261 = vmatprep.subr.bf16.mxu1 %v5260_v9  ;;  %v1627_v9 = vld [vmem:[%s7426_s22 + $0x2b18] sm:$0xff]  ;;  %v5282_v12 = vpack.c.bf16 %v1610_v6, %v1594_v4  ;;  %v1770_v2 = vld [vmem:[%s7426_s22 + $0x2f90] sm:$0xff]  ;;  %v1801_v4 = vld [vmem:[%s7426_s22 + $0x3088] sm:$0xff] }
 0x10b   : > { %v1803_v6 = vld [vmem:[%s7426_s22 + $0x3098] sm:$0xff] }
 0x10c   : > { %5007 = vmatpush1.bf16.msra.mxu0 %v5006_v15  ;;  %v1640_v15 = vld [vmem:[%s7426_s22 + $0x2b80] sm:$0xff]  ;;  %v1883_v43 = vld [vmem:[%s7426_s22 + $0x3318] sm:$0xff] }
 0x10d   : > { %5263 = vmatpush1.bf16.msra.mxu1 %v5262_v16  ;;  %5009 = vmatprep.subr.bf16.mxu0 %v5008_v17  ;;  %v1626_v16 = vld [vmem:[%s7426_s22 + $0x2b10] sm:$0xff]  ;;  %v5284_v17 = vpack.c.bf16 %v1643_v10, %v1627_v9  ;;  %v5030_v23 = vpack.c.bf16 %v1640_v15, %v1624_v14  ;;  %v5048_v9 = vpack.c.bf16 %v1801_v4, %v1785_v3  ;;  %v1784_v10 = vld [vmem:[%s7426_s22 + $0x3000] sm:$0xff]  ;;  %v1817_v15 = vld [vmem:[%s7426_s22 + $0x3108] sm:$0xff] }
 0x10e   : > { %5265 = vmatprep.subr.bf16.mxu1 %v5264_v21  ;;  %v1659_v21 = vld [vmem:[%s7426_s22 + $0x2c18] sm:$0xff]  ;;  %v5286_v24 = vpack.c.bf16 %v1642_v18, %v1626_v16  ;;  %v1802_v14 = vld [vmem:[%s7426_s22 + $0x3090] sm:$0xff]  ;;  %v1833_v16 = vld [vmem:[%s7426_s22 + $0x3188] sm:$0xff] }
 0x10f   : > { %v1835_v18 = vld [vmem:[%s7426_s22 + $0x3198] sm:$0xff] }
 0x110   : > { %5011 = vmatpush1.bf16.msra.mxu0 %v5010_v27  ;;  %v1672_v27 = vld [vmem:[%s7426_s22 + $0x2c80] sm:$0xff]  ;;  %v1899_v44 = vld [vmem:[%s7426_s22 + $0x3398] sm:$0xff] }
 0x111   : > { %5267 = vmatpush1.bf16.msra.mxu1 %v5266_v28  ;;  %5013 = vmatprep.subr.bf16.mxu0 %v5012_v29  ;;  %v1658_v28 = vld [vmem:[%s7426_s22 + $0x2c10] sm:$0xff]  ;;  %v5288_v29 = vpack.c.bf16 %v1675_v22, %v1659_v21  ;;  %v5034_v35 = vpack.c.bf16 %v1672_v27, %v1656_v26  ;;  %v5052_v22 = vpack.c.bf16 %v1833_v16, %v1817_v15  ;;  %v1915_v55 = vld [vmem:[%s7426_s22 + $0x3418] sm:$0xff] }
 0x112   : > { %5269 = vmatprep.subr.bf16.mxu1 %v5268_v33  ;;  %v1691_v33 = vld [vmem:[%s7426_s22 + $0x2d18] sm:$0xff]  ;;  %v5290_v36 = vpack.c.bf16 %v1674_v30, %v1658_v28  ;;  %v1834_v27 = vld [vmem:[%s7426_s22 + $0x3190] sm:$0xff]  ;;  %v1849_v28 = vld [vmem:[%s7426_s22 + $0x3208] sm:$0xff] }
 0x113   : > { %v1851_v30 = vld [vmem:[%s7426_s22 + $0x3218] sm:$0xff] }
 0x114   : > { %5015 = vmatpush1.bf16.msra.mxu0 %v5014_v39  ;;  %v1704_v39 = vld [vmem:[%s7426_s22 + $0x2d80] sm:$0xff]  ;;  %v1931_v56 = vld [vmem:[%s7426_s22 + $0x3498] sm:$0xff] }
 0x115   : > { %5271 = vmatpush1.bf16.msra.mxu1 %v5270_v40  ;;  %5017 = vmatprep.subr.bf16.mxu0 %v5016_v41  ;;  %v1690_v40 = vld [vmem:[%s7426_s22 + $0x2d10] sm:$0xff]  ;;  %v5292_v41 = vpack.c.bf16 %v1707_v34, %v1691_v33  ;;  %v5038_v47 = vpack.c.bf16 %v1704_v39, %v1688_v38  ;;  %v5312_v39 = vpack.c.bf16 %v1867_v31, %v1851_v30  ;;  %v1947_v3 = vld [vmem:[%s7426_s22 + $0x3518] sm:$0xff] }
 0x116   : > { %5273 = vmatprep.subr.bf16.mxu1 %v5272_v45  ;;  %v1723_v45 = vld [vmem:[%s7426_s22 + $0x2e18] sm:$0xff]  ;;  %v5294_v48 = vpack.c.bf16 %v1706_v42, %v1690_v40  ;;  %v1850_v38 = vld [vmem:[%s7426_s22 + $0x3210] sm:$0xff]  ;;  %v1897_v42 = vld [vmem:[%s7426_s22 + $0x3388] sm:$0xff] }
 0x117   : > { %v1866_v40 = vld [vmem:[%s7426_s22 + $0x3290] sm:$0xff]  ;;  %v1963_v4 = vld [vmem:[%s7426_s22 + $0x3598] sm:$0xff] }
 0x118   : > { %5019 = vmatpush1.bf16.msra.mxu0 %v5018_v51  ;;  %v1736_v51 = vld [vmem:[%s7426_s22 + $0x2e80] sm:$0xff]  ;;  %v1979_v15 = vld [vmem:[%s7426_s22 + $0x3618] sm:$0xff] }
 0x119   : > { %5275 = vmatpush1.bf16.msra.mxu1 %v5274_v52  ;;  %5021 = vmatprep.subr.bf16.mxu0 %v5020_v53  ;;  %v1722_v52 = vld [vmem:[%s7426_s22 + $0x2e10] sm:$0xff]  ;;  %v5296_v53 = vpack.c.bf16 %v1739_v46, %v1723_v45  ;;  %v5042_v59 = vpack.c.bf16 %v1736_v51, %v1720_v50  ;;  %v5314_v46 = vpack.c.bf16 %v1866_v40, %v1850_v38  ;;  %v1995_v16 = vld [vmem:[%s7426_s22 + $0x3698] sm:$0xff]  ;;  %v2057_v38 = vld [vmem:[%s7426_s22 + $0x3888] sm:$0xff] }
 0x11a   : > { %5277 = vmatprep.subr.bf16.mxu1 %v5276_v57  ;;  %v1755_v57 = vld [vmem:[%s7426_s22 + $0x2f18] sm:$0xff]  ;;  %v5298_v60 = vpack.c.bf16 %v1738_v54, %v1722_v52  ;;  %v1882_v50 = vld [vmem:[%s7426_s22 + $0x3310] sm:$0xff]  ;;  %v5316_v51 = vpack.c.bf16 %v1899_v44, %v1883_v43  ;;  %v1929_v54 = vld [vmem:[%s7426_s22 + $0x3488] sm:$0xff] }
 0x11b   : > { %v1898_v52 = vld [vmem:[%s7426_s22 + $0x3390] sm:$0xff]  ;;  %v2059_v40 = vld [vmem:[%s7426_s22 + $0x3898] sm:$0xff]  ;;  %v2040_v44 = vld [vmem:[%s7426_s22 + $0x3800] sm:$0xff] }
 0x11c   : > { %5023 = vmatpush1.bf16.msra.mxu0 %v5022_v63  ;;  %v1768_v63 = vld [vmem:[%s7426_s22 + $0x2f80] sm:$0xff] }
 0x11d   : > { %5279 = vmatpush1.bf16.msra.mxu1 %v5278_v0  ;;  %5025 = vmatprep.subr.bf16.mxu0 %v5024_v1  ;;  %v1754_v0 = vld [vmem:[%s7426_s22 + $0x2f10] sm:$0xff]  ;;  %v5300_v1 = vpack.c.bf16 %v1771_v58, %v1755_v57  ;;  %v5046_v7 = vpack.c.bf16 %v1768_v63, %v1752_v62  ;;  %v5318_v58 = vpack.c.bf16 %v1898_v52, %v1882_v50  ;;  %v2089_v50 = vld [vmem:[%s7426_s22 + $0x3988] sm:$0xff]  ;;  %v2091_v52 = vld [vmem:[%s7426_s22 + $0x3998] sm:$0xff] }
 0x11e   : > { %5281 = vmatprep.subr.bf16.mxu1 %v5280_v5  ;;  %v1787_v5 = vld [vmem:[%s7426_s22 + $0x3018] sm:$0xff]  ;;  %v5302_v8 = vpack.c.bf16 %v1770_v2, %v1754_v0  ;;  %v1914_v62 = vld [vmem:[%s7426_s22 + $0x3410] sm:$0xff]  ;;  %v5320_v63 = vpack.c.bf16 %v1931_v56, %v1915_v55  ;;  %v1961_v2 = vld [vmem:[%s7426_s22 + $0x3588] sm:$0xff] }
 0x11f   : > { %v1930_v0 = vld [vmem:[%s7426_s22 + $0x3490] sm:$0xff]  ;;  %v2072_v56 = vld [vmem:[%s7426_s22 + $0x3900] sm:$0xff] }
 0x120   : > { %5027 = vmatpush1.bf16.msra.mxu0 %v5026_v11  ;;  %v1800_v11 = vld [vmem:[%s7426_s22 + $0x3080] sm:$0xff] }
 0x121   : > { %5283 = vmatpush1.bf16.msra.mxu1 %v5282_v12  ;;  %5029 = vmatprep.subr.bf16.mxu0 %v5028_v13  ;;  %v1786_v12 = vld [vmem:[%s7426_s22 + $0x3010] sm:$0xff]  ;;  %v5304_v13 = vpack.c.bf16 %v1803_v6, %v1787_v5  ;;  %v5050_v20 = vpack.c.bf16 %v1800_v11, %v1784_v10  ;;  %v5322_v6 = vpack.c.bf16 %v1930_v0, %v1914_v62  ;;  %v2121_v62 = vld [vmem:[%s7426_s22 + $0x3a88] sm:$0xff]  ;;  %v2123_v0 = vld [vmem:[%s7426_s22 + $0x3a98] sm:$0xff] }
 0x122   : > { %5285 = vmatprep.subr.bf16.mxu1 %v5284_v17  ;;  %v1819_v17 = vld [vmem:[%s7426_s22 + $0x3118] sm:$0xff]  ;;  %v5306_v21 = vpack.c.bf16 %v1802_v14, %v1786_v12  ;;  %v1946_v10 = vld [vmem:[%s7426_s22 + $0x3510] sm:$0xff]  ;;  %v5324_v11 = vpack.c.bf16 %v1963_v4, %v1947_v3  ;;  %v1993_v14 = vld [vmem:[%s7426_s22 + $0x3688] sm:$0xff] }
 0x123   : > { %v5308_v26 = vpack.c.bf16 %v1835_v18, %v1819_v17  ;;  %v1962_v12 = vld [vmem:[%s7426_s22 + $0x3590] sm:$0xff]  ;;  %v2104_v4 = vld [vmem:[%s7426_s22 + $0x3a00] sm:$0xff] }
 0x124   : > { %5031 = vmatpush1.bf16.msra.mxu0 %v5030_v23  ;;  %v1816_v23 = vld [vmem:[%s7426_s22 + $0x3100] sm:$0xff]  ;;  %v5326_v18 = vpack.c.bf16 %v1962_v12, %v1946_v10  ;;  %v2153_v10 = vld [vmem:[%s7426_s22 + $0x3b88] sm:$0xff]  ;;  %v2155_v12 = vld [vmem:[%s7426_s22 + $0x3b98] sm:$0xff] }
 0x125   : > { %5287 = vmatpush1.bf16.msra.mxu1 %v5286_v24  ;;  %5033 = vmatprep.subr.bf16.mxu0 %v5032_v25  ;;  %v1832_v24 = vld [vmem:[%s7426_s22 + $0x3180] sm:$0xff]  ;;  %v1818_v25 = vld [vmem:[%s7426_s22 + $0x3110] sm:$0xff] }
 0x126   : > { %5289 = vmatprep.subr.bf16.mxu1 %v5288_v29  ;;  %v1865_v29 = vld [vmem:[%s7426_s22 + $0x3288] sm:$0xff]  ;;  %v5054_v33 = vpack.c.bf16 %v1832_v24, %v1816_v23  ;;  %v5310_v34 = vpack.c.bf16 %v1834_v27, %v1818_v25  ;;  %v5328_v23 = vpack.c.bf16 %v1995_v16, %v1979_v15  ;;  %v1994_v24 = vld [vmem:[%s7426_s22 + $0x3690] sm:$0xff]  ;;  %v2011_v27 = vld [vmem:[%s7426_s22 + $0x3718] sm:$0xff] }
 0x127   : > { %v2009_v25 = vld [vmem:[%s7426_s22 + $0x3708] sm:$0xff]  ;;  %v2136_v16 = vld [vmem:[%s7426_s22 + $0x3b00] sm:$0xff] }
 0x128   : > { %5035 = vmatpush1.bf16.msra.mxu0 %v5034_v35  ;;  %v5056_v35 = vpack.c.bf16 %v1865_v29, %v1849_v28  ;;  %v2027_v28 = vld [vmem:[%s7426_s22 + $0x3798] sm:$0xff] }
 0x129   : > { %5291 = vmatpush1.bf16.msra.mxu1 %v5290_v36  ;;  %5037 = vmatprep.subr.bf16.mxu0 %v5036_v37  ;;  %v1848_v36 = vld [vmem:[%s7426_s22 + $0x3200] sm:$0xff] }
 0x12a   : > { %5293 = vmatprep.subr.bf16.mxu1 %v5292_v41  ;;  %v1864_v37 = vld [vmem:[%s7426_s22 + $0x3280] sm:$0xff]  ;;  %v1881_v41 = vld [vmem:[%s7426_s22 + $0x3308] sm:$0xff] }
 0x12b   : > { %v5058_v45 = vpack.c.bf16 %v1864_v37, %v1848_v36  ;;  %v2026_v36 = vld [vmem:[%s7426_s22 + $0x3790] sm:$0xff]  ;;  %v2041_v37 = vld [vmem:[%s7426_s22 + $0x3808] sm:$0xff] }
 0x12c   : > { %5039 = vmatpush1.bf16.msra.mxu0 %v5038_v47  ;;  %v5060_v47 = vpack.c.bf16 %v1897_v42, %v1881_v41  ;;  %v5080_v43 = vpack.c.bf16 %v2057_v38, %v2041_v37 }
 0x12d   : > { %5295 = vmatpush1.bf16.msra.mxu1 %v5294_v48  ;;  %5041 = vmatprep.subr.bf16.mxu0 %v5040_v49  ;;  %v1880_v48 = vld [vmem:[%s7426_s22 + $0x3300] sm:$0xff] }
 0x12e   : > { %5297 = vmatprep.subr.bf16.mxu1 %v5296_v53  ;;  %v1896_v49 = vld [vmem:[%s7426_s22 + $0x3380] sm:$0xff]  ;;  %v1913_v53 = vld [vmem:[%s7426_s22 + $0x3408] sm:$0xff] }
 0x12f   : > { %v5062_v57 = vpack.c.bf16 %v1896_v49, %v1880_v48  ;;  %v2058_v48 = vld [vmem:[%s7426_s22 + $0x3890] sm:$0xff]  ;;  %v2073_v49 = vld [vmem:[%s7426_s22 + $0x3908] sm:$0xff] }
 0x130   : > { %5043 = vmatpush1.bf16.msra.mxu0 %v5042_v59  ;;  %v5064_v59 = vpack.c.bf16 %v1929_v54, %v1913_v53  ;;  %v5084_v55 = vpack.c.bf16 %v2089_v50, %v2073_v49 }
 0x131   : > { %5299 = vmatpush1.bf16.msra.mxu1 %v5298_v60  ;;  %5045 = vmatprep.subr.bf16.mxu0 %v5044_v61  ;;  %v1912_v60 = vld [vmem:[%s7426_s22 + $0x3400] sm:$0xff] }
 0x132   : > { %5301 = vmatprep.subr.bf16.mxu1 %v5300_v1  ;;  %v1928_v61 = vld [vmem:[%s7426_s22 + $0x3480] sm:$0xff]  ;;  %v1945_v1 = vld [vmem:[%s7426_s22 + $0x3508] sm:$0xff] }
 0x133   : > { %v5066_v5 = vpack.c.bf16 %v1928_v61, %v1912_v60  ;;  %v2090_v60 = vld [vmem:[%s7426_s22 + $0x3990] sm:$0xff]  ;;  %v2105_v61 = vld [vmem:[%s7426_s22 + $0x3a08] sm:$0xff] }
 0x134   : > { %5047 = vmatpush1.bf16.msra.mxu0 %v5046_v7  ;;  %v5068_v7 = vpack.c.bf16 %v1961_v2, %v1945_v1  ;;  %v5088_v3 = vpack.c.bf16 %v2121_v62, %v2105_v61 }
 0x135   : > { %5303 = vmatpush1.bf16.msra.mxu1 %v5302_v8  ;;  %5049 = vmatprep.subr.bf16.mxu0 %v5048_v9  ;;  %v1944_v8 = vld [vmem:[%s7426_s22 + $0x3500] sm:$0xff] }
 0x136   : > { %5305 = vmatprep.subr.bf16.mxu1 %v5304_v13  ;;  %v1960_v9 = vld [vmem:[%s7426_s22 + $0x3580] sm:$0xff]  ;;  %v1977_v13 = vld [vmem:[%s7426_s22 + $0x3608] sm:$0xff] }
 0x137   : > { %2587 = vmatmul.mubr.f32.vlgmr.msra.gmra.mrb[0].mxu0 %v244_v19  ;;  %v5070_v17 = vpack.c.bf16 %v1960_v9, %v1944_v8  ;;  %v2122_v8 = vld [vmem:[%s7426_s22 + $0x3a90] sm:$0xff]  ;;  %v2137_v9 = vld [vmem:[%s7426_s22 + $0x3b08] sm:$0xff] }
 0x138   : > { %5051 = vmatpush1.bf16.msra.mxu0 %v5050_v20  ;;  %2871 = vmatmul.mubr.f32.vlgmr.msra.gmra.mrb[0].mxu1 %v244_v19  ;;  %v5072_v19 = vpack.c.bf16 %v1993_v14, %v1977_v13  ;;  %v1976_v20 = vld [vmem:[%s7426_s22 + $0x3600] sm:$0xff]  ;;  %v5092_v15 = vpack.c.bf16 %v2153_v10, %v2137_v9 }
 0x139   : > { %5307 = vmatpush1.bf16.msra.mxu1 %v5306_v21  ;;  %5053 = vmatprep.subr.bf16.mxu0 %v5052_v22  ;;  %v1992_v21 = vld [vmem:[%s7426_s22 + $0x3680] sm:$0xff]  ;;  %v1978_v22 = vld [vmem:[%s7426_s22 + $0x3610] sm:$0xff] }
 0x13a   : > { %5309 = vmatprep.subr.bf16.mxu1 %v5308_v26  ;;  %2657 = vmatprep.mubr.f32.mxu0 %v247_v32  ;;  %v2025_v26 = vld [vmem:[%s7426_s22 + $0x3788] sm:$0xff]  ;;  %v5074_v29 = vpack.c.bf16 %v1992_v21, %v1976_v20  ;;  %v5330_v30 = vpack.c.bf16 %v1994_v24, %v1978_v22  ;;  %v2154_v20 = vld [vmem:[%s7426_s22 + $0x3b90] sm:$0xff]  ;;  %v2187_v24 = vld [vmem:[%s7426_s22 + $0x3c98] sm:$0xff] }
 0x13b   : > { %2941 = vmatprep.mubr.f32.mxu1 %v247_v32  ;;  %v5076_v31 = vpack.c.bf16 %v2025_v26, %v2009_v25  ;;  %v2008_v32 = vld [vmem:[%s7426_s22 + $0x3700] sm:$0xff]  ;;  %v2169_v21 = vld [vmem:[%s7426_s22 + $0x3c08] sm:$0xff] }
 0x13c   : > { %5055 = vmatpush1.bf16.msra.mxu0 %v5054_v33  ;;  %v2024_v33 = vld [vmem:[%s7426_s22 + $0x3780] sm:$0xff]  ;;  %v2185_v22 = vld [vmem:[%s7426_s22 + $0x3c88] sm:$0xff] }
 0x13d   : > { %5311 = vmatpush1.bf16.msra.mxu1 %v5310_v34  ;;  %5057 = vmatprep.subr.bf16.mxu0 %v5056_v35  ;;  %v2010_v34 = vld [vmem:[%s7426_s22 + $0x3710] sm:$0xff]  ;;  %v5332_v35 = vpack.c.bf16 %v2027_v28, %v2011_v27  ;;  %v5078_v41 = vpack.c.bf16 %v2024_v33, %v2008_v32  ;;  %v5096_v27 = vpack.c.bf16 %v2185_v22, %v2169_v21  ;;  %v2168_v28 = vld [vmem:[%s7426_s22 + $0x3c00] sm:$0xff]  ;;  %v2201_v33 = vld [vmem:[%s7426_s22 + $0x3d08] sm:$0xff] }
 0x13e   : > { %5313 = vmatprep.subr.bf16.mxu1 %v5312_v39  ;;  %v2043_v39 = vld [vmem:[%s7426_s22 + $0x3818] sm:$0xff]  ;;  %v5334_v42 = vpack.c.bf16 %v2026_v36, %v2010_v34  ;;  %v2186_v32 = vld [vmem:[%s7426_s22 + $0x3c90] sm:$0xff]  ;;  %v2217_v34 = vld [vmem:[%s7426_s22 + $0x3d88] sm:$0xff] }
 0x13f   : > { %v2219_v36 = vld [vmem:[%s7426_s22 + $0x3d98] sm:$0xff]  ;;  %v246_v21 = vld [vmem:[#allocation2 + $0x30] sm:$0xff] }
 0x140   : > { %5059 = vmatpush1.bf16.msra.mxu0 %v5058_v45  ;;  %v2056_v45 = vld [vmem:[%s7426_s22 + $0x3880] sm:$0xff] }
 0x141   : > { %5315 = vmatpush1.bf16.msra.mxu1 %v5314_v46  ;;  %5061 = vmatprep.subr.bf16.mxu0 %v5060_v47  ;;  %v2042_v46 = vld [vmem:[%s7426_s22 + $0x3810] sm:$0xff]  ;;  %v5336_v47 = vpack.c.bf16 %v2059_v40, %v2043_v39  ;;  %v5082_v53 = vpack.c.bf16 %v2056_v45, %v2040_v44  ;;  %v5100_v39 = vpack.c.bf16 %v2217_v34, %v2201_v33  ;;  %v2200_v40 = vld [vmem:[%s7426_s22 + $0x3d00] sm:$0xff]  ;;  %v2233_v45 = vld [vmem:[%s7426_s22 + $0x3e08] sm:$0xff] }
 0x142   : > { %5317 = vmatprep.subr.bf16.mxu1 %v5316_v51  ;;  %v2075_v51 = vld [vmem:[%s7426_s22 + $0x3918] sm:$0xff]  ;;  %v5338_v54 = vpack.c.bf16 %v2058_v48, %v2042_v46  ;;  %v2218_v44 = vld [vmem:[%s7426_s22 + $0x3d90] sm:$0xff]  ;;  %v2249_v46 = vld [vmem:[%s7426_s22 + $0x3e88] sm:$0xff] }
 0x143   : > { %v2251_v48 = vld [vmem:[%s7426_s22 + $0x3e98] sm:$0xff] }
 0x144   : > { %5063 = vmatpush1.bf16.msra.mxu0 %v5062_v57  ;;  %v2088_v57 = vld [vmem:[%s7426_s22 + $0x3980] sm:$0xff]  ;;  %v335_v33 = vld [vmem:[%s7426_s22 + $0x2b8] sm:$0xff] }
 0x145   : > { %5319 = vmatpush1.bf16.msra.mxu1 %v5318_v58  ;;  %5065 = vmatprep.subr.bf16.mxu0 %v5064_v59  ;;  %v2074_v58 = vld [vmem:[%s7426_s22 + $0x3910] sm:$0xff]  ;;  %v5340_v59 = vpack.c.bf16 %v2091_v52, %v2075_v51  ;;  %v5086_v1 = vpack.c.bf16 %v2088_v57, %v2072_v56  ;;  %v5104_v51 = vpack.c.bf16 %v2249_v46, %v2233_v45  ;;  %v2232_v52 = vld [vmem:[%s7426_s22 + $0x3e00] sm:$0xff]  ;;  %v2265_v57 = vld [vmem:[%s7426_s22 + $0x3f08] sm:$0xff] }
 0x146   : > { %5321 = vmatprep.subr.bf16.mxu1 %v5320_v63  ;;  %v2107_v63 = vld [vmem:[%s7426_s22 + $0x3a18] sm:$0xff]  ;;  %v5342_v2 = vpack.c.bf16 %v2090_v60, %v2074_v58  ;;  %v2250_v56 = vld [vmem:[%s7426_s22 + $0x3e90] sm:$0xff]  ;;  %v2281_v58 = vld [vmem:[%s7426_s22 + $0x3f88] sm:$0xff] }
 0x147   : > { %v2283_v60 = vld [vmem:[%s7426_s22 + $0x3f98] sm:$0xff] }
 0x148   : > { %5067 = vmatpush1.bf16.msra.mxu0 %v5066_v5  ;;  %v2120_v5 = vld [vmem:[%s7426_s22 + $0x3a80] sm:$0xff]  ;;  %v351_v45 = vld [vmem:[%s7426_s22 + $0x338] sm:$0xff] }
 0x149   : > { %5323 = vmatpush1.bf16.msra.mxu1 %v5322_v6  ;;  %5069 = vmatprep.subr.bf16.mxu0 %v5068_v7  ;;  %v2106_v6 = vld [vmem:[%s7426_s22 + $0x3a10] sm:$0xff]  ;;  %v5344_v7 = vpack.c.bf16 %v2123_v0, %v2107_v63  ;;  %v5090_v13 = vpack.c.bf16 %v2120_v5, %v2104_v4  ;;  %v5108_v63 = vpack.c.bf16 %v2281_v58, %v2265_v57  ;;  %v2264_v0 = vld [vmem:[%s7426_s22 + $0x3f00] sm:$0xff]  ;;  %v253_v5 = vld [vmem:[%s7426_s22 + $0x28] sm:$0xff] }
 0x14a   : > { %5325 = vmatprep.subr.bf16.mxu1 %v5324_v11  ;;  %v2139_v11 = vld [vmem:[%s7426_s22 + $0x3b18] sm:$0xff]  ;;  %v5346_v14 = vpack.c.bf16 %v2122_v8, %v2106_v6  ;;  %v2282_v4 = vld [vmem:[%s7426_s22 + $0x3f90] sm:$0xff]  ;;  %v269_v6 = vld [vmem:[%s7426_s22 + $0xa8] sm:$0xff] }
 0x14b   : > { %v271_v8 = vld [vmem:[%s7426_s22 + $0xb8] sm:$0xff] }
 0x14c   : > { %5071 = vmatpush1.bf16.msra.mxu0 %v5070_v17  ;;  %v2152_v17 = vld [vmem:[%s7426_s22 + $0x3b80] sm:$0xff]  ;;  %v367_v46 = vld [vmem:[%s7426_s22 + $0x3b8] sm:$0xff] }
 0x14d   : > { %5327 = vmatpush1.bf16.msra.mxu1 %v5326_v18  ;;  %5073 = vmatprep.subr.bf16.mxu0 %v5072_v19  ;;  %v2138_v18 = vld [vmem:[%s7426_s22 + $0x3b10] sm:$0xff]  ;;  %v5348_v19 = vpack.c.bf16 %v2155_v12, %v2139_v11  ;;  %v5094_v25 = vpack.c.bf16 %v2152_v17, %v2136_v16  ;;  %v5368_v11 = vpack.c.bf16 %v269_v6, %v253_v5  ;;  %v252_v12 = vld [vmem:[%s7426_s22 + $0x20] sm:$0xff]  ;;  %v285_v17 = vld [vmem:[%s7426_s22 + $0x128] sm:$0xff] }
 0x14e   : > { %5329 = vmatprep.subr.bf16.mxu1 %v5328_v23  ;;  %v2171_v23 = vld [vmem:[%s7426_s22 + $0x3c18] sm:$0xff]  ;;  %v5350_v26 = vpack.c.bf16 %v2154_v20, %v2138_v18  ;;  %v270_v16 = vld [vmem:[%s7426_s22 + $0xb0] sm:$0xff]  ;;  %v301_v18 = vld [vmem:[%s7426_s22 + $0x1a8] sm:$0xff] }
 0x14f   : > { %v303_v20 = vld [vmem:[%s7426_s22 + $0x1b8] sm:$0xff] }
 0x150   : > { %5075 = vmatpush1.bf16.msra.mxu0 %v5074_v29  ;;  %v2184_v29 = vld [vmem:[%s7426_s22 + $0x3c80] sm:$0xff]  ;;  %v383_v57 = vld [vmem:[%s7426_s22 + $0x438] sm:$0xff] }
 0x151   : > { %5331 = vmatpush1.bf16.msra.mxu1 %v5330_v30  ;;  %5077 = vmatprep.subr.bf16.mxu0 %v5076_v31  ;;  %v2170_v30 = vld [vmem:[%s7426_s22 + $0x3c10] sm:$0xff]  ;;  %v5352_v31 = vpack.c.bf16 %v2187_v24, %v2171_v23  ;;  %v5098_v37 = vpack.c.bf16 %v2184_v29, %v2168_v28  ;;  %v5372_v24 = vpack.c.bf16 %v301_v18, %v285_v17  ;;  %v399_v58 = vld [vmem:[%s7426_s22 + $0x4b8] sm:$0xff] }
 0x152   : > { %5333 = vmatprep.subr.bf16.mxu1 %v5332_v35  ;;  %v2203_v35 = vld [vmem:[%s7426_s22 + $0x3d18] sm:$0xff]  ;;  %v5354_v38 = vpack.c.bf16 %v2186_v32, %v2170_v30  ;;  %v302_v29 = vld [vmem:[%s7426_s22 + $0x1b0] sm:$0xff]  ;;  %v317_v30 = vld [vmem:[%s7426_s22 + $0x228] sm:$0xff] }
 0x153   : > { %v319_v32 = vld [vmem:[%s7426_s22 + $0x238] sm:$0xff] }
 0x154   : > { %5079 = vmatpush1.bf16.msra.mxu0 %v5078_v41  ;;  %v2216_v41 = vld [vmem:[%s7426_s22 + $0x3d80] sm:$0xff]  ;;  %v415_v5 = vld [vmem:[%s7426_s22 + $0x538] sm:$0xff] }
 0x155   : > { %5335 = vmatpush1.bf16.msra.mxu1 %v5334_v42  ;;  %5081 = vmatprep.subr.bf16.mxu0 %v5080_v43  ;;  %v2202_v42 = vld [vmem:[%s7426_s22 + $0x3d10] sm:$0xff]  ;;  %v5356_v43 = vpack.c.bf16 %v2219_v36, %v2203_v35  ;;  %v5102_v49 = vpack.c.bf16 %v2216_v41, %v2200_v40  ;;  %v5632_v40 = vpack.c.bf16 %v335_v33, %v319_v32  ;;  %v431_v6 = vld [vmem:[%s7426_s22 + $0x5b8] sm:$0xff] }
 0x156   : > { %5337 = vmatprep.subr.bf16.mxu1 %v5336_v47  ;;  %v2235_v47 = vld [vmem:[%s7426_s22 + $0x3e18] sm:$0xff]  ;;  %v5358_v50 = vpack.c.bf16 %v2218_v44, %v2202_v42  ;;  %v334_v41 = vld [vmem:[%s7426_s22 + $0x2b0] sm:$0xff]  ;;  %v349_v42 = vld [vmem:[%s7426_s22 + $0x328] sm:$0xff] }
 0x157   : > { %v7033_v44 = vld [vmem:[#allocation2 + $0x8] sm:$0xff]  ;;  %v447_v17 = vld [vmem:[%s7426_s22 + $0x638] sm:$0xff] }
 0x158   : > { %5083 = vmatpush1.bf16.msra.mxu0 %v5082_v53  ;;  %v2248_v53 = vld [vmem:[%s7426_s22 + $0x3e80] sm:$0xff]  ;;  %v463_v18 = vld [vmem:[%s7426_s22 + $0x6b8] sm:$0xff] }
 0x159   : > { %5339 = vmatpush1.bf16.msra.mxu1 %v5338_v54  ;;  %5085 = vmatprep.subr.bf16.mxu0 %v5084_v55  ;;  %v2234_v54 = vld [vmem:[%s7426_s22 + $0x3e10] sm:$0xff]  ;;  %v5360_v55 = vpack.c.bf16 %v2251_v48, %v2235_v47  ;;  %v5106_v61 = vpack.c.bf16 %v2248_v53, %v2232_v52  ;;  %v5636_v53 = vpack.c.bf16 %v367_v46, %v351_v45  ;;  %v508_v46 = vld [vmem:[%s7426_s22 + $0x820] sm:$0xff] }
 0x15a   : > { %5341 = vmatprep.subr.bf16.mxu1 %v5340_v59  ;;  %v2267_v59 = vld [vmem:[%s7426_s22 + $0x3f18] sm:$0xff]  ;;  %v5362_v62 = vpack.c.bf16 %v2250_v56, %v2234_v54  ;;  %v350_v52 = vld [vmem:[%s7426_s22 + $0x330] sm:$0xff]  ;;  %v397_v56 = vld [vmem:[%s7426_s22 + $0x4a8] sm:$0xff] }
 0x15b   : > { %v366_v54 = vld [vmem:[%s7426_s22 + $0x3b0] sm:$0xff] }
 0x15c   : > { %5087 = vmatpush1.bf16.msra.mxu0 %v5086_v1  ;;  %v2280_v1 = vld [vmem:[%s7426_s22 + $0x3f80] sm:$0xff] }
 0x15d   : > { %5343 = vmatpush1.bf16.msra.mxu1 %v5342_v2  ;;  %5089 = vmatprep.subr.bf16.mxu0 %v5088_v3  ;;  %v2266_v2 = vld [vmem:[%s7426_s22 + $0x3f10] sm:$0xff]  ;;  %v5364_v3 = vpack.c.bf16 %v2283_v60, %v2267_v59  ;;  %v5110_v9 = vpack.c.bf16 %v2280_v1, %v2264_v0  ;;  %v5638_v60 = vpack.c.bf16 %v366_v54, %v350_v52  ;;  %v557_v52 = vld [vmem:[%s7426_s22 + $0x9a8] sm:$0xff]  ;;  %v559_v54 = vld [vmem:[%s7426_s22 + $0x9b8] sm:$0xff] }
 0x15e   : > { %5345 = vmatprep.subr.bf16.mxu1 %v5344_v7  ;;  %v255_v7 = vld [vmem:[%s7426_s22 + $0x38] sm:$0xff]  ;;  %v5366_v10 = vpack.c.bf16 %v2282_v4, %v2266_v2  ;;  %v382_v0 = vld [vmem:[%s7426_s22 + $0x430] sm:$0xff]  ;;  %v5640_v1 = vpack.c.bf16 %v399_v58, %v383_v57  ;;  %v429_v4 = vld [vmem:[%s7426_s22 + $0x5a8] sm:$0xff] }
 0x15f   : > { %v398_v2 = vld [vmem:[%s7426_s22 + $0x4b0] sm:$0xff]  ;;  %v540_v58 = vld [vmem:[%s7426_s22 + $0x920] sm:$0xff] }
 0x160   : > { %5091 = vmatpush1.bf16.msra.mxu0 %v5090_v13  ;;  %v268_v13 = vld [vmem:[%s7426_s22 + $0xa0] sm:$0xff] }
 0x161   : > { %5347 = vmatpush1.bf16.msra.mxu1 %v5346_v14  ;;  %5093 = vmatprep.subr.bf16.mxu0 %v5092_v15  ;;  %v254_v14 = vld [vmem:[%s7426_s22 + $0x30] sm:$0xff]  ;;  %v5624_v15 = vpack.c.bf16 %v271_v8, %v255_v7  ;;  %v5370_v22 = vpack.c.bf16 %v268_v13, %v252_v12  ;;  %v5642_v8 = vpack.c.bf16 %v398_v2, %v382_v0  ;;  %v589_v0 = vld [vmem:[%s7426_s22 + $0xaa8] sm:$0xff]  ;;  %v591_v2 = vld [vmem:[%s7426_s22 + $0xab8] sm:$0xff] }
 0x162   : > { %5349 = vmatprep.subr.bf16.mxu1 %v5348_v19  ;;  %v287_v19 = vld [vmem:[%s7426_s22 + $0x138] sm:$0xff]  ;;  %v5626_v23 = vpack.c.bf16 %v270_v16, %v254_v14  ;;  %v414_v12 = vld [vmem:[%s7426_s22 + $0x530] sm:$0xff]  ;;  %v5644_v13 = vpack.c.bf16 %v431_v6, %v415_v5  ;;  %v461_v16 = vld [vmem:[%s7426_s22 + $0x6a8] sm:$0xff] }
 0x163   : > { %v5628_v28 = vpack.c.bf16 %v303_v20, %v287_v19  ;;  %v430_v14 = vld [vmem:[%s7426_s22 + $0x5b0] sm:$0xff]  ;;  %v572_v6 = vld [vmem:[%s7426_s22 + $0xa20] sm:$0xff] }
 0x164   : > { %5095 = vmatpush1.bf16.msra.mxu0 %v5094_v25  ;;  %v284_v25 = vld [vmem:[%s7426_s22 + $0x120] sm:$0xff]  ;;  %v5646_v20 = vpack.c.bf16 %v430_v14, %v414_v12  ;;  %v621_v12 = vld [vmem:[%s7426_s22 + $0xba8] sm:$0xff]  ;;  %v623_v14 = vld [vmem:[%s7426_s22 + $0xbb8] sm:$0xff] }
 0x165   : > { %5351 = vmatpush1.bf16.msra.mxu1 %v5350_v26  ;;  %5097 = vmatprep.subr.bf16.mxu0 %v5096_v27  ;;  %v300_v26 = vld [vmem:[%s7426_s22 + $0x1a0] sm:$0xff]  ;;  %v286_v27 = vld [vmem:[%s7426_s22 + $0x130] sm:$0xff] }
 0x166   : > { %5353 = vmatprep.subr.bf16.mxu1 %v5352_v31  ;;  %v333_v31 = vld [vmem:[%s7426_s22 + $0x2a8] sm:$0xff]  ;;  %v5374_v34 = vpack.c.bf16 %v300_v26, %v284_v25  ;;  %v5630_v35 = vpack.c.bf16 %v302_v29, %v286_v27  ;;  %v5648_v25 = vpack.c.bf16 %v463_v18, %v447_v17  ;;  %v462_v26 = vld [vmem:[%s7426_s22 + $0x6b0] sm:$0xff]  ;;  %v479_v29 = vld [vmem:[%s7426_s22 + $0x738] sm:$0xff] }
 0x167   : > { %v5376_v36 = vpack.c.bf16 %v333_v31, %v317_v30  ;;  %v477_v27 = vld [vmem:[%s7426_s22 + $0x728] sm:$0xff]  ;;  %v495_v30 = vld [vmem:[%s7426_s22 + $0x7b8] sm:$0xff]  ;;  %v604_v18 = vld [vmem:[%s7426_s22 + $0xb20] sm:$0xff] }
 0x168   : > { %5099 = vmatpush1.bf16.msra.mxu0 %v5098_v37  ;;  %v316_v37 = vld [vmem:[%s7426_s22 + $0x220] sm:$0xff] }
 0x169   : > { %5355 = vmatpush1.bf16.msra.mxu1 %v5354_v38  ;;  %5101 = vmatprep.subr.bf16.mxu0 %v5100_v39  ;;  %v332_v38 = vld [vmem:[%s7426_s22 + $0x2a0] sm:$0xff]  ;;  %v318_v39 = vld [vmem:[%s7426_s22 + $0x230] sm:$0xff] }
 0x16a   : > { %5357 = vmatprep.subr.bf16.mxu1 %v5356_v43  ;;  %v365_v43 = vld [vmem:[%s7426_s22 + $0x3a8] sm:$0xff]  ;;  %v5378_v47 = vpack.c.bf16 %v332_v38, %v316_v37  ;;  %v5634_v48 = vpack.c.bf16 %v334_v41, %v318_v39  ;;  %v5652_v37 = vpack.c.bf16 %v495_v30, %v479_v29  ;;  %v494_v38 = vld [vmem:[%s7426_s22 + $0x7b0] sm:$0xff]  ;;  %v511_v41 = vld [vmem:[%s7426_s22 + $0x838] sm:$0xff] }
 0x16b   : > { %v509_v39 = vld [vmem:[%s7426_s22 + $0x828] sm:$0xff]  ;;  %v636_v30 = vld [vmem:[%s7426_s22 + $0xc20] sm:$0xff] }
 0x16c   : > { %5103 = vmatpush1.bf16.msra.mxu0 %v5102_v49  ;;  %v5380_v49 = vpack.c.bf16 %v365_v43, %v349_v42  ;;  %v527_v42 = vld [vmem:[%s7426_s22 + $0x8b8] sm:$0xff] }
 0x16d   : > { %5359 = vmatpush1.bf16.msra.mxu1 %v5358_v50  ;;  %5105 = vmatprep.subr.bf16.mxu0 %v5104_v51  ;;  %v348_v50 = vld [vmem:[%s7426_s22 + $0x320] sm:$0xff] }
 0x16e   : > { %5361 = vmatprep.subr.bf16.mxu1 %v5360_v55  ;;  %v364_v51 = vld [vmem:[%s7426_s22 + $0x3a0] sm:$0xff]  ;;  %v381_v55 = vld [vmem:[%s7426_s22 + $0x428] sm:$0xff] }
 0x16f   : > { %v5382_v59 = vpack.c.bf16 %v364_v51, %v348_v50  ;;  %v526_v50 = vld [vmem:[%s7426_s22 + $0x8b0] sm:$0xff]  ;;  %v541_v51 = vld [vmem:[%s7426_s22 + $0x928] sm:$0xff] }
 0x170   : > { %5107 = vmatpush1.bf16.msra.mxu0 %v5106_v61  ;;  %v5384_v61 = vpack.c.bf16 %v397_v56, %v381_v55  ;;  %v5404_v57 = vpack.c.bf16 %v557_v52, %v541_v51 }
 0x171   : > { %5363 = vmatpush1.bf16.msra.mxu1 %v5362_v62  ;;  %5109 = vmatprep.subr.bf16.mxu0 %v5108_v63  ;;  %v380_v62 = vld [vmem:[%s7426_s22 + $0x420] sm:$0xff] }
 0x172   : > { %5365 = vmatprep.subr.bf16.mxu1 %v5364_v3  ;;  %v396_v63 = vld [vmem:[%s7426_s22 + $0x4a0] sm:$0xff]  ;;  %v413_v3 = vld [vmem:[%s7426_s22 + $0x528] sm:$0xff] }
 0x173   : > { %v5386_v7 = vpack.c.bf16 %v396_v63, %v380_v62  ;;  %v558_v62 = vld [vmem:[%s7426_s22 + $0x9b0] sm:$0xff]  ;;  %v573_v63 = vld [vmem:[%s7426_s22 + $0xa28] sm:$0xff] }
 0x174   : > { %5111 = vmatpush1.bf16.msra.mxu0 %v5110_v9  ;;  %v5388_v9 = vpack.c.bf16 %v429_v4, %v413_v3  ;;  %v5408_v5 = vpack.c.bf16 %v589_v0, %v573_v63 }
 0x175   : > { %5367 = vmatpush1.bf16.msra.mxu1 %v5366_v10  ;;  %5369 = vmatprep.subr.bf16.mxu0 %v5368_v11  ;;  %v412_v10 = vld [vmem:[%s7426_s22 + $0x520] sm:$0xff] }
 0x176   : > { %5625 = vmatprep.subr.bf16.mxu1 %v5624_v15  ;;  %v428_v11 = vld [vmem:[%s7426_s22 + $0x5a0] sm:$0xff]  ;;  %v445_v15 = vld [vmem:[%s7426_s22 + $0x628] sm:$0xff] }
 0x177   : > { %2658 = vmatmul.mubr.f32.vlgmr.msra.gmra.mrb[0].mxu0 %v246_v21  ;;  %v5390_v19 = vpack.c.bf16 %v428_v11, %v412_v10  ;;  %v590_v10 = vld [vmem:[%s7426_s22 + $0xab0] sm:$0xff]  ;;  %v605_v11 = vld [vmem:[%s7426_s22 + $0xb28] sm:$0xff] }
 0x178   : > { %2942 = vmatmul.mubr.f32.vlgmr.msra.gmra.mrb[0].mxu1 %v246_v21  ;;  %5371 = vmatpush1.bf16.msra.mxu0 %v5370_v22  ;;  %v5392_v21 = vpack.c.bf16 %v461_v16, %v445_v15  ;;  %v444_v22 = vld [vmem:[%s7426_s22 + $0x620] sm:$0xff]  ;;  %v5412_v17 = vpack.c.bf16 %v621_v12, %v605_v11 }
 0x179   : > { %5627 = vmatpush1.bf16.msra.mxu1 %v5626_v23  ;;  %5373 = vmatprep.subr.bf16.mxu0 %v5372_v24  ;;  %v460_v23 = vld [vmem:[%s7426_s22 + $0x6a0] sm:$0xff]  ;;  %v446_v24 = vld [vmem:[%s7426_s22 + $0x630] sm:$0xff] }
 0x17a   : > { %5629 = vmatprep.subr.bf16.mxu1 %v5628_v28  ;;  %3012 = vmatprep.mubr.f32.mxu0 %v7033_v44  ;;  %v493_v28 = vld [vmem:[%s7426_s22 + $0x7a8] sm:$0xff]  ;;  %v5394_v31 = vpack.c.bf16 %v460_v23, %v444_v22  ;;  %v5650_v32 = vpack.c.bf16 %v462_v26, %v446_v24  ;;  %v622_v22 = vld [vmem:[%s7426_s22 + $0xbb0] sm:$0xff]  ;;  %v655_v26 = vld [vmem:[%s7426_s22 + $0xcb8] sm:$0xff] }
 0x17b   : > { %3296 = vmatprep.mubr.f32.mxu1 %v7033_v44  ;;  %v5396_v33 = vpack.c.bf16 %v493_v28, %v477_v27  ;;  %v637_v23 = vld [vmem:[%s7426_s22 + $0xc28] sm:$0xff] }
 0x17c   : > { %5375 = vmatpush1.bf16.msra.mxu0 %v5374_v34  ;;  %v476_v34 = vld [vmem:[%s7426_s22 + $0x720] sm:$0xff]  ;;  %v653_v24 = vld [vmem:[%s7426_s22 + $0xca8] sm:$0xff] }
 0x17d   : > { %5631 = vmatpush1.bf16.msra.mxu1 %v5630_v35  ;;  %5377 = vmatprep.subr.bf16.mxu0 %v5376_v36  ;;  %v492_v35 = vld [vmem:[%s7426_s22 + $0x7a0] sm:$0xff]  ;;  %v478_v36 = vld [vmem:[%s7426_s22 + $0x730] sm:$0xff]  ;;  %v5416_v29 = vpack.c.bf16 %v653_v24, %v637_v23 }
 0x17e   : > { %5633 = vmatprep.subr.bf16.mxu1 %v5632_v40  ;;  %v525_v40 = vld [vmem:[%s7426_s22 + $0x8a8] sm:$0xff]  ;;  %v5398_v43 = vpack.c.bf16 %v492_v35, %v476_v34  ;;  %v5654_v44 = vpack.c.bf16 %v494_v38, %v478_v36  ;;  %v654_v34 = vld [vmem:[%s7426_s22 + $0xcb0] sm:$0xff]  ;;  %v687_v38 = vld [vmem:[%s7426_s22 + $0xdb8] sm:$0xff] }
 0x17f   : > { %v5400_v45 = vpack.c.bf16 %v525_v40, %v509_v39  ;;  %v669_v35 = vld [vmem:[%s7426_s22 + $0xd28] sm:$0xff] }
 0x180   : > { %5379 = vmatpush1.bf16.msra.mxu0 %v5378_v47  ;;  %v524_v47 = vld [vmem:[%s7426_s22 + $0x8a0] sm:$0xff]  ;;  %v685_v36 = vld [vmem:[%s7426_s22 + $0xda8] sm:$0xff] }
 0x181   : > { %5635 = vmatpush1.bf16.msra.mxu1 %v5634_v48  ;;  %5381 = vmatprep.subr.bf16.mxu0 %v5380_v49  ;;  %v510_v48 = vld [vmem:[%s7426_s22 + $0x830] sm:$0xff]  ;;  %v5656_v49 = vpack.c.bf16 %v527_v42, %v511_v41  ;;  %v5402_v55 = vpack.c.bf16 %v524_v47, %v508_v46  ;;  %v5420_v41 = vpack.c.bf16 %v685_v36, %v669_v35  ;;  %v668_v42 = vld [vmem:[%s7426_s22 + $0xd20] sm:$0xff]  ;;  %v701_v47 = vld [vmem:[%s7426_s22 + $0xe28] sm:$0xff] }
 0x182   : > { %5637 = vmatprep.subr.bf16.mxu1 %v5636_v53  ;;  %v543_v53 = vld [vmem:[%s7426_s22 + $0x938] sm:$0xff]  ;;  %v5658_v56 = vpack.c.bf16 %v526_v50, %v510_v48  ;;  %v686_v46 = vld [vmem:[%s7426_s22 + $0xdb0] sm:$0xff]  ;;  %v717_v48 = vld [vmem:[%s7426_s22 + $0xea8] sm:$0xff] }
 0x183   : > { %v719_v50 = vld [vmem:[%s7426_s22 + $0xeb8] sm:$0xff] }
 0x184   : > { %5383 = vmatpush1.bf16.msra.mxu0 %v5382_v59  ;;  %v556_v59 = vld [vmem:[%s7426_s22 + $0x9a0] sm:$0xff]  ;;  %v847_v35 = vld [vmem:[%s7426_s22 + $0x12b8] sm:$0xff] }
 0x185   : > { %5639 = vmatpush1.bf16.msra.mxu1 %v5638_v60  ;;  %5385 = vmatprep.subr.bf16.mxu0 %v5384_v61  ;;  %v542_v60 = vld [vmem:[%s7426_s22 + $0x930] sm:$0xff]  ;;  %v5660_v61 = vpack.c.bf16 %v559_v54, %v543_v53  ;;  %v5406_v3 = vpack.c.bf16 %v556_v59, %v540_v58  ;;  %v5424_v53 = vpack.c.bf16 %v717_v48, %v701_v47  ;;  %v700_v54 = vld [vmem:[%s7426_s22 + $0xe20] sm:$0xff]  ;;  %v733_v59 = vld [vmem:[%s7426_s22 + $0xf28] sm:$0xff] }
 0x186   : > { %5641 = vmatprep.subr.bf16.mxu1 %v5640_v1  ;;  %v575_v1 = vld [vmem:[%s7426_s22 + $0xa38] sm:$0xff]  ;;  %v5662_v4 = vpack.c.bf16 %v558_v62, %v542_v60  ;;  %v718_v58 = vld [vmem:[%s7426_s22 + $0xeb0] sm:$0xff]  ;;  %v749_v60 = vld [vmem:[%s7426_s22 + $0xfa8] sm:$0xff] }
 0x187   : > { %v751_v62 = vld [vmem:[%s7426_s22 + $0xfb8] sm:$0xff] }
 0x188   : > { %5387 = vmatpush1.bf16.msra.mxu0 %v5386_v7  ;;  %v588_v7 = vld [vmem:[%s7426_s22 + $0xaa0] sm:$0xff]  ;;  %v863_v47 = vld [vmem:[%s7426_s22 + $0x1338] sm:$0xff] }
 0x189   : > { %5643 = vmatpush1.bf16.msra.mxu1 %v5642_v8  ;;  %5389 = vmatprep.subr.bf16.mxu0 %v5388_v9  ;;  %v574_v8 = vld [vmem:[%s7426_s22 + $0xa30] sm:$0xff]  ;;  %v5664_v9 = vpack.c.bf16 %v591_v2, %v575_v1  ;;  %v5410_v15 = vpack.c.bf16 %v588_v7, %v572_v6  ;;  %v5428_v1 = vpack.c.bf16 %v749_v60, %v733_v59  ;;  %v732_v2 = vld [vmem:[%s7426_s22 + $0xf20] sm:$0xff]  ;;  %v765_v7 = vld [vmem:[%s7426_s22 + $0x1028] sm:$0xff] }
 0x18a   : > { %5645 = vmatprep.subr.bf16.mxu1 %v5644_v13  ;;  %v607_v13 = vld [vmem:[%s7426_s22 + $0xb38] sm:$0xff]  ;;  %v5666_v16 = vpack.c.bf16 %v590_v10, %v574_v8  ;;  %v750_v6 = vld [vmem:[%s7426_s22 + $0xfb0] sm:$0xff]  ;;  %v781_v8 = vld [vmem:[%s7426_s22 + $0x10a8] sm:$0xff] }
 0x18b   : > { %v783_v10 = vld [vmem:[%s7426_s22 + $0x10b8] sm:$0xff] }
 0x18c   : > { %5391 = vmatpush1.bf16.msra.mxu0 %v5390_v19  ;;  %v620_v19 = vld [vmem:[%s7426_s22 + $0xba0] sm:$0xff]  ;;  %v879_v48 = vld [vmem:[%s7426_s22 + $0x13b8] sm:$0xff] }
 0x18d   : > { %5647 = vmatpush1.bf16.msra.mxu1 %v5646_v20  ;;  %5393 = vmatprep.subr.bf16.mxu0 %v5392_v21  ;;  %v606_v20 = vld [vmem:[%s7426_s22 + $0xb30] sm:$0xff]  ;;  %v5668_v21 = vpack.c.bf16 %v623_v14, %v607_v13  ;;  %v5414_v27 = vpack.c.bf16 %v620_v19, %v604_v18  ;;  %v5432_v13 = vpack.c.bf16 %v781_v8, %v765_v7  ;;  %v764_v14 = vld [vmem:[%s7426_s22 + $0x1020] sm:$0xff]  ;;  %v797_v19 = vld [vmem:[%s7426_s22 + $0x1128] sm:$0xff] }
 0x18e   : > { %5649 = vmatprep.subr.bf16.mxu1 %v5648_v25  ;;  %v639_v25 = vld [vmem:[%s7426_s22 + $0xc38] sm:$0xff]  ;;  %v5670_v28 = vpack.c.bf16 %v622_v22, %v606_v20  ;;  %v782_v18 = vld [vmem:[%s7426_s22 + $0x10b0] sm:$0xff]  ;;  %v813_v20 = vld [vmem:[%s7426_s22 + $0x11a8] sm:$0xff] }
 0x18f   : > { %v815_v22 = vld [vmem:[%s7426_s22 + $0x11b8] sm:$0xff] }
 0x190   : > { %5395 = vmatpush1.bf16.msra.mxu0 %v5394_v31  ;;  %v652_v31 = vld [vmem:[%s7426_s22 + $0xca0] sm:$0xff]  ;;  %v895_v59 = vld [vmem:[%s7426_s22 + $0x1438] sm:$0xff] }
 0x191   : > { %5651 = vmatpush1.bf16.msra.mxu1 %v5650_v32  ;;  %5397 = vmatprep.subr.bf16.mxu0 %v5396_v33  ;;  %v638_v32 = vld [vmem:[%s7426_s22 + $0xc30] sm:$0xff]  ;;  %v5672_v33 = vpack.c.bf16 %v655_v26, %v639_v25  ;;  %v5418_v39 = vpack.c.bf16 %v652_v31, %v636_v30  ;;  %v5436_v25 = vpack.c.bf16 %v813_v20, %v797_v19  ;;  %v796_v26 = vld [vmem:[%s7426_s22 + $0x1120] sm:$0xff]  ;;  %v829_v31 = vld [vmem:[%s7426_s22 + $0x1228] sm:$0xff] }
 0x192   : > { %5653 = vmatprep.subr.bf16.mxu1 %v5652_v37  ;;  %v671_v37 = vld [vmem:[%s7426_s22 + $0xd38] sm:$0xff]  ;;  %v5674_v40 = vpack.c.bf16 %v654_v34, %v638_v32  ;;  %v814_v30 = vld [vmem:[%s7426_s22 + $0x11b0] sm:$0xff]  ;;  %v845_v32 = vld [vmem:[%s7426_s22 + $0x12a8] sm:$0xff] }
 0x193   : > { %v831_v34 = vld [vmem:[%s7426_s22 + $0x1238] sm:$0xff] }
 0x194   : > { %5399 = vmatpush1.bf16.msra.mxu0 %v5398_v43  ;;  %v684_v43 = vld [vmem:[%s7426_s22 + $0xda0] sm:$0xff]  ;;  %v911_v60 = vld [vmem:[%s7426_s22 + $0x14b8] sm:$0xff] }
 0x195   : > { %5655 = vmatpush1.bf16.msra.mxu1 %v5654_v44  ;;  %5401 = vmatprep.subr.bf16.mxu0 %v5400_v45  ;;  %v670_v44 = vld [vmem:[%s7426_s22 + $0xd30] sm:$0xff]  ;;  %v5676_v45 = vpack.c.bf16 %v687_v38, %v671_v37  ;;  %v5422_v51 = vpack.c.bf16 %v684_v43, %v668_v42  ;;  %v5440_v38 = vpack.c.bf16 %v845_v32, %v829_v31  ;;  %v927_v7 = vld [vmem:[%s7426_s22 + $0x1538] sm:$0xff] }
 0x196   : > { %5657 = vmatprep.subr.bf16.mxu1 %v5656_v49  ;;  %v703_v49 = vld [vmem:[%s7426_s22 + $0xe38] sm:$0xff]  ;;  %v5678_v52 = vpack.c.bf16 %v686_v46, %v670_v44  ;;  %v5696_v42 = vpack.c.bf16 %v847_v35, %v831_v34  ;;  %v846_v43 = vld [vmem:[%s7426_s22 + $0x12b0] sm:$0xff]  ;;  %v861_v44 = vld [vmem:[%s7426_s22 + $0x1328] sm:$0xff] }
 0x197   : > { %v7035_v46 = vld [vmem:[#allocation2 + $0x18] sm:$0xff] }
 0x198   : > { %5403 = vmatpush1.bf16.msra.mxu0 %v5402_v55  ;;  %v716_v55 = vld [vmem:[%s7426_s22 + $0xea0] sm:$0xff]  ;;  %v943_v8 = vld [vmem:[%s7426_s22 + $0x15b8] sm:$0xff] }
 0x199   : > { %5659 = vmatpush1.bf16.msra.mxu1 %v5658_v56  ;;  %5405 = vmatprep.subr.bf16.mxu0 %v5404_v57  ;;  %v702_v56 = vld [vmem:[%s7426_s22 + $0xe30] sm:$0xff]  ;;  %v5680_v57 = vpack.c.bf16 %v719_v50, %v703_v49  ;;  %v5426_v63 = vpack.c.bf16 %v716_v55, %v700_v54  ;;  %v5700_v55 = vpack.c.bf16 %v879_v48, %v863_v47  ;;  %v959_v19 = vld [vmem:[%s7426_s22 + $0x1638] sm:$0xff]  ;;  %v1020_v48 = vld [vmem:[%s7426_s22 + $0x1820] sm:$0xff] }
 0x19a   : > { %5661 = vmatprep.subr.bf16.mxu1 %v5660_v61  ;;  %v735_v61 = vld [vmem:[%s7426_s22 + $0xf38] sm:$0xff]  ;;  %v5682_v0 = vpack.c.bf16 %v718_v58, %v702_v56  ;;  %v862_v54 = vld [vmem:[%s7426_s22 + $0x1330] sm:$0xff]  ;;  %v909_v58 = vld [vmem:[%s7426_s22 + $0x14a8] sm:$0xff] }
 0x19b   : > { %v878_v56 = vld [vmem:[%s7426_s22 + $0x13b0] sm:$0xff]  ;;  %v975_v20 = vld [vmem:[%s7426_s22 + $0x16b8] sm:$0xff] }
 0x19c   : > { %5407 = vmatpush1.bf16.msra.mxu0 %v5406_v3  ;;  %v748_v3 = vld [vmem:[%s7426_s22 + $0xfa0] sm:$0xff]  ;;  %v991_v31 = vld [vmem:[%s7426_s22 + $0x1738] sm:$0xff] }
 0x19d   : > { %5663 = vmatpush1.bf16.msra.mxu1 %v5662_v4  ;;  %5409 = vmatprep.subr.bf16.mxu0 %v5408_v5  ;;  %v734_v4 = vld [vmem:[%s7426_s22 + $0xf30] sm:$0xff]  ;;  %v5684_v5 = vpack.c.bf16 %v751_v62, %v735_v61  ;;  %v5430_v11 = vpack.c.bf16 %v748_v3, %v732_v2  ;;  %v5702_v62 = vpack.c.bf16 %v878_v56, %v862_v54  ;;  %v1007_v32 = vld [vmem:[%s7426_s22 + $0x17b8] sm:$0xff]  ;;  %v1069_v54 = vld [vmem:[%s7426_s22 + $0x19a8] sm:$0xff] }
 0x19e   : > { %5665 = vmatprep.subr.bf16.mxu1 %v5664_v9  ;;  %v767_v9 = vld [vmem:[%s7426_s22 + $0x1038] sm:$0xff]  ;;  %v5686_v12 = vpack.c.bf16 %v750_v6, %v734_v4  ;;  %v894_v2 = vld [vmem:[%s7426_s22 + $0x1430] sm:$0xff]  ;;  %v5704_v3 = vpack.c.bf16 %v911_v60, %v895_v59  ;;  %v941_v6 = vld [vmem:[%s7426_s22 + $0x15a8] sm:$0xff] }
 0x19f   : > { %v910_v4 = vld [vmem:[%s7426_s22 + $0x14b0] sm:$0xff]  ;;  %v1071_v56 = vld [vmem:[%s7426_s22 + $0x19b8] sm:$0xff]  ;;  %v1052_v60 = vld [vmem:[%s7426_s22 + $0x1920] sm:$0xff] }
 0x1a0   : > { %5411 = vmatpush1.bf16.msra.mxu0 %v5410_v15  ;;  %v780_v15 = vld [vmem:[%s7426_s22 + $0x10a0] sm:$0xff] }
 0x1a1   : > { %5667 = vmatpush1.bf16.msra.mxu1 %v5666_v16  ;;  %5413 = vmatprep.subr.bf16.mxu0 %v5412_v17  ;;  %v766_v16 = vld [vmem:[%s7426_s22 + $0x1030] sm:$0xff]  ;;  %v5688_v17 = vpack.c.bf16 %v783_v10, %v767_v9  ;;  %v5434_v23 = vpack.c.bf16 %v780_v15, %v764_v14  ;;  %v5706_v10 = vpack.c.bf16 %v910_v4, %v894_v2  ;;  %v1101_v2 = vld [vmem:[%s7426_s22 + $0x1aa8] sm:$0xff]  ;;  %v1103_v4 = vld [vmem:[%s7426_s22 + $0x1ab8] sm:$0xff] }
 0x1a2   : > { %5669 = vmatprep.subr.bf16.mxu1 %v5668_v21  ;;  %v799_v21 = vld [vmem:[%s7426_s22 + $0x1138] sm:$0xff]  ;;  %v5690_v24 = vpack.c.bf16 %v782_v18, %v766_v16  ;;  %v926_v14 = vld [vmem:[%s7426_s22 + $0x1530] sm:$0xff]  ;;  %v5708_v15 = vpack.c.bf16 %v943_v8, %v927_v7  ;;  %v973_v18 = vld [vmem:[%s7426_s22 + $0x16a8] sm:$0xff] }
 0x1a3   : > { %v942_v16 = vld [vmem:[%s7426_s22 + $0x15b0] sm:$0xff]  ;;  %v1084_v8 = vld [vmem:[%s7426_s22 + $0x1a20] sm:$0xff] }
 0x1a4   : > { %5415 = vmatpush1.bf16.msra.mxu0 %v5414_v27  ;;  %v812_v27 = vld [vmem:[%s7426_s22 + $0x11a0] sm:$0xff] }
 0x1a5   : > { %5671 = vmatpush1.bf16.msra.mxu1 %v5670_v28  ;;  %5417 = vmatprep.subr.bf16.mxu0 %v5416_v29  ;;  %v798_v28 = vld [vmem:[%s7426_s22 + $0x1130] sm:$0xff]  ;;  %v5692_v29 = vpack.c.bf16 %v815_v22, %v799_v21  ;;  %v5438_v36 = vpack.c.bf16 %v812_v27, %v796_v26  ;;  %v5710_v22 = vpack.c.bf16 %v942_v16, %v926_v14  ;;  %v1133_v14 = vld [vmem:[%s7426_s22 + $0x1ba8] sm:$0xff]  ;;  %v1135_v16 = vld [vmem:[%s7426_s22 + $0x1bb8] sm:$0xff] }
 0x1a6   : > { %5673 = vmatprep.subr.bf16.mxu1 %v5672_v33  ;;  %v7034_v33 = vld [vmem:[#allocation2] sm:$0xff]  ;;  %v5694_v37 = vpack.c.bf16 %v814_v30, %v798_v28  ;;  %v958_v26 = vld [vmem:[%s7426_s22 + $0x1630] sm:$0xff]  ;;  %v5712_v27 = vpack.c.bf16 %v975_v20, %v959_v19  ;;  %v1005_v30 = vld [vmem:[%s7426_s22 + $0x17a8] sm:$0xff] }
 0x1a7   : > { %v974_v28 = vld [vmem:[%s7426_s22 + $0x16b0] sm:$0xff]  ;;  %v1116_v20 = vld [vmem:[%s7426_s22 + $0x1b20] sm:$0xff] }
 0x1a8   : > { %5419 = vmatpush1.bf16.msra.mxu0 %v5418_v39  ;;  %v828_v39 = vld [vmem:[%s7426_s22 + $0x1220] sm:$0xff]  ;;  %v5714_v34 = vpack.c.bf16 %v974_v28, %v958_v26  ;;  %v1165_v26 = vld [vmem:[%s7426_s22 + $0x1ca8] sm:$0xff]  ;;  %v1167_v28 = vld [vmem:[%s7426_s22 + $0x1cb8] sm:$0xff] }
 0x1a9   : > { %5675 = vmatpush1.bf16.msra.mxu1 %v5674_v40  ;;  %5421 = vmatprep.subr.bf16.mxu0 %v5420_v41  ;;  %v844_v40 = vld [vmem:[%s7426_s22 + $0x12a0] sm:$0xff]  ;;  %v830_v41 = vld [vmem:[%s7426_s22 + $0x1230] sm:$0xff] }
 0x1aa   : > { %5677 = vmatprep.subr.bf16.mxu1 %v5676_v45  ;;  %v877_v45 = vld [vmem:[%s7426_s22 + $0x13a8] sm:$0xff]  ;;  %v5442_v49 = vpack.c.bf16 %v844_v40, %v828_v39  ;;  %v5698_v50 = vpack.c.bf16 %v846_v43, %v830_v41  ;;  %v5716_v39 = vpack.c.bf16 %v1007_v32, %v991_v31  ;;  %v1006_v40 = vld [vmem:[%s7426_s22 + $0x17b0] sm:$0xff]  ;;  %v1023_v43 = vld [vmem:[%s7426_s22 + $0x1838] sm:$0xff] }
 0x1ab   : > { %v1021_v41 = vld [vmem:[%s7426_s22 + $0x1828] sm:$0xff]  ;;  %v1148_v32 = vld [vmem:[%s7426_s22 + $0x1c20] sm:$0xff] }
 0x1ac   : > { %5423 = vmatpush1.bf16.msra.mxu0 %v5422_v51  ;;  %v5444_v51 = vpack.c.bf16 %v877_v45, %v861_v44  ;;  %v1039_v44 = vld [vmem:[%s7426_s22 + $0x18b8] sm:$0xff] }
 0x1ad   : > { %5679 = vmatpush1.bf16.msra.mxu1 %v5678_v52  ;;  %5425 = vmatprep.subr.bf16.mxu0 %v5424_v53  ;;  %v860_v52 = vld [vmem:[%s7426_s22 + $0x1320] sm:$0xff] }
 0x1ae   : > { %5681 = vmatprep.subr.bf16.mxu1 %v5680_v57  ;;  %v876_v53 = vld [vmem:[%s7426_s22 + $0x13a0] sm:$0xff]  ;;  %v893_v57 = vld [vmem:[%s7426_s22 + $0x1428] sm:$0xff] }
 0x1af   : > { %v5446_v61 = vpack.c.bf16 %v876_v53, %v860_v52  ;;  %v1038_v52 = vld [vmem:[%s7426_s22 + $0x18b0] sm:$0xff]  ;;  %v1053_v53 = vld [vmem:[%s7426_s22 + $0x1928] sm:$0xff] }
 0x1b0   : > { %5427 = vmatpush1.bf16.msra.mxu0 %v5426_v63  ;;  %v5448_v63 = vpack.c.bf16 %v909_v58, %v893_v57  ;;  %v5468_v59 = vpack.c.bf16 %v1069_v54, %v1053_v53 }
 0x1b1   : > { %5683 = vmatpush1.bf16.msra.mxu1 %v5682_v0  ;;  %5429 = vmatprep.subr.bf16.mxu0 %v5428_v1  ;;  %v892_v0 = vld [vmem:[%s7426_s22 + $0x1420] sm:$0xff] }
 0x1b2   : > { %5685 = vmatprep.subr.bf16.mxu1 %v5684_v5  ;;  %v908_v1 = vld [vmem:[%s7426_s22 + $0x14a0] sm:$0xff]  ;;  %v925_v5 = vld [vmem:[%s7426_s22 + $0x1528] sm:$0xff] }
 0x1b3   : > { %v5450_v9 = vpack.c.bf16 %v908_v1, %v892_v0  ;;  %v1070_v0 = vld [vmem:[%s7426_s22 + $0x19b0] sm:$0xff]  ;;  %v1085_v1 = vld [vmem:[%s7426_s22 + $0x1a28] sm:$0xff] }
 0x1b4   : > { %5431 = vmatpush1.bf16.msra.mxu0 %v5430_v11  ;;  %v5452_v11 = vpack.c.bf16 %v941_v6, %v925_v5  ;;  %v5472_v7 = vpack.c.bf16 %v1101_v2, %v1085_v1 }
 0x1b5   : > { %5687 = vmatpush1.bf16.msra.mxu1 %v5686_v12  ;;  %5433 = vmatprep.subr.bf16.mxu0 %v5432_v13  ;;  %v924_v12 = vld [vmem:[%s7426_s22 + $0x1520] sm:$0xff] }
 0x1b6   : > { %5689 = vmatprep.subr.bf16.mxu1 %v5688_v17  ;;  %v940_v13 = vld [vmem:[%s7426_s22 + $0x15a0] sm:$0xff]  ;;  %v957_v17 = vld [vmem:[%s7426_s22 + $0x1628] sm:$0xff] }
 0x1b7   : > { %3013 = vmatmul.mubr.f32.vlgmr.msra.gmra.mrb[2].mxu0 %v7034_v33  ;;  %v5454_v21 = vpack.c.bf16 %v940_v13, %v924_v12  ;;  %v1102_v12 = vld [vmem:[%s7426_s22 + $0x1ab0] sm:$0xff]  ;;  %v1117_v13 = vld [vmem:[%s7426_s22 + $0x1b28] sm:$0xff] }
 0x1b8   : > { %5435 = vmatpush1.bf16.msra.mxu0 %v5434_v23  ;;  %3297 = vmatmul.mubr.f32.vlgmr.msra.gmra.mrb[2].mxu1 %v7034_v33  ;;  %v5456_v23 = vpack.c.bf16 %v973_v18, %v957_v17  ;;  %v5476_v19 = vpack.c.bf16 %v1133_v14, %v1117_v13 }
 0x1b9   : > { %5691 = vmatpush1.bf16.msra.mxu1 %v5690_v24  ;;  %5437 = vmatprep.subr.bf16.mxu0 %v5436_v25  ;;  %v956_v24 = vld [vmem:[%s7426_s22 + $0x1620] sm:$0xff] }
 0x1ba   : > { %5693 = vmatprep.subr.bf16.mxu1 %v5692_v29  ;;  %3083 = vmatprep.mubr.f32.mxu0 %v7035_v46  ;;  %v972_v25 = vld [vmem:[%s7426_s22 + $0x16a0] sm:$0xff]  ;;  %v989_v29 = vld [vmem:[%s7426_s22 + $0x1728] sm:$0xff] }
 0x1bb   : > { %3367 = vmatprep.mubr.f32.mxu1 %v7035_v46  ;;  %v5458_v33 = vpack.c.bf16 %v972_v25, %v956_v24  ;;  %v5460_v35 = vpack.c.bf16 %v1005_v30, %v989_v29  ;;  %v1134_v24 = vld [vmem:[%s7426_s22 + $0x1bb0] sm:$0xff]  ;;  %v1149_v25 = vld [vmem:[%s7426_s22 + $0x1c28] sm:$0xff] }
 0x1bc   : > { %5439 = vmatpush1.bf16.msra.mxu0 %v5438_v36  ;;  %v988_v36 = vld [vmem:[%s7426_s22 + $0x1720] sm:$0xff]  ;;  %v5480_v31 = vpack.c.bf16 %v1165_v26, %v1149_v25 }
 0x1bd   : > { %5695 = vmatpush1.bf16.msra.mxu1 %v5694_v37  ;;  %5441 = vmatprep.subr.bf16.mxu0 %v5440_v38  ;;  %v1004_v37 = vld [vmem:[%s7426_s22 + $0x17a0] sm:$0xff]  ;;  %v990_v38 = vld [vmem:[%s7426_s22 + $0x1730] sm:$0xff] }
 0x1be   : > { %5697 = vmatprep.subr.bf16.mxu1 %v5696_v42  ;;  %v1037_v42 = vld [vmem:[%s7426_s22 + $0x18a8] sm:$0xff]  ;;  %v5462_v45 = vpack.c.bf16 %v1004_v37, %v988_v36  ;;  %v5718_v46 = vpack.c.bf16 %v1006_v40, %v990_v38  ;;  %v1166_v36 = vld [vmem:[%s7426_s22 + $0x1cb0] sm:$0xff]  ;;  %v1199_v40 = vld [vmem:[%s7426_s22 + $0x1db8] sm:$0xff] }
 0x1bf   : > { %v5464_v47 = vpack.c.bf16 %v1037_v42, %v1021_v41  ;;  %v1181_v37 = vld [vmem:[%s7426_s22 + $0x1d28] sm:$0xff] }
 0x1c0   : > { %5443 = vmatpush1.bf16.msra.mxu0 %v5442_v49  ;;  %v1036_v49 = vld [vmem:[%s7426_s22 + $0x18a0] sm:$0xff]  ;;  %v1197_v38 = vld [vmem:[%s7426_s22 + $0x1da8] sm:$0xff] }
 0x1c1   : > { %5699 = vmatpush1.bf16.msra.mxu1 %v5698_v50  ;;  %5445 = vmatprep.subr.bf16.mxu0 %v5444_v51  ;;  %v1022_v50 = vld [vmem:[%s7426_s22 + $0x1830] sm:$0xff]  ;;  %v5720_v51 = vpack.c.bf16 %v1039_v44, %v1023_v43  ;;  %v5466_v57 = vpack.c.bf16 %v1036_v49, %v1020_v48  ;;  %v5484_v43 = vpack.c.bf16 %v1197_v38, %v1181_v37  ;;  %v1180_v44 = vld [vmem:[%s7426_s22 + $0x1d20] sm:$0xff]  ;;  %v1213_v49 = vld [vmem:[%s7426_s22 + $0x1e28] sm:$0xff] }
 0x1c2   : > { %5701 = vmatprep.subr.bf16.mxu1 %v5700_v55  ;;  %v1055_v55 = vld [vmem:[%s7426_s22 + $0x1938] sm:$0xff]  ;;  %v5722_v58 = vpack.c.bf16 %v1038_v52, %v1022_v50  ;;  %v1198_v48 = vld [vmem:[%s7426_s22 + $0x1db0] sm:$0xff]  ;;  %v1229_v50 = vld [vmem:[%s7426_s22 + $0x1ea8] sm:$0xff] }
 0x1c3   : > { %v1231_v52 = vld [vmem:[%s7426_s22 + $0x1eb8] sm:$0xff] }
 0x1c4   : > { %5447 = vmatpush1.bf16.msra.mxu0 %v5446_v61  ;;  %v1068_v61 = vld [vmem:[%s7426_s22 + $0x19a0] sm:$0xff]  ;;  %v1359_v37 = vld [vmem:[%s7426_s22 + $0x22b8] sm:$0xff] }
 0x1c5   : > { %5703 = vmatpush1.bf16.msra.mxu1 %v5702_v62  ;;  %5449 = vmatprep.subr.bf16.mxu0 %v5448_v63  ;;  %v1054_v62 = vld [vmem:[%s7426_s22 + $0x1930] sm:$0xff]  ;;  %v5724_v63 = vpack.c.bf16 %v1071_v56, %v1055_v55  ;;  %v5470_v5 = vpack.c.bf16 %v1068_v61, %v1052_v60  ;;  %v5488_v55 = vpack.c.bf16 %v1229_v50, %v1213_v49  ;;  %v1212_v56 = vld [vmem:[%s7426_s22 + $0x1e20] sm:$0xff]  ;;  %v1245_v61 = vld [vmem:[%s7426_s22 + $0x1f28] sm:$0xff] }
 0x1c6   : > { %5705 = vmatprep.subr.bf16.mxu1 %v5704_v3  ;;  %v1087_v3 = vld [vmem:[%s7426_s22 + $0x1a38] sm:$0xff]  ;;  %v5726_v6 = vpack.c.bf16 %v1070_v0, %v1054_v62  ;;  %v1230_v60 = vld [vmem:[%s7426_s22 + $0x1eb0] sm:$0xff]  ;;  %v1261_v62 = vld [vmem:[%s7426_s22 + $0x1fa8] sm:$0xff] }
 0x1c7   : > { %v1263_v0 = vld [vmem:[%s7426_s22 + $0x1fb8] sm:$0xff] }
 0x1c8   : > { %5451 = vmatpush1.bf16.msra.mxu0 %v5450_v9  ;;  %v1100_v9 = vld [vmem:[%s7426_s22 + $0x1aa0] sm:$0xff]  ;;  %v1375_v49 = vld [vmem:[%s7426_s22 + $0x2338] sm:$0xff] }
 0x1c9   : > { %5707 = vmatpush1.bf16.msra.mxu1 %v5706_v10  ;;  %5453 = vmatprep.subr.bf16.mxu0 %v5452_v11  ;;  %v1086_v10 = vld [vmem:[%s7426_s22 + $0x1a30] sm:$0xff]  ;;  %v5728_v11 = vpack.c.bf16 %v1103_v4, %v1087_v3  ;;  %v5474_v17 = vpack.c.bf16 %v1100_v9, %v1084_v8  ;;  %v5492_v3 = vpack.c.bf16 %v1261_v62, %v1245_v61  ;;  %v1244_v4 = vld [vmem:[%s7426_s22 + $0x1f20] sm:$0xff]  ;;  %v1277_v9 = vld [vmem:[%s7426_s22 + $0x2028] sm:$0xff] }
 0x1ca   : > { %5709 = vmatprep.subr.bf16.mxu1 %v5708_v15  ;;  %v1119_v15 = vld [vmem:[%s7426_s22 + $0x1b38] sm:$0xff]  ;;  %v5730_v18 = vpack.c.bf16 %v1102_v12, %v1086_v10  ;;  %v1262_v8 = vld [vmem:[%s7426_s22 + $0x1fb0] sm:$0xff]  ;;  %v1293_v10 = vld [vmem:[%s7426_s22 + $0x20a8] sm:$0xff] }
 0x1cb   : > { %v1295_v12 = vld [vmem:[%s7426_s22 + $0x20b8] sm:$0xff] }
 0x1cc   : > { %5455 = vmatpush1.bf16.msra.mxu0 %v5454_v21  ;;  %v1132_v21 = vld [vmem:[%s7426_s22 + $0x1ba0] sm:$0xff]  ;;  %v1391_v50 = vld [vmem:[%s7426_s22 + $0x23b8] sm:$0xff] }
 0x1cd   : > { %5711 = vmatpush1.bf16.msra.mxu1 %v5710_v22  ;;  %5457 = vmatprep.subr.bf16.mxu0 %v5456_v23  ;;  %v1118_v22 = vld [vmem:[%s7426_s22 + $0x1b30] sm:$0xff]  ;;  %v5732_v23 = vpack.c.bf16 %v1135_v16, %v1119_v15  ;;  %v5478_v29 = vpack.c.bf16 %v1132_v21, %v1116_v20  ;;  %v5496_v15 = vpack.c.bf16 %v1293_v10, %v1277_v9  ;;  %v1276_v16 = vld [vmem:[%s7426_s22 + $0x2020] sm:$0xff]  ;;  %v1309_v21 = vld [vmem:[%s7426_s22 + $0x2128] sm:$0xff] }
 0x1ce   : > { %5713 = vmatprep.subr.bf16.mxu1 %v5712_v27  ;;  %v1151_v27 = vld [vmem:[%s7426_s22 + $0x1c38] sm:$0xff]  ;;  %v5734_v30 = vpack.c.bf16 %v1134_v24, %v1118_v22  ;;  %v1294_v20 = vld [vmem:[%s7426_s22 + $0x20b0] sm:$0xff]  ;;  %v1325_v22 = vld [vmem:[%s7426_s22 + $0x21a8] sm:$0xff] }
 0x1cf   : > { %v1327_v24 = vld [vmem:[%s7426_s22 + $0x21b8] sm:$0xff] }
 0x1d0   : > { %5459 = vmatpush1.bf16.msra.mxu0 %v5458_v33  ;;  %v1164_v33 = vld [vmem:[%s7426_s22 + $0x1ca0] sm:$0xff]  ;;  %v1407_v61 = vld [vmem:[%s7426_s22 + $0x2438] sm:$0xff] }
 0x1d1   : > { %5715 = vmatpush1.bf16.msra.mxu1 %v5714_v34  ;;  %5461 = vmatprep.subr.bf16.mxu0 %v5460_v35  ;;  %v1150_v34 = vld [vmem:[%s7426_s22 + $0x1c30] sm:$0xff]  ;;  %v5736_v35 = vpack.c.bf16 %v1167_v28, %v1151_v27  ;;  %v5482_v41 = vpack.c.bf16 %v1164_v33, %v1148_v32  ;;  %v5500_v27 = vpack.c.bf16 %v1325_v22, %v1309_v21  ;;  %v1308_v28 = vld [vmem:[%s7426_s22 + $0x2120] sm:$0xff]  ;;  %v1341_v33 = vld [vmem:[%s7426_s22 + $0x2228] sm:$0xff] }
 0x1d2   : > { %5717 = vmatprep.subr.bf16.mxu1 %v5716_v39  ;;  %v1183_v39 = vld [vmem:[%s7426_s22 + $0x1d38] sm:$0xff]  ;;  %v5738_v42 = vpack.c.bf16 %v1166_v36, %v1150_v34  ;;  %v1326_v32 = vld [vmem:[%s7426_s22 + $0x21b0] sm:$0xff]  ;;  %v1357_v34 = vld [vmem:[%s7426_s22 + $0x22a8] sm:$0xff] }
 0x1d3   : > { %v1343_v36 = vld [vmem:[%s7426_s22 + $0x2238] sm:$0xff] }
 0x1d4   : > { %5463 = vmatpush1.bf16.msra.mxu0 %v5462_v45  ;;  %v1196_v45 = vld [vmem:[%s7426_s22 + $0x1da0] sm:$0xff]  ;;  %v1423_v62 = vld [vmem:[%s7426_s22 + $0x24b8] sm:$0xff] }
 0x1d5   : > { %5719 = vmatpush1.bf16.msra.mxu1 %v5718_v46  ;;  %5465 = vmatprep.subr.bf16.mxu0 %v5464_v47  ;;  %v1182_v46 = vld [vmem:[%s7426_s22 + $0x1d30] sm:$0xff]  ;;  %v5740_v47 = vpack.c.bf16 %v1199_v40, %v1183_v39  ;;  %v5486_v53 = vpack.c.bf16 %v1196_v45, %v1180_v44  ;;  %v5504_v40 = vpack.c.bf16 %v1357_v34, %v1341_v33  ;;  %v1439_v9 = vld [vmem:[%s7426_s22 + $0x2538] sm:$0xff] }
 0x1d6   : > { %5721 = vmatprep.subr.bf16.mxu1 %v5720_v51  ;;  %v1215_v51 = vld [vmem:[%s7426_s22 + $0x1e38] sm:$0xff]  ;;  %v5742_v54 = vpack.c.bf16 %v1198_v48, %v1182_v46  ;;  %v5760_v44 = vpack.c.bf16 %v1359_v37, %v1343_v36  ;;  %v1358_v45 = vld [vmem:[%s7426_s22 + $0x22b0] sm:$0xff]  ;;  %v1373_v46 = vld [vmem:[%s7426_s22 + $0x2328] sm:$0xff] }
 0x1d7   : > { %v7037_v48 = vld [vmem:[#allocation2 + $0x28] sm:$0xff]  ;;  %v1455_v10 = vld [vmem:[%s7426_s22 + $0x25b8] sm:$0xff] }
 0x1d8   : > { %5467 = vmatpush1.bf16.msra.mxu0 %v5466_v57  ;;  %v1228_v57 = vld [vmem:[%s7426_s22 + $0x1ea0] sm:$0xff]  ;;  %v1471_v21 = vld [vmem:[%s7426_s22 + $0x2638] sm:$0xff] }
 0x1d9   : > { %5723 = vmatpush1.bf16.msra.mxu1 %v5722_v58  ;;  %5469 = vmatprep.subr.bf16.mxu0 %v5468_v59  ;;  %v1214_v58 = vld [vmem:[%s7426_s22 + $0x1e30] sm:$0xff]  ;;  %v5744_v59 = vpack.c.bf16 %v1231_v52, %v1215_v51  ;;  %v5490_v1 = vpack.c.bf16 %v1228_v57, %v1212_v56  ;;  %v5764_v57 = vpack.c.bf16 %v1391_v50, %v1375_v49  ;;  %v1487_v22 = vld [vmem:[%s7426_s22 + $0x26b8] sm:$0xff]  ;;  %v1532_v50 = vld [vmem:[%s7426_s22 + $0x2820] sm:$0xff] }
 0x1da   : > { %5725 = vmatprep.subr.bf16.mxu1 %v5724_v63  ;;  %v1247_v63 = vld [vmem:[%s7426_s22 + $0x1f38] sm:$0xff]  ;;  %v5746_v2 = vpack.c.bf16 %v1230_v60, %v1214_v58  ;;  %v1374_v56 = vld [vmem:[%s7426_s22 + $0x2330] sm:$0xff]  ;;  %v1421_v60 = vld [vmem:[%s7426_s22 + $0x24a8] sm:$0xff] }
 0x1db   : > { %v1390_v58 = vld [vmem:[%s7426_s22 + $0x23b0] sm:$0xff]  ;;  %v1503_v33 = vld [vmem:[%s7426_s22 + $0x2738] sm:$0xff] }
 0x1dc   : > { %5471 = vmatpush1.bf16.msra.mxu0 %v5470_v5  ;;  %v1260_v5 = vld [vmem:[%s7426_s22 + $0x1fa0] sm:$0xff]  ;;  %v1519_v34 = vld [vmem:[%s7426_s22 + $0x27b8] sm:$0xff] }
 0x1dd   : > { %5727 = vmatpush1.bf16.msra.mxu1 %v5726_v6  ;;  %5473 = vmatprep.subr.bf16.mxu0 %v5472_v7  ;;  %v1246_v6 = vld [vmem:[%s7426_s22 + $0x1f30] sm:$0xff]  ;;  %v5748_v7 = vpack.c.bf16 %v1263_v0, %v1247_v63  ;;  %v5494_v13 = vpack.c.bf16 %v1260_v5, %v1244_v4  ;;  %v5766_v0 = vpack.c.bf16 %v1390_v58, %v1374_v56  ;;  %v1581_v56 = vld [vmem:[%s7426_s22 + $0x29a8] sm:$0xff]  ;;  %v1583_v58 = vld [vmem:[%s7426_s22 + $0x29b8] sm:$0xff] }
 0x1de   : > { %5729 = vmatprep.subr.bf16.mxu1 %v5728_v11  ;;  %v1279_v11 = vld [vmem:[%s7426_s22 + $0x2038] sm:$0xff]  ;;  %v5750_v14 = vpack.c.bf16 %v1262_v8, %v1246_v6  ;;  %v1406_v4 = vld [vmem:[%s7426_s22 + $0x2430] sm:$0xff]  ;;  %v5768_v5 = vpack.c.bf16 %v1423_v62, %v1407_v61  ;;  %v1453_v8 = vld [vmem:[%s7426_s22 + $0x25a8] sm:$0xff] }
 0x1df   : > { %v1422_v6 = vld [vmem:[%s7426_s22 + $0x24b0] sm:$0xff]  ;;  %v1564_v62 = vld [vmem:[%s7426_s22 + $0x2920] sm:$0xff] }
 0x1e0   : > { %5475 = vmatpush1.bf16.msra.mxu0 %v5474_v17  ;;  %v1292_v17 = vld [vmem:[%s7426_s22 + $0x20a0] sm:$0xff] }
 0x1e1   : > { %5731 = vmatpush1.bf16.msra.mxu1 %v5730_v18  ;;  %5477 = vmatprep.subr.bf16.mxu0 %v5476_v19  ;;  %v1278_v18 = vld [vmem:[%s7426_s22 + $0x2030] sm:$0xff]  ;;  %v5752_v19 = vpack.c.bf16 %v1295_v12, %v1279_v11  ;;  %v5498_v25 = vpack.c.bf16 %v1292_v17, %v1276_v16  ;;  %v5770_v12 = vpack.c.bf16 %v1422_v6, %v1406_v4  ;;  %v1613_v4 = vld [vmem:[%s7426_s22 + $0x2aa8] sm:$0xff]  ;;  %v1615_v6 = vld [vmem:[%s7426_s22 + $0x2ab8] sm:$0xff] }
 0x1e2   : > { %5733 = vmatprep.subr.bf16.mxu1 %v5732_v23  ;;  %v1311_v23 = vld [vmem:[%s7426_s22 + $0x2138] sm:$0xff]  ;;  %v5754_v26 = vpack.c.bf16 %v1294_v20, %v1278_v18  ;;  %v1438_v16 = vld [vmem:[%s7426_s22 + $0x2530] sm:$0xff]  ;;  %v5772_v17 = vpack.c.bf16 %v1455_v10, %v1439_v9  ;;  %v1485_v20 = vld [vmem:[%s7426_s22 + $0x26a8] sm:$0xff] }
 0x1e3   : > { %v1454_v18 = vld [vmem:[%s7426_s22 + $0x25b0] sm:$0xff]  ;;  %v1596_v10 = vld [vmem:[%s7426_s22 + $0x2a20] sm:$0xff] }
 0x1e4   : > { %5479 = vmatpush1.bf16.msra.mxu0 %v5478_v29  ;;  %v1324_v29 = vld [vmem:[%s7426_s22 + $0x21a0] sm:$0xff] }
 0x1e5   : > { %5735 = vmatpush1.bf16.msra.mxu1 %v5734_v30  ;;  %5481 = vmatprep.subr.bf16.mxu0 %v5480_v31  ;;  %v1310_v30 = vld [vmem:[%s7426_s22 + $0x2130] sm:$0xff]  ;;  %v5756_v31 = vpack.c.bf16 %v1327_v24, %v1311_v23  ;;  %v5502_v38 = vpack.c.bf16 %v1324_v29, %v1308_v28  ;;  %v5774_v24 = vpack.c.bf16 %v1454_v18, %v1438_v16  ;;  %v1645_v16 = vld [vmem:[%s7426_s22 + $0x2ba8] sm:$0xff]  ;;  %v1647_v18 = vld [vmem:[%s7426_s22 + $0x2bb8] sm:$0xff] }
 0x1e6   : > { %5737 = vmatprep.subr.bf16.mxu1 %v5736_v35  ;;  %v7036_v35 = vld [vmem:[#allocation2 + $0x10] sm:$0xff]  ;;  %v5758_v39 = vpack.c.bf16 %v1326_v32, %v1310_v30  ;;  %v5776_v29 = vpack.c.bf16 %v1487_v22, %v1471_v21  ;;  %v1517_v32 = vld [vmem:[%s7426_s22 + $0x27a8] sm:$0xff]  ;;  %v1628_v22 = vld [vmem:[%s7426_s22 + $0x2b20] sm:$0xff] }
 0x1e7   : > { %v1470_v28 = vld [vmem:[%s7426_s22 + $0x2630] sm:$0xff] }
 0x1e8   : > { %5483 = vmatpush1.bf16.msra.mxu0 %v5482_v41  ;;  %v1340_v41 = vld [vmem:[%s7426_s22 + $0x2220] sm:$0xff]  ;;  %v1486_v30 = vld [vmem:[%s7426_s22 + $0x26b0] sm:$0xff] }
 0x1e9   : > { %5739 = vmatpush1.bf16.msra.mxu1 %v5738_v42  ;;  %5485 = vmatprep.subr.bf16.mxu0 %v5484_v43  ;;  %v1356_v42 = vld [vmem:[%s7426_s22 + $0x22a0] sm:$0xff]  ;;  %v1342_v43 = vld [vmem:[%s7426_s22 + $0x2230] sm:$0xff]  ;;  %v5778_v36 = vpack.c.bf16 %v1486_v30, %v1470_v28  ;;  %v1677_v28 = vld [vmem:[%s7426_s22 + $0x2ca8] sm:$0xff] }
 0x1ea   : > { %5741 = vmatprep.subr.bf16.mxu1 %v5740_v47  ;;  %v1389_v47 = vld [vmem:[%s7426_s22 + $0x23a8] sm:$0xff]  ;;  %v5506_v51 = vpack.c.bf16 %v1356_v42, %v1340_v41  ;;  %v5762_v52 = vpack.c.bf16 %v1358_v45, %v1342_v43  ;;  %v5780_v41 = vpack.c.bf16 %v1519_v34, %v1503_v33  ;;  %v1518_v42 = vld [vmem:[%s7426_s22 + $0x27b0] sm:$0xff]  ;;  %v1535_v45 = vld [vmem:[%s7426_s22 + $0x2838] sm:$0xff] }
 0x1eb   : > { %v1533_v43 = vld [vmem:[%s7426_s22 + $0x2828] sm:$0xff]  ;;  %v1679_v30 = vld [vmem:[%s7426_s22 + $0x2cb8] sm:$0xff]  ;;  %v1660_v34 = vld [vmem:[%s7426_s22 + $0x2c20] sm:$0xff] }
 0x1ec   : > { %5487 = vmatpush1.bf16.msra.mxu0 %v5486_v53  ;;  %v5508_v53 = vpack.c.bf16 %v1389_v47, %v1373_v46  ;;  %v1551_v46 = vld [vmem:[%s7426_s22 + $0x28b8] sm:$0xff] }
 0x1ed   : > { %5743 = vmatpush1.bf16.msra.mxu1 %v5742_v54  ;;  %5489 = vmatprep.subr.bf16.mxu0 %v5488_v55  ;;  %v1372_v54 = vld [vmem:[%s7426_s22 + $0x2320] sm:$0xff] }
 0x1ee   : > { %5745 = vmatprep.subr.bf16.mxu1 %v5744_v59  ;;  %v1388_v55 = vld [vmem:[%s7426_s22 + $0x23a0] sm:$0xff]  ;;  %v1405_v59 = vld [vmem:[%s7426_s22 + $0x2428] sm:$0xff] }
 0x1ef   : > { %v5510_v63 = vpack.c.bf16 %v1388_v55, %v1372_v54  ;;  %v1550_v54 = vld [vmem:[%s7426_s22 + $0x28b0] sm:$0xff]  ;;  %v1565_v55 = vld [vmem:[%s7426_s22 + $0x2928] sm:$0xff] }
 0x1f0   : > { %5491 = vmatpush1.bf16.msra.mxu0 %v5490_v1  ;;  %v5512_v1 = vpack.c.bf16 %v1421_v60, %v1405_v59  ;;  %v5532_v61 = vpack.c.bf16 %v1581_v56, %v1565_v55 }
 0x1f1   : > { %5747 = vmatpush1.bf16.msra.mxu1 %v5746_v2  ;;  %5493 = vmatprep.subr.bf16.mxu0 %v5492_v3  ;;  %v1404_v2 = vld [vmem:[%s7426_s22 + $0x2420] sm:$0xff] }
 0x1f2   : > { %5749 = vmatprep.subr.bf16.mxu1 %v5748_v7  ;;  %v1420_v3 = vld [vmem:[%s7426_s22 + $0x24a0] sm:$0xff]  ;;  %v1437_v7 = vld [vmem:[%s7426_s22 + $0x2528] sm:$0xff] }
 0x1f3   : > { %v5514_v11 = vpack.c.bf16 %v1420_v3, %v1404_v2  ;;  %v1582_v2 = vld [vmem:[%s7426_s22 + $0x29b0] sm:$0xff]  ;;  %v1597_v3 = vld [vmem:[%s7426_s22 + $0x2a28] sm:$0xff] }
 0x1f4   : > { %5495 = vmatpush1.bf16.msra.mxu0 %v5494_v13  ;;  %v5516_v13 = vpack.c.bf16 %v1453_v8, %v1437_v7  ;;  %v5536_v9 = vpack.c.bf16 %v1613_v4, %v1597_v3 }
 0x1f5   : > { %5751 = vmatpush1.bf16.msra.mxu1 %v5750_v14  ;;  %5497 = vmatprep.subr.bf16.mxu0 %v5496_v15  ;;  %v1436_v14 = vld [vmem:[%s7426_s22 + $0x2520] sm:$0xff] }
 0x1f6   : > { %5753 = vmatprep.subr.bf16.mxu1 %v5752_v19  ;;  %v1452_v15 = vld [vmem:[%s7426_s22 + $0x25a0] sm:$0xff]  ;;  %v1469_v19 = vld [vmem:[%s7426_s22 + $0x2628] sm:$0xff] }
 0x1f7   : > { %3084 = vmatmul.mubr.f32.vlgmr.msra.gmra.mrb[2].mxu0 %v7036_v35  ;;  %v5518_v23 = vpack.c.bf16 %v1452_v15, %v1436_v14  ;;  %v1614_v14 = vld [vmem:[%s7426_s22 + $0x2ab0] sm:$0xff]  ;;  %v1629_v15 = vld [vmem:[%s7426_s22 + $0x2b28] sm:$0xff] }
 0x1f8   : > { %5499 = vmatpush1.bf16.msra.mxu0 %v5498_v25  ;;  %3368 = vmatmul.mubr.f32.vlgmr.msra.gmra.mrb[2].mxu1 %v7036_v35  ;;  %v5520_v25 = vpack.c.bf16 %v1485_v20, %v1469_v19  ;;  %v5540_v21 = vpack.c.bf16 %v1645_v16, %v1629_v15 }
 0x1f9   : > { %5755 = vmatpush1.bf16.msra.mxu1 %v5754_v26  ;;  %5501 = vmatprep.subr.bf16.mxu0 %v5500_v27  ;;  %v1468_v26 = vld [vmem:[%s7426_s22 + $0x2620] sm:$0xff] }
 0x1fa   : > { %5757 = vmatprep.subr.bf16.mxu1 %v5756_v31  ;;  %3154 = vmatprep.mubr.f32.mxu0 %v7037_v48  ;;  %v1484_v27 = vld [vmem:[%s7426_s22 + $0x26a0] sm:$0xff]  ;;  %v1501_v31 = vld [vmem:[%s7426_s22 + $0x2728] sm:$0xff] }
 0x1fb   : > { %3438 = vmatprep.mubr.f32.mxu1 %v7037_v48  ;;  %v5522_v35 = vpack.c.bf16 %v1484_v27, %v1468_v26  ;;  %v5524_v37 = vpack.c.bf16 %v1517_v32, %v1501_v31  ;;  %v1646_v26 = vld [vmem:[%s7426_s22 + $0x2bb0] sm:$0xff]  ;;  %v1661_v27 = vld [vmem:[%s7426_s22 + $0x2c28] sm:$0xff] }
 0x1fc   : > { %5503 = vmatpush1.bf16.msra.mxu0 %v5502_v38  ;;  %v1500_v38 = vld [vmem:[%s7426_s22 + $0x2720] sm:$0xff]  ;;  %v5544_v33 = vpack.c.bf16 %v1677_v28, %v1661_v27 }
 0x1fd   : > { %5759 = vmatpush1.bf16.msra.mxu1 %v5758_v39  ;;  %5505 = vmatprep.subr.bf16.mxu0 %v5504_v40  ;;  %v1516_v39 = vld [vmem:[%s7426_s22 + $0x27a0] sm:$0xff]  ;;  %v1502_v40 = vld [vmem:[%s7426_s22 + $0x2730] sm:$0xff] }
 0x1fe   : > { %5761 = vmatprep.subr.bf16.mxu1 %v5760_v44  ;;  %v1549_v44 = vld [vmem:[%s7426_s22 + $0x28a8] sm:$0xff]  ;;  %v5526_v47 = vpack.c.bf16 %v1516_v39, %v1500_v38  ;;  %v5782_v48 = vpack.c.bf16 %v1518_v42, %v1502_v40  ;;  %v1678_v38 = vld [vmem:[%s7426_s22 + $0x2cb0] sm:$0xff]  ;;  %v1711_v42 = vld [vmem:[%s7426_s22 + $0x2db8] sm:$0xff] }
 0x1ff   : > { %v5528_v49 = vpack.c.bf16 %v1549_v44, %v1533_v43  ;;  %v1693_v39 = vld [vmem:[%s7426_s22 + $0x2d28] sm:$0xff] }
 0x200   : > { %5507 = vmatpush1.bf16.msra.mxu0 %v5506_v51  ;;  %v1548_v51 = vld [vmem:[%s7426_s22 + $0x28a0] sm:$0xff]  ;;  %v1709_v40 = vld [vmem:[%s7426_s22 + $0x2da8] sm:$0xff] }
 0x201   : > { %5763 = vmatpush1.bf16.msra.mxu1 %v5762_v52  ;;  %5509 = vmatprep.subr.bf16.mxu0 %v5508_v53  ;;  %v1534_v52 = vld [vmem:[%s7426_s22 + $0x2830] sm:$0xff]  ;;  %v5784_v53 = vpack.c.bf16 %v1551_v46, %v1535_v45  ;;  %v5530_v59 = vpack.c.bf16 %v1548_v51, %v1532_v50  ;;  %v5548_v45 = vpack.c.bf16 %v1709_v40, %v1693_v39  ;;  %v1692_v46 = vld [vmem:[%s7426_s22 + $0x2d20] sm:$0xff]  ;;  %v1725_v51 = vld [vmem:[%s7426_s22 + $0x2e28] sm:$0xff] }
 0x202   : > { %5765 = vmatprep.subr.bf16.mxu1 %v5764_v57  ;;  %v1567_v57 = vld [vmem:[%s7426_s22 + $0x2938] sm:$0xff]  ;;  %v5786_v60 = vpack.c.bf16 %v1550_v54, %v1534_v52  ;;  %v1710_v50 = vld [vmem:[%s7426_s22 + $0x2db0] sm:$0xff]  ;;  %v1741_v52 = vld [vmem:[%s7426_s22 + $0x2ea8] sm:$0xff] }
 0x203   : > { %v1743_v54 = vld [vmem:[%s7426_s22 + $0x2eb8] sm:$0xff] }
 0x204   : > { %5511 = vmatpush1.bf16.msra.mxu0 %v5510_v63  ;;  %v1580_v63 = vld [vmem:[%s7426_s22 + $0x29a0] sm:$0xff]  ;;  %v1871_v39 = vld [vmem:[%s7426_s22 + $0x32b8] sm:$0xff] }
 0x205   : > { %5767 = vmatpush1.bf16.msra.mxu1 %v5766_v0  ;;  %5513 = vmatprep.subr.bf16.mxu0 %v5512_v1  ;;  %v1566_v0 = vld [vmem:[%s7426_s22 + $0x2930] sm:$0xff]  ;;  %v5788_v1 = vpack.c.bf16 %v1583_v58, %v1567_v57  ;;  %v5534_v7 = vpack.c.bf16 %v1580_v63, %v1564_v62  ;;  %v5552_v57 = vpack.c.bf16 %v1741_v52, %v1725_v51  ;;  %v1724_v58 = vld [vmem:[%s7426_s22 + $0x2e20] sm:$0xff]  ;;  %v1757_v63 = vld [vmem:[%s7426_s22 + $0x2f28] sm:$0xff] }
 0x206   : > { %5769 = vmatprep.subr.bf16.mxu1 %v5768_v5  ;;  %v1599_v5 = vld [vmem:[%s7426_s22 + $0x2a38] sm:$0xff]  ;;  %v5790_v8 = vpack.c.bf16 %v1582_v2, %v1566_v0  ;;  %v1742_v62 = vld [vmem:[%s7426_s22 + $0x2eb0] sm:$0xff]  ;;  %v1773_v0 = vld [vmem:[%s7426_s22 + $0x2fa8] sm:$0xff] }
 0x207   : > { %v1775_v2 = vld [vmem:[%s7426_s22 + $0x2fb8] sm:$0xff] }
 0x208   : > { %5515 = vmatpush1.bf16.msra.mxu0 %v5514_v11  ;;  %v1612_v11 = vld [vmem:[%s7426_s22 + $0x2aa0] sm:$0xff]  ;;  %v1887_v51 = vld [vmem:[%s7426_s22 + $0x3338] sm:$0xff] }
 0x209   : > { %5771 = vmatpush1.bf16.msra.mxu1 %v5770_v12  ;;  %5517 = vmatprep.subr.bf16.mxu0 %v5516_v13  ;;  %v1598_v12 = vld [vmem:[%s7426_s22 + $0x2a30] sm:$0xff]  ;;  %v5792_v13 = vpack.c.bf16 %v1615_v6, %v1599_v5  ;;  %v5538_v19 = vpack.c.bf16 %v1612_v11, %v1596_v10  ;;  %v5556_v5 = vpack.c.bf16 %v1773_v0, %v1757_v63  ;;  %v1756_v6 = vld [vmem:[%s7426_s22 + $0x2f20] sm:$0xff]  ;;  %v1789_v11 = vld [vmem:[%s7426_s22 + $0x3028] sm:$0xff] }
 0x20a   : > { %5773 = vmatprep.subr.bf16.mxu1 %v5772_v17  ;;  %v1631_v17 = vld [vmem:[%s7426_s22 + $0x2b38] sm:$0xff]  ;;  %v5794_v20 = vpack.c.bf16 %v1614_v14, %v1598_v12  ;;  %v1774_v10 = vld [vmem:[%s7426_s22 + $0x2fb0] sm:$0xff]  ;;  %v1805_v12 = vld [vmem:[%s7426_s22 + $0x30a8] sm:$0xff] }
 0x20b   : > { %v1807_v14 = vld [vmem:[%s7426_s22 + $0x30b8] sm:$0xff]  ;;  %v1933_v63 = vld [vmem:[%s7426_s22 + $0x34a8] sm:$0xff] }
 0x20c   : > { %5519 = vmatpush1.bf16.msra.mxu0 %v5518_v23  ;;  %v1644_v23 = vld [vmem:[%s7426_s22 + $0x2ba0] sm:$0xff]  ;;  %v1903_v52 = vld [vmem:[%s7426_s22 + $0x33b8] sm:$0xff] }
 0x20d   : > { %5775 = vmatpush1.bf16.msra.mxu1 %v5774_v24  ;;  %5521 = vmatprep.subr.bf16.mxu0 %v5520_v25  ;;  %v1630_v24 = vld [vmem:[%s7426_s22 + $0x2b30] sm:$0xff]  ;;  %v5796_v25 = vpack.c.bf16 %v1647_v18, %v1631_v17  ;;  %v5542_v31 = vpack.c.bf16 %v1644_v23, %v1628_v22  ;;  %v5560_v17 = vpack.c.bf16 %v1805_v12, %v1789_v11  ;;  %v1788_v18 = vld [vmem:[%s7426_s22 + $0x3020] sm:$0xff]  ;;  %v1821_v23 = vld [vmem:[%s7426_s22 + $0x3128] sm:$0xff] }
 0x20e   : > { %5777 = vmatprep.subr.bf16.mxu1 %v5776_v29  ;;  %v1663_v29 = vld [vmem:[%s7426_s22 + $0x2c38] sm:$0xff]  ;;  %v5798_v32 = vpack.c.bf16 %v1646_v26, %v1630_v24  ;;  %v1806_v22 = vld [vmem:[%s7426_s22 + $0x30b0] sm:$0xff]  ;;  %v1837_v24 = vld [vmem:[%s7426_s22 + $0x31a8] sm:$0xff] }
 0x20f   : > { %v1839_v26 = vld [vmem:[%s7426_s22 + $0x31b8] sm:$0xff]  ;;  %v1949_v11 = vld [vmem:[%s7426_s22 + $0x3528] sm:$0xff] }
 0x210   : > { %5523 = vmatpush1.bf16.msra.mxu0 %v5522_v35  ;;  %v1676_v35 = vld [vmem:[%s7426_s22 + $0x2ca0] sm:$0xff]  ;;  %v1919_v0 = vld [vmem:[%s7426_s22 + $0x3438] sm:$0xff]  ;;  %v1965_v12 = vld [vmem:[%s7426_s22 + $0x35a8] sm:$0xff] }
 0x211   : > { %5779 = vmatpush1.bf16.msra.mxu1 %v5778_v36  ;;  %5525 = vmatprep.subr.bf16.mxu0 %v5524_v37  ;;  %v1662_v36 = vld [vmem:[%s7426_s22 + $0x2c30] sm:$0xff]  ;;  %v5800_v37 = vpack.c.bf16 %v1679_v30, %v1663_v29  ;;  %v5546_v43 = vpack.c.bf16 %v1676_v35, %v1660_v34  ;;  %v5564_v29 = vpack.c.bf16 %v1837_v24, %v1821_v23  ;;  %v1820_v30 = vld [vmem:[%s7426_s22 + $0x3120] sm:$0xff]  ;;  %v1853_v35 = vld [vmem:[%s7426_s22 + $0x3228] sm:$0xff] }
 0x212   : > { %5781 = vmatprep.subr.bf16.mxu1 %v5780_v41  ;;  %v1695_v41 = vld [vmem:[%s7426_s22 + $0x2d38] sm:$0xff]  ;;  %v5802_v44 = vpack.c.bf16 %v1678_v38, %v1662_v36  ;;  %v1838_v34 = vld [vmem:[%s7426_s22 + $0x31b0] sm:$0xff]  ;;  %v1869_v36 = vld [vmem:[%s7426_s22 + $0x32a8] sm:$0xff] }
 0x213   : > { %v1855_v38 = vld [vmem:[%s7426_s22 + $0x3238] sm:$0xff]  ;;  %v1948_v23 = vld [vmem:[%s7426_s22 + $0x3520] sm:$0xff] }
 0x214   : > { %5527 = vmatpush1.bf16.msra.mxu0 %v5526_v47  ;;  %v1708_v47 = vld [vmem:[%s7426_s22 + $0x2da0] sm:$0xff] }
 0x215   : > { %5783 = vmatpush1.bf16.msra.mxu1 %v5782_v48  ;;  %5529 = vmatprep.subr.bf16.mxu0 %v5528_v49  ;;  %v1694_v48 = vld [vmem:[%s7426_s22 + $0x2d30] sm:$0xff]  ;;  %v5804_v49 = vpack.c.bf16 %v1711_v42, %v1695_v41  ;;  %v5550_v55 = vpack.c.bf16 %v1708_v47, %v1692_v46  ;;  %v5568_v42 = vpack.c.bf16 %v1869_v36, %v1853_v35  ;;  %v1964_v24 = vld [vmem:[%s7426_s22 + $0x35a0] sm:$0xff] }
 0x216   : > { %5785 = vmatprep.subr.bf16.mxu1 %v5784_v53  ;;  %v1727_v53 = vld [vmem:[%s7426_s22 + $0x2e38] sm:$0xff]  ;;  %v5806_v56 = vpack.c.bf16 %v1710_v50, %v1694_v48  ;;  %v5824_v46 = vpack.c.bf16 %v1871_v39, %v1855_v38  ;;  %v1870_v47 = vld [vmem:[%s7426_s22 + $0x32b0] sm:$0xff]  ;;  %v1885_v48 = vld [vmem:[%s7426_s22 + $0x3328] sm:$0xff]  ;;  %v5582_v35 = vpack.c.bf16 %v1964_v24, %v1948_v23 }
 0x217   : > { %v7039_v50 = vld [vmem:[#allocation2 + $0x38] sm:$0xff]  ;;  %v1980_v36 = vld [vmem:[%s7426_s22 + $0x3620] sm:$0xff]  ;;  %v1982_v38 = vld [vmem:[%s7426_s22 + $0x3630] sm:$0xff] }
 0x218   : > { %5531 = vmatpush1.bf16.msra.mxu0 %v5530_v59  ;;  %v1740_v59 = vld [vmem:[%s7426_s22 + $0x2ea0] sm:$0xff]  ;;  %v2062_v24 = vld [vmem:[%s7426_s22 + $0x38b0] sm:$0xff] }
 0x219   : > { %5787 = vmatpush1.bf16.msra.mxu1 %v5786_v60  ;;  %5533 = vmatprep.subr.bf16.mxu0 %v5532_v61  ;;  %v1726_v60 = vld [vmem:[%s7426_s22 + $0x2e30] sm:$0xff]  ;;  %v5808_v61 = vpack.c.bf16 %v1743_v54, %v1727_v53  ;;  %v5554_v3 = vpack.c.bf16 %v1740_v59, %v1724_v58  ;;  %v2300_v53 = vlaneseq  ;;  %v1900_v58 = vld [vmem:[%s7426_s22 + $0x33a0] sm:$0xff] }
 0x21a   : > { %5789 = vmatprep.subr.bf16.mxu1 %v5788_v1  ;;  %v1759_v1 = vld [vmem:[%s7426_s22 + $0x2f38] sm:$0xff]  ;;  %v5810_v4 = vpack.c.bf16 %v1742_v62, %v1726_v60  ;;  %v1886_v59 = vld [vmem:[%s7426_s22 + $0x3330] sm:$0xff]  ;;  %v5828_v60 = vpack.c.bf16 %v1903_v52, %v1887_v51  ;;  %v1917_v62 = vld [vmem:[%s7426_s22 + $0x3428] sm:$0xff] }
 0x21c   : > { %5535 = vmatpush1.bf16.msra.mxu0 %v5534_v7  ;;  %v1772_v7 = vld [vmem:[%s7426_s22 + $0x2fa0] sm:$0xff] }
 0x21d   : > { %5791 = vmatpush1.bf16.msra.mxu1 %v5790_v8  ;;  %5537 = vmatprep.subr.bf16.mxu0 %v5536_v9  ;;  %v1758_v8 = vld [vmem:[%s7426_s22 + $0x2f30] sm:$0xff]  ;;  %v5812_v9 = vpack.c.bf16 %v1775_v2, %v1759_v1  ;;  %v5558_v15 = vpack.c.bf16 %v1772_v7, %v1756_v6  ;;  %v1935_v1 = vld [vmem:[%s7426_s22 + $0x34b8] sm:$0xff]  ;;  %v8365_v2 = vshrl.u32 %v2300_v53, 7  ;;  %v1916_v6 = vld [vmem:[%s7426_s22 + $0x3420] sm:$0xff] }
 0x21e   : > { %5793 = vmatprep.subr.bf16.mxu1 %v5792_v13  ;;  %v1791_v13 = vld [vmem:[%s7426_s22 + $0x3038] sm:$0xff]  ;;  %v5814_v16 = vpack.c.bf16 %v1774_v10, %v1758_v8  ;;  %v1932_v7 = vld [vmem:[%s7426_s22 + $0x34a0] sm:$0xff]  ;;  %v1918_v8 = vld [vmem:[%s7426_s22 + $0x3430] sm:$0xff] }
 0x21f   : > { %v1934_v10 = vld [vmem:[%s7426_s22 + $0x34b0] sm:$0xff] }
 0x220   : > { %5539 = vmatpush1.bf16.msra.mxu0 %v5538_v19  ;;  %v1804_v19 = vld [vmem:[%s7426_s22 + $0x30a0] sm:$0xff] }
 0x221   : > { %5795 = vmatpush1.bf16.msra.mxu1 %v5794_v20  ;;  %5541 = vmatprep.subr.bf16.mxu0 %v5540_v21  ;;  %v1790_v20 = vld [vmem:[%s7426_s22 + $0x3030] sm:$0xff]  ;;  %v5816_v21 = vpack.c.bf16 %v1807_v14, %v1791_v13  ;;  %v5562_v27 = vpack.c.bf16 %v1804_v19, %v1788_v18  ;;  %v2302_v13 = vsub.s32 0, %v8365_v2  ;;  %v1951_v14 = vld [vmem:[%s7426_s22 + $0x3538] sm:$0xff]  ;;  %v2310_v18 = vsub.s32 2, %v8365_v2 }
 0x222   : > { %5797 = vmatprep.subr.bf16.mxu1 %v5796_v25  ;;  %v1823_v25 = vld [vmem:[%s7426_s22 + $0x3138] sm:$0xff]  ;;  %v5818_v28 = vpack.c.bf16 %v1806_v22, %v1790_v20  ;;  %v2306_v19 = vsub.s32 1, %v8365_v2  ;;  %v5834_v20 = vpack.c.bf16 %v1934_v10, %v1918_v8  ;;  %v5580_v22 = vpack.c.bf16 %v1965_v12, %v1949_v11 }
 0x223   : > { %v2047_v8 = vld [vmem:[%s7426_s22 + $0x3838] sm:$0xff] }
 0x224   : > { %5543 = vmatpush1.bf16.msra.mxu0 %v5542_v31  ;;  %v1836_v31 = vld [vmem:[%s7426_s22 + $0x31a0] sm:$0xff] }
 0x225   : > { %5799 = vmatpush1.bf16.msra.mxu1 %v5798_v32  ;;  %5545 = vmatprep.subr.bf16.mxu0 %v5544_v33  ;;  %v1822_v32 = vld [vmem:[%s7426_s22 + $0x3130] sm:$0xff]  ;;  %v5820_v33 = vpack.c.bf16 %v1839_v26, %v1823_v25  ;;  %v5566_v40 = vpack.c.bf16 %v1836_v31, %v1820_v30  ;;  %v1983_v31 = vld [vmem:[%s7426_s22 + $0x3638] sm:$0xff] }
 0x226   : > { %5801 = vmatprep.subr.bf16.mxu1 %v5800_v37  ;;  %v7038_v37 = vld [vmem:[#allocation2 + $0x20] sm:$0xff]  ;;  %v5822_v41 = vpack.c.bf16 %v1838_v34, %v1822_v32  ;;  %v1950_v25 = vld [vmem:[%s7426_s22 + $0x3530] sm:$0xff]  ;;  %v1999_v32 = vld [vmem:[%s7426_s22 + $0x36b8] sm:$0xff] }
 0x228   : > { %5547 = vmatpush1.bf16.msra.mxu0 %v5546_v43  ;;  %v1852_v43 = vld [vmem:[%s7426_s22 + $0x3220] sm:$0xff] }
 0x229   : > { %5803 = vmatpush1.bf16.msra.mxu1 %v5802_v44  ;;  %5549 = vmatprep.subr.bf16.mxu0 %v5548_v45  ;;  %v1868_v44 = vld [vmem:[%s7426_s22 + $0x32a0] sm:$0xff]  ;;  %v1854_v45 = vld [vmem:[%s7426_s22 + $0x3230] sm:$0xff] }
 0x22a   : > { %5805 = vmatprep.subr.bf16.mxu1 %v5804_v49  ;;  %v1901_v49 = vld [vmem:[%s7426_s22 + $0x33a8] sm:$0xff]  ;;  %v5570_v54 = vpack.c.bf16 %v1868_v44, %v1852_v43 }
 0x22b   : > { %v2013_v43 = vld [vmem:[%s7426_s22 + $0x3728] sm:$0xff] }
 0x22c   : > { %5551 = vmatpush1.bf16.msra.mxu0 %v5550_v55  ;;  %v5826_v55 = vpack.c.bf16 %v1870_v47, %v1854_v45  ;;  %v2029_v44 = vld [vmem:[%s7426_s22 + $0x37a8] sm:$0xff]  ;;  %v2015_v47 = vld [vmem:[%s7426_s22 + $0x3738] sm:$0xff] }
 0x22d   : > { %5807 = vmatpush1.bf16.msra.mxu1 %v5806_v56  ;;  %5553 = vmatprep.subr.bf16.mxu0 %v5552_v57  ;;  %v5572_v56 = vpack.c.bf16 %v1901_v49, %v1885_v48  ;;  %v1884_v57 = vld [vmem:[%s7426_s22 + $0x3320] sm:$0xff]  ;;  %v2031_v48 = vld [vmem:[%s7426_s22 + $0x37b8] sm:$0xff] }
 0x22e   : > { %5809 = vmatprep.subr.bf16.mxu1 %v5808_v61  ;;  %v1902_v61 = vld [vmem:[%s7426_s22 + $0x33b0] sm:$0xff] }
 0x230   : > { %5555 = vmatpush1.bf16.msra.mxu0 %v5554_v3  ;;  %v5574_v3 = vpack.c.bf16 %v1900_v58, %v1884_v57  ;;  %v5588_v57 = vpack.c.bf16 %v2029_v44, %v2013_v43  ;;  %v2012_v58 = vld [vmem:[%s7426_s22 + $0x3720] sm:$0xff] }
 0x231   : > { %5811 = vmatpush1.bf16.msra.mxu1 %v5810_v4  ;;  %5557 = vmatprep.subr.bf16.mxu0 %v5556_v5  ;;  %v5830_v4 = vpack.c.bf16 %v1902_v61, %v1886_v59  ;;  %v5576_v5 = vpack.c.bf16 %v1933_v63, %v1917_v62  ;;  %v2028_v59 = vld [vmem:[%s7426_s22 + $0x37a0] sm:$0xff]  ;;  %v5844_v63 = vpack.c.bf16 %v2031_v48, %v2015_v47  ;;  %v2126_v48 = vld [vmem:[%s7426_s22 + $0x3ab0] sm:$0xff] }
 0x232   : > { %5813 = vmatprep.subr.bf16.mxu1 %v5812_v9  ;;  %v5832_v9 = vpack.c.bf16 %v1935_v1, %v1919_v0  ;;  %v2030_v0 = vld [vmem:[%s7426_s22 + $0x37b0] sm:$0xff]  ;;  %v2045_v1 = vld [vmem:[%s7426_s22 + $0x3828] sm:$0xff]  ;;  %v5590_v12 = vpack.c.bf16 %v2028_v59, %v2012_v58  ;;  %v2108_v44 = vld [vmem:[%s7426_s22 + $0x3a20] sm:$0xff] }
 0x233   : > { %v2142_v58 = vld [vmem:[%s7426_s22 + $0x3b30] sm:$0xff] }
 0x234   : > { %5559 = vmatpush1.bf16.msra.mxu0 %v5558_v15  ;;  %v1967_v15 = vld [vmem:[%s7426_s22 + $0x35b8] sm:$0xff] }
 0x235   : > { %5815 = vmatpush1.bf16.msra.mxu1 %v5814_v16  ;;  %5561 = vmatprep.subr.bf16.mxu0 %v5560_v17  ;;  %v5578_v16 = vpack.c.bf16 %v1932_v7, %v1916_v6  ;;  %v2296_v17 = vld [vmem:[%s8376_s27] sm:$0xff]  ;;  %v5836_v26 = vpack.c.bf16 %v1967_v15, %v1951_v14 }
 0x236   : > { %5817 = vmatprep.subr.bf16.mxu1 %v5816_v21  ;;  %v2314_v21 = vsub.s32 3, %v8365_v2  ;;  %v2303_v30 = vrot.slane %v2296_v17, %v2302_v13  ;;  %v2307_v34 = vrot.slane %v2296_v17, %v2306_v19 }
 0x237   : > { %3155 = vmatmul.mubr.f32.vlgmr.msra.gmra.mrb[2].mxu0 %v7038_v37 }
 0x238   : > { %5563 = vmatpush1.bf16.msra.mxu0 %v5562_v27  ;;  %3439 = vmatmul.mubr.f32.vlgmr.msra.gmra.mrb[2].mxu1 %v7038_v37  ;;  %v1966_v27 = vld [vmem:[%s7426_s22 + $0x35b0] sm:$0xff]  ;;  %v1996_v37 = vld [vmem:[%s7426_s22 + $0x36a0] sm:$0xff]  ;;  %v2315_v39 = vrot.slane %v2296_v17, %v2314_v21 }
 0x239   : > { %5819 = vmatpush1.bf16.msra.mxu1 %v5818_v28  ;;  %5565 = vmatprep.subr.bf16.mxu0 %v5564_v29  ;;  %v1981_v28 = vld [vmem:[%s7426_s22 + $0x3628] sm:$0xff]  ;;  %v5586_v52 = vpack.c.bf16 %v1996_v37, %v1980_v36  ;;  %v2094_v36 = vld [vmem:[%s7426_s22 + $0x39b0] sm:$0xff] }
 0x23a   : > { %5821 = vmatprep.subr.bf16.mxu1 %v5820_v33  ;;  %3225 = vmatprep.mubr.f32.mxu0 %v7039_v50  ;;  %v1997_v29 = vld [vmem:[%s7426_s22 + $0x36a8] sm:$0xff]  ;;  %v2311_v33 = vrot.slane %v2296_v17, %v2310_v18  ;;  %v2044_v17 = vld [vmem:[%s7426_s22 + $0x3820] sm:$0xff] }
 0x23b   : > { %3509 = vmatprep.mubr.f32.mxu1 %v7039_v50  ;;  %v2109_v37 = vld [vmem:[%s7426_s22 + $0x3a28] sm:$0xff] }
 0x23c   : > { %5567 = vmatpush1.bf16.msra.mxu0 %v5566_v40  ;;  %v5838_v40 = vpack.c.bf16 %v1966_v27, %v1950_v25  ;;  %v2077_v25 = vld [vmem:[%s7426_s22 + $0x3928] sm:$0xff]  ;;  %v2079_v27 = vld [vmem:[%s7426_s22 + $0x3938] sm:$0xff] }
 0x23d   : > { %5823 = vmatpush1.bf16.msra.mxu1 %v5822_v41  ;;  %5569 = vmatprep.subr.bf16.mxu0 %v5568_v42  ;;  %v5584_v41 = vpack.c.bf16 %v1997_v29, %v1981_v28  ;;  %v1998_v42 = vld [vmem:[%s7426_s22 + $0x36b0] sm:$0xff]  ;;  %v2095_v28 = vld [vmem:[%s7426_s22 + $0x39b8] sm:$0xff] }
 0x23e   : > { %5825 = vmatprep.subr.bf16.mxu1 %v5824_v46  ;;  %v5840_v46 = vpack.c.bf16 %v1999_v32, %v1983_v31  ;;  %v2076_v32 = vld [vmem:[%s7426_s22 + $0x3920] sm:$0xff] }
 0x240   : > { %5571 = vmatpush1.bf16.msra.mxu0 %v5570_v54 }
 0x241   : > { %5827 = vmatpush1.bf16.msra.mxu1 %v5826_v55  ;;  %5573 = vmatprep.subr.bf16.mxu0 %v5572_v56  ;;  %v5842_v56 = vpack.c.bf16 %v1998_v42, %v1982_v38  ;;  %v2125_v38 = vld [vmem:[%s7426_s22 + $0x3aa8] sm:$0xff] }
 0x242   : > { %5829 = vmatprep.subr.bf16.mxu1 %v5828_v60  ;;  %v2014_v60 = vld [vmem:[%s7426_s22 + $0x3730] sm:$0xff]  ;;  %v5600_v43 = vpack.c.bf16 %v2125_v38, %v2109_v37  ;;  %v2269_v38 = vld [vmem:[%s7426_s22 + $0x3f28] sm:$0xff] }
 0x243   : > { %v5846_v15 = vpack.c.bf16 %v2030_v0, %v2014_v60  ;;  %v2158_v60 = vld [vmem:[%s7426_s22 + $0x3bb0] sm:$0xff]  ;;  %v2191_v0 = vld [vmem:[%s7426_s22 + $0x3cb8] sm:$0xff] }
 0x244   : > { %5575 = vmatpush1.bf16.msra.mxu0 %v5574_v3  ;;  %v2061_v3 = vld [vmem:[%s7426_s22 + $0x38a8] sm:$0xff]  ;;  %v2254_v37 = vld [vmem:[%s7426_s22 + $0x3eb0] sm:$0xff] }
 0x245   : > { %5831 = vmatpush1.bf16.msra.mxu1 %v5830_v4  ;;  %5577 = vmatprep.subr.bf16.mxu0 %v5576_v5 }
 0x246   : > { %5833 = vmatprep.subr.bf16.mxu1 %v5832_v9  ;;  %v2063_v9 = vld [vmem:[%s7426_s22 + $0x38b8] sm:$0xff] }
 0x247   : > { %v5848_v23 = vpack.c.bf16 %v2063_v9, %v2047_v8  ;;  %v2190_v9 = vld [vmem:[%s7426_s22 + $0x3cb0] sm:$0xff] }
 0x248   : > { %5579 = vmatpush1.bf16.msra.mxu0 %v5578_v16  ;;  %v5592_v16 = vpack.c.bf16 %v2061_v3, %v2045_v1  ;;  %v5862_v3 = vpack.c.bf16 %v2158_v60, %v2142_v58  ;;  %v272_v58 = vld [vmem:[%s7426_s22 + $0xc0] sm:$0xff] }
 0x249   : > { %5835 = vmatpush1.bf16.msra.mxu1 %v5834_v20  ;;  %5581 = vmatprep.subr.bf16.mxu0 %v5580_v22  ;;  %v2060_v20 = vld [vmem:[%s7426_s22 + $0x38a0] sm:$0xff]  ;;  %v2046_v22 = vld [vmem:[%s7426_s22 + $0x3830] sm:$0xff] }
 0x24a   : > { %v2659_v45 = vpop.f32.mrb[0].mxu0  ;;  %5837 = vmatprep.subr.bf16.mxu1 %v5836_v26  ;;  %v2093_v26 = vld [vmem:[%s7426_s22 + $0x39a8] sm:$0xff]  ;;  %v5594_v29 = vpack.c.bf16 %v2060_v20, %v2044_v17  ;;  %v2204_v20 = vld [vmem:[%s7426_s22 + $0x3d20] sm:$0xff] }
 0x24b   : > { %v6904_v49 = vadd.f32 %v2659_v45, %v2303_v30  ;;  %v2943_v50 = vpop.f32.mrb[0].mxu1  ;;  %v2661_v51 = vpop.f32.mrb[1].mxu0  ;;  %v5850_v30 = vpack.c.bf16 %v2062_v24, %v2046_v22  ;;  %v5596_v31 = vpack.c.bf16 %v2093_v26, %v2077_v25  ;;  %v2124_v45 = vld [vmem:[%s7426_s22 + $0x3aa0] sm:$0xff]  ;;  %v2222_v25 = vld [vmem:[%s7426_s22 + $0x3db0] sm:$0xff]  ;;  %v2237_v26 = vld [vmem:[%s7426_s22 + $0x3e28] sm:$0xff] }
 0x24c   : > { %v6906_v53 = vadd.f32 %v2943_v50, %v2311_v33  ;;  %v6905_v54 = vadd.f32 %v2661_v51, %v2307_v34  ;;  %v2945_v55 = vpop.f32.mrb[1].mxu1  ;;  %5583 = vmatpush1.bf16.msra.mxu0 %v5582_v35  ;;  %v2092_v33 = vld [vmem:[%s7426_s22 + $0x39a0] sm:$0xff]  ;;  %v2078_v34 = vld [vmem:[%s7426_s22 + $0x3930] sm:$0xff]  ;;  %v5852_v35 = vpack.c.bf16 %v2095_v28, %v2079_v27  ;;  %v2157_v50 = vld [vmem:[%s7426_s22 + $0x3ba8] sm:$0xff] }
 0x24d   : > { %vm4652_vm0 = vcmp.gt.f32.partialorder %v6904_v49, 0.0  ;;  %v4668_v61 = vmul.f32 0.2, %v6904_v49  ;;  %v6907_v62 = vadd.f32 %v2945_v55, %v2315_v39  ;;  %5839 = vmatpush1.bf16.msra.mxu1 %v5838_v40  ;;  %5585 = vmatprep.subr.bf16.mxu0 %v5584_v41  ;;  %v2111_v39 = vld [vmem:[%s7426_s22 + $0x3a38] sm:$0xff]  ;;  %v5598_v41 = vpack.c.bf16 %v2092_v33, %v2076_v32  ;;  %v2220_v22 = vld [vmem:[%s7426_s22 + $0x3da0] sm:$0xff]  ;;  %v2253_v27 = vld [vmem:[%s7426_s22 + $0x3ea8] sm:$0xff] }
 0x24e   : > { %vm4654_vm1 = vcmp.gt.f32.partialorder %v6906_v53, 0.0  ;;  %v4670_v4 = vmul.f32 0.2, %v6906_v53  ;;  %vm4653_vm2 = vcmp.gt.f32.partialorder %v6905_v54, 0.0  ;;  %v4669_v5 = vmul.f32 0.2, %v6905_v54  ;;  %5841 = vmatprep.subr.bf16.mxu1 %v5840_v46 }
 0x24f   : > { %v4684_v6 = vsel %vm4652_vm0, %v6904_v49, %v4668_v61  ;;  %vm4655_vm3 = vcmp.gt.f32.partialorder %v6907_v62, 0.0  ;;  %v4671_v7 = vmul.f32 0.2, %v6907_v62  ;;  %v2127_v40 = vld [vmem:[%s7426_s22 + $0x3ab8] sm:$0xff]  ;;  %v5854_v42 = vpack.c.bf16 %v2094_v36, %v2078_v34  ;;  %v2110_v46 = vld [vmem:[%s7426_s22 + $0x3a30] sm:$0xff]  ;;  %v2141_v49 = vld [vmem:[%s7426_s22 + $0x3b28] sm:$0xff] }
 0x250   : > { %4700 = vst [vmem:[%s8417_s10] sm:$0xff] %v4684_v6  ;;  %v4686_v10 = vsel %vm4654_vm1, %v6906_v53, %v4670_v4  ;;  %v4685_v11 = vsel %vm4653_vm2, %v6905_v54, %v4669_v5  ;;  %5587 = vmatpush1.bf16.msra.mxu0 %v5586_v52  ;;  %v5856_v47 = vpack.c.bf16 %v2127_v40, %v2111_v39  ;;  %v2143_v51 = vld [vmem:[%s7426_s22 + $0x3b38] sm:$0xff]  ;;  %v2173_v61 = vld [vmem:[%s7426_s22 + $0x3c28] sm:$0xff]  ;;  %v2172_v5 = vld [vmem:[%s7426_s22 + $0x3c20] sm:$0xff] }
 0x251   : > { %4702 = vst [vmem:[%s8417_s10 + $0x10] sm:$0xff] %v4686_v10  ;;  %4701 = vst [vmem:[%s8417_s10 + $0x8] sm:$0xff] %v4685_v11  ;;  %v4687_v14 = vsel %vm4655_vm3, %v6907_v62, %v4671_v7  ;;  %5843 = vmatpush1.bf16.msra.mxu1 %v5842_v56  ;;  %5589 = vmatprep.subr.bf16.mxu0 %v5588_v57  ;;  %v2159_v52 = vld [vmem:[%s7426_s22 + $0x3bb8] sm:$0xff]  ;;  %v5602_v53 = vpack.c.bf16 %v2124_v45, %v2108_v44  ;;  %v2140_v56 = vld [vmem:[%s7426_s22 + $0x3b20] sm:$0xff] }
 0x252   : > { %4703 = vst [vmem:[%s8417_s10 + $0x18] sm:$0xff] %v4687_v14  ;;  %5845 = vmatprep.subr.bf16.mxu1 %v5844_v63  ;;  %v5858_v54 = vpack.c.bf16 %v2126_v48, %v2110_v46  ;;  %v5604_v55 = vpack.c.bf16 %v2157_v50, %v2141_v49  ;;  %v2156_v57 = vld [vmem:[%s7426_s22 + $0x3ba0] sm:$0xff]  ;;  %v5860_v59 = vpack.c.bf16 %v2159_v52, %v2143_v51  ;;  %v2189_v62 = vld [vmem:[%s7426_s22 + $0x3ca8] sm:$0xff]  ;;  %v2175_v63 = vld [vmem:[%s7426_s22 + $0x3c38] sm:$0xff] }
 0x253   : > { %v5606_v1 = vpack.c.bf16 %v2156_v57, %v2140_v56  ;;  %v5608_v4 = vpack.c.bf16 %v2189_v62, %v2173_v61  ;;  %v2188_v6 = vld [vmem:[%s7426_s22 + $0x3ca0] sm:$0xff]  ;;  %v2174_v7 = vld [vmem:[%s7426_s22 + $0x3c30] sm:$0xff]  ;;  %v5864_v8 = vpack.c.bf16 %v2191_v0, %v2175_v63  ;;  %v2205_v10 = vld [vmem:[%s7426_s22 + $0x3d28] sm:$0xff]  ;;  %v5616_v32 = vpack.c.bf16 %v2253_v27, %v2237_v26 }
 0x254   : > { %5591 = vmatpush1.bf16.msra.mxu0 %v5590_v12  ;;  %v2221_v11 = vld [vmem:[%s7426_s22 + $0x3da8] sm:$0xff]  ;;  %v2207_v12 = vld [vmem:[%s7426_s22 + $0x3d38] sm:$0xff]  ;;  %v2236_v33 = vld [vmem:[%s7426_s22 + $0x3e20] sm:$0xff] }
 0x255   : > { %5847 = vmatpush1.bf16.msra.mxu1 %v5846_v15  ;;  %5593 = vmatprep.subr.bf16.mxu0 %v5592_v16  ;;  %v2223_v14 = vld [vmem:[%s7426_s22 + $0x3db8] sm:$0xff]  ;;  %v5610_v15 = vpack.c.bf16 %v2188_v6, %v2172_v5  ;;  %v5866_v16 = vpack.c.bf16 %v2190_v9, %v2174_v7  ;;  %v5612_v17 = vpack.c.bf16 %v2221_v11, %v2205_v10  ;;  %v2252_v34 = vld [vmem:[%s7426_s22 + $0x3ea0] sm:$0xff]  ;;  %v2285_v39 = vld [vmem:[%s7426_s22 + $0x3fa8] sm:$0xff] }
 0x256   : > { %5849 = vmatprep.subr.bf16.mxu1 %v5848_v23  ;;  %v2206_v23 = vld [vmem:[%s7426_s22 + $0x3d30] sm:$0xff]  ;;  %v5868_v24 = vpack.c.bf16 %v2223_v14, %v2207_v12  ;;  %v2239_v28 = vld [vmem:[%s7426_s22 + $0x3e38] sm:$0xff]  ;;  %v5620_v44 = vpack.c.bf16 %v2285_v39, %v2269_v38  ;;  %v2268_v45 = vld [vmem:[%s7426_s22 + $0x3f20] sm:$0xff] }
 0x257   : > { %v2271_v40 = vld [vmem:[%s7426_s22 + $0x3f38] sm:$0xff]  ;;  %v2284_v46 = vld [vmem:[%s7426_s22 + $0x3fa0] sm:$0xff]  ;;  %v2286_v49 = vld [vmem:[%s7426_s22 + $0x3fb0] sm:$0xff] }
 0x258   : > { %5595 = vmatpush1.bf16.msra.mxu0 %v5594_v29  ;;  %v2255_v29 = vld [vmem:[%s7426_s22 + $0x3eb8] sm:$0xff]  ;;  %v257_v50 = vld [vmem:[%s7426_s22 + $0x48] sm:$0xff]  ;;  %v256_v57 = vld [vmem:[%s7426_s22 + $0x40] sm:$0xff] }
 0x259   : > { %5851 = vmatpush1.bf16.msra.mxu1 %v5850_v30  ;;  %5597 = vmatprep.subr.bf16.mxu0 %v5596_v31  ;;  %v5614_v30 = vpack.c.bf16 %v2220_v22, %v2204_v20  ;;  %v5870_v31 = vpack.c.bf16 %v2222_v25, %v2206_v23  ;;  %v5872_v36 = vpack.c.bf16 %v2255_v29, %v2239_v28  ;;  %v273_v51 = vld [vmem:[%s7426_s22 + $0xc8] sm:$0xff]  ;;  %v259_v52 = vld [vmem:[%s7426_s22 + $0x58] sm:$0xff]  ;;  %v274_v61 = vld [vmem:[%s7426_s22 + $0xd0] sm:$0xff] }
 0x25a   : > { %5853 = vmatprep.subr.bf16.mxu1 %v5852_v35  ;;  %v2238_v35 = vld [vmem:[%s7426_s22 + $0x3e30] sm:$0xff]  ;;  %v5880_v56 = vpack.c.bf16 %v273_v51, %v257_v50  ;;  %v289_v62 = vld [vmem:[%s7426_s22 + $0x148] sm:$0xff]  ;;  %v291_v0 = vld [vmem:[%s7426_s22 + $0x158] sm:$0xff] }
 0x25b   : > { %v305_v63 = vld [vmem:[%s7426_s22 + $0x1c8] sm:$0xff]  ;;  %v288_v6 = vld [vmem:[%s7426_s22 + $0x140] sm:$0xff]  ;;  %v306_v10 = vld [vmem:[%s7426_s22 + $0x1d0] sm:$0xff] }
 0x25c   : > { %5599 = vmatpush1.bf16.msra.mxu0 %v5598_v41  ;;  %v2287_v41 = vld [vmem:[%s7426_s22 + $0x3fb8] sm:$0xff]  ;;  %v5884_v5 = vpack.c.bf16 %v305_v63, %v289_v62  ;;  %v304_v7 = vld [vmem:[%s7426_s22 + $0x1c0] sm:$0xff]  ;;  %v321_v11 = vld [vmem:[%s7426_s22 + $0x248] sm:$0xff] }
 0x25d   : > { %5855 = vmatpush1.bf16.msra.mxu1 %v5854_v42  ;;  %5601 = vmatprep.subr.bf16.mxu0 %v5600_v43  ;;  %v5618_v42 = vpack.c.bf16 %v2252_v34, %v2236_v33  ;;  %v5874_v43 = vpack.c.bf16 %v2254_v37, %v2238_v35  ;;  %v5876_v48 = vpack.c.bf16 %v2287_v41, %v2271_v40  ;;  %v337_v12 = vld [vmem:[%s7426_s22 + $0x2c8] sm:$0xff]  ;;  %v7040_v14 = vld [vmem:[#allocation2 + $0x30] sm:$0xff]  ;;  %v320_v23 = vld [vmem:[%s7426_s22 + $0x240] sm:$0xff] }
 0x25e   : > { %5857 = vmatprep.subr.bf16.mxu1 %v5856_v47  ;;  %v2270_v47 = vld [vmem:[%s7426_s22 + $0x3f30] sm:$0xff]  ;;  %v5888_v22 = vpack.c.bf16 %v337_v12, %v321_v11  ;;  %v353_v28 = vld [vmem:[%s7426_s22 + $0x348] sm:$0xff]  ;;  %v368_v37 = vld [vmem:[%s7426_s22 + $0x3c0] sm:$0xff] }
 0x25f   : > { %v322_v25 = vld [vmem:[%s7426_s22 + $0x250] sm:$0xff]  ;;  %v369_v29 = vld [vmem:[%s7426_s22 + $0x3c8] sm:$0xff] }
 0x260   : > { %5603 = vmatpush1.bf16.msra.mxu0 %v5602_v53  ;;  %v275_v53 = vld [vmem:[%s7426_s22 + $0xd8] sm:$0xff]  ;;  %v338_v27 = vld [vmem:[%s7426_s22 + $0x2d0] sm:$0xff]  ;;  %v5892_v35 = vpack.c.bf16 %v369_v29, %v353_v28  ;;  %v385_v41 = vld [vmem:[%s7426_s22 + $0x448] sm:$0xff] }
 0x261   : > { %5859 = vmatpush1.bf16.msra.mxu1 %v5858_v54  ;;  %5605 = vmatprep.subr.bf16.mxu0 %v5604_v55  ;;  %v5622_v54 = vpack.c.bf16 %v2284_v46, %v2268_v45  ;;  %v5878_v55 = vpack.c.bf16 %v2286_v49, %v2270_v47  ;;  %v6136_v60 = vpack.c.bf16 %v275_v53, %v259_v52  ;;  %v354_v38 = vld [vmem:[%s7426_s22 + $0x350] sm:$0xff]  ;;  %v400_v49 = vld [vmem:[%s7426_s22 + $0x4c0] sm:$0xff]  ;;  %v417_v53 = vld [vmem:[%s7426_s22 + $0x548] sm:$0xff] }
 0x262   : > { %5861 = vmatprep.subr.bf16.mxu1 %v5860_v59  ;;  %v258_v59 = vld [vmem:[%s7426_s22 + $0x50] sm:$0xff]  ;;  %v6146_v34 = vpack.c.bf16 %v338_v27, %v322_v25  ;;  %v480_v25 = vld [vmem:[%s7426_s22 + $0x740] sm:$0xff] }
 0x263   : > { %v370_v40 = vld [vmem:[%s7426_s22 + $0x3d0] sm:$0xff] }
 0x264   : > { %5607 = vmatpush1.bf16.msra.mxu0 %v5606_v1  ;;  %v307_v1 = vld [vmem:[%s7426_s22 + $0x1d8] sm:$0xff]  ;;  %v6150_v46 = vpack.c.bf16 %v370_v40, %v354_v38  ;;  %v386_v50 = vld [vmem:[%s7426_s22 + $0x450] sm:$0xff]  ;;  %v528_v38 = vld [vmem:[%s7426_s22 + $0x8c0] sm:$0xff] }
 0x265   : > { %5863 = vmatpush1.bf16.msra.mxu1 %v5862_v3  ;;  %5609 = vmatprep.subr.bf16.mxu0 %v5608_v4  ;;  %v5882_v3 = vpack.c.bf16 %v272_v58, %v256_v57  ;;  %v6138_v4 = vpack.c.bf16 %v274_v61, %v258_v59  ;;  %v6140_v9 = vpack.c.bf16 %v307_v1, %v291_v0  ;;  %v402_v52 = vld [vmem:[%s7426_s22 + $0x4d0] sm:$0xff]  ;;  %v432_v61 = vld [vmem:[%s7426_s22 + $0x5c0] sm:$0xff]  ;;  %v449_v1 = vld [vmem:[%s7426_s22 + $0x648] sm:$0xff] }
 0x266   : > { %5865 = vmatprep.subr.bf16.mxu1 %v5864_v8  ;;  %v290_v8 = vld [vmem:[%s7426_s22 + $0x150] sm:$0xff]  ;;  %v6154_v58 = vpack.c.bf16 %v402_v52, %v386_v50  ;;  %v560_v50 = vld [vmem:[%s7426_s22 + $0x9c0] sm:$0xff] }
 0x267   : > { %v6142_v20 = vpack.c.bf16 %v306_v10, %v290_v8  ;;  %v418_v62 = vld [vmem:[%s7426_s22 + $0x550] sm:$0xff]  ;;  %v464_v10 = vld [vmem:[%s7426_s22 + $0x6c0] sm:$0xff] }
 0x268   : > { %5611 = vmatpush1.bf16.msra.mxu0 %v5610_v15  ;;  %v323_v15 = vld [vmem:[%s7426_s22 + $0x258] sm:$0xff]  ;;  %v434_v0 = vld [vmem:[%s7426_s22 + $0x5d0] sm:$0xff] }
 0x269   : > { %5867 = vmatpush1.bf16.msra.mxu1 %v5866_v16  ;;  %5613 = vmatprep.subr.bf16.mxu0 %v5612_v17  ;;  %v339_v16 = vld [vmem:[%s7426_s22 + $0x2d8] sm:$0xff]  ;;  %v5886_v17 = vpack.c.bf16 %v304_v7, %v288_v6  ;;  %v6158_v7 = vpack.c.bf16 %v434_v0, %v418_v62  ;;  %v450_v11 = vld [vmem:[%s7426_s22 + $0x650] sm:$0xff]  ;;  %v592_v62 = vld [vmem:[%s7426_s22 + $0xac0] sm:$0xff] }
 0x26a   : > { %5869 = vmatprep.subr.bf16.mxu1 %v5868_v24  ;;  %v336_v24 = vld [vmem:[%s7426_s22 + $0x2c0] sm:$0xff]  ;;  %v6144_v26 = vpack.c.bf16 %v339_v16, %v323_v15  ;;  %v481_v15 = vld [vmem:[%s7426_s22 + $0x748] sm:$0xff]  ;;  %v482_v27 = vld [vmem:[%s7426_s22 + $0x750] sm:$0xff] }
 0x26b   : > { %v5890_v33 = vpack.c.bf16 %v336_v24, %v320_v23  ;;  %v497_v16 = vld [vmem:[%s7426_s22 + $0x7c8] sm:$0xff]  ;;  %v498_v29 = vld [vmem:[%s7426_s22 + $0x7d0] sm:$0xff] }
 0x26c   : > { %5615 = vmatpush1.bf16.msra.mxu0 %v5614_v30  ;;  %v7041_v30 = vld [vmem:[#allocation2 + $0x8] sm:$0xff]  ;;  %v5908_v24 = vpack.c.bf16 %v497_v16, %v481_v15  ;;  %v626_v15 = vld [vmem:[%s7426_s22 + $0xbd0] sm:$0xff] }
 0x26d   : > { %5871 = vmatpush1.bf16.msra.mxu1 %v5870_v31  ;;  %5617 = vmatprep.subr.bf16.mxu0 %v5616_v32  ;;  %v355_v31 = vld [vmem:[%s7426_s22 + $0x358] sm:$0xff]  ;;  %v641_v16 = vld [vmem:[%s7426_s22 + $0xc48] sm:$0xff] }
 0x26e   : > { %5873 = vmatprep.subr.bf16.mxu1 %v5872_v36  ;;  %v371_v32 = vld [vmem:[%s7426_s22 + $0x3d8] sm:$0xff]  ;;  %v352_v36 = vld [vmem:[%s7426_s22 + $0x340] sm:$0xff] }
 0x26f   : > { %v6148_v39 = vpack.c.bf16 %v371_v32, %v355_v31  ;;  %v5894_v45 = vpack.c.bf16 %v368_v37, %v352_v36  ;;  %v529_v31 = vld [vmem:[%s7426_s22 + $0x8c8] sm:$0xff]  ;;  %v515_v32 = vld [vmem:[%s7426_s22 + $0x858] sm:$0xff]  ;;  %v512_v37 = vld [vmem:[%s7426_s22 + $0x840] sm:$0xff] }
 0x270   : > { %5619 = vmatpush1.bf16.msra.mxu0 %v5618_v42  ;;  %v401_v42 = vld [vmem:[%s7426_s22 + $0x4c8] sm:$0xff] }
 0x271   : > { %5875 = vmatpush1.bf16.msra.mxu1 %v5874_v43  ;;  %5621 = vmatprep.subr.bf16.mxu0 %v5620_v44  ;;  %v387_v43 = vld [vmem:[%s7426_s22 + $0x458] sm:$0xff]  ;;  %v5896_v47 = vpack.c.bf16 %v401_v42, %v385_v41  ;;  %v530_v41 = vld [vmem:[%s7426_s22 + $0x8d0] sm:$0xff]  ;;  %v545_v42 = vld [vmem:[%s7426_s22 + $0x948] sm:$0xff] }
 0x272   : > { %5877 = vmatprep.subr.bf16.mxu1 %v5876_v48  ;;  %v403_v44 = vld [vmem:[%s7426_s22 + $0x4d8] sm:$0xff]  ;;  %v384_v48 = vld [vmem:[%s7426_s22 + $0x440] sm:$0xff] }
 0x273   : > { %v6152_v51 = vpack.c.bf16 %v403_v44, %v387_v43  ;;  %v5898_v57 = vpack.c.bf16 %v400_v49, %v384_v48  ;;  %v561_v43 = vld [vmem:[%s7426_s22 + $0x9c8] sm:$0xff]  ;;  %v547_v44 = vld [vmem:[%s7426_s22 + $0x958] sm:$0xff]  ;;  %v544_v49 = vld [vmem:[%s7426_s22 + $0x940] sm:$0xff] }
 0x274   : > { %5623 = vmatpush1.bf16.msra.mxu0 %v5622_v54  ;;  %v433_v54 = vld [vmem:[%s7426_s22 + $0x5c8] sm:$0xff]  ;;  %v5916_v48 = vpack.c.bf16 %v561_v43, %v545_v42  ;;  %v690_v42 = vld [vmem:[%s7426_s22 + $0xdd0] sm:$0xff] }
 0x275   : > { %5879 = vmatpush1.bf16.msra.mxu1 %v5878_v55  ;;  %5881 = vmatprep.subr.bf16.mxu0 %v5880_v56  ;;  %v419_v55 = vld [vmem:[%s7426_s22 + $0x558] sm:$0xff]  ;;  %v5900_v59 = vpack.c.bf16 %v433_v54, %v417_v53  ;;  %v562_v53 = vld [vmem:[%s7426_s22 + $0x9d0] sm:$0xff]  ;;  %v577_v54 = vld [vmem:[%s7426_s22 + $0xa48] sm:$0xff] }
 0x276   : > { %6137 = vmatprep.subr.bf16.mxu1 %v6136_v60  ;;  %v435_v56 = vld [vmem:[%s7426_s22 + $0x5d8] sm:$0xff]  ;;  %v416_v60 = vld [vmem:[%s7426_s22 + $0x540] sm:$0xff]  ;;  %v705_v43 = vld [vmem:[%s7426_s22 + $0xe48] sm:$0xff] }
 0x277   : > { %3226 = vmatmul.mubr.f32.vlgmr.msra.gmra.mrb[2].mxu0 %v7040_v14  ;;  %v6156_v63 = vpack.c.bf16 %v435_v56, %v419_v55  ;;  %v5902_v6 = vpack.c.bf16 %v432_v61, %v416_v60  ;;  %v593_v55 = vld [vmem:[%s7426_s22 + $0xac8] sm:$0xff]  ;;  %v579_v56 = vld [vmem:[%s7426_s22 + $0xa58] sm:$0xff]  ;;  %v576_v61 = vld [vmem:[%s7426_s22 + $0xa40] sm:$0xff] }
 0x278   : > { %3510 = vmatmul.mubr.f32.vlgmr.msra.gmra.mrb[2].mxu1 %v7040_v14  ;;  %5883 = vmatpush1.bf16.msra.mxu0 %v5882_v3  ;;  %v465_v3 = vld [vmem:[%s7426_s22 + $0x6c8] sm:$0xff]  ;;  %v466_v14 = vld [vmem:[%s7426_s22 + $0x6d0] sm:$0xff]  ;;  %v5920_v60 = vpack.c.bf16 %v593_v55, %v577_v54 }
 0x279   : > { %6139 = vmatpush1.bf16.msra.mxu1 %v6138_v4  ;;  %5885 = vmatprep.subr.bf16.mxu0 %v5884_v5  ;;  %v451_v4 = vld [vmem:[%s7426_s22 + $0x658] sm:$0xff]  ;;  %v5904_v8 = vpack.c.bf16 %v465_v3, %v449_v1  ;;  %v6162_v23 = vpack.c.bf16 %v466_v14, %v450_v11  ;;  %v594_v1 = vld [vmem:[%s7426_s22 + $0xad0] sm:$0xff]  ;;  %v609_v3 = vld [vmem:[%s7426_s22 + $0xb48] sm:$0xff] }
 0x27a   : > { %6141 = vmatprep.subr.bf16.mxu1 %v6140_v9  ;;  %3580 = vmatprep.mubr.f32.mxu0 %v7041_v30  ;;  %v467_v5 = vld [vmem:[%s7426_s22 + $0x6d8] sm:$0xff]  ;;  %v448_v9 = vld [vmem:[%s7426_s22 + $0x640] sm:$0xff]  ;;  %v722_v54 = vld [vmem:[%s7426_s22 + $0xed0] sm:$0xff] }
 0x27b   : > { %3864 = vmatprep.mubr.f32.mxu1 %v7041_v30  ;;  %v6160_v12 = vpack.c.bf16 %v467_v5, %v451_v4  ;;  %v513_v30 = vld [vmem:[%s7426_s22 + $0x848] sm:$0xff]  ;;  %v611_v5 = vld [vmem:[%s7426_s22 + $0xb58] sm:$0xff]  ;;  %v624_v11 = vld [vmem:[%s7426_s22 + $0xbc0] sm:$0xff] }
 0x27c   : > { %5887 = vmatpush1.bf16.msra.mxu0 %v5886_v17  ;;  %v483_v17 = vld [vmem:[%s7426_s22 + $0x758] sm:$0xff]  ;;  %v5912_v36 = vpack.c.bf16 %v529_v31, %v513_v30  ;;  %v625_v4 = vld [vmem:[%s7426_s22 + $0xbc8] sm:$0xff]  ;;  %v658_v30 = vld [vmem:[%s7426_s22 + $0xcd0] sm:$0xff] }
 0x27d   : > { %6143 = vmatpush1.bf16.msra.mxu1 %v6142_v20  ;;  %5889 = vmatprep.subr.bf16.mxu0 %v5888_v22  ;;  %v499_v20 = vld [vmem:[%s7426_s22 + $0x7d8] sm:$0xff]  ;;  %v5906_v22 = vpack.c.bf16 %v464_v10, %v448_v9  ;;  %v5924_v9 = vpack.c.bf16 %v625_v4, %v609_v3  ;;  %v608_v10 = vld [vmem:[%s7426_s22 + $0xb40] sm:$0xff]  ;;  %v673_v31 = vld [vmem:[%s7426_s22 + $0xd48] sm:$0xff] }
 0x27e   : > { %6145 = vmatprep.subr.bf16.mxu1 %v6144_v26  ;;  %v496_v26 = vld [vmem:[%s7426_s22 + $0x7c0] sm:$0xff]  ;;  %v6164_v28 = vpack.c.bf16 %v499_v20, %v483_v17  ;;  %v657_v17 = vld [vmem:[%s7426_s22 + $0xcc8] sm:$0xff]  ;;  %v643_v20 = vld [vmem:[%s7426_s22 + $0xc58] sm:$0xff] }
 0x27f   : > { %v737_v55 = vld [vmem:[%s7426_s22 + $0xf48] sm:$0xff]  ;;  %v754_v3 = vld [vmem:[%s7426_s22 + $0xfd0] sm:$0xff] }
 0x280   : > { %5891 = vmatpush1.bf16.msra.mxu0 %v5890_v33  ;;  %v531_v33 = vld [vmem:[%s7426_s22 + $0x8d8] sm:$0xff]  ;;  %v769_v4 = vld [vmem:[%s7426_s22 + $0x1048] sm:$0xff] }
 0x281   : > { %6147 = vmatpush1.bf16.msra.mxu1 %v6146_v34  ;;  %5893 = vmatprep.subr.bf16.mxu0 %v5892_v35  ;;  %v5910_v34 = vpack.c.bf16 %v496_v26, %v480_v25  ;;  %v6166_v35 = vpack.c.bf16 %v498_v29, %v482_v27  ;;  %v6168_v40 = vpack.c.bf16 %v531_v33, %v515_v32  ;;  %v640_v26 = vld [vmem:[%s7426_s22 + $0xc40] sm:$0xff]  ;;  %v689_v32 = vld [vmem:[%s7426_s22 + $0xdc8] sm:$0xff]  ;;  %v675_v33 = vld [vmem:[%s7426_s22 + $0xd58] sm:$0xff] }
 0x282   : > { %6149 = vmatprep.subr.bf16.mxu1 %v6148_v39  ;;  %v514_v39 = vld [vmem:[%s7426_s22 + $0x850] sm:$0xff]  ;;  %v5928_v25 = vpack.c.bf16 %v657_v17, %v641_v16  ;;  %v656_v27 = vld [vmem:[%s7426_s22 + $0xcc0] sm:$0xff]  ;;  %v801_v17 = vld [vmem:[%s7426_s22 + $0x1148] sm:$0xff] }
 0x283   : > { %v786_v16 = vld [vmem:[%s7426_s22 + $0x10d0] sm:$0xff] }
 0x284   : > { %5895 = vmatpush1.bf16.msra.mxu0 %v5894_v45  ;;  %v563_v45 = vld [vmem:[%s7426_s22 + $0x9d8] sm:$0xff] }
 0x285   : > { %6151 = vmatpush1.bf16.msra.mxu1 %v6150_v46  ;;  %5897 = vmatprep.subr.bf16.mxu0 %v5896_v47  ;;  %v5914_v46 = vpack.c.bf16 %v528_v38, %v512_v37  ;;  %v6170_v47 = vpack.c.bf16 %v530_v41, %v514_v39  ;;  %v6172_v52 = vpack.c.bf16 %v563_v45, %v547_v44  ;;  %v672_v38 = vld [vmem:[%s7426_s22 + $0xd40] sm:$0xff]  ;;  %v721_v44 = vld [vmem:[%s7426_s22 + $0xec8] sm:$0xff]  ;;  %v707_v45 = vld [vmem:[%s7426_s22 + $0xe58] sm:$0xff] }
 0x286   : > { %6153 = vmatprep.subr.bf16.mxu1 %v6152_v51  ;;  %v546_v51 = vld [vmem:[%s7426_s22 + $0x950] sm:$0xff]  ;;  %v5932_v37 = vpack.c.bf16 %v689_v32, %v673_v31  ;;  %v688_v39 = vld [vmem:[%s7426_s22 + $0xdc0] sm:$0xff]  ;;  %v833_v32 = vld [vmem:[%s7426_s22 + $0x1248] sm:$0xff] }
 0x287   : > { %v818_v31 = vld [vmem:[%s7426_s22 + $0x11d0] sm:$0xff] }
 0x288   : > { %5899 = vmatpush1.bf16.msra.mxu0 %v5898_v57  ;;  %v595_v57 = vld [vmem:[%s7426_s22 + $0xad8] sm:$0xff] }
 0x289   : > { %6155 = vmatpush1.bf16.msra.mxu1 %v6154_v58  ;;  %5901 = vmatprep.subr.bf16.mxu0 %v5900_v59  ;;  %v5918_v58 = vpack.c.bf16 %v560_v50, %v544_v49  ;;  %v6174_v59 = vpack.c.bf16 %v562_v53, %v546_v51  ;;  %v6176_v0 = vpack.c.bf16 %v595_v57, %v579_v56  ;;  %v704_v50 = vld [vmem:[%s7426_s22 + $0xe40] sm:$0xff]  ;;  %v753_v56 = vld [vmem:[%s7426_s22 + $0xfc8] sm:$0xff]  ;;  %v739_v57 = vld [vmem:[%s7426_s22 + $0xf58] sm:$0xff] }
 0x28a   : > { %6157 = vmatprep.subr.bf16.mxu1 %v6156_v63  ;;  %v578_v63 = vld [vmem:[%s7426_s22 + $0xa50] sm:$0xff]  ;;  %v5936_v49 = vpack.c.bf16 %v721_v44, %v705_v43  ;;  %v720_v51 = vld [vmem:[%s7426_s22 + $0xec0] sm:$0xff] }
 0x28b   : > { %v850_v44 = vld [vmem:[%s7426_s22 + $0x12d0] sm:$0xff] }
 0x28c   : > { %5903 = vmatpush1.bf16.msra.mxu0 %v5902_v6  ;;  %v627_v6 = vld [vmem:[%s7426_s22 + $0xbd8] sm:$0xff] }
 0x28d   : > { %6159 = vmatpush1.bf16.msra.mxu1 %v6158_v7  ;;  %5905 = vmatprep.subr.bf16.mxu0 %v5904_v8  ;;  %v5922_v7 = vpack.c.bf16 %v592_v62, %v576_v61  ;;  %v6178_v8 = vpack.c.bf16 %v594_v1, %v578_v63  ;;  %v6180_v14 = vpack.c.bf16 %v627_v6, %v611_v5  ;;  %v736_v62 = vld [vmem:[%s7426_s22 + $0xf40] sm:$0xff]  ;;  %v785_v5 = vld [vmem:[%s7426_s22 + $0x10c8] sm:$0xff]  ;;  %v771_v6 = vld [vmem:[%s7426_s22 + $0x1058] sm:$0xff] }
 0x28e   : > { %6161 = vmatprep.subr.bf16.mxu1 %v6160_v12  ;;  %v610_v12 = vld [vmem:[%s7426_s22 + $0xb50] sm:$0xff]  ;;  %v5940_v61 = vpack.c.bf16 %v753_v56, %v737_v55  ;;  %v752_v63 = vld [vmem:[%s7426_s22 + $0xfc0] sm:$0xff] }
 0x28f   : > { %v866_v55 = vld [vmem:[%s7426_s22 + $0x1350] sm:$0xff] }
 0x290   : > { %5907 = vmatpush1.bf16.msra.mxu0 %v5906_v22  ;;  %v659_v22 = vld [vmem:[%s7426_s22 + $0xcd8] sm:$0xff] }
 0x291   : > { %6163 = vmatpush1.bf16.msra.mxu1 %v6162_v23  ;;  %5909 = vmatprep.subr.bf16.mxu0 %v5908_v24  ;;  %v5926_v23 = vpack.c.bf16 %v624_v11, %v608_v10  ;;  %v6182_v24 = vpack.c.bf16 %v626_v15, %v610_v12  ;;  %v6184_v29 = vpack.c.bf16 %v659_v22, %v643_v20  ;;  %v768_v11 = vld [vmem:[%s7426_s22 + $0x1040] sm:$0xff]  ;;  %v817_v20 = vld [vmem:[%s7426_s22 + $0x11c8] sm:$0xff]  ;;  %v803_v22 = vld [vmem:[%s7426_s22 + $0x1158] sm:$0xff] }
 0x292   : > { %6165 = vmatprep.subr.bf16.mxu1 %v6164_v28  ;;  %v642_v28 = vld [vmem:[%s7426_s22 + $0xc50] sm:$0xff]  ;;  %v5944_v10 = vpack.c.bf16 %v785_v5, %v769_v4  ;;  %v784_v12 = vld [vmem:[%s7426_s22 + $0x10c0] sm:$0xff] }
 0x293   : > { %v898_v4 = vld [vmem:[%s7426_s22 + $0x1450] sm:$0xff] }
 0x294   : > { %5911 = vmatpush1.bf16.msra.mxu0 %v5910_v34  ;;  %v691_v34 = vld [vmem:[%s7426_s22 + $0xdd8] sm:$0xff] }
 0x295   : > { %6167 = vmatpush1.bf16.msra.mxu1 %v6166_v35  ;;  %5913 = vmatprep.subr.bf16.mxu0 %v5912_v36  ;;  %v5930_v35 = vpack.c.bf16 %v656_v27, %v640_v26  ;;  %v6186_v36 = vpack.c.bf16 %v658_v30, %v642_v28  ;;  %v6188_v41 = vpack.c.bf16 %v691_v34, %v675_v33  ;;  %v800_v27 = vld [vmem:[%s7426_s22 + $0x1140] sm:$0xff]  ;;  %v849_v33 = vld [vmem:[%s7426_s22 + $0x12c8] sm:$0xff] }
 0x296   : > { %6169 = vmatprep.subr.bf16.mxu1 %v6168_v40  ;;  %v674_v40 = vld [vmem:[%s7426_s22 + $0xd50] sm:$0xff]  ;;  %v5948_v26 = vpack.c.bf16 %v817_v20, %v801_v17  ;;  %v816_v28 = vld [vmem:[%s7426_s22 + $0x11c0] sm:$0xff] }
 0x297   : > { %v7042_v34 = vld [vmem:[#allocation2] sm:$0xff]  ;;  %v930_v17 = vld [vmem:[%s7426_s22 + $0x1550] sm:$0xff] }
 0x298   : > { %5915 = vmatpush1.bf16.msra.mxu0 %v5914_v46  ;;  %v723_v46 = vld [vmem:[%s7426_s22 + $0xed8] sm:$0xff] }
 0x299   : > { %6171 = vmatpush1.bf16.msra.mxu1 %v6170_v47  ;;  %5917 = vmatprep.subr.bf16.mxu0 %v5916_v48  ;;  %v5934_v47 = vpack.c.bf16 %v688_v39, %v672_v38  ;;  %v6190_v48 = vpack.c.bf16 %v690_v42, %v674_v40  ;;  %v6192_v53 = vpack.c.bf16 %v723_v46, %v707_v45  ;;  %v832_v40 = vld [vmem:[%s7426_s22 + $0x1240] sm:$0xff]  ;;  %v834_v42 = vld [vmem:[%s7426_s22 + $0x1250] sm:$0xff]  ;;  %v865_v45 = vld [vmem:[%s7426_s22 + $0x1348] sm:$0xff] }
 0x29a   : > { %6173 = vmatprep.subr.bf16.mxu1 %v6172_v52  ;;  %v706_v52 = vld [vmem:[%s7426_s22 + $0xe50] sm:$0xff]  ;;  %v5952_v39 = vpack.c.bf16 %v849_v33, %v833_v32  ;;  %v881_v46 = vld [vmem:[%s7426_s22 + $0x13c8] sm:$0xff] }
 0x29b   : > { %v962_v32 = vld [vmem:[%s7426_s22 + $0x1650] sm:$0xff] }
 0x29c   : > { %5919 = vmatpush1.bf16.msra.mxu0 %v5918_v58  ;;  %v755_v58 = vld [vmem:[%s7426_s22 + $0xfd8] sm:$0xff] }
 0x29d   : > { %6175 = vmatpush1.bf16.msra.mxu1 %v6174_v59  ;;  %5921 = vmatprep.subr.bf16.mxu0 %v5920_v60  ;;  %v5938_v59 = vpack.c.bf16 %v720_v51, %v704_v50  ;;  %v6194_v60 = vpack.c.bf16 %v722_v54, %v706_v52  ;;  %v6196_v1 = vpack.c.bf16 %v755_v58, %v739_v57  ;;  %v880_v54 = vld [vmem:[%s7426_s22 + $0x13c0] sm:$0xff]  ;;  %v882_v57 = vld [vmem:[%s7426_s22 + $0x13d0] sm:$0xff]  ;;  %v897_v58 = vld [vmem:[%s7426_s22 + $0x1448] sm:$0xff] }
 0x29e   : > { %6177 = vmatprep.subr.bf16.mxu1 %v6176_v0  ;;  %v738_v0 = vld [vmem:[%s7426_s22 + $0xf50] sm:$0xff]  ;;  %v6210_v51 = vpack.c.bf16 %v850_v44, %v834_v42  ;;  %v5956_v52 = vpack.c.bf16 %v881_v46, %v865_v45  ;;  %v992_v42 = vld [vmem:[%s7426_s22 + $0x1740] sm:$0xff] }
 0x29f   : > { %v994_v44 = vld [vmem:[%s7426_s22 + $0x1750] sm:$0xff] }
 0x2a0   : > { %5923 = vmatpush1.bf16.msra.mxu0 %v5922_v7  ;;  %v787_v7 = vld [vmem:[%s7426_s22 + $0x10d8] sm:$0xff]  ;;  %v1010_v46 = vld [vmem:[%s7426_s22 + $0x17d0] sm:$0xff] }
 0x2a1   : > { %6179 = vmatpush1.bf16.msra.mxu1 %v6178_v8  ;;  %5925 = vmatprep.subr.bf16.mxu0 %v5924_v9  ;;  %v5942_v8 = vpack.c.bf16 %v752_v63, %v736_v62  ;;  %v6198_v9 = vpack.c.bf16 %v754_v3, %v738_v0  ;;  %v6200_v15 = vpack.c.bf16 %v787_v7, %v771_v6  ;;  %v912_v3 = vld [vmem:[%s7426_s22 + $0x14c0] sm:$0xff]  ;;  %v914_v6 = vld [vmem:[%s7426_s22 + $0x14d0] sm:$0xff]  ;;  %v929_v7 = vld [vmem:[%s7426_s22 + $0x1548] sm:$0xff] }
 0x2a2   : > { %6181 = vmatprep.subr.bf16.mxu1 %v6180_v14  ;;  %v770_v14 = vld [vmem:[%s7426_s22 + $0x1050] sm:$0xff]  ;;  %v6214_v63 = vpack.c.bf16 %v882_v57, %v866_v55  ;;  %v1040_v55 = vld [vmem:[%s7426_s22 + $0x18c0] sm:$0xff] }
 0x2a4   : > { %5927 = vmatpush1.bf16.msra.mxu0 %v5926_v23  ;;  %v819_v23 = vld [vmem:[%s7426_s22 + $0x11d8] sm:$0xff] }
 0x2a5   : > { %6183 = vmatpush1.bf16.msra.mxu1 %v6182_v24  ;;  %5929 = vmatprep.subr.bf16.mxu0 %v5928_v25  ;;  %v5946_v24 = vpack.c.bf16 %v784_v12, %v768_v11  ;;  %v6202_v25 = vpack.c.bf16 %v786_v16, %v770_v14  ;;  %v6204_v30 = vpack.c.bf16 %v819_v23, %v803_v22  ;;  %v944_v16 = vld [vmem:[%s7426_s22 + $0x15c0] sm:$0xff]  ;;  %v946_v22 = vld [vmem:[%s7426_s22 + $0x15d0] sm:$0xff]  ;;  %v961_v23 = vld [vmem:[%s7426_s22 + $0x1648] sm:$0xff] }
 0x2a6   : > { %6185 = vmatprep.subr.bf16.mxu1 %v6184_v29  ;;  %v802_v29 = vld [vmem:[%s7426_s22 + $0x1150] sm:$0xff]  ;;  %v6218_v12 = vpack.c.bf16 %v914_v6, %v898_v4  ;;  %v1072_v4 = vld [vmem:[%s7426_s22 + $0x19c0] sm:$0xff] }
 0x2a7   : > { %v6206_v38 = vpack.c.bf16 %v818_v31, %v802_v29  ;;  %v976_v31 = vld [vmem:[%s7426_s22 + $0x16c0] sm:$0xff] }
 0x2a8   : > { %5931 = vmatpush1.bf16.msra.mxu0 %v5930_v35  ;;  %v835_v35 = vld [vmem:[%s7426_s22 + $0x1258] sm:$0xff] }
 0x2a9   : > { %6187 = vmatpush1.bf16.msra.mxu1 %v6186_v36  ;;  %5933 = vmatprep.subr.bf16.mxu0 %v5932_v37  ;;  %v851_v36 = vld [vmem:[%s7426_s22 + $0x12d8] sm:$0xff]  ;;  %v5950_v37 = vpack.c.bf16 %v816_v28, %v800_v27  ;;  %v6222_v28 = vpack.c.bf16 %v946_v22, %v930_v17  ;;  %v1104_v17 = vld [vmem:[%s7426_s22 + $0x1ac0] sm:$0xff] }
 0x2aa   : > { %6189 = vmatprep.subr.bf16.mxu1 %v6188_v41  ;;  %v848_v41 = vld [vmem:[%s7426_s22 + $0x12c0] sm:$0xff]  ;;  %v6208_v43 = vpack.c.bf16 %v851_v36, %v835_v35  ;;  %v993_v35 = vld [vmem:[%s7426_s22 + $0x1748] sm:$0xff] }
 0x2ab   : > { %v5954_v50 = vpack.c.bf16 %v848_v41, %v832_v40  ;;  %v1009_v36 = vld [vmem:[%s7426_s22 + $0x17c8] sm:$0xff] }
 0x2ac   : > { %5935 = vmatpush1.bf16.msra.mxu0 %v5934_v47  ;;  %v7043_v47 = vld [vmem:[#allocation2 + $0x18] sm:$0xff]  ;;  %v5972_v41 = vpack.c.bf16 %v1009_v36, %v993_v35  ;;  %v1138_v35 = vld [vmem:[%s7426_s22 + $0x1bd0] sm:$0xff]  ;;  %v1153_v36 = vld [vmem:[%s7426_s22 + $0x1c48] sm:$0xff] }
 0x2ad   : > { %6191 = vmatpush1.bf16.msra.mxu1 %v6190_v48  ;;  %5937 = vmatprep.subr.bf16.mxu0 %v5936_v49  ;;  %v867_v48 = vld [vmem:[%s7426_s22 + $0x1358] sm:$0xff] }
 0x2ae   : > { %6193 = vmatprep.subr.bf16.mxu1 %v6192_v53  ;;  %v883_v49 = vld [vmem:[%s7426_s22 + $0x13d8] sm:$0xff]  ;;  %v864_v53 = vld [vmem:[%s7426_s22 + $0x1340] sm:$0xff] }
 0x2af   : > { %v6212_v56 = vpack.c.bf16 %v883_v49, %v867_v48  ;;  %v5958_v62 = vpack.c.bf16 %v880_v54, %v864_v53  ;;  %v1041_v48 = vld [vmem:[%s7426_s22 + $0x18c8] sm:$0xff]  ;;  %v1027_v49 = vld [vmem:[%s7426_s22 + $0x1858] sm:$0xff]  ;;  %v1024_v54 = vld [vmem:[%s7426_s22 + $0x1840] sm:$0xff] }
 0x2b0   : > { %5939 = vmatpush1.bf16.msra.mxu0 %v5938_v59  ;;  %v913_v59 = vld [vmem:[%s7426_s22 + $0x14c8] sm:$0xff] }
 0x2b1   : > { %6195 = vmatpush1.bf16.msra.mxu1 %v6194_v60  ;;  %5941 = vmatprep.subr.bf16.mxu0 %v5940_v61  ;;  %v899_v60 = vld [vmem:[%s7426_s22 + $0x1458] sm:$0xff]  ;;  %v5960_v0 = vpack.c.bf16 %v913_v59, %v897_v58  ;;  %v1042_v58 = vld [vmem:[%s7426_s22 + $0x18d0] sm:$0xff]  ;;  %v1057_v59 = vld [vmem:[%s7426_s22 + $0x1948] sm:$0xff] }
 0x2b2   : > { %6197 = vmatprep.subr.bf16.mxu1 %v6196_v1  ;;  %v915_v61 = vld [vmem:[%s7426_s22 + $0x14d8] sm:$0xff]  ;;  %v896_v1 = vld [vmem:[%s7426_s22 + $0x1440] sm:$0xff] }
 0x2b3   : > { %v6216_v5 = vpack.c.bf16 %v915_v61, %v899_v60  ;;  %v5962_v11 = vpack.c.bf16 %v912_v3, %v896_v1  ;;  %v1073_v60 = vld [vmem:[%s7426_s22 + $0x19c8] sm:$0xff]  ;;  %v1059_v61 = vld [vmem:[%s7426_s22 + $0x1958] sm:$0xff]  ;;  %v1056_v3 = vld [vmem:[%s7426_s22 + $0x1940] sm:$0xff] }
 0x2b4   : > { %5943 = vmatpush1.bf16.msra.mxu0 %v5942_v8  ;;  %v945_v8 = vld [vmem:[%s7426_s22 + $0x15c8] sm:$0xff]  ;;  %v5980_v1 = vpack.c.bf16 %v1073_v60, %v1057_v59  ;;  %v1202_v59 = vld [vmem:[%s7426_s22 + $0x1dd0] sm:$0xff] }
 0x2b5   : > { %6199 = vmatpush1.bf16.msra.mxu1 %v6198_v9  ;;  %5945 = vmatprep.subr.bf16.mxu0 %v5944_v10  ;;  %v931_v9 = vld [vmem:[%s7426_s22 + $0x1558] sm:$0xff]  ;;  %v5964_v14 = vpack.c.bf16 %v945_v8, %v929_v7  ;;  %v1074_v7 = vld [vmem:[%s7426_s22 + $0x19d0] sm:$0xff]  ;;  %v1089_v8 = vld [vmem:[%s7426_s22 + $0x1a48] sm:$0xff] }
 0x2b6   : > { %6201 = vmatprep.subr.bf16.mxu1 %v6200_v15  ;;  %v947_v10 = vld [vmem:[%s7426_s22 + $0x15d8] sm:$0xff]  ;;  %v928_v15 = vld [vmem:[%s7426_s22 + $0x1540] sm:$0xff]  ;;  %v1217_v60 = vld [vmem:[%s7426_s22 + $0x1e48] sm:$0xff] }
 0x2b7   : > { %3581 = vmatmul.mubr.f32.vlgmr.msra.gmra.mrb[4].mxu0 %v7042_v34  ;;  %v6220_v20 = vpack.c.bf16 %v947_v10, %v931_v9  ;;  %v5966_v27 = vpack.c.bf16 %v944_v16, %v928_v15  ;;  %v1105_v9 = vld [vmem:[%s7426_s22 + $0x1ac8] sm:$0xff]  ;;  %v1091_v10 = vld [vmem:[%s7426_s22 + $0x1a58] sm:$0xff]  ;;  %v1088_v16 = vld [vmem:[%s7426_s22 + $0x1a40] sm:$0xff] }
 0x2b8   : > { %5947 = vmatpush1.bf16.msra.mxu0 %v5946_v24  ;;  %3865 = vmatmul.mubr.f32.vlgmr.msra.gmra.mrb[4].mxu1 %v7042_v34  ;;  %v977_v24 = vld [vmem:[%s7426_s22 + $0x16c8] sm:$0xff]  ;;  %v978_v34 = vld [vmem:[%s7426_s22 + $0x16d0] sm:$0xff]  ;;  %v5984_v15 = vpack.c.bf16 %v1105_v9, %v1089_v8 }
 0x2b9   : > { %6203 = vmatpush1.bf16.msra.mxu1 %v6202_v25  ;;  %5949 = vmatprep.subr.bf16.mxu0 %v5948_v26  ;;  %v963_v25 = vld [vmem:[%s7426_s22 + $0x1658] sm:$0xff]  ;;  %v5968_v29 = vpack.c.bf16 %v977_v24, %v961_v23  ;;  %v6226_v40 = vpack.c.bf16 %v978_v34, %v962_v32  ;;  %v1106_v23 = vld [vmem:[%s7426_s22 + $0x1ad0] sm:$0xff]  ;;  %v1121_v24 = vld [vmem:[%s7426_s22 + $0x1b48] sm:$0xff] }
 0x2ba   : > { %6205 = vmatprep.subr.bf16.mxu1 %v6204_v30  ;;  %3651 = vmatprep.mubr.f32.mxu0 %v7043_v47  ;;  %v979_v26 = vld [vmem:[%s7426_s22 + $0x16d8] sm:$0xff]  ;;  %v960_v30 = vld [vmem:[%s7426_s22 + $0x1640] sm:$0xff]  ;;  %v1234_v8 = vld [vmem:[%s7426_s22 + $0x1ed0] sm:$0xff] }
 0x2bb   : > { %3935 = vmatprep.mubr.f32.mxu1 %v7043_v47  ;;  %v6224_v33 = vpack.c.bf16 %v979_v26, %v963_v25  ;;  %v1025_v47 = vld [vmem:[%s7426_s22 + $0x1848] sm:$0xff]  ;;  %v1123_v26 = vld [vmem:[%s7426_s22 + $0x1b58] sm:$0xff]  ;;  %v1136_v32 = vld [vmem:[%s7426_s22 + $0x1bc0] sm:$0xff] }
 0x2bc   : > { %5951 = vmatpush1.bf16.msra.mxu0 %v5950_v37  ;;  %v995_v37 = vld [vmem:[%s7426_s22 + $0x1758] sm:$0xff]  ;;  %v5976_v53 = vpack.c.bf16 %v1041_v48, %v1025_v47  ;;  %v1137_v25 = vld [vmem:[%s7426_s22 + $0x1bc8] sm:$0xff]  ;;  %v1170_v47 = vld [vmem:[%s7426_s22 + $0x1cd0] sm:$0xff] }
 0x2bd   : > { %6207 = vmatpush1.bf16.msra.mxu1 %v6206_v38  ;;  %5953 = vmatprep.subr.bf16.mxu0 %v5952_v39  ;;  %v1011_v38 = vld [vmem:[%s7426_s22 + $0x17d8] sm:$0xff]  ;;  %v5970_v39 = vpack.c.bf16 %v976_v31, %v960_v30  ;;  %v5988_v30 = vpack.c.bf16 %v1137_v25, %v1121_v24  ;;  %v1120_v31 = vld [vmem:[%s7426_s22 + $0x1b40] sm:$0xff]  ;;  %v1185_v48 = vld [vmem:[%s7426_s22 + $0x1d48] sm:$0xff] }
 0x2be   : > { %6209 = vmatprep.subr.bf16.mxu1 %v6208_v43  ;;  %v1008_v43 = vld [vmem:[%s7426_s22 + $0x17c0] sm:$0xff]  ;;  %v6228_v45 = vpack.c.bf16 %v1011_v38, %v995_v37  ;;  %v1169_v37 = vld [vmem:[%s7426_s22 + $0x1cc8] sm:$0xff]  ;;  %v1155_v38 = vld [vmem:[%s7426_s22 + $0x1c58] sm:$0xff] }
 0x2bf   : > { %v1249_v9 = vld [vmem:[%s7426_s22 + $0x1f48] sm:$0xff]  ;;  %v1266_v24 = vld [vmem:[%s7426_s22 + $0x1fd0] sm:$0xff] }
 0x2c0   : > { %5955 = vmatpush1.bf16.msra.mxu0 %v5954_v50  ;;  %v1043_v50 = vld [vmem:[%s7426_s22 + $0x18d8] sm:$0xff]  ;;  %v1281_v25 = vld [vmem:[%s7426_s22 + $0x2048] sm:$0xff] }
 0x2c1   : > { %6211 = vmatpush1.bf16.msra.mxu1 %v6210_v51  ;;  %5957 = vmatprep.subr.bf16.mxu0 %v5956_v52  ;;  %v5974_v51 = vpack.c.bf16 %v1008_v43, %v992_v42  ;;  %v6230_v52 = vpack.c.bf16 %v1010_v46, %v994_v44  ;;  %v6232_v57 = vpack.c.bf16 %v1043_v50, %v1027_v49  ;;  %v1152_v43 = vld [vmem:[%s7426_s22 + $0x1c40] sm:$0xff]  ;;  %v1201_v49 = vld [vmem:[%s7426_s22 + $0x1dc8] sm:$0xff]  ;;  %v1187_v50 = vld [vmem:[%s7426_s22 + $0x1d58] sm:$0xff] }
 0x2c2   : > { %6213 = vmatprep.subr.bf16.mxu1 %v6212_v56  ;;  %v1026_v56 = vld [vmem:[%s7426_s22 + $0x1850] sm:$0xff]  ;;  %v5992_v42 = vpack.c.bf16 %v1169_v37, %v1153_v36  ;;  %v1168_v44 = vld [vmem:[%s7426_s22 + $0x1cc0] sm:$0xff]  ;;  %v1313_v37 = vld [vmem:[%s7426_s22 + $0x2148] sm:$0xff] }
 0x2c3   : > { %v1298_v36 = vld [vmem:[%s7426_s22 + $0x20d0] sm:$0xff] }
 0x2c4   : > { %5959 = vmatpush1.bf16.msra.mxu0 %v5958_v62  ;;  %v1075_v62 = vld [vmem:[%s7426_s22 + $0x19d8] sm:$0xff] }
 0x2c5   : > { %6215 = vmatpush1.bf16.msra.mxu1 %v6214_v63  ;;  %5961 = vmatprep.subr.bf16.mxu0 %v5960_v0  ;;  %v5978_v63 = vpack.c.bf16 %v1040_v55, %v1024_v54  ;;  %v6234_v0 = vpack.c.bf16 %v1042_v58, %v1026_v56  ;;  %v6236_v6 = vpack.c.bf16 %v1075_v62, %v1059_v61  ;;  %v1184_v55 = vld [vmem:[%s7426_s22 + $0x1d40] sm:$0xff]  ;;  %v1233_v61 = vld [vmem:[%s7426_s22 + $0x1ec8] sm:$0xff]  ;;  %v1219_v62 = vld [vmem:[%s7426_s22 + $0x1e58] sm:$0xff] }
 0x2c6   : > { %6217 = vmatprep.subr.bf16.mxu1 %v6216_v5  ;;  %v1058_v5 = vld [vmem:[%s7426_s22 + $0x1950] sm:$0xff]  ;;  %v5996_v54 = vpack.c.bf16 %v1201_v49, %v1185_v48  ;;  %v1200_v56 = vld [vmem:[%s7426_s22 + $0x1dc0] sm:$0xff]  ;;  %v1345_v49 = vld [vmem:[%s7426_s22 + $0x2248] sm:$0xff] }
 0x2c7   : > { %v1330_v48 = vld [vmem:[%s7426_s22 + $0x21d0] sm:$0xff] }
 0x2c8   : > { %5963 = vmatpush1.bf16.msra.mxu0 %v5962_v11  ;;  %v1107_v11 = vld [vmem:[%s7426_s22 + $0x1ad8] sm:$0xff] }
 0x2c9   : > { %6219 = vmatpush1.bf16.msra.mxu1 %v6218_v12  ;;  %5965 = vmatprep.subr.bf16.mxu0 %v5964_v14  ;;  %v5982_v12 = vpack.c.bf16 %v1072_v4, %v1056_v3  ;;  %v6238_v14 = vpack.c.bf16 %v1074_v7, %v1058_v5  ;;  %v6240_v22 = vpack.c.bf16 %v1107_v11, %v1091_v10  ;;  %v1216_v4 = vld [vmem:[%s7426_s22 + $0x1e40] sm:$0xff]  ;;  %v1265_v10 = vld [vmem:[%s7426_s22 + $0x1fc8] sm:$0xff]  ;;  %v1251_v11 = vld [vmem:[%s7426_s22 + $0x1f58] sm:$0xff] }
 0x2ca   : > { %6221 = vmatprep.subr.bf16.mxu1 %v6220_v20  ;;  %v1090_v20 = vld [vmem:[%s7426_s22 + $0x1a50] sm:$0xff]  ;;  %v6000_v3 = vpack.c.bf16 %v1233_v61, %v1217_v60  ;;  %v1232_v5 = vld [vmem:[%s7426_s22 + $0x1ec0] sm:$0xff] }
 0x2cb   : > { %v1362_v61 = vld [vmem:[%s7426_s22 + $0x22d0] sm:$0xff] }
 0x2cc   : > { %5967 = vmatpush1.bf16.msra.mxu0 %v5966_v27  ;;  %v1139_v27 = vld [vmem:[%s7426_s22 + $0x1bd8] sm:$0xff] }
 0x2cd   : > { %6223 = vmatpush1.bf16.msra.mxu1 %v6222_v28  ;;  %5969 = vmatprep.subr.bf16.mxu0 %v5968_v29  ;;  %v5986_v28 = vpack.c.bf16 %v1104_v17, %v1088_v16  ;;  %v6242_v29 = vpack.c.bf16 %v1106_v23, %v1090_v20  ;;  %v6244_v34 = vpack.c.bf16 %v1139_v27, %v1123_v26  ;;  %v1248_v17 = vld [vmem:[%s7426_s22 + $0x1f40] sm:$0xff]  ;;  %v1297_v26 = vld [vmem:[%s7426_s22 + $0x20c8] sm:$0xff]  ;;  %v1283_v27 = vld [vmem:[%s7426_s22 + $0x2058] sm:$0xff] }
 0x2ce   : > { %6225 = vmatprep.subr.bf16.mxu1 %v6224_v33  ;;  %v1122_v33 = vld [vmem:[%s7426_s22 + $0x1b50] sm:$0xff]  ;;  %v6004_v16 = vpack.c.bf16 %v1265_v10, %v1249_v9  ;;  %v1264_v20 = vld [vmem:[%s7426_s22 + $0x1fc0] sm:$0xff] }
 0x2cf   : > { %v1378_v9 = vld [vmem:[%s7426_s22 + $0x2350] sm:$0xff] }
 0x2d0   : > { %5971 = vmatpush1.bf16.msra.mxu0 %v5970_v39  ;;  %v1171_v39 = vld [vmem:[%s7426_s22 + $0x1cd8] sm:$0xff] }
 0x2d1   : > { %6227 = vmatpush1.bf16.msra.mxu1 %v6226_v40  ;;  %5973 = vmatprep.subr.bf16.mxu0 %v5972_v41  ;;  %v5990_v40 = vpack.c.bf16 %v1136_v32, %v1120_v31  ;;  %v6246_v41 = vpack.c.bf16 %v1138_v35, %v1122_v33  ;;  %v6248_v46 = vpack.c.bf16 %v1171_v39, %v1155_v38  ;;  %v1280_v32 = vld [vmem:[%s7426_s22 + $0x2040] sm:$0xff]  ;;  %v1329_v38 = vld [vmem:[%s7426_s22 + $0x21c8] sm:$0xff]  ;;  %v1315_v39 = vld [vmem:[%s7426_s22 + $0x2158] sm:$0xff] }
 0x2d2   : > { %6229 = vmatprep.subr.bf16.mxu1 %v6228_v45  ;;  %v1154_v45 = vld [vmem:[%s7426_s22 + $0x1c50] sm:$0xff]  ;;  %v6008_v31 = vpack.c.bf16 %v1297_v26, %v1281_v25  ;;  %v1296_v33 = vld [vmem:[%s7426_s22 + $0x20c0] sm:$0xff] }
 0x2d3   : > { %v1410_v25 = vld [vmem:[%s7426_s22 + $0x2450] sm:$0xff] }
 0x2d4   : > { %5975 = vmatpush1.bf16.msra.mxu0 %v5974_v51  ;;  %v1203_v51 = vld [vmem:[%s7426_s22 + $0x1dd8] sm:$0xff] }
 0x2d5   : > { %6231 = vmatpush1.bf16.msra.mxu1 %v6230_v52  ;;  %5977 = vmatprep.subr.bf16.mxu0 %v5976_v53  ;;  %v5994_v52 = vpack.c.bf16 %v1168_v44, %v1152_v43  ;;  %v6250_v53 = vpack.c.bf16 %v1170_v47, %v1154_v45  ;;  %v6252_v58 = vpack.c.bf16 %v1203_v51, %v1187_v50  ;;  %v1312_v44 = vld [vmem:[%s7426_s22 + $0x2140] sm:$0xff]  ;;  %v1361_v50 = vld [vmem:[%s7426_s22 + $0x22c8] sm:$0xff]  ;;  %v7044_v51 = vld [vmem:[#allocation2 + $0x10] sm:$0xff] }
 0x2d6   : > { %6233 = vmatprep.subr.bf16.mxu1 %v6232_v57  ;;  %v1186_v57 = vld [vmem:[%s7426_s22 + $0x1d50] sm:$0xff]  ;;  %v6012_v43 = vpack.c.bf16 %v1329_v38, %v1313_v37  ;;  %v1328_v45 = vld [vmem:[%s7426_s22 + $0x21c0] sm:$0xff] }
 0x2d7   : > { %v1442_v37 = vld [vmem:[%s7426_s22 + $0x2550] sm:$0xff] }
 0x2d8   : > { %5979 = vmatpush1.bf16.msra.mxu0 %v5978_v63  ;;  %v1235_v63 = vld [vmem:[%s7426_s22 + $0x1ed8] sm:$0xff] }
 0x2d9   : > { %6235 = vmatpush1.bf16.msra.mxu1 %v6234_v0  ;;  %5981 = vmatprep.subr.bf16.mxu0 %v5980_v1  ;;  %v5998_v0 = vpack.c.bf16 %v1200_v56, %v1184_v55  ;;  %v6254_v1 = vpack.c.bf16 %v1202_v59, %v1186_v57  ;;  %v6256_v7 = vpack.c.bf16 %v1235_v63, %v1219_v62  ;;  %v1344_v57 = vld [vmem:[%s7426_s22 + $0x2240] sm:$0xff]  ;;  %v1346_v59 = vld [vmem:[%s7426_s22 + $0x2250] sm:$0xff]  ;;  %v1377_v62 = vld [vmem:[%s7426_s22 + $0x2348] sm:$0xff] }
 0x2da   : > { %6237 = vmatprep.subr.bf16.mxu1 %v6236_v6  ;;  %v1218_v6 = vld [vmem:[%s7426_s22 + $0x1e50] sm:$0xff]  ;;  %v6016_v56 = vpack.c.bf16 %v1361_v50, %v1345_v49  ;;  %v1393_v63 = vld [vmem:[%s7426_s22 + $0x23c8] sm:$0xff] }
 0x2db   : > { %v1474_v49 = vld [vmem:[%s7426_s22 + $0x2650] sm:$0xff] }
 0x2dc   : > { %5983 = vmatpush1.bf16.msra.mxu0 %v5982_v12  ;;  %v1267_v12 = vld [vmem:[%s7426_s22 + $0x1fd8] sm:$0xff] }
 0x2dd   : > { %6239 = vmatpush1.bf16.msra.mxu1 %v6238_v14  ;;  %5985 = vmatprep.subr.bf16.mxu0 %v5984_v15  ;;  %v6002_v14 = vpack.c.bf16 %v1232_v5, %v1216_v4  ;;  %v6258_v15 = vpack.c.bf16 %v1234_v8, %v1218_v6  ;;  %v6260_v23 = vpack.c.bf16 %v1267_v12, %v1251_v11  ;;  %v1392_v8 = vld [vmem:[%s7426_s22 + $0x23c0] sm:$0xff]  ;;  %v1394_v11 = vld [vmem:[%s7426_s22 + $0x23d0] sm:$0xff]  ;;  %v1409_v12 = vld [vmem:[%s7426_s22 + $0x2448] sm:$0xff] }
 0x2de   : > { %6241 = vmatprep.subr.bf16.mxu1 %v6240_v22  ;;  %v1250_v22 = vld [vmem:[%s7426_s22 + $0x1f50] sm:$0xff]  ;;  %v6274_v5 = vpack.c.bf16 %v1362_v61, %v1346_v59  ;;  %v6020_v6 = vpack.c.bf16 %v1393_v63, %v1377_v62  ;;  %v1504_v59 = vld [vmem:[%s7426_s22 + $0x2740] sm:$0xff] }
 0x2df   : > { %v1506_v61 = vld [vmem:[%s7426_s22 + $0x2750] sm:$0xff] }
 0x2e0   : > { %5987 = vmatpush1.bf16.msra.mxu0 %v5986_v28  ;;  %v1299_v28 = vld [vmem:[%s7426_s22 + $0x20d8] sm:$0xff]  ;;  %v1522_v63 = vld [vmem:[%s7426_s22 + $0x27d0] sm:$0xff] }
 0x2e1   : > { %6243 = vmatpush1.bf16.msra.mxu1 %v6242_v29  ;;  %5989 = vmatprep.subr.bf16.mxu0 %v5988_v30  ;;  %v6006_v29 = vpack.c.bf16 %v1264_v20, %v1248_v17  ;;  %v6262_v30 = vpack.c.bf16 %v1266_v24, %v1250_v22  ;;  %v6264_v35 = vpack.c.bf16 %v1299_v28, %v1283_v27  ;;  %v1424_v24 = vld [vmem:[%s7426_s22 + $0x24c0] sm:$0xff]  ;;  %v1426_v27 = vld [vmem:[%s7426_s22 + $0x24d0] sm:$0xff]  ;;  %v1441_v28 = vld [vmem:[%s7426_s22 + $0x2548] sm:$0xff] }
 0x2e2   : > { %6245 = vmatprep.subr.bf16.mxu1 %v6244_v34  ;;  %v1282_v34 = vld [vmem:[%s7426_s22 + $0x2050] sm:$0xff]  ;;  %v6278_v20 = vpack.c.bf16 %v1394_v11, %v1378_v9  ;;  %v1552_v9 = vld [vmem:[%s7426_s22 + $0x28c0] sm:$0xff] }
 0x2e4   : > { %5991 = vmatpush1.bf16.msra.mxu0 %v5990_v40  ;;  %v1331_v40 = vld [vmem:[%s7426_s22 + $0x21d8] sm:$0xff] }
 0x2e5   : > { %6247 = vmatpush1.bf16.msra.mxu1 %v6246_v41  ;;  %5993 = vmatprep.subr.bf16.mxu0 %v5992_v42  ;;  %v6010_v41 = vpack.c.bf16 %v1296_v33, %v1280_v32  ;;  %v6266_v42 = vpack.c.bf16 %v1298_v36, %v1282_v34  ;;  %v6268_v47 = vpack.c.bf16 %v1331_v40, %v1315_v39  ;;  %v1456_v36 = vld [vmem:[%s7426_s22 + $0x25c0] sm:$0xff]  ;;  %v1458_v39 = vld [vmem:[%s7426_s22 + $0x25d0] sm:$0xff]  ;;  %v1473_v40 = vld [vmem:[%s7426_s22 + $0x2648] sm:$0xff] }
 0x2e6   : > { %6249 = vmatprep.subr.bf16.mxu1 %v6248_v46  ;;  %v1314_v46 = vld [vmem:[%s7426_s22 + $0x2150] sm:$0xff]  ;;  %v6282_v33 = vpack.c.bf16 %v1426_v27, %v1410_v25  ;;  %v1584_v25 = vld [vmem:[%s7426_s22 + $0x29c0] sm:$0xff] }
 0x2e7   : > { %v6270_v55 = vpack.c.bf16 %v1330_v48, %v1314_v46  ;;  %v1488_v48 = vld [vmem:[%s7426_s22 + $0x26c0] sm:$0xff] }
 0x2e8   : > { %5995 = vmatpush1.bf16.msra.mxu0 %v5994_v52  ;;  %v1347_v52 = vld [vmem:[%s7426_s22 + $0x2258] sm:$0xff] }
 0x2e9   : > { %6251 = vmatpush1.bf16.msra.mxu1 %v6250_v53  ;;  %5997 = vmatprep.subr.bf16.mxu0 %v5996_v54  ;;  %v1363_v53 = vld [vmem:[%s7426_s22 + $0x22d8] sm:$0xff]  ;;  %v6014_v54 = vpack.c.bf16 %v1328_v45, %v1312_v44  ;;  %v6286_v45 = vpack.c.bf16 %v1458_v39, %v1442_v37  ;;  %v1616_v37 = vld [vmem:[%s7426_s22 + $0x2ac0] sm:$0xff] }
 0x2ea   : > { %6253 = vmatprep.subr.bf16.mxu1 %v6252_v58  ;;  %v1360_v58 = vld [vmem:[%s7426_s22 + $0x22c0] sm:$0xff]  ;;  %v6272_v60 = vpack.c.bf16 %v1363_v53, %v1347_v52  ;;  %v1505_v52 = vld [vmem:[%s7426_s22 + $0x2748] sm:$0xff] }
 0x2eb   : > { %v6018_v4 = vpack.c.bf16 %v1360_v58, %v1344_v57  ;;  %v1521_v53 = vld [vmem:[%s7426_s22 + $0x27c8] sm:$0xff] }
 0x2ec   : > { %5999 = vmatpush1.bf16.msra.mxu0 %v5998_v0  ;;  %v7045_v0 = vld [vmem:[#allocation2 + $0x28] sm:$0xff]  ;;  %v6036_v58 = vpack.c.bf16 %v1521_v53, %v1505_v52  ;;  %v1650_v52 = vld [vmem:[%s7426_s22 + $0x2bd0] sm:$0xff] }
 0x2ed   : > { %6255 = vmatpush1.bf16.msra.mxu1 %v6254_v1  ;;  %6001 = vmatprep.subr.bf16.mxu0 %v6000_v3  ;;  %v1379_v1 = vld [vmem:[%s7426_s22 + $0x2358] sm:$0xff]  ;;  %v1665_v53 = vld [vmem:[%s7426_s22 + $0x2c48] sm:$0xff] }
 0x2ee   : > { %6257 = vmatprep.subr.bf16.mxu1 %v6256_v7  ;;  %v1395_v3 = vld [vmem:[%s7426_s22 + $0x23d8] sm:$0xff]  ;;  %v1376_v7 = vld [vmem:[%s7426_s22 + $0x2340] sm:$0xff] }
 0x2ef   : > { %v6276_v10 = vpack.c.bf16 %v1395_v3, %v1379_v1  ;;  %v6022_v17 = vpack.c.bf16 %v1392_v8, %v1376_v7  ;;  %v1553_v1 = vld [vmem:[%s7426_s22 + $0x28c8] sm:$0xff]  ;;  %v1539_v3 = vld [vmem:[%s7426_s22 + $0x2858] sm:$0xff]  ;;  %v1536_v8 = vld [vmem:[%s7426_s22 + $0x2840] sm:$0xff] }
 0x2f0   : > { %6003 = vmatpush1.bf16.msra.mxu0 %v6002_v14  ;;  %v1425_v14 = vld [vmem:[%s7426_s22 + $0x24c8] sm:$0xff] }
 0x2f1   : > { %6259 = vmatpush1.bf16.msra.mxu1 %v6258_v15  ;;  %6005 = vmatprep.subr.bf16.mxu0 %v6004_v16  ;;  %v1411_v15 = vld [vmem:[%s7426_s22 + $0x2458] sm:$0xff]  ;;  %v6024_v22 = vpack.c.bf16 %v1425_v14, %v1409_v12  ;;  %v1554_v12 = vld [vmem:[%s7426_s22 + $0x28d0] sm:$0xff]  ;;  %v1569_v14 = vld [vmem:[%s7426_s22 + $0x2948] sm:$0xff] }
 0x2f2   : > { %6261 = vmatprep.subr.bf16.mxu1 %v6260_v23  ;;  %v1427_v16 = vld [vmem:[%s7426_s22 + $0x24d8] sm:$0xff]  ;;  %v1408_v23 = vld [vmem:[%s7426_s22 + $0x2440] sm:$0xff] }
 0x2f3   : > { %v6280_v26 = vpack.c.bf16 %v1427_v16, %v1411_v15  ;;  %v6026_v32 = vpack.c.bf16 %v1424_v24, %v1408_v23  ;;  %v1585_v15 = vld [vmem:[%s7426_s22 + $0x29c8] sm:$0xff]  ;;  %v1571_v16 = vld [vmem:[%s7426_s22 + $0x2958] sm:$0xff]  ;;  %v1568_v24 = vld [vmem:[%s7426_s22 + $0x2940] sm:$0xff] }
 0x2f4   : > { %6007 = vmatpush1.bf16.msra.mxu0 %v6006_v29  ;;  %v1457_v29 = vld [vmem:[%s7426_s22 + $0x25c8] sm:$0xff]  ;;  %v6044_v23 = vpack.c.bf16 %v1585_v15, %v1569_v14  ;;  %v1714_v14 = vld [vmem:[%s7426_s22 + $0x2dd0] sm:$0xff] }
 0x2f5   : > { %6263 = vmatpush1.bf16.msra.mxu1 %v6262_v30  ;;  %6009 = vmatprep.subr.bf16.mxu0 %v6008_v31  ;;  %v1443_v30 = vld [vmem:[%s7426_s22 + $0x2558] sm:$0xff]  ;;  %v6028_v34 = vpack.c.bf16 %v1457_v29, %v1441_v28  ;;  %v1586_v28 = vld [vmem:[%s7426_s22 + $0x29d0] sm:$0xff]  ;;  %v1601_v29 = vld [vmem:[%s7426_s22 + $0x2a48] sm:$0xff] }
 0x2f6   : > { %6265 = vmatprep.subr.bf16.mxu1 %v6264_v35  ;;  %v1459_v31 = vld [vmem:[%s7426_s22 + $0x25d8] sm:$0xff]  ;;  %v1440_v35 = vld [vmem:[%s7426_s22 + $0x2540] sm:$0xff]  ;;  %v1729_v15 = vld [vmem:[%s7426_s22 + $0x2e48] sm:$0xff] }
 0x2f7   : > { %3652 = vmatmul.mubr.f32.vlgmr.msra.gmra.mrb[4].mxu0 %v7044_v51  ;;  %v6284_v38 = vpack.c.bf16 %v1459_v31, %v1443_v30  ;;  %v6030_v44 = vpack.c.bf16 %v1456_v36, %v1440_v35  ;;  %v1617_v30 = vld [vmem:[%s7426_s22 + $0x2ac8] sm:$0xff]  ;;  %v1603_v31 = vld [vmem:[%s7426_s22 + $0x2a58] sm:$0xff]  ;;  %v1600_v36 = vld [vmem:[%s7426_s22 + $0x2a40] sm:$0xff] }
 0x2f8   : > { %6011 = vmatpush1.bf16.msra.mxu0 %v6010_v41  ;;  %3936 = vmatmul.mubr.f32.vlgmr.msra.gmra.mrb[4].mxu1 %v7044_v51  ;;  %v1489_v41 = vld [vmem:[%s7426_s22 + $0x26c8] sm:$0xff]  ;;  %v1490_v51 = vld [vmem:[%s7426_s22 + $0x26d0] sm:$0xff]  ;;  %v6048_v35 = vpack.c.bf16 %v1617_v30, %v1601_v29 }
 0x2f9   : > { %6267 = vmatpush1.bf16.msra.mxu1 %v6266_v42  ;;  %6013 = vmatprep.subr.bf16.mxu0 %v6012_v43  ;;  %v1475_v42 = vld [vmem:[%s7426_s22 + $0x2658] sm:$0xff]  ;;  %v6032_v46 = vpack.c.bf16 %v1489_v41, %v1473_v40  ;;  %v6290_v57 = vpack.c.bf16 %v1490_v51, %v1474_v49  ;;  %v1618_v40 = vld [vmem:[%s7426_s22 + $0x2ad0] sm:$0xff]  ;;  %v1633_v41 = vld [vmem:[%s7426_s22 + $0x2b48] sm:$0xff] }
 0x2fa   : > { %6269 = vmatprep.subr.bf16.mxu1 %v6268_v47  ;;  %3722 = vmatprep.mubr.f32.mxu0 %v7045_v0  ;;  %v1491_v43 = vld [vmem:[%s7426_s22 + $0x26d8] sm:$0xff]  ;;  %v1472_v47 = vld [vmem:[%s7426_s22 + $0x2640] sm:$0xff]  ;;  %v1746_v29 = vld [vmem:[%s7426_s22 + $0x2ed0] sm:$0xff] }
 0x2fb   : > { %4006 = vmatprep.mubr.f32.mxu1 %v7045_v0  ;;  %v6288_v50 = vpack.c.bf16 %v1491_v43, %v1475_v42  ;;  %v1537_v0 = vld [vmem:[%s7426_s22 + $0x2848] sm:$0xff]  ;;  %v1635_v43 = vld [vmem:[%s7426_s22 + $0x2b58] sm:$0xff]  ;;  %v1648_v49 = vld [vmem:[%s7426_s22 + $0x2bc0] sm:$0xff] }
 0x2fc   : > { %6015 = vmatpush1.bf16.msra.mxu0 %v6014_v54  ;;  %v1507_v54 = vld [vmem:[%s7426_s22 + $0x2758] sm:$0xff]  ;;  %v6040_v7 = vpack.c.bf16 %v1553_v1, %v1537_v0  ;;  %v1649_v42 = vld [vmem:[%s7426_s22 + $0x2bc8] sm:$0xff]  ;;  %v1682_v0 = vld [vmem:[%s7426_s22 + $0x2cd0] sm:$0xff] }
 0x2fd   : > { %6271 = vmatpush1.bf16.msra.mxu1 %v6270_v55  ;;  %6017 = vmatprep.subr.bf16.mxu0 %v6016_v56  ;;  %v1523_v55 = vld [vmem:[%s7426_s22 + $0x27d8] sm:$0xff]  ;;  %v6034_v56 = vpack.c.bf16 %v1488_v48, %v1472_v47  ;;  %v6052_v47 = vpack.c.bf16 %v1649_v42, %v1633_v41  ;;  %v1632_v48 = vld [vmem:[%s7426_s22 + $0x2b40] sm:$0xff]  ;;  %v1697_v1 = vld [vmem:[%s7426_s22 + $0x2d48] sm:$0xff] }
 0x2fe   : > { %6273 = vmatprep.subr.bf16.mxu1 %v6272_v60  ;;  %v1520_v60 = vld [vmem:[%s7426_s22 + $0x27c0] sm:$0xff]  ;;  %v6292_v62 = vpack.c.bf16 %v1523_v55, %v1507_v54  ;;  %v1681_v54 = vld [vmem:[%s7426_s22 + $0x2cc8] sm:$0xff]  ;;  %v1667_v55 = vld [vmem:[%s7426_s22 + $0x2c58] sm:$0xff] }
 0x2ff   : > { %v1761_v30 = vld [vmem:[%s7426_s22 + $0x2f48] sm:$0xff]  ;;  %v1778_v41 = vld [vmem:[%s7426_s22 + $0x2fd0] sm:$0xff] }
 0x300   : > { %6019 = vmatpush1.bf16.msra.mxu0 %v6018_v4  ;;  %v1555_v4 = vld [vmem:[%s7426_s22 + $0x28d8] sm:$0xff]  ;;  %v1793_v42 = vld [vmem:[%s7426_s22 + $0x3048] sm:$0xff] }
 0x301   : > { %6275 = vmatpush1.bf16.msra.mxu1 %v6274_v5  ;;  %6021 = vmatprep.subr.bf16.mxu0 %v6020_v6  ;;  %v6038_v5 = vpack.c.bf16 %v1520_v60, %v1504_v59  ;;  %v6294_v6 = vpack.c.bf16 %v1522_v63, %v1506_v61  ;;  %v6296_v11 = vpack.c.bf16 %v1555_v4, %v1539_v3  ;;  %v1664_v60 = vld [vmem:[%s7426_s22 + $0x2c40] sm:$0xff]  ;;  %v1713_v3 = vld [vmem:[%s7426_s22 + $0x2dc8] sm:$0xff]  ;;  %v1699_v4 = vld [vmem:[%s7426_s22 + $0x2d58] sm:$0xff] }
 0x302   : > { %6277 = vmatprep.subr.bf16.mxu1 %v6276_v10  ;;  %v1538_v10 = vld [vmem:[%s7426_s22 + $0x2850] sm:$0xff]  ;;  %v6056_v59 = vpack.c.bf16 %v1681_v54, %v1665_v53  ;;  %v1680_v61 = vld [vmem:[%s7426_s22 + $0x2cc0] sm:$0xff]  ;;  %v1825_v54 = vld [vmem:[%s7426_s22 + $0x3148] sm:$0xff] }
 0x303   : > { %v1810_v53 = vld [vmem:[%s7426_s22 + $0x30d0] sm:$0xff] }
 0x304   : > { %6023 = vmatpush1.bf16.msra.mxu0 %v6022_v17  ;;  %v1587_v17 = vld [vmem:[%s7426_s22 + $0x29d8] sm:$0xff] }
 0x305   : > { %6279 = vmatpush1.bf16.msra.mxu1 %v6278_v20  ;;  %6025 = vmatprep.subr.bf16.mxu0 %v6024_v22  ;;  %v6042_v20 = vpack.c.bf16 %v1552_v9, %v1536_v8  ;;  %v6298_v22 = vpack.c.bf16 %v1554_v12, %v1538_v10  ;;  %v6300_v27 = vpack.c.bf16 %v1587_v17, %v1571_v16  ;;  %v1696_v9 = vld [vmem:[%s7426_s22 + $0x2d40] sm:$0xff]  ;;  %v1745_v16 = vld [vmem:[%s7426_s22 + $0x2ec8] sm:$0xff]  ;;  %v1731_v17 = vld [vmem:[%s7426_s22 + $0x2e58] sm:$0xff] }
 0x306   : > { %6281 = vmatprep.subr.bf16.mxu1 %v6280_v26  ;;  %v1570_v26 = vld [vmem:[%s7426_s22 + $0x2950] sm:$0xff]  ;;  %v6060_v8 = vpack.c.bf16 %v1713_v3, %v1697_v1  ;;  %v1712_v10 = vld [vmem:[%s7426_s22 + $0x2dc0] sm:$0xff]  ;;  %v1857_v3 = vld [vmem:[%s7426_s22 + $0x3248] sm:$0xff] }
 0x307   : > { %v1842_v1 = vld [vmem:[%s7426_s22 + $0x31d0] sm:$0xff] }
 0x308   : > { %6027 = vmatpush1.bf16.msra.mxu0 %v6026_v32  ;;  %v1619_v32 = vld [vmem:[%s7426_s22 + $0x2ad8] sm:$0xff] }
 0x309   : > { %6283 = vmatpush1.bf16.msra.mxu1 %v6282_v33  ;;  %6029 = vmatprep.subr.bf16.mxu0 %v6028_v34  ;;  %v6046_v33 = vpack.c.bf16 %v1584_v25, %v1568_v24  ;;  %v6302_v34 = vpack.c.bf16 %v1586_v28, %v1570_v26  ;;  %v6304_v39 = vpack.c.bf16 %v1619_v32, %v1603_v31  ;;  %v1728_v25 = vld [vmem:[%s7426_s22 + $0x2e40] sm:$0xff]  ;;  %v1777_v31 = vld [vmem:[%s7426_s22 + $0x2fc8] sm:$0xff]  ;;  %v1763_v32 = vld [vmem:[%s7426_s22 + $0x2f58] sm:$0xff] }
 0x30a   : > { %6285 = vmatprep.subr.bf16.mxu1 %v6284_v38  ;;  %v1602_v38 = vld [vmem:[%s7426_s22 + $0x2a50] sm:$0xff]  ;;  %v6064_v24 = vpack.c.bf16 %v1745_v16, %v1729_v15  ;;  %v1744_v26 = vld [vmem:[%s7426_s22 + $0x2ec0] sm:$0xff] }
 0x30b   : > { %v1874_v16 = vld [vmem:[%s7426_s22 + $0x32d0] sm:$0xff] }
 0x30c   : > { %6031 = vmatpush1.bf16.msra.mxu0 %v6030_v44  ;;  %v1651_v44 = vld [vmem:[%s7426_s22 + $0x2bd8] sm:$0xff] }
 0x30d   : > { %6287 = vmatpush1.bf16.msra.mxu1 %v6286_v45  ;;  %6033 = vmatprep.subr.bf16.mxu0 %v6032_v46  ;;  %v6050_v45 = vpack.c.bf16 %v1616_v37, %v1600_v36  ;;  %v6306_v46 = vpack.c.bf16 %v1618_v40, %v1602_v38  ;;  %v6308_v51 = vpack.c.bf16 %v1651_v44, %v1635_v43  ;;  %v1760_v37 = vld [vmem:[%s7426_s22 + $0x2f40] sm:$0xff]  ;;  %v1809_v43 = vld [vmem:[%s7426_s22 + $0x30c8] sm:$0xff]  ;;  %v1795_v44 = vld [vmem:[%s7426_s22 + $0x3058] sm:$0xff] }
 0x30e   : > { %6289 = vmatprep.subr.bf16.mxu1 %v6288_v50  ;;  %v1634_v50 = vld [vmem:[%s7426_s22 + $0x2b50] sm:$0xff]  ;;  %v6068_v36 = vpack.c.bf16 %v1777_v31, %v1761_v30  ;;  %v1776_v38 = vld [vmem:[%s7426_s22 + $0x2fc0] sm:$0xff] }
 0x30f   : > { %v1890_v30 = vld [vmem:[%s7426_s22 + $0x3350] sm:$0xff] }
 0x310   : > { %6035 = vmatpush1.bf16.msra.mxu0 %v6034_v56  ;;  %v1683_v56 = vld [vmem:[%s7426_s22 + $0x2cd8] sm:$0xff] }
 0x311   : > { %6291 = vmatpush1.bf16.msra.mxu1 %v6290_v57  ;;  %6037 = vmatprep.subr.bf16.mxu0 %v6036_v58  ;;  %v6054_v57 = vpack.c.bf16 %v1648_v49, %v1632_v48  ;;  %v6310_v58 = vpack.c.bf16 %v1650_v52, %v1634_v50  ;;  %v6312_v63 = vpack.c.bf16 %v1683_v56, %v1667_v55  ;;  %v1792_v49 = vld [vmem:[%s7426_s22 + $0x3040] sm:$0xff]  ;;  %v1841_v55 = vld [vmem:[%s7426_s22 + $0x31c8] sm:$0xff]  ;;  %v1827_v56 = vld [vmem:[%s7426_s22 + $0x3158] sm:$0xff] }
 0x312   : > { %6293 = vmatprep.subr.bf16.mxu1 %v6292_v62  ;;  %v1666_v62 = vld [vmem:[%s7426_s22 + $0x2c50] sm:$0xff]  ;;  %v6072_v48 = vpack.c.bf16 %v1809_v43, %v1793_v42  ;;  %v1808_v50 = vld [vmem:[%s7426_s22 + $0x30c0] sm:$0xff] }
 0x313   : > { %v1922_v42 = vld [vmem:[%s7426_s22 + $0x3450] sm:$0xff] }
 0x314   : > { %6039 = vmatpush1.bf16.msra.mxu0 %v6038_v5  ;;  %v1715_v5 = vld [vmem:[%s7426_s22 + $0x2dd8] sm:$0xff] }
 0x315   : > { %6295 = vmatpush1.bf16.msra.mxu1 %v6294_v6  ;;  %6041 = vmatprep.subr.bf16.mxu0 %v6040_v7  ;;  %v6058_v6 = vpack.c.bf16 %v1680_v61, %v1664_v60  ;;  %v6314_v7 = vpack.c.bf16 %v1682_v0, %v1666_v62  ;;  %v6316_v12 = vpack.c.bf16 %v1715_v5, %v1699_v4  ;;  %v1824_v61 = vld [vmem:[%s7426_s22 + $0x3140] sm:$0xff]  ;;  %v1873_v4 = vld [vmem:[%s7426_s22 + $0x32c8] sm:$0xff] }
 0x316   : > { %6297 = vmatprep.subr.bf16.mxu1 %v6296_v11  ;;  %v1698_v11 = vld [vmem:[%s7426_s22 + $0x2d50] sm:$0xff]  ;;  %v6076_v60 = vpack.c.bf16 %v1841_v55, %v1825_v54  ;;  %v1840_v62 = vld [vmem:[%s7426_s22 + $0x31c0] sm:$0xff]  ;;  %v2330_v54 = vsub.s32 7, %v8365_v2 }
 0x317   : > { %v7046_v5 = vld [vmem:[#allocation2 + $0x20] sm:$0xff] }
 0x318   : > { %6043 = vmatpush1.bf16.msra.mxu0 %v6042_v20  ;;  %v1747_v20 = vld [vmem:[%s7426_s22 + $0x2ed8] sm:$0xff] }
 0x319   : > { %6299 = vmatpush1.bf16.msra.mxu1 %v6298_v22  ;;  %6045 = vmatprep.subr.bf16.mxu0 %v6044_v23  ;;  %v6062_v22 = vpack.c.bf16 %v1712_v10, %v1696_v9  ;;  %v6318_v23 = vpack.c.bf16 %v1714_v14, %v1698_v11  ;;  %v6320_v28 = vpack.c.bf16 %v1747_v20, %v1731_v17  ;;  %v1856_v11 = vld [vmem:[%s7426_s22 + $0x3240] sm:$0xff]  ;;  %v1858_v14 = vld [vmem:[%s7426_s22 + $0x3250] sm:$0xff]  ;;  %v1889_v17 = vld [vmem:[%s7426_s22 + $0x3348] sm:$0xff] }
 0x31a   : > { %6301 = vmatprep.subr.bf16.mxu1 %v6300_v27  ;;  %v1730_v27 = vld [vmem:[%s7426_s22 + $0x2e50] sm:$0xff]  ;;  %v6080_v10 = vpack.c.bf16 %v1873_v4, %v1857_v3  ;;  %v1905_v20 = vld [vmem:[%s7426_s22 + $0x33c8] sm:$0xff]  ;;  %v2003_v3 = vld [vmem:[%s7426_s22 + $0x36d8] sm:$0xff] }
 0x31c   : > { %6047 = vmatpush1.bf16.msra.mxu0 %v6046_v33  ;;  %v1779_v33 = vld [vmem:[%s7426_s22 + $0x2fd8] sm:$0xff] }
 0x31d   : > { %6303 = vmatpush1.bf16.msra.mxu1 %v6302_v34  ;;  %6049 = vmatprep.subr.bf16.mxu0 %v6048_v35  ;;  %v6066_v34 = vpack.c.bf16 %v1744_v26, %v1728_v25  ;;  %v6322_v35 = vpack.c.bf16 %v1746_v29, %v1730_v27  ;;  %v6324_v40 = vpack.c.bf16 %v1779_v33, %v1763_v32  ;;  %v1904_v29 = vld [vmem:[%s7426_s22 + $0x33c0] sm:$0xff]  ;;  %v1906_v32 = vld [vmem:[%s7426_s22 + $0x33d0] sm:$0xff]  ;;  %v1921_v33 = vld [vmem:[%s7426_s22 + $0x3448] sm:$0xff] }
 0x31e   : > { %6305 = vmatprep.subr.bf16.mxu1 %v6304_v39  ;;  %v1762_v39 = vld [vmem:[%s7426_s22 + $0x2f50] sm:$0xff]  ;;  %v6338_v26 = vpack.c.bf16 %v1874_v16, %v1858_v14  ;;  %v6084_v27 = vpack.c.bf16 %v1905_v20, %v1889_v17  ;;  %v2033_v16 = vld [vmem:[%s7426_s22 + $0x37c8] sm:$0xff] }
 0x31f   : > { %v2002_v14 = vld [vmem:[%s7426_s22 + $0x36d0] sm:$0xff] }
 0x320   : > { %6051 = vmatpush1.bf16.msra.mxu0 %v6050_v45  ;;  %v1811_v45 = vld [vmem:[%s7426_s22 + $0x30d8] sm:$0xff] }
 0x321   : > { %6307 = vmatpush1.bf16.msra.mxu1 %v6306_v46  ;;  %6053 = vmatprep.subr.bf16.mxu0 %v6052_v47  ;;  %v6070_v46 = vpack.c.bf16 %v1776_v38, %v1760_v37  ;;  %v6326_v47 = vpack.c.bf16 %v1778_v41, %v1762_v39  ;;  %v6328_v52 = vpack.c.bf16 %v1811_v45, %v1795_v44  ;;  %v1936_v41 = vld [vmem:[%s7426_s22 + $0x34c0] sm:$0xff]  ;;  %v1938_v44 = vld [vmem:[%s7426_s22 + $0x34d0] sm:$0xff]  ;;  %v1953_v45 = vld [vmem:[%s7426_s22 + $0x3548] sm:$0xff] }
 0x322   : > { %6309 = vmatprep.subr.bf16.mxu1 %v6308_v51  ;;  %v1794_v51 = vld [vmem:[%s7426_s22 + $0x3050] sm:$0xff]  ;;  %v6342_v38 = vpack.c.bf16 %v1906_v32, %v1890_v30 }
 0x324   : > { %6055 = vmatpush1.bf16.msra.mxu0 %v6054_v57  ;;  %v1843_v57 = vld [vmem:[%s7426_s22 + $0x31d8] sm:$0xff] }
 0x325   : > { %6311 = vmatpush1.bf16.msra.mxu1 %v6310_v58  ;;  %6057 = vmatprep.subr.bf16.mxu0 %v6056_v59  ;;  %v6074_v58 = vpack.c.bf16 %v1808_v50, %v1792_v49  ;;  %v6330_v59 = vpack.c.bf16 %v1810_v53, %v1794_v51  ;;  %v6332_v0 = vpack.c.bf16 %v1843_v57, %v1827_v56  ;;  %v1971_v49 = vld [vmem:[%s7426_s22 + $0x35d8] sm:$0xff]  ;;  %v2326_v51 = vsub.s32 6, %v8365_v2  ;;  %v1952_v56 = vld [vmem:[%s7426_s22 + $0x3540] sm:$0xff] }
 0x326   : > { %6313 = vmatprep.subr.bf16.mxu1 %v6312_v63  ;;  %v1826_v63 = vld [vmem:[%s7426_s22 + $0x3150] sm:$0xff]  ;;  %v6346_v53 = vpack.c.bf16 %v1938_v44, %v1922_v42  ;;  %v1968_v57 = vld [vmem:[%s7426_s22 + $0x35c0] sm:$0xff] }
 0x327   : > { %v6334_v9 = vpack.c.bf16 %v1842_v1, %v1826_v63  ;;  %v7048_v63 = vld [vmem:[%s8376_s27] sm:$0xff]  ;;  %v1987_v1 = vld [vmem:[%s7426_s22 + $0x3658] sm:$0xff] }
 0x328   : > { %6059 = vmatpush1.bf16.msra.mxu0 %v6058_v6  ;;  %v1859_v6 = vld [vmem:[%s7426_s22 + $0x3258] sm:$0xff]  ;;  %v2327_v4 = vrot.slane %v7048_v63, %v2326_v51  ;;  %v6352_v20 = vpack.c.bf16 %v2003_v3, %v1987_v1 }
 0x329   : > { %6315 = vmatpush1.bf16.msra.mxu1 %v6314_v7  ;;  %6061 = vmatprep.subr.bf16.mxu0 %v6060_v8  ;;  %v1875_v7 = vld [vmem:[%s7426_s22 + $0x32d8] sm:$0xff]  ;;  %v6078_v8 = vpack.c.bf16 %v1840_v62, %v1824_v61  ;;  %v1985_v61 = vld [vmem:[%s7426_s22 + $0x3648] sm:$0xff] }
 0x32a   : > { %6317 = vmatprep.subr.bf16.mxu1 %v6316_v12  ;;  %v1872_v12 = vld [vmem:[%s7426_s22 + $0x32c0] sm:$0xff]  ;;  %v6336_v15 = vpack.c.bf16 %v1875_v7, %v1859_v6  ;;  %v2001_v62 = vld [vmem:[%s7426_s22 + $0x36c8] sm:$0xff]  ;;  %v6094_v6 = vpack.c.bf16 %v1968_v57, %v1952_v56  ;;  %v2083_v1 = vld [vmem:[%s7426_s22 + $0x3958] sm:$0xff] }
 0x32b   : > { %v6082_v25 = vpack.c.bf16 %v1872_v12, %v1856_v11  ;;  %v1984_v7 = vld [vmem:[%s7426_s22 + $0x3640] sm:$0xff]  ;;  %v6096_v12 = vpack.c.bf16 %v2001_v62, %v1985_v61  ;;  %v2066_v62 = vld [vmem:[%s7426_s22 + $0x38d0] sm:$0xff]  ;;  %v2099_v3 = vld [vmem:[%s7426_s22 + $0x39d8] sm:$0xff] }
 0x32c   : > { %6063 = vmatpush1.bf16.msra.mxu0 %v6062_v22  ;;  %v7047_v22 = vld [vmem:[#allocation2 + $0x38] sm:$0xff] }
 0x32d   : > { %6319 = vmatpush1.bf16.msra.mxu1 %v6318_v23  ;;  %6065 = vmatprep.subr.bf16.mxu0 %v6064_v24  ;;  %v1891_v23 = vld [vmem:[%s7426_s22 + $0x3358] sm:$0xff] }
 0x32e   : > { %6321 = vmatprep.subr.bf16.mxu1 %v6320_v28  ;;  %v1907_v24 = vld [vmem:[%s7426_s22 + $0x33d8] sm:$0xff]  ;;  %v1888_v28 = vld [vmem:[%s7426_s22 + $0x3340] sm:$0xff] }
 0x32f   : > { %v6340_v31 = vpack.c.bf16 %v1907_v24, %v1891_v23  ;;  %v6086_v37 = vpack.c.bf16 %v1904_v29, %v1888_v28  ;;  %v2035_v23 = vld [vmem:[%s7426_s22 + $0x37d8] sm:$0xff] }
 0x330   : > { %6067 = vmatpush1.bf16.msra.mxu0 %v6066_v34  ;;  %v1937_v34 = vld [vmem:[%s7426_s22 + $0x34c8] sm:$0xff] }
 0x331   : > { %6323 = vmatpush1.bf16.msra.mxu1 %v6322_v35  ;;  %6069 = vmatprep.subr.bf16.mxu0 %v6068_v36  ;;  %v1923_v35 = vld [vmem:[%s7426_s22 + $0x3458] sm:$0xff]  ;;  %v6088_v39 = vpack.c.bf16 %v1937_v34, %v1921_v33  ;;  %v2016_v33 = vld [vmem:[%s7426_s22 + $0x3740] sm:$0xff] }
 0x332   : > { %6325 = vmatprep.subr.bf16.mxu1 %v6324_v40  ;;  %v1939_v36 = vld [vmem:[%s7426_s22 + $0x34d8] sm:$0xff]  ;;  %v1920_v40 = vld [vmem:[%s7426_s22 + $0x3440] sm:$0xff] }
 0x333   : > { %v6344_v43 = vpack.c.bf16 %v1939_v36, %v1923_v35  ;;  %v6090_v50 = vpack.c.bf16 %v1936_v41, %v1920_v40  ;;  %v2032_v34 = vld [vmem:[%s7426_s22 + $0x37c0] sm:$0xff]  ;;  %v2018_v35 = vld [vmem:[%s7426_s22 + $0x3750] sm:$0xff]  ;;  %v2049_v40 = vld [vmem:[%s7426_s22 + $0x3848] sm:$0xff] }
 0x334   : > { %6071 = vmatpush1.bf16.msra.mxu0 %v6070_v46  ;;  %v1969_v46 = vld [vmem:[%s7426_s22 + $0x35c8] sm:$0xff] }
 0x335   : > { %6327 = vmatpush1.bf16.msra.mxu1 %v6326_v47  ;;  %6073 = vmatprep.subr.bf16.mxu0 %v6072_v48  ;;  %v2318_v47 = vsub.s32 4, %v8365_v2  ;;  %v1955_v48 = vld [vmem:[%s7426_s22 + $0x3558] sm:$0xff]  ;;  %v6092_v55 = vpack.c.bf16 %v1969_v46, %v1953_v45  ;;  %v2065_v41 = vld [vmem:[%s7426_s22 + $0x38c8] sm:$0xff] }
 0x336   : > { %6329 = vmatprep.subr.bf16.mxu1 %v6328_v52  ;;  %v2322_v52 = vsub.s32 5, %v8365_v2  ;;  %v2051_v46 = vld [vmem:[%s7426_s22 + $0x3858] sm:$0xff]  ;;  %v6104_v57 = vpack.c.bf16 %v2065_v41, %v2049_v40  ;;  %v2177_v40 = vld [vmem:[%s7426_s22 + $0x3c48] sm:$0xff] }
 0x337   : > { %3723 = vmatmul.mubr.f32.vlgmr.msra.gmra.mrb[4].mxu0 %v7046_v5  ;;  %v2193_v41 = vld [vmem:[%s7426_s22 + $0x3cc8] sm:$0xff] }
 0x338   : > { %6075 = vmatpush1.bf16.msra.mxu0 %v6074_v58  ;;  %4007 = vmatmul.mubr.f32.vlgmr.msra.gmra.mrb[4].mxu1 %v7046_v5  ;;  %v1954_v58 = vld [vmem:[%s7426_s22 + $0x3550] sm:$0xff]  ;;  %v2323_v5 = vrot.slane %v7048_v63, %v2322_v52 }
 0x339   : > { %6331 = vmatpush1.bf16.msra.mxu1 %v6330_v59  ;;  %6077 = vmatprep.subr.bf16.mxu0 %v6076_v60  ;;  %v6348_v59 = vpack.c.bf16 %v1971_v49, %v1955_v48  ;;  %v1970_v60 = vld [vmem:[%s7426_s22 + $0x35d0] sm:$0xff]  ;;  %v2067_v48 = vld [vmem:[%s7426_s22 + $0x38d8] sm:$0xff] }
 0x33a   : > { %6333 = vmatprep.subr.bf16.mxu1 %v6332_v0  ;;  %3793 = vmatprep.mubr.f32.mxu0 %v7047_v22  ;;  %v2319_v0 = vrot.slane %v7048_v63, %v2318_v47  ;;  %v6350_v11 = vpack.c.bf16 %v1970_v60, %v1954_v58  ;;  %v2048_v58 = vld [vmem:[%s7426_s22 + $0x3840] sm:$0xff]  ;;  %v2050_v60 = vld [vmem:[%s7426_s22 + $0x3850] sm:$0xff]  ;;  %v6360_v61 = vpack.c.bf16 %v2067_v48, %v2051_v46 }
 0x33b   : > { %4077 = vmatprep.mubr.f32.mxu1 %v7047_v22  ;;  %v2019_v22 = vld [vmem:[%s7426_s22 + $0x3758] sm:$0xff]  ;;  %v6120_v46 = vpack.c.bf16 %v2193_v41, %v2177_v40  ;;  %v2176_v48 = vld [vmem:[%s7426_s22 + $0x3c40] sm:$0xff] }
 0x33c   : > { %6079 = vmatpush1.bf16.msra.mxu0 %v6078_v8  ;;  %v2000_v8 = vld [vmem:[%s7426_s22 + $0x36c0] sm:$0xff] }
 0x33d   : > { %6335 = vmatpush1.bf16.msra.mxu1 %v6334_v9  ;;  %6081 = vmatprep.subr.bf16.mxu0 %v6080_v10  ;;  %v1986_v9 = vld [vmem:[%s7426_s22 + $0x3650] sm:$0xff]  ;;  %v2331_v10 = vrot.slane %v7048_v63, %v2330_v54  ;;  %v2081_v63 = vld [vmem:[%s7426_s22 + $0x3948] sm:$0xff]  ;;  %v260_v40 = vld [vmem:[%s7426_s22 + $0x60] sm:$0xff] }
 0x33e   : > { %6337 = vmatprep.subr.bf16.mxu1 %v6336_v15  ;;  %v2017_v15 = vld [vmem:[%s7426_s22 + $0x3748] sm:$0xff]  ;;  %v276_v41 = vld [vmem:[%s7426_s22 + $0xe0] sm:$0xff] }
 0x33f   : > { %v6100_v32 = vpack.c.bf16 %v2033_v16, %v2017_v15  ;;  %v2115_v15 = vld [vmem:[%s7426_s22 + $0x3a58] sm:$0xff] }
 0x340   : > { %6083 = vmatpush1.bf16.msra.mxu0 %v6082_v25  ;;  %v2131_v16 = vld [vmem:[%s7426_s22 + $0x3ad8] sm:$0xff] }
 0x341   : > { %6339 = vmatpush1.bf16.msra.mxu1 %v6338_v26  ;;  %6085 = vmatprep.subr.bf16.mxu0 %v6084_v27  ;;  %v6098_v27 = vpack.c.bf16 %v2000_v8, %v1984_v7  ;;  %v2080_v7 = vld [vmem:[%s7426_s22 + $0x3940] sm:$0xff] }
 0x342   : > { %6341 = vmatprep.subr.bf16.mxu1 %v6340_v31  ;;  %v6354_v31 = vpack.c.bf16 %v2002_v14, %v1986_v9  ;;  %v2096_v8 = vld [vmem:[%s7426_s22 + $0x39c0] sm:$0xff]  ;;  %v2082_v9 = vld [vmem:[%s7426_s22 + $0x3950] sm:$0xff]  ;;  %v2129_v14 = vld [vmem:[%s7426_s22 + $0x3ac8] sm:$0xff] }
 0x344   : > { %6087 = vmatpush1.bf16.msra.mxu0 %v6086_v37 }
 0x345   : > { %6343 = vmatpush1.bf16.msra.mxu1 %v6342_v38  ;;  %6089 = vmatprep.subr.bf16.mxu0 %v6088_v39  ;;  %v6356_v38 = vpack.c.bf16 %v2035_v23, %v2019_v22  ;;  %v2034_v39 = vld [vmem:[%s7426_s22 + $0x37d0] sm:$0xff]  ;;  %v2112_v23 = vld [vmem:[%s7426_s22 + $0x3a40] sm:$0xff] }
 0x346   : > { %6345 = vmatprep.subr.bf16.mxu1 %v6344_v43  ;;  %v6358_v56 = vpack.c.bf16 %v2034_v39, %v2018_v35  ;;  %v2144_v35 = vld [vmem:[%s7426_s22 + $0x3b40] sm:$0xff]  ;;  %v2162_v39 = vld [vmem:[%s7426_s22 + $0x3bd0] sm:$0xff] }
 0x348   : > { %6091 = vmatpush1.bf16.msra.mxu0 %v6090_v50 }
 0x349   : > { %6347 = vmatpush1.bf16.msra.mxu1 %v6346_v53  ;;  %6093 = vmatprep.subr.bf16.mxu0 %v6092_v55  ;;  %v6102_v53 = vpack.c.bf16 %v2032_v34, %v2016_v33 }
 0x34a   : > { %v3227_v17 = vpop.f32.mrb[2].mxu0  ;;  %6349 = vmatprep.subr.bf16.mxu1 %v6348_v59  ;;  %v2064_v59 = vld [vmem:[%s7426_s22 + $0x38c0] sm:$0xff] }
 0x34b   : > { %v6908_v24 = vadd.f32 %v3227_v17, %v2319_v0  ;;  %v3511_v25 = vpop.f32.mrb[2].mxu1  ;;  %v3229_v26 = vpop.f32.mrb[3].mxu0  ;;  %v2097_v0 = vld [vmem:[%s7426_s22 + $0x39c8] sm:$0xff]  ;;  %v6110_v17 = vpack.c.bf16 %v2096_v8, %v2080_v7  ;;  %v2243_v7 = vld [vmem:[%s7426_s22 + $0x3e58] sm:$0xff] }
 0x34c   : > { %v6910_v28 = vadd.f32 %v3511_v25, %v2327_v4  ;;  %v6909_v29 = vadd.f32 %v3229_v26, %v2323_v5  ;;  %v3513_v30 = vpop.f32.mrb[3].mxu1  ;;  %6095 = vmatpush1.bf16.msra.mxu0 %v6094_v6  ;;  %v6106_v4 = vpack.c.bf16 %v2064_v59, %v2048_v58  ;;  %v6362_v5 = vpack.c.bf16 %v2066_v62, %v2050_v60  ;;  %v2114_v25 = vld [vmem:[%s7426_s22 + $0x3a50] sm:$0xff]  ;;  %v2211_v58 = vld [vmem:[%s7426_s22 + $0x3d58] sm:$0xff] }
 0x34d   : > { %vm4656_vm4 = vcmp.gt.f32.partialorder %v6908_v24, 0.0  ;;  %v4672_v36 = vmul.f32 0.2, %v6908_v24  ;;  %v6911_v37 = vadd.f32 %v3513_v30, %v2331_v10  ;;  %6351 = vmatpush1.bf16.msra.mxu1 %v6350_v11  ;;  %6097 = vmatprep.subr.bf16.mxu0 %v6096_v12  ;;  %v6108_v6 = vpack.c.bf16 %v2097_v0, %v2081_v63  ;;  %v2098_v11 = vld [vmem:[%s7426_s22 + $0x39d0] sm:$0xff]  ;;  %v2113_v12 = vld [vmem:[%s7426_s22 + $0x3a48] sm:$0xff]  ;;  %v2147_v30 = vld [vmem:[%s7426_s22 + $0x3b58] sm:$0xff] }
 0x34e   : > { %vm4658_vm5 = vcmp.gt.f32.partialorder %v6910_v28, 0.0  ;;  %v4674_v42 = vmul.f32 0.2, %v6910_v28  ;;  %vm4657_vm6 = vcmp.gt.f32.partialorder %v6909_v29, 0.0  ;;  %v4673_v43 = vmul.f32 0.2, %v6909_v29  ;;  %6353 = vmatprep.subr.bf16.mxu1 %v6352_v20 }
 0x34f   : > { %v4688_v44 = vsel %vm4656_vm4, %v6908_v24, %v4672_v36  ;;  %vm4659_vm7 = vcmp.gt.f32.partialorder %v6911_v37, 0.0  ;;  %v4675_v45 = vmul.f32 0.2, %v6911_v37  ;;  %v6364_v10 = vpack.c.bf16 %v2099_v3, %v2083_v1  ;;  %v2128_v24 = vld [vmem:[%s7426_s22 + $0x3ac0] sm:$0xff]  ;;  %v2227_v59 = vld [vmem:[%s7426_s22 + $0x3dd8] sm:$0xff]  ;;  %v2210_v1 = vld [vmem:[%s7426_s22 + $0x3d50] sm:$0xff] }
 0x350   : > { %4704 = vst [vmem:[%s8417_s10 + $0x20] sm:$0xff] %v4688_v44  ;;  %v4690_v49 = vsel %vm4658_vm5, %v6910_v28, %v4674_v42  ;;  %v4689_v50 = vsel %vm4657_vm6, %v6909_v29, %v4673_v43  ;;  %6099 = vmatpush1.bf16.msra.mxu0 %v6098_v27  ;;  %v6366_v20 = vpack.c.bf16 %v2098_v11, %v2082_v9  ;;  %v2130_v27 = vld [vmem:[%s7426_s22 + $0x3ad0] sm:$0xff]  ;;  %v2145_v28 = vld [vmem:[%s7426_s22 + $0x3b48] sm:$0xff]  ;;  %v2160_v36 = vld [vmem:[%s7426_s22 + $0x3bc0] sm:$0xff] }
 0x351   : > { %4706 = vst [vmem:[%s8417_s10 + $0x30] sm:$0xff] %v4690_v49  ;;  %4705 = vst [vmem:[%s8417_s10 + $0x28] sm:$0xff] %v4689_v50  ;;  %v4691_v55 = vsel %vm4659_vm7, %v6911_v37, %v4675_v45  ;;  %6355 = vmatpush1.bf16.msra.mxu1 %v6354_v31  ;;  %6101 = vmatprep.subr.bf16.mxu0 %v6100_v32  ;;  %v6112_v22 = vpack.c.bf16 %v2129_v14, %v2113_v12  ;;  %v2161_v29 = vld [vmem:[%s7426_s22 + $0x3bc8] sm:$0xff]  ;;  %v2163_v31 = vld [vmem:[%s7426_s22 + $0x3bd8] sm:$0xff] }
 0x352   : > { %4707 = vst [vmem:[%s8417_s10 + $0x38] sm:$0xff] %v4691_v55  ;;  %6357 = vmatprep.subr.bf16.mxu1 %v6356_v38  ;;  %v6368_v26 = vpack.c.bf16 %v2131_v16, %v2115_v15  ;;  %v6114_v32 = vpack.c.bf16 %v2128_v24, %v2112_v23  ;;  %v6370_v33 = vpack.c.bf16 %v2130_v27, %v2114_v25  ;;  %v2146_v37 = vld [vmem:[%s7426_s22 + $0x3b50] sm:$0xff]  ;;  %v2179_v42 = vld [vmem:[%s7426_s22 + $0x3c58] sm:$0xff]  ;;  %v2192_v49 = vld [vmem:[%s7426_s22 + $0x3cc0] sm:$0xff] }
 0x353   : > { %v6116_v34 = vpack.c.bf16 %v2161_v29, %v2145_v28  ;;  %v6372_v38 = vpack.c.bf16 %v2163_v31, %v2147_v30  ;;  %v2195_v43 = vld [vmem:[%s7426_s22 + $0x3cd8] sm:$0xff]  ;;  %v6118_v44 = vpack.c.bf16 %v2160_v36, %v2144_v35  ;;  %v6374_v45 = vpack.c.bf16 %v2162_v39, %v2146_v37  ;;  %v2178_v50 = vld [vmem:[%s7426_s22 + $0x3c50] sm:$0xff]  ;;  %v2208_v63 = vld [vmem:[%s7426_s22 + $0x3d40] sm:$0xff] }
 0x354   : > { %6103 = vmatpush1.bf16.msra.mxu0 %v6102_v53  ;;  %v6376_v53 = vpack.c.bf16 %v2195_v43, %v2179_v42  ;;  %v2194_v55 = vld [vmem:[%s7426_s22 + $0x3cd0] sm:$0xff]  ;;  %v6122_v60 = vpack.c.bf16 %v2192_v49, %v2176_v48  ;;  %v2224_v0 = vld [vmem:[%s7426_s22 + $0x3dc0] sm:$0xff]  ;;  %v6380_v3 = vpack.c.bf16 %v2227_v59, %v2211_v58  ;;  %v2259_v8 = vld [vmem:[%s7426_s22 + $0x3ed8] sm:$0xff] }
 0x355   : > { %6359 = vmatpush1.bf16.msra.mxu1 %v6358_v56  ;;  %6105 = vmatprep.subr.bf16.mxu0 %v6104_v57  ;;  %v2209_v56 = vld [vmem:[%s7426_s22 + $0x3d48] sm:$0xff]  ;;  %v6126_v9 = vpack.c.bf16 %v2224_v0, %v2208_v63  ;;  %v2240_v12 = vld [vmem:[%s7426_s22 + $0x3e40] sm:$0xff]  ;;  %v2242_v15 = vld [vmem:[%s7426_s22 + $0x3e50] sm:$0xff]  ;;  %v6384_v16 = vpack.c.bf16 %v2259_v8, %v2243_v7 }
 0x356   : > { %6361 = vmatprep.subr.bf16.mxu1 %v6360_v61  ;;  %v2225_v57 = vld [vmem:[%s7426_s22 + $0x3dc8] sm:$0xff]  ;;  %v6378_v61 = vpack.c.bf16 %v2194_v55, %v2178_v50  ;;  %v2256_v14 = vld [vmem:[%s7426_s22 + $0x3ec0] sm:$0xff]  ;;  %v2275_v23 = vld [vmem:[%s7426_s22 + $0x3f58] sm:$0xff]  ;;  %v6394_v50 = vpack.c.bf16 %v276_v41, %v260_v40 }
 0x357   : > { %v6124_v62 = vpack.c.bf16 %v2225_v57, %v2209_v56  ;;  %v2291_v24 = vld [vmem:[%s7426_s22 + $0x3fd8] sm:$0xff]  ;;  %v6130_v25 = vpack.c.bf16 %v2256_v14, %v2240_v12  ;;  %v2272_v28 = vld [vmem:[%s7426_s22 + $0x3f40] sm:$0xff]  ;;  %v2274_v30 = vld [vmem:[%s7426_s22 + $0x3f50] sm:$0xff] }
 0x358   : > { %6107 = vmatpush1.bf16.msra.mxu0 %v6106_v4  ;;  %v2226_v4 = vld [vmem:[%s7426_s22 + $0x3dd0] sm:$0xff]  ;;  %v2288_v29 = vld [vmem:[%s7426_s22 + $0x3fc0] sm:$0xff]  ;;  %v6388_v31 = vpack.c.bf16 %v2291_v24, %v2275_v23  ;;  %v263_v35 = vld [vmem:[%s7426_s22 + $0x78] sm:$0xff] }
 0x359   : > { %6363 = vmatpush1.bf16.msra.mxu1 %v6362_v5  ;;  %6109 = vmatprep.subr.bf16.mxu0 %v6108_v6  ;;  %v2241_v5 = vld [vmem:[%s7426_s22 + $0x3e48] sm:$0xff]  ;;  %v279_v36 = vld [vmem:[%s7426_s22 + $0xf8] sm:$0xff]  ;;  %v6134_v37 = vpack.c.bf16 %v2288_v29, %v2272_v28  ;;  %v262_v42 = vld [vmem:[%s7426_s22 + $0x70] sm:$0xff] }
 0x35a   : > { %6365 = vmatprep.subr.bf16.mxu1 %v6364_v10  ;;  %v2257_v6 = vld [vmem:[%s7426_s22 + $0x3ec8] sm:$0xff]  ;;  %v6382_v10 = vpack.c.bf16 %v2226_v4, %v2210_v1  ;;  %v6648_v43 = vpack.c.bf16 %v279_v36, %v263_v35  ;;  %v295_v48 = vld [vmem:[%s7426_s22 + $0x178] sm:$0xff]  ;;  %v292_v56 = vld [vmem:[%s7426_s22 + $0x160] sm:$0xff] }
 0x35b   : > { %v6128_v11 = vpack.c.bf16 %v2257_v6, %v2241_v5  ;;  %v311_v49 = vld [vmem:[%s7426_s22 + $0x1f8] sm:$0xff]  ;;  %v308_v57 = vld [vmem:[%s7426_s22 + $0x1e0] sm:$0xff]  ;;  %v294_v58 = vld [vmem:[%s7426_s22 + $0x170] sm:$0xff] }
 0x35c   : > { %6111 = vmatpush1.bf16.msra.mxu0 %v6110_v17  ;;  %v2258_v17 = vld [vmem:[%s7426_s22 + $0x3ed0] sm:$0xff]  ;;  %v6652_v59 = vpack.c.bf16 %v311_v49, %v295_v48  ;;  %v327_v0 = vld [vmem:[%s7426_s22 + $0x278] sm:$0xff]  ;;  %v324_v6 = vld [vmem:[%s7426_s22 + $0x260] sm:$0xff] }
 0x35d   : > { %6367 = vmatpush1.bf16.msra.mxu1 %v6366_v20  ;;  %6113 = vmatprep.subr.bf16.mxu0 %v6112_v22  ;;  %v2273_v20 = vld [vmem:[%s7426_s22 + $0x3f48] sm:$0xff]  ;;  %v7049_v63 = vld [vmem:[#allocation2 + $0x30] sm:$0xff]  ;;  %v343_v1 = vld [vmem:[%s7426_s22 + $0x2f8] sm:$0xff] }
 0x35e   : > { %6369 = vmatprep.subr.bf16.mxu1 %v6368_v26  ;;  %v2289_v22 = vld [vmem:[%s7426_s22 + $0x3fc8] sm:$0xff]  ;;  %v6386_v26 = vpack.c.bf16 %v2258_v17, %v2242_v15  ;;  %v340_v7 = vld [vmem:[%s7426_s22 + $0x2e0] sm:$0xff]  ;;  %v326_v8 = vld [vmem:[%s7426_s22 + $0x270] sm:$0xff] }
 0x35f   : > { %v6132_v27 = vpack.c.bf16 %v2289_v22, %v2273_v20  ;;  %v373_v12 = vld [vmem:[%s7426_s22 + $0x3e8] sm:$0xff]  ;;  %v359_v15 = vld [vmem:[%s7426_s22 + $0x378] sm:$0xff]  ;;  %v6402_v17 = vpack.c.bf16 %v340_v7, %v324_v6  ;;  %v356_v23 = vld [vmem:[%s7426_s22 + $0x360] sm:$0xff] }
 0x360   : > { %6115 = vmatpush1.bf16.msra.mxu0 %v6114_v32  ;;  %v2290_v32 = vld [vmem:[%s7426_s22 + $0x3fd0] sm:$0xff]  ;;  %v7050_v14 = vld [vmem:[#allocation2 + $0x8] sm:$0xff]  ;;  %v372_v24 = vld [vmem:[%s7426_s22 + $0x3e0] sm:$0xff] }
 0x361   : > { %6371 = vmatpush1.bf16.msra.mxu1 %v6370_v33  ;;  %6117 = vmatprep.subr.bf16.mxu0 %v6116_v34  ;;  %v261_v33 = vld [vmem:[%s7426_s22 + $0x68] sm:$0xff]  ;;  %v388_v35 = vld [vmem:[%s7426_s22 + $0x460] sm:$0xff]  ;;  %v487_v7 = vld [vmem:[%s7426_s22 + $0x778] sm:$0xff] }
 0x362   : > { %6373 = vmatprep.subr.bf16.mxu1 %v6372_v38  ;;  %v277_v34 = vld [vmem:[%s7426_s22 + $0xe8] sm:$0xff]  ;;  %v6390_v38 = vpack.c.bf16 %v2290_v32, %v2274_v30  ;;  %v391_v30 = vld [vmem:[%s7426_s22 + $0x478] sm:$0xff]  ;;  %v6406_v32 = vpack.c.bf16 %v372_v24, %v356_v23  ;;  %v404_v36 = vld [vmem:[%s7426_s22 + $0x4e0] sm:$0xff] }
 0x363   : > { %v6392_v39 = vpack.c.bf16 %v277_v34, %v261_v33  ;;  %v389_v28 = vld [vmem:[%s7426_s22 + $0x468] sm:$0xff]  ;;  %v420_v48 = vld [vmem:[%s7426_s22 + $0x560] sm:$0xff]  ;;  %v519_v23 = vld [vmem:[%s7426_s22 + $0x878] sm:$0xff] }
 0x364   : > { %6119 = vmatpush1.bf16.msra.mxu0 %v6118_v44  ;;  %v278_v44 = vld [vmem:[%s7426_s22 + $0xf0] sm:$0xff]  ;;  %v405_v29 = vld [vmem:[%s7426_s22 + $0x4e8] sm:$0xff]  ;;  %v436_v49 = vld [vmem:[%s7426_s22 + $0x5e0] sm:$0xff] }
 0x365   : > { %6375 = vmatpush1.bf16.msra.mxu1 %v6374_v45  ;;  %6121 = vmatprep.subr.bf16.mxu0 %v6120_v46  ;;  %v293_v45 = vld [vmem:[%s7426_s22 + $0x168] sm:$0xff]  ;;  %v6408_v34 = vpack.c.bf16 %v405_v29, %v389_v28  ;;  %v535_v24 = vld [vmem:[%s7426_s22 + $0x8f8] sm:$0xff]  ;;  %v516_v28 = vld [vmem:[%s7426_s22 + $0x860] sm:$0xff] }
 0x366   : > { %6377 = vmatprep.subr.bf16.mxu1 %v6376_v53  ;;  %v309_v46 = vld [vmem:[%s7426_s22 + $0x1e8] sm:$0xff]  ;;  %v6650_v53 = vpack.c.bf16 %v278_v44, %v262_v42  ;;  %v423_v42 = vld [vmem:[%s7426_s22 + $0x578] sm:$0xff]  ;;  %v6410_v44 = vpack.c.bf16 %v404_v36, %v388_v35  ;;  %v532_v29 = vld [vmem:[%s7426_s22 + $0x8e0] sm:$0xff] }
 0x367   : > { %v6396_v55 = vpack.c.bf16 %v309_v46, %v293_v45  ;;  %v421_v40 = vld [vmem:[%s7426_s22 + $0x568] sm:$0xff]  ;;  %v551_v35 = vld [vmem:[%s7426_s22 + $0x978] sm:$0xff] }
 0x368   : > { %6123 = vmatpush1.bf16.msra.mxu0 %v6122_v60  ;;  %v310_v60 = vld [vmem:[%s7426_s22 + $0x1f0] sm:$0xff]  ;;  %v437_v41 = vld [vmem:[%s7426_s22 + $0x5e8] sm:$0xff]  ;;  %v567_v36 = vld [vmem:[%s7426_s22 + $0x9f8] sm:$0xff] }
 0x369   : > { %6379 = vmatpush1.bf16.msra.mxu1 %v6378_v61  ;;  %6125 = vmatprep.subr.bf16.mxu0 %v6124_v62  ;;  %v325_v61 = vld [vmem:[%s7426_s22 + $0x268] sm:$0xff]  ;;  %v6654_v4 = vpack.c.bf16 %v310_v60, %v294_v58  ;;  %v6412_v46 = vpack.c.bf16 %v437_v41, %v421_v40  ;;  %v455_v58 = vld [vmem:[%s7426_s22 + $0x678] sm:$0xff]  ;;  %v6414_v60 = vpack.c.bf16 %v436_v49, %v420_v48  ;;  %v548_v40 = vld [vmem:[%s7426_s22 + $0x960] sm:$0xff] }
 0x36a   : > { %6381 = vmatprep.subr.bf16.mxu1 %v6380_v3  ;;  %v341_v62 = vld [vmem:[%s7426_s22 + $0x2e8] sm:$0xff]  ;;  %v6398_v3 = vpack.c.bf16 %v308_v57, %v292_v56  ;;  %v564_v41 = vld [vmem:[%s7426_s22 + $0x9e0] sm:$0xff]  ;;  %v583_v48 = vld [vmem:[%s7426_s22 + $0xa78] sm:$0xff] }
 0x36b   : > { %v6400_v5 = vpack.c.bf16 %v341_v62, %v325_v61  ;;  %v453_v56 = vld [vmem:[%s7426_s22 + $0x668] sm:$0xff]  ;;  %v599_v49 = vld [vmem:[%s7426_s22 + $0xaf8] sm:$0xff] }
 0x36c   : > { %6127 = vmatpush1.bf16.msra.mxu0 %v6126_v9  ;;  %v6656_v9 = vpack.c.bf16 %v343_v1, %v327_v0  ;;  %v469_v57 = vld [vmem:[%s7426_s22 + $0x6e8] sm:$0xff]  ;;  %v468_v0 = vld [vmem:[%s7426_s22 + $0x6e0] sm:$0xff]  ;;  %v454_v1 = vld [vmem:[%s7426_s22 + $0x670] sm:$0xff] }
 0x36d   : > { %6383 = vmatpush1.bf16.msra.mxu1 %v6382_v10  ;;  %6129 = vmatprep.subr.bf16.mxu0 %v6128_v11  ;;  %v342_v10 = vld [vmem:[%s7426_s22 + $0x2f0] sm:$0xff]  ;;  %v357_v11 = vld [vmem:[%s7426_s22 + $0x368] sm:$0xff]  ;;  %v6416_v62 = vpack.c.bf16 %v469_v57, %v453_v56  ;;  %v580_v56 = vld [vmem:[%s7426_s22 + $0xa60] sm:$0xff] }
 0x36e   : > { %6385 = vmatprep.subr.bf16.mxu1 %v6384_v16  ;;  %v375_v16 = vld [vmem:[%s7426_s22 + $0x3f8] sm:$0xff]  ;;  %v6658_v20 = vpack.c.bf16 %v342_v10, %v326_v8  ;;  %v6404_v22 = vpack.c.bf16 %v373_v12, %v357_v11  ;;  %v501_v6 = vld [vmem:[%s7426_s22 + $0x7e8] sm:$0xff]  ;;  %v484_v12 = vld [vmem:[%s7426_s22 + $0x760] sm:$0xff] }
 0x36f   : > { %v503_v8 = vld [vmem:[%s7426_s22 + $0x7f8] sm:$0xff]  ;;  %v596_v57 = vld [vmem:[%s7426_s22 + $0xae0] sm:$0xff] }
 0x370   : > { %6131 = vmatpush1.bf16.msra.mxu0 %v6130_v25  ;;  %v358_v25 = vld [vmem:[%s7426_s22 + $0x370] sm:$0xff] }
 0x371   : > { %6387 = vmatpush1.bf16.msra.mxu1 %v6386_v26  ;;  %6133 = vmatprep.subr.bf16.mxu0 %v6132_v27  ;;  %v6660_v26 = vpack.c.bf16 %v375_v16, %v359_v15  ;;  %v374_v27 = vld [vmem:[%s7426_s22 + $0x3f0] sm:$0xff]  ;;  %v6676_v16 = vpack.c.bf16 %v503_v8, %v487_v7 }
 0x372   : > { %6389 = vmatprep.subr.bf16.mxu1 %v6388_v31  ;;  %v407_v31 = vld [vmem:[%s7426_s22 + $0x4f8] sm:$0xff]  ;;  %v6662_v33 = vpack.c.bf16 %v374_v27, %v358_v25  ;;  %v486_v15 = vld [vmem:[%s7426_s22 + $0x770] sm:$0xff] }
 0x373   : > { %v614_v7 = vld [vmem:[%s7426_s22 + $0xb70] sm:$0xff] }
 0x374   : > { %6135 = vmatpush1.bf16.msra.mxu0 %v6134_v37  ;;  %v390_v37 = vld [vmem:[%s7426_s22 + $0x470] sm:$0xff] }
 0x375   : > { %6391 = vmatpush1.bf16.msra.mxu1 %v6390_v38  ;;  %6393 = vmatprep.subr.bf16.mxu0 %v6392_v39  ;;  %v6664_v38 = vpack.c.bf16 %v407_v31, %v391_v30  ;;  %v406_v39 = vld [vmem:[%s7426_s22 + $0x4f0] sm:$0xff]  ;;  %v6680_v31 = vpack.c.bf16 %v535_v24, %v519_v23 }
 0x376   : > { %6649 = vmatprep.subr.bf16.mxu1 %v6648_v43  ;;  %v439_v43 = vld [vmem:[%s7426_s22 + $0x5f8] sm:$0xff]  ;;  %v6666_v45 = vpack.c.bf16 %v406_v39, %v390_v37  ;;  %v518_v30 = vld [vmem:[%s7426_s22 + $0x870] sm:$0xff]  ;;  %v6426_v37 = vpack.c.bf16 %v532_v29, %v516_v28 }
 0x377   : > { %3794 = vmatmul.mubr.f32.vlgmr.msra.gmra.mrb[4].mxu0 %v7049_v63  ;;  %v646_v23 = vld [vmem:[%s7426_s22 + $0xc70] sm:$0xff]  ;;  %v679_v28 = vld [vmem:[%s7426_s22 + $0xd78] sm:$0xff] }
 0x378   : > { %4078 = vmatmul.mubr.f32.vlgmr.msra.gmra.mrb[4].mxu1 %v7049_v63  ;;  %6395 = vmatpush1.bf16.msra.mxu0 %v6394_v50  ;;  %v422_v50 = vld [vmem:[%s7426_s22 + $0x570] sm:$0xff]  ;;  %v452_v63 = vld [vmem:[%s7426_s22 + $0x660] sm:$0xff]  ;;  %v695_v29 = vld [vmem:[%s7426_s22 + $0xdf8] sm:$0xff] }
 0x379   : > { %6651 = vmatpush1.bf16.msra.mxu1 %v6650_v53  ;;  %6397 = vmatprep.subr.bf16.mxu0 %v6396_v55  ;;  %v6668_v53 = vpack.c.bf16 %v439_v43, %v423_v42  ;;  %v438_v55 = vld [vmem:[%s7426_s22 + $0x5f0] sm:$0xff]  ;;  %v6684_v43 = vpack.c.bf16 %v567_v36, %v551_v35  ;;  %v6700_v36 = vpack.c.bf16 %v695_v29, %v679_v28 }
 0x37a   : > { %6653 = vmatprep.subr.bf16.mxu1 %v6652_v59  ;;  %4148 = vmatprep.mubr.f32.mxu0 %v7050_v14  ;;  %v471_v59 = vld [vmem:[%s7426_s22 + $0x6f8] sm:$0xff]  ;;  %v6670_v61 = vpack.c.bf16 %v438_v55, %v422_v50  ;;  %v550_v42 = vld [vmem:[%s7426_s22 + $0x970] sm:$0xff]  ;;  %v6430_v50 = vpack.c.bf16 %v564_v41, %v548_v40 }
 0x37b   : > { %4432 = vmatprep.mubr.f32.mxu1 %v7050_v14  ;;  %v500_v14 = vld [vmem:[%s7426_s22 + $0x7e0] sm:$0xff]  ;;  %v678_v35 = vld [vmem:[%s7426_s22 + $0xd70] sm:$0xff]  ;;  %v711_v40 = vld [vmem:[%s7426_s22 + $0xe78] sm:$0xff] }
 0x37c   : > { %6399 = vmatpush1.bf16.msra.mxu0 %v6398_v3  ;;  %v6672_v3 = vpack.c.bf16 %v471_v59, %v455_v58  ;;  %v6422_v25 = vpack.c.bf16 %v500_v14, %v484_v12  ;;  %v582_v58 = vld [vmem:[%s7426_s22 + $0xa70] sm:$0xff]  ;;  %v6688_v59 = vpack.c.bf16 %v599_v49, %v583_v48  ;;  %v647_v12 = vld [vmem:[%s7426_s22 + $0xc78] sm:$0xff] }
 0x37d   : > { %6655 = vmatpush1.bf16.msra.mxu1 %v6654_v4  ;;  %6401 = vmatprep.subr.bf16.mxu0 %v6400_v5  ;;  %v470_v4 = vld [vmem:[%s7426_s22 + $0x6f0] sm:$0xff]  ;;  %v485_v5 = vld [vmem:[%s7426_s22 + $0x768] sm:$0xff]  ;;  %v663_v14 = vld [vmem:[%s7426_s22 + $0xcf8] sm:$0xff] }
 0x37e   : > { %6657 = vmatprep.subr.bf16.mxu1 %v6656_v9  ;;  %v6418_v9 = vpack.c.bf16 %v468_v0, %v452_v63  ;;  %v6674_v10 = vpack.c.bf16 %v470_v4, %v454_v1  ;;  %v6420_v11 = vpack.c.bf16 %v501_v6, %v485_v5  ;;  %v615_v63 = vld [vmem:[%s7426_s22 + $0xb78] sm:$0xff]  ;;  %v6434_v1 = vpack.c.bf16 %v596_v57, %v580_v56  ;;  %v612_v5 = vld [vmem:[%s7426_s22 + $0xb60] sm:$0xff]  ;;  %v710_v48 = vld [vmem:[%s7426_s22 + $0xe70] sm:$0xff] }
 0x37f   : > { %v631_v0 = vld [vmem:[%s7426_s22 + $0xbf8] sm:$0xff]  ;;  %v628_v6 = vld [vmem:[%s7426_s22 + $0xbe0] sm:$0xff]  ;;  %v6696_v24 = vpack.c.bf16 %v663_v14, %v647_v12  ;;  %v774_v12 = vld [vmem:[%s7426_s22 + $0x1070] sm:$0xff] }
 0x380   : > { %6403 = vmatpush1.bf16.msra.mxu0 %v6402_v17  ;;  %v502_v17 = vld [vmem:[%s7426_s22 + $0x7f0] sm:$0xff]  ;;  %v6692_v8 = vpack.c.bf16 %v631_v0, %v615_v63  ;;  %v727_v41 = vld [vmem:[%s7426_s22 + $0xef8] sm:$0xff] }
 0x381   : > { %6659 = vmatpush1.bf16.msra.mxu1 %v6658_v20  ;;  %6405 = vmatprep.subr.bf16.mxu0 %v6404_v22  ;;  %v517_v20 = vld [vmem:[%s7426_s22 + $0x868] sm:$0xff]  ;;  %v6704_v49 = vpack.c.bf16 %v727_v41, %v711_v40  ;;  %v743_v56 = vld [vmem:[%s7426_s22 + $0xf78] sm:$0xff]  ;;  %v742_v63 = vld [vmem:[%s7426_s22 + $0xf70] sm:$0xff] }
 0x382   : > { %6661 = vmatprep.subr.bf16.mxu1 %v6660_v26  ;;  %v533_v22 = vld [vmem:[%s7426_s22 + $0x8e8] sm:$0xff]  ;;  %v6678_v26 = vpack.c.bf16 %v502_v17, %v486_v15  ;;  %v6438_v15 = vpack.c.bf16 %v628_v6, %v612_v5  ;;  %v759_v57 = vld [vmem:[%s7426_s22 + $0xff8] sm:$0xff]  ;;  %v806_v28 = vld [vmem:[%s7426_s22 + $0x1170] sm:$0xff] }
 0x383   : > { %v6424_v27 = vpack.c.bf16 %v533_v22, %v517_v20  ;;  %v644_v20 = vld [vmem:[%s7426_s22 + $0xc60] sm:$0xff]  ;;  %v6708_v0 = vpack.c.bf16 %v759_v57, %v743_v56  ;;  %v775_v5 = vld [vmem:[%s7426_s22 + $0x1078] sm:$0xff]  ;;  %v838_v41 = vld [vmem:[%s7426_s22 + $0x1270] sm:$0xff] }
 0x384   : > { %6407 = vmatpush1.bf16.msra.mxu0 %v6406_v32  ;;  %v534_v32 = vld [vmem:[%s7426_s22 + $0x8f0] sm:$0xff]  ;;  %v660_v22 = vld [vmem:[%s7426_s22 + $0xce0] sm:$0xff]  ;;  %v791_v6 = vld [vmem:[%s7426_s22 + $0x10f8] sm:$0xff] }
 0x385   : > { %6663 = vmatpush1.bf16.msra.mxu1 %v6662_v33  ;;  %6409 = vmatprep.subr.bf16.mxu0 %v6408_v34  ;;  %v549_v33 = vld [vmem:[%s7426_s22 + $0x968] sm:$0xff]  ;;  %v6712_v14 = vpack.c.bf16 %v791_v6, %v775_v5  ;;  %v852_v40 = vld [vmem:[%s7426_s22 + $0x12e0] sm:$0xff] }
 0x386   : > { %6665 = vmatprep.subr.bf16.mxu1 %v6664_v38  ;;  %v565_v34 = vld [vmem:[%s7426_s22 + $0x9e8] sm:$0xff]  ;;  %v6682_v38 = vpack.c.bf16 %v534_v32, %v518_v30  ;;  %v6442_v30 = vpack.c.bf16 %v660_v22, %v644_v20  ;;  %v807_v20 = vld [vmem:[%s7426_s22 + $0x1178] sm:$0xff]  ;;  %v868_v56 = vld [vmem:[%s7426_s22 + $0x1360] sm:$0xff] }
 0x387   : > { %v6428_v39 = vpack.c.bf16 %v565_v34, %v549_v33  ;;  %v676_v33 = vld [vmem:[%s7426_s22 + $0xd60] sm:$0xff]  ;;  %v823_v22 = vld [vmem:[%s7426_s22 + $0x11f8] sm:$0xff] }
 0x388   : > { %6411 = vmatpush1.bf16.msra.mxu0 %v6410_v44  ;;  %v566_v44 = vld [vmem:[%s7426_s22 + $0x9f0] sm:$0xff]  ;;  %v692_v34 = vld [vmem:[%s7426_s22 + $0xde0] sm:$0xff]  ;;  %v6716_v29 = vpack.c.bf16 %v823_v22, %v807_v20 }
 0x389   : > { %6667 = vmatpush1.bf16.msra.mxu1 %v6666_v45  ;;  %6413 = vmatprep.subr.bf16.mxu0 %v6412_v46  ;;  %v581_v45 = vld [vmem:[%s7426_s22 + $0xa68] sm:$0xff]  ;;  %v884_v57 = vld [vmem:[%s7426_s22 + $0x13e0] sm:$0xff] }
 0x38a   : > { %6669 = vmatprep.subr.bf16.mxu1 %v6668_v53  ;;  %v597_v46 = vld [vmem:[%s7426_s22 + $0xae8] sm:$0xff]  ;;  %v6686_v53 = vpack.c.bf16 %v566_v44, %v550_v42  ;;  %v6446_v42 = vpack.c.bf16 %v692_v34, %v676_v33  ;;  %v7051_v33 = vld [vmem:[#allocation2] sm:$0xff]  ;;  %v839_v34 = vld [vmem:[%s7426_s22 + $0x1278] sm:$0xff] }
 0x38b   : > { %v6432_v55 = vpack.c.bf16 %v597_v46, %v581_v45  ;;  %v708_v45 = vld [vmem:[%s7426_s22 + $0xe60] sm:$0xff] }
 0x38c   : > { %6415 = vmatpush1.bf16.msra.mxu0 %v6414_v60  ;;  %v598_v60 = vld [vmem:[%s7426_s22 + $0xaf0] sm:$0xff]  ;;  %v724_v46 = vld [vmem:[%s7426_s22 + $0xee0] sm:$0xff] }
 0x38d   : > { %6671 = vmatpush1.bf16.msra.mxu1 %v6670_v61  ;;  %6417 = vmatprep.subr.bf16.mxu0 %v6416_v62  ;;  %v613_v61 = vld [vmem:[%s7426_s22 + $0xb68] sm:$0xff]  ;;  %v900_v5 = vld [vmem:[%s7426_s22 + $0x1460] sm:$0xff] }
 0x38e   : > { %6673 = vmatprep.subr.bf16.mxu1 %v6672_v3  ;;  %v629_v62 = vld [vmem:[%s7426_s22 + $0xbe8] sm:$0xff]  ;;  %v6690_v3 = vpack.c.bf16 %v598_v60, %v582_v58  ;;  %v6450_v58 = vpack.c.bf16 %v724_v46, %v708_v45  ;;  %v7052_v46 = vld [vmem:[#allocation2 + $0x18] sm:$0xff]  ;;  %v916_v6 = vld [vmem:[%s7426_s22 + $0x14e0] sm:$0xff] }
 0x38f   : > { %v6436_v4 = vpack.c.bf16 %v629_v62, %v613_v61  ;;  %v740_v61 = vld [vmem:[%s7426_s22 + $0xf60] sm:$0xff]  ;;  %v885_v45 = vld [vmem:[%s7426_s22 + $0x13e8] sm:$0xff] }
 0x390   : > { %6419 = vmatpush1.bf16.msra.mxu0 %v6418_v9  ;;  %v630_v9 = vld [vmem:[%s7426_s22 + $0xbf0] sm:$0xff]  ;;  %v756_v62 = vld [vmem:[%s7426_s22 + $0xfe0] sm:$0xff] }
 0x391   : > { %6675 = vmatpush1.bf16.msra.mxu1 %v6674_v10  ;;  %6421 = vmatprep.subr.bf16.mxu0 %v6420_v11  ;;  %v645_v10 = vld [vmem:[%s7426_s22 + $0xc68] sm:$0xff]  ;;  %v932_v20 = vld [vmem:[%s7426_s22 + $0x1560] sm:$0xff] }
 0x392   : > { %6677 = vmatprep.subr.bf16.mxu1 %v6676_v16  ;;  %v661_v11 = vld [vmem:[%s7426_s22 + $0xce8] sm:$0xff]  ;;  %v6694_v16 = vpack.c.bf16 %v630_v9, %v614_v7  ;;  %v6454_v7 = vpack.c.bf16 %v756_v62, %v740_v61  ;;  %v948_v22 = vld [vmem:[%s7426_s22 + $0x15e0] sm:$0xff] }
 0x393   : > { %v6440_v17 = vpack.c.bf16 %v661_v11, %v645_v10  ;;  %v772_v10 = vld [vmem:[%s7426_s22 + $0x1060] sm:$0xff]  ;;  %v901_v61 = vld [vmem:[%s7426_s22 + $0x1468] sm:$0xff] }
 0x394   : > { %6423 = vmatpush1.bf16.msra.mxu0 %v6422_v25  ;;  %v662_v25 = vld [vmem:[%s7426_s22 + $0xcf0] sm:$0xff]  ;;  %v788_v11 = vld [vmem:[%s7426_s22 + $0x10e0] sm:$0xff]  ;;  %v917_v62 = vld [vmem:[%s7426_s22 + $0x14e8] sm:$0xff] }
 0x395   : > { %6679 = vmatpush1.bf16.msra.mxu1 %v6678_v26  ;;  %6425 = vmatprep.subr.bf16.mxu0 %v6424_v27  ;;  %v677_v26 = vld [vmem:[%s7426_s22 + $0xd68] sm:$0xff] }
 0x396   : > { %6681 = vmatprep.subr.bf16.mxu1 %v6680_v31  ;;  %v693_v27 = vld [vmem:[%s7426_s22 + $0xde8] sm:$0xff]  ;;  %v6698_v31 = vpack.c.bf16 %v662_v25, %v646_v23  ;;  %v6458_v23 = vpack.c.bf16 %v788_v11, %v772_v10 }
 0x397   : > { %v6444_v32 = vpack.c.bf16 %v693_v27, %v677_v26  ;;  %v804_v26 = vld [vmem:[%s7426_s22 + $0x1160] sm:$0xff]  ;;  %v933_v10 = vld [vmem:[%s7426_s22 + $0x1568] sm:$0xff] }
 0x398   : > { %6427 = vmatpush1.bf16.msra.mxu0 %v6426_v37  ;;  %v694_v37 = vld [vmem:[%s7426_s22 + $0xdf0] sm:$0xff]  ;;  %v820_v27 = vld [vmem:[%s7426_s22 + $0x11e0] sm:$0xff]  ;;  %v949_v11 = vld [vmem:[%s7426_s22 + $0x15e8] sm:$0xff] }
 0x399   : > { %6683 = vmatpush1.bf16.msra.mxu1 %v6682_v38  ;;  %6429 = vmatprep.subr.bf16.mxu0 %v6428_v39  ;;  %v709_v38 = vld [vmem:[%s7426_s22 + $0xe68] sm:$0xff] }
 0x39a   : > { %6685 = vmatprep.subr.bf16.mxu1 %v6684_v43  ;;  %v725_v39 = vld [vmem:[%s7426_s22 + $0xee8] sm:$0xff]  ;;  %v6702_v43 = vpack.c.bf16 %v694_v37, %v678_v35  ;;  %v855_v35 = vld [vmem:[%s7426_s22 + $0x12f8] sm:$0xff] }
 0x39b   : > { %v6448_v44 = vpack.c.bf16 %v725_v39, %v709_v38  ;;  %v836_v39 = vld [vmem:[%s7426_s22 + $0x1260] sm:$0xff] }
 0x39c   : > { %6431 = vmatpush1.bf16.msra.mxu0 %v6430_v50  ;;  %v726_v50 = vld [vmem:[%s7426_s22 + $0xef0] sm:$0xff] }
 0x39d   : > { %6687 = vmatpush1.bf16.msra.mxu1 %v6686_v53  ;;  %6433 = vmatprep.subr.bf16.mxu0 %v6432_v55  ;;  %v741_v53 = vld [vmem:[%s7426_s22 + $0xf68] sm:$0xff] }
 0x39e   : > { %6689 = vmatprep.subr.bf16.mxu1 %v6688_v59  ;;  %v757_v55 = vld [vmem:[%s7426_s22 + $0xfe8] sm:$0xff]  ;;  %v6706_v59 = vpack.c.bf16 %v726_v50, %v710_v48  ;;  %v871_v48 = vld [vmem:[%s7426_s22 + $0x1378] sm:$0xff]  ;;  %v6466_v50 = vpack.c.bf16 %v852_v40, %v836_v39 }
 0x39f   : > { %v6452_v60 = vpack.c.bf16 %v757_v55, %v741_v53  ;;  %v1013_v39 = vld [vmem:[%s7426_s22 + $0x17e8] sm:$0xff]  ;;  %v999_v40 = vld [vmem:[%s7426_s22 + $0x1778] sm:$0xff] }
 0x3a0   : > { %6435 = vmatpush1.bf16.msra.mxu0 %v6434_v1  ;;  %v758_v1 = vld [vmem:[%s7426_s22 + $0xff0] sm:$0xff] }
 0x3a1   : > { %6691 = vmatpush1.bf16.msra.mxu1 %v6690_v3  ;;  %6437 = vmatprep.subr.bf16.mxu0 %v6436_v4  ;;  %v773_v3 = vld [vmem:[%s7426_s22 + $0x1068] sm:$0xff] }
 0x3a2   : > { %6693 = vmatprep.subr.bf16.mxu1 %v6692_v8  ;;  %v789_v4 = vld [vmem:[%s7426_s22 + $0x10e8] sm:$0xff]  ;;  %v6710_v8 = vpack.c.bf16 %v758_v1, %v742_v63  ;;  %v903_v63 = vld [vmem:[%s7426_s22 + $0x1478] sm:$0xff]  ;;  %v6470_v1 = vpack.c.bf16 %v884_v57, %v868_v56 }
 0x3a3   : > { %v6456_v9 = vpack.c.bf16 %v789_v4, %v773_v3  ;;  %v6472_v4 = vpack.c.bf16 %v917_v62, %v901_v61  ;;  %v1031_v56 = vld [vmem:[%s7426_s22 + $0x1878] sm:$0xff]  ;;  %v1028_v61 = vld [vmem:[%s7426_s22 + $0x1860] sm:$0xff] }
 0x3a4   : > { %6439 = vmatpush1.bf16.msra.mxu0 %v6438_v15  ;;  %v790_v15 = vld [vmem:[%s7426_s22 + $0x10f0] sm:$0xff]  ;;  %v1047_v57 = vld [vmem:[%s7426_s22 + $0x18f8] sm:$0xff]  ;;  %v1044_v62 = vld [vmem:[%s7426_s22 + $0x18e0] sm:$0xff] }
 0x3a5   : > { %6695 = vmatpush1.bf16.msra.mxu1 %v6694_v16  ;;  %6441 = vmatprep.subr.bf16.mxu0 %v6440_v17  ;;  %v805_v16 = vld [vmem:[%s7426_s22 + $0x1168] sm:$0xff] }
 0x3a6   : > { %6697 = vmatprep.subr.bf16.mxu1 %v6696_v24  ;;  %v821_v17 = vld [vmem:[%s7426_s22 + $0x11e8] sm:$0xff]  ;;  %v6714_v24 = vpack.c.bf16 %v790_v15, %v774_v12  ;;  %v935_v12 = vld [vmem:[%s7426_s22 + $0x1578] sm:$0xff]  ;;  %v6474_v15 = vpack.c.bf16 %v916_v6, %v900_v5 }
 0x3a7   : > { %v6460_v25 = vpack.c.bf16 %v821_v17, %v805_v16  ;;  %v6476_v17 = vpack.c.bf16 %v949_v11, %v933_v10  ;;  %v1063_v5 = vld [vmem:[%s7426_s22 + $0x1978] sm:$0xff]  ;;  %v1060_v10 = vld [vmem:[%s7426_s22 + $0x1960] sm:$0xff] }
 0x3a8   : > { %6443 = vmatpush1.bf16.msra.mxu0 %v6442_v30  ;;  %v822_v30 = vld [vmem:[%s7426_s22 + $0x11f0] sm:$0xff]  ;;  %v1079_v6 = vld [vmem:[%s7426_s22 + $0x19f8] sm:$0xff]  ;;  %v1076_v11 = vld [vmem:[%s7426_s22 + $0x19e0] sm:$0xff] }
 0x3a9   : > { %6699 = vmatpush1.bf16.msra.mxu1 %v6698_v31  ;;  %6445 = vmatprep.subr.bf16.mxu0 %v6444_v32  ;;  %v837_v31 = vld [vmem:[%s7426_s22 + $0x1268] sm:$0xff]  ;;  %v6718_v37 = vpack.c.bf16 %v822_v30, %v806_v28  ;;  %v967_v28 = vld [vmem:[%s7426_s22 + $0x1678] sm:$0xff]  ;;  %v6478_v30 = vpack.c.bf16 %v948_v22, %v932_v20 }
 0x3aa   : > { %6701 = vmatprep.subr.bf16.mxu1 %v6700_v36  ;;  %v853_v32 = vld [vmem:[%s7426_s22 + $0x12e8] sm:$0xff]  ;;  %v6462_v36 = vpack.c.bf16 %v820_v27, %v804_v26  ;;  %v1095_v20 = vld [vmem:[%s7426_s22 + $0x1a78] sm:$0xff] }
 0x3ab   : > { %v6464_v38 = vpack.c.bf16 %v853_v32, %v837_v31  ;;  %v965_v26 = vld [vmem:[%s7426_s22 + $0x1668] sm:$0xff]  ;;  %v1111_v22 = vld [vmem:[%s7426_s22 + $0x1af8] sm:$0xff] }
 0x3ac   : > { %6447 = vmatpush1.bf16.msra.mxu0 %v6446_v42  ;;  %v6720_v42 = vpack.c.bf16 %v855_v35, %v839_v34  ;;  %v981_v27 = vld [vmem:[%s7426_s22 + $0x16e8] sm:$0xff]  ;;  %v980_v34 = vld [vmem:[%s7426_s22 + $0x16e0] sm:$0xff]  ;;  %v966_v35 = vld [vmem:[%s7426_s22 + $0x1670] sm:$0xff] }
 0x3ad   : > { %6703 = vmatpush1.bf16.msra.mxu1 %v6702_v43  ;;  %6449 = vmatprep.subr.bf16.mxu0 %v6448_v44  ;;  %v854_v43 = vld [vmem:[%s7426_s22 + $0x12f0] sm:$0xff]  ;;  %v869_v44 = vld [vmem:[%s7426_s22 + $0x1368] sm:$0xff]  ;;  %v6480_v32 = vpack.c.bf16 %v981_v27, %v965_v26  ;;  %v1092_v26 = vld [vmem:[%s7426_s22 + $0x1a60] sm:$0xff] }
 0x3ae   : > { %6705 = vmatprep.subr.bf16.mxu1 %v6704_v49  ;;  %v887_v49 = vld [vmem:[%s7426_s22 + $0x13f8] sm:$0xff]  ;;  %v6722_v53 = vpack.c.bf16 %v854_v43, %v838_v41  ;;  %v6468_v55 = vpack.c.bf16 %v885_v45, %v869_v44  ;;  %v996_v45 = vld [vmem:[%s7426_s22 + $0x1760] sm:$0xff] }
 0x3af   : > { %v1015_v41 = vld [vmem:[%s7426_s22 + $0x17f8] sm:$0xff]  ;;  %v1108_v27 = vld [vmem:[%s7426_s22 + $0x1ae0] sm:$0xff] }
 0x3b0   : > { %6451 = vmatpush1.bf16.msra.mxu0 %v6450_v58  ;;  %v870_v58 = vld [vmem:[%s7426_s22 + $0x1370] sm:$0xff] }
 0x3b1   : > { %6707 = vmatpush1.bf16.msra.mxu1 %v6706_v59  ;;  %6453 = vmatprep.subr.bf16.mxu0 %v6452_v60  ;;  %v6724_v59 = vpack.c.bf16 %v887_v49, %v871_v48  ;;  %v886_v60 = vld [vmem:[%s7426_s22 + $0x13f0] sm:$0xff]  ;;  %v6740_v49 = vpack.c.bf16 %v1015_v41, %v999_v40 }
 0x3b2   : > { %6709 = vmatprep.subr.bf16.mxu1 %v6708_v0  ;;  %v919_v0 = vld [vmem:[%s7426_s22 + $0x14f8] sm:$0xff]  ;;  %v6726_v3 = vpack.c.bf16 %v886_v60, %v870_v58  ;;  %v998_v48 = vld [vmem:[%s7426_s22 + $0x1770] sm:$0xff] }
 0x3b3   : > { %v1126_v40 = vld [vmem:[%s7426_s22 + $0x1b70] sm:$0xff] }
 0x3b4   : > { %6455 = vmatpush1.bf16.msra.mxu0 %v6454_v7  ;;  %v902_v7 = vld [vmem:[%s7426_s22 + $0x1470] sm:$0xff] }
 0x3b5   : > { %6711 = vmatpush1.bf16.msra.mxu1 %v6710_v8  ;;  %6457 = vmatprep.subr.bf16.mxu0 %v6456_v9  ;;  %v6728_v8 = vpack.c.bf16 %v919_v0, %v903_v63  ;;  %v918_v9 = vld [vmem:[%s7426_s22 + $0x14f0] sm:$0xff]  ;;  %v6744_v0 = vpack.c.bf16 %v1047_v57, %v1031_v56 }
 0x3b6   : > { %6713 = vmatprep.subr.bf16.mxu1 %v6712_v14  ;;  %v951_v14 = vld [vmem:[%s7426_s22 + $0x15f8] sm:$0xff]  ;;  %v6730_v16 = vpack.c.bf16 %v918_v9, %v902_v7  ;;  %v1030_v63 = vld [vmem:[%s7426_s22 + $0x1870] sm:$0xff]  ;;  %v6490_v7 = vpack.c.bf16 %v1044_v62, %v1028_v61 }
 0x3b7   : > { %4149 = vmatmul.mubr.f32.vlgmr.msra.gmra.mrb[6].mxu0 %v7051_v33  ;;  %v1158_v56 = vld [vmem:[%s7426_s22 + $0x1c70] sm:$0xff]  ;;  %v1191_v61 = vld [vmem:[%s7426_s22 + $0x1d78] sm:$0xff] }
 0x3b8   : > { %6459 = vmatpush1.bf16.msra.mxu0 %v6458_v23  ;;  %4433 = vmatmul.mubr.f32.vlgmr.msra.gmra.mrb[6].mxu1 %v7051_v33  ;;  %v934_v23 = vld [vmem:[%s7426_s22 + $0x1570] sm:$0xff]  ;;  %v964_v33 = vld [vmem:[%s7426_s22 + $0x1660] sm:$0xff]  ;;  %v1207_v62 = vld [vmem:[%s7426_s22 + $0x1df8] sm:$0xff] }
 0x3b9   : > { %6715 = vmatpush1.bf16.msra.mxu1 %v6714_v24  ;;  %6461 = vmatprep.subr.bf16.mxu0 %v6460_v25  ;;  %v6732_v24 = vpack.c.bf16 %v951_v14, %v935_v12  ;;  %v950_v25 = vld [vmem:[%s7426_s22 + $0x15f0] sm:$0xff]  ;;  %v6748_v14 = vpack.c.bf16 %v1079_v6, %v1063_v5  ;;  %v6764_v6 = vpack.c.bf16 %v1207_v62, %v1191_v61 }
 0x3ba   : > { %6717 = vmatprep.subr.bf16.mxu1 %v6716_v29  ;;  %4219 = vmatprep.mubr.f32.mxu0 %v7052_v46  ;;  %v983_v29 = vld [vmem:[%s7426_s22 + $0x16f8] sm:$0xff]  ;;  %v6734_v31 = vpack.c.bf16 %v950_v25, %v934_v23  ;;  %v1062_v12 = vld [vmem:[%s7426_s22 + $0x1970] sm:$0xff]  ;;  %v6494_v23 = vpack.c.bf16 %v1076_v11, %v1060_v10 }
 0x3bb   : > { %4503 = vmatprep.mubr.f32.mxu1 %v7052_v46  ;;  %v1012_v46 = vld [vmem:[%s7426_s22 + $0x17e0] sm:$0xff]  ;;  %v1190_v5 = vld [vmem:[%s7426_s22 + $0x1d70] sm:$0xff]  ;;  %v1223_v10 = vld [vmem:[%s7426_s22 + $0x1e78] sm:$0xff] }
 0x3bc   : > { %6463 = vmatpush1.bf16.msra.mxu0 %v6462_v36  ;;  %v6736_v36 = vpack.c.bf16 %v983_v29, %v967_v28  ;;  %v6486_v58 = vpack.c.bf16 %v1012_v46, %v996_v45  ;;  %v1094_v28 = vld [vmem:[%s7426_s22 + $0x1a70] sm:$0xff]  ;;  %v6752_v29 = vpack.c.bf16 %v1111_v22, %v1095_v20  ;;  %v1159_v45 = vld [vmem:[%s7426_s22 + $0x1c78] sm:$0xff] }
 0x3bd   : > { %6719 = vmatpush1.bf16.msra.mxu1 %v6718_v37  ;;  %6465 = vmatprep.subr.bf16.mxu0 %v6464_v38  ;;  %v982_v37 = vld [vmem:[%s7426_s22 + $0x16f0] sm:$0xff]  ;;  %v997_v38 = vld [vmem:[%s7426_s22 + $0x1768] sm:$0xff]  ;;  %v1175_v46 = vld [vmem:[%s7426_s22 + $0x1cf8] sm:$0xff] }
 0x3be   : > { %6721 = vmatprep.subr.bf16.mxu1 %v6720_v42  ;;  %v6482_v42 = vpack.c.bf16 %v980_v34, %v964_v33  ;;  %v6738_v43 = vpack.c.bf16 %v982_v37, %v966_v35  ;;  %v6484_v44 = vpack.c.bf16 %v1013_v39, %v997_v38  ;;  %v1127_v33 = vld [vmem:[%s7426_s22 + $0x1b78] sm:$0xff]  ;;  %v6498_v35 = vpack.c.bf16 %v1108_v27, %v1092_v26  ;;  %v1124_v38 = vld [vmem:[%s7426_s22 + $0x1b60] sm:$0xff]  ;;  %v1222_v20 = vld [vmem:[%s7426_s22 + $0x1e70] sm:$0xff] }
 0x3bf   : > { %v1143_v34 = vld [vmem:[%s7426_s22 + $0x1bf8] sm:$0xff]  ;;  %v1140_v39 = vld [vmem:[%s7426_s22 + $0x1be0] sm:$0xff]  ;;  %v6760_v57 = vpack.c.bf16 %v1175_v46, %v1159_v45  ;;  %v1286_v45 = vld [vmem:[%s7426_s22 + $0x2070] sm:$0xff] }
 0x3c0   : > { %6467 = vmatpush1.bf16.msra.mxu0 %v6466_v50  ;;  %v1014_v50 = vld [vmem:[%s7426_s22 + $0x17f0] sm:$0xff]  ;;  %v6756_v41 = vpack.c.bf16 %v1143_v34, %v1127_v33  ;;  %v1239_v11 = vld [vmem:[%s7426_s22 + $0x1ef8] sm:$0xff] }
 0x3c1   : > { %6723 = vmatpush1.bf16.msra.mxu1 %v6722_v53  ;;  %6469 = vmatprep.subr.bf16.mxu0 %v6468_v55  ;;  %v1029_v53 = vld [vmem:[%s7426_s22 + $0x1868] sm:$0xff]  ;;  %v6768_v22 = vpack.c.bf16 %v1239_v11, %v1223_v10  ;;  %v1255_v26 = vld [vmem:[%s7426_s22 + $0x1f78] sm:$0xff]  ;;  %v1254_v33 = vld [vmem:[%s7426_s22 + $0x1f70] sm:$0xff] }
 0x3c2   : > { %6725 = vmatprep.subr.bf16.mxu1 %v6724_v59  ;;  %v1045_v55 = vld [vmem:[%s7426_s22 + $0x18e8] sm:$0xff]  ;;  %v6742_v59 = vpack.c.bf16 %v1014_v50, %v998_v48  ;;  %v6502_v48 = vpack.c.bf16 %v1140_v39, %v1124_v38  ;;  %v1271_v27 = vld [vmem:[%s7426_s22 + $0x1ff8] sm:$0xff]  ;;  %v1318_v61 = vld [vmem:[%s7426_s22 + $0x2170] sm:$0xff] }
 0x3c3   : > { %v6488_v60 = vpack.c.bf16 %v1045_v55, %v1029_v53  ;;  %v1156_v53 = vld [vmem:[%s7426_s22 + $0x1c60] sm:$0xff]  ;;  %v6772_v34 = vpack.c.bf16 %v1271_v27, %v1255_v26  ;;  %v1287_v38 = vld [vmem:[%s7426_s22 + $0x2078] sm:$0xff]  ;;  %v1350_v11 = vld [vmem:[%s7426_s22 + $0x2270] sm:$0xff] }
 0x3c4   : > { %6471 = vmatpush1.bf16.msra.mxu0 %v6470_v1  ;;  %v1046_v1 = vld [vmem:[%s7426_s22 + $0x18f0] sm:$0xff]  ;;  %v1172_v55 = vld [vmem:[%s7426_s22 + $0x1ce0] sm:$0xff]  ;;  %v1303_v39 = vld [vmem:[%s7426_s22 + $0x20f8] sm:$0xff] }
 0x3c5   : > { %6727 = vmatpush1.bf16.msra.mxu1 %v6726_v3  ;;  %6473 = vmatprep.subr.bf16.mxu0 %v6472_v4  ;;  %v1061_v3 = vld [vmem:[%s7426_s22 + $0x1968] sm:$0xff]  ;;  %v6776_v46 = vpack.c.bf16 %v1303_v39, %v1287_v38  ;;  %v1364_v10 = vld [vmem:[%s7426_s22 + $0x22e0] sm:$0xff] }
 0x3c6   : > { %6729 = vmatprep.subr.bf16.mxu1 %v6728_v8  ;;  %v1077_v4 = vld [vmem:[%s7426_s22 + $0x19e8] sm:$0xff]  ;;  %v6746_v8 = vpack.c.bf16 %v1046_v1, %v1030_v63  ;;  %v6506_v63 = vpack.c.bf16 %v1172_v55, %v1156_v53  ;;  %v1319_v53 = vld [vmem:[%s7426_s22 + $0x2178] sm:$0xff]  ;;  %v1380_v26 = vld [vmem:[%s7426_s22 + $0x2360] sm:$0xff] }
 0x3c7   : > { %v6492_v9 = vpack.c.bf16 %v1077_v4, %v1061_v3  ;;  %v1188_v3 = vld [vmem:[%s7426_s22 + $0x1d60] sm:$0xff]  ;;  %v1335_v55 = vld [vmem:[%s7426_s22 + $0x21f8] sm:$0xff] }
 0x3c8   : > { %6475 = vmatpush1.bf16.msra.mxu0 %v6474_v15  ;;  %v1078_v15 = vld [vmem:[%s7426_s22 + $0x19f0] sm:$0xff]  ;;  %v1204_v4 = vld [vmem:[%s7426_s22 + $0x1de0] sm:$0xff]  ;;  %v6780_v62 = vpack.c.bf16 %v1335_v55, %v1319_v53 }
 0x3c9   : > { %6731 = vmatpush1.bf16.msra.mxu1 %v6730_v16  ;;  %6477 = vmatprep.subr.bf16.mxu0 %v6476_v17  ;;  %v1093_v16 = vld [vmem:[%s7426_s22 + $0x1a68] sm:$0xff]  ;;  %v1396_v27 = vld [vmem:[%s7426_s22 + $0x23e0] sm:$0xff] }
 0x3ca   : > { %6733 = vmatprep.subr.bf16.mxu1 %v6732_v24  ;;  %v1109_v17 = vld [vmem:[%s7426_s22 + $0x1ae8] sm:$0xff]  ;;  %v6750_v24 = vpack.c.bf16 %v1078_v15, %v1062_v12  ;;  %v6510_v12 = vpack.c.bf16 %v1204_v4, %v1188_v3  ;;  %v7053_v3 = vld [vmem:[#allocation2 + $0x10] sm:$0xff]  ;;  %v1351_v4 = vld [vmem:[%s7426_s22 + $0x2278] sm:$0xff] }
 0x3cb   : > { %v6496_v25 = vpack.c.bf16 %v1109_v17, %v1093_v16  ;;  %v1220_v16 = vld [vmem:[%s7426_s22 + $0x1e60] sm:$0xff] }
 0x3cc   : > { %6479 = vmatpush1.bf16.msra.mxu0 %v6478_v30  ;;  %v1110_v30 = vld [vmem:[%s7426_s22 + $0x1af0] sm:$0xff]  ;;  %v1236_v17 = vld [vmem:[%s7426_s22 + $0x1ee0] sm:$0xff] }
 0x3cd   : > { %6735 = vmatpush1.bf16.msra.mxu1 %v6734_v31  ;;  %6481 = vmatprep.subr.bf16.mxu0 %v6480_v32  ;;  %v1125_v31 = vld [vmem:[%s7426_s22 + $0x1b68] sm:$0xff]  ;;  %v1412_v38 = vld [vmem:[%s7426_s22 + $0x2460] sm:$0xff] }
 0x3ce   : > { %6737 = vmatprep.subr.bf16.mxu1 %v6736_v36  ;;  %v1141_v32 = vld [vmem:[%s7426_s22 + $0x1be8] sm:$0xff]  ;;  %v6754_v36 = vpack.c.bf16 %v1110_v30, %v1094_v28  ;;  %v6514_v28 = vpack.c.bf16 %v1236_v17, %v1220_v16  ;;  %v1428_v39 = vld [vmem:[%s7426_s22 + $0x24e0] sm:$0xff] }
 0x3cf   : > { %v6500_v37 = vpack.c.bf16 %v1141_v32, %v1125_v31  ;;  %v1252_v31 = vld [vmem:[%s7426_s22 + $0x1f60] sm:$0xff]  ;;  %v1397_v16 = vld [vmem:[%s7426_s22 + $0x23e8] sm:$0xff] }
 0x3d0   : > { %6483 = vmatpush1.bf16.msra.mxu0 %v6482_v42  ;;  %v1142_v42 = vld [vmem:[%s7426_s22 + $0x1bf0] sm:$0xff]  ;;  %v1268_v32 = vld [vmem:[%s7426_s22 + $0x1fe0] sm:$0xff]  ;;  %v7054_v17 = vld [vmem:[#allocation2 + $0x28] sm:$0xff] }
 0x3d1   : > { %6739 = vmatpush1.bf16.msra.mxu1 %v6738_v43  ;;  %6485 = vmatprep.subr.bf16.mxu0 %v6484_v44  ;;  %v1157_v43 = vld [vmem:[%s7426_s22 + $0x1c68] sm:$0xff]  ;;  %v1444_v53 = vld [vmem:[%s7426_s22 + $0x2560] sm:$0xff] }
 0x3d2   : > { %6741 = vmatprep.subr.bf16.mxu1 %v6740_v49  ;;  %v1173_v44 = vld [vmem:[%s7426_s22 + $0x1ce8] sm:$0xff]  ;;  %v6758_v49 = vpack.c.bf16 %v1142_v42, %v1126_v40  ;;  %v6518_v40 = vpack.c.bf16 %v1268_v32, %v1252_v31  ;;  %v1460_v55 = vld [vmem:[%s7426_s22 + $0x25e0] sm:$0xff] }
 0x3d3   : > { %v6504_v50 = vpack.c.bf16 %v1173_v44, %v1157_v43  ;;  %v1284_v43 = vld [vmem:[%s7426_s22 + $0x2060] sm:$0xff]  ;;  %v1413_v31 = vld [vmem:[%s7426_s22 + $0x2468] sm:$0xff] }
 0x3d4   : > { %6487 = vmatpush1.bf16.msra.mxu0 %v6486_v58  ;;  %v1174_v58 = vld [vmem:[%s7426_s22 + $0x1cf0] sm:$0xff]  ;;  %v1300_v44 = vld [vmem:[%s7426_s22 + $0x20e0] sm:$0xff]  ;;  %v1429_v32 = vld [vmem:[%s7426_s22 + $0x24e8] sm:$0xff] }
 0x3d5   : > { %6743 = vmatpush1.bf16.msra.mxu1 %v6742_v59  ;;  %6489 = vmatprep.subr.bf16.mxu0 %v6488_v60  ;;  %v1189_v59 = vld [vmem:[%s7426_s22 + $0x1d68] sm:$0xff] }
 0x3d6   : > { %6745 = vmatprep.subr.bf16.mxu1 %v6744_v0  ;;  %v1205_v60 = vld [vmem:[%s7426_s22 + $0x1de8] sm:$0xff]  ;;  %v6762_v0 = vpack.c.bf16 %v1174_v58, %v1158_v56  ;;  %v6522_v56 = vpack.c.bf16 %v1300_v44, %v1284_v43 }
 0x3d7   : > { %v6508_v1 = vpack.c.bf16 %v1205_v60, %v1189_v59  ;;  %v1316_v59 = vld [vmem:[%s7426_s22 + $0x2160] sm:$0xff]  ;;  %v1445_v43 = vld [vmem:[%s7426_s22 + $0x2568] sm:$0xff] }
 0x3d8   : > { %6491 = vmatpush1.bf16.msra.mxu0 %v6490_v7  ;;  %v1206_v7 = vld [vmem:[%s7426_s22 + $0x1df0] sm:$0xff]  ;;  %v1332_v60 = vld [vmem:[%s7426_s22 + $0x21e0] sm:$0xff]  ;;  %v1461_v44 = vld [vmem:[%s7426_s22 + $0x25e8] sm:$0xff] }
 0x3d9   : > { %6747 = vmatpush1.bf16.msra.mxu1 %v6746_v8  ;;  %6493 = vmatprep.subr.bf16.mxu0 %v6492_v9  ;;  %v1221_v8 = vld [vmem:[%s7426_s22 + $0x1e68] sm:$0xff] }
 0x3da   : > { %6749 = vmatprep.subr.bf16.mxu1 %v6748_v14  ;;  %v1237_v9 = vld [vmem:[%s7426_s22 + $0x1ee8] sm:$0xff]  ;;  %v6766_v14 = vpack.c.bf16 %v1206_v7, %v1190_v5  ;;  %v1367_v5 = vld [vmem:[%s7426_s22 + $0x22f8] sm:$0xff] }
 0x3db   : > { %v6512_v15 = vpack.c.bf16 %v1237_v9, %v1221_v8  ;;  %v1348_v9 = vld [vmem:[%s7426_s22 + $0x2260] sm:$0xff] }
 0x3dc   : > { %6495 = vmatpush1.bf16.msra.mxu0 %v6494_v23  ;;  %v1238_v23 = vld [vmem:[%s7426_s22 + $0x1ef0] sm:$0xff] }
 0x3dd   : > { %6751 = vmatpush1.bf16.msra.mxu1 %v6750_v24  ;;  %6497 = vmatprep.subr.bf16.mxu0 %v6496_v25  ;;  %v1253_v24 = vld [vmem:[%s7426_s22 + $0x1f68] sm:$0xff] }
 0x3de   : > { %6753 = vmatprep.subr.bf16.mxu1 %v6752_v29  ;;  %v1269_v25 = vld [vmem:[%s7426_s22 + $0x1fe8] sm:$0xff]  ;;  %v6770_v29 = vpack.c.bf16 %v1238_v23, %v1222_v20  ;;  %v1383_v20 = vld [vmem:[%s7426_s22 + $0x2378] sm:$0xff]  ;;  %v6530_v23 = vpack.c.bf16 %v1364_v10, %v1348_v9 }
 0x3df   : > { %v6516_v30 = vpack.c.bf16 %v1269_v25, %v1253_v24  ;;  %v1525_v9 = vld [vmem:[%s7426_s22 + $0x27e8] sm:$0xff]  ;;  %v1511_v10 = vld [vmem:[%s7426_s22 + $0x2778] sm:$0xff] }
 0x3e0   : > { %6499 = vmatpush1.bf16.msra.mxu0 %v6498_v35  ;;  %v1270_v35 = vld [vmem:[%s7426_s22 + $0x1ff0] sm:$0xff] }
 0x3e1   : > { %6755 = vmatpush1.bf16.msra.mxu1 %v6754_v36  ;;  %6501 = vmatprep.subr.bf16.mxu0 %v6500_v37  ;;  %v1285_v36 = vld [vmem:[%s7426_s22 + $0x2068] sm:$0xff] }
 0x3e2   : > { %6757 = vmatprep.subr.bf16.mxu1 %v6756_v41  ;;  %v1301_v37 = vld [vmem:[%s7426_s22 + $0x20e8] sm:$0xff]  ;;  %v6774_v41 = vpack.c.bf16 %v1270_v35, %v1254_v33  ;;  %v1415_v33 = vld [vmem:[%s7426_s22 + $0x2478] sm:$0xff]  ;;  %v6534_v35 = vpack.c.bf16 %v1396_v27, %v1380_v26 }
 0x3e3   : > { %v6520_v42 = vpack.c.bf16 %v1301_v37, %v1285_v36  ;;  %v6536_v37 = vpack.c.bf16 %v1429_v32, %v1413_v31  ;;  %v1543_v26 = vld [vmem:[%s7426_s22 + $0x2878] sm:$0xff]  ;;  %v1540_v31 = vld [vmem:[%s7426_s22 + $0x2860] sm:$0xff] }
 0x3e4   : > { %6503 = vmatpush1.bf16.msra.mxu0 %v6502_v48  ;;  %v1302_v48 = vld [vmem:[%s7426_s22 + $0x20f0] sm:$0xff]  ;;  %v1559_v27 = vld [vmem:[%s7426_s22 + $0x28f8] sm:$0xff]  ;;  %v1556_v32 = vld [vmem:[%s7426_s22 + $0x28e0] sm:$0xff] }
 0x3e5   : > { %6759 = vmatpush1.bf16.msra.mxu1 %v6758_v49  ;;  %6505 = vmatprep.subr.bf16.mxu0 %v6504_v50  ;;  %v1317_v49 = vld [vmem:[%s7426_s22 + $0x2168] sm:$0xff] }
 0x3e6   : > { %6761 = vmatprep.subr.bf16.mxu1 %v6760_v57  ;;  %v1333_v50 = vld [vmem:[%s7426_s22 + $0x21e8] sm:$0xff]  ;;  %v6778_v57 = vpack.c.bf16 %v1302_v48, %v1286_v45  ;;  %v1447_v45 = vld [vmem:[%s7426_s22 + $0x2578] sm:$0xff]  ;;  %v6538_v48 = vpack.c.bf16 %v1428_v39, %v1412_v38 }
 0x3e7   : > { %v6524_v58 = vpack.c.bf16 %v1333_v50, %v1317_v49  ;;  %v6540_v50 = vpack.c.bf16 %v1461_v44, %v1445_v43  ;;  %v1575_v38 = vld [vmem:[%s7426_s22 + $0x2978] sm:$0xff]  ;;  %v1572_v43 = vld [vmem:[%s7426_s22 + $0x2960] sm:$0xff] }
 0x3e8   : > { %6507 = vmatpush1.bf16.msra.mxu0 %v6506_v63  ;;  %v1334_v63 = vld [vmem:[%s7426_s22 + $0x21f0] sm:$0xff]  ;;  %v1591_v39 = vld [vmem:[%s7426_s22 + $0x29f8] sm:$0xff]  ;;  %v1588_v44 = vld [vmem:[%s7426_s22 + $0x29e0] sm:$0xff] }
 0x3e9   : > { %6763 = vmatpush1.bf16.msra.mxu1 %v6762_v0  ;;  %6509 = vmatprep.subr.bf16.mxu0 %v6508_v1  ;;  %v1349_v0 = vld [vmem:[%s7426_s22 + $0x2268] sm:$0xff]  ;;  %v6782_v7 = vpack.c.bf16 %v1334_v63, %v1318_v61  ;;  %v1479_v61 = vld [vmem:[%s7426_s22 + $0x2678] sm:$0xff]  ;;  %v6542_v63 = vpack.c.bf16 %v1460_v55, %v1444_v53 }
 0x3ea   : > { %6765 = vmatprep.subr.bf16.mxu1 %v6764_v6  ;;  %v1365_v1 = vld [vmem:[%s7426_s22 + $0x22e8] sm:$0xff]  ;;  %v6526_v6 = vpack.c.bf16 %v1332_v60, %v1316_v59  ;;  %v1607_v53 = vld [vmem:[%s7426_s22 + $0x2a78] sm:$0xff] }
 0x3eb   : > { %v6528_v8 = vpack.c.bf16 %v1365_v1, %v1349_v0  ;;  %v1477_v59 = vld [vmem:[%s7426_s22 + $0x2668] sm:$0xff]  ;;  %v1623_v55 = vld [vmem:[%s7426_s22 + $0x2af8] sm:$0xff] }
 0x3ec   : > { %6511 = vmatpush1.bf16.msra.mxu0 %v6510_v12  ;;  %v6784_v12 = vpack.c.bf16 %v1367_v5, %v1351_v4  ;;  %v1493_v60 = vld [vmem:[%s7426_s22 + $0x26e8] sm:$0xff]  ;;  %v1492_v4 = vld [vmem:[%s7426_s22 + $0x26e0] sm:$0xff]  ;;  %v1478_v5 = vld [vmem:[%s7426_s22 + $0x2670] sm:$0xff] }
 0x3ed   : > { %6767 = vmatpush1.bf16.msra.mxu1 %v6766_v14  ;;  %6513 = vmatprep.subr.bf16.mxu0 %v6512_v15  ;;  %v1366_v14 = vld [vmem:[%s7426_s22 + $0x22f0] sm:$0xff]  ;;  %v1381_v15 = vld [vmem:[%s7426_s22 + $0x2368] sm:$0xff]  ;;  %v6544_v1 = vpack.c.bf16 %v1493_v60, %v1477_v59  ;;  %v1604_v59 = vld [vmem:[%s7426_s22 + $0x2a60] sm:$0xff] }
 0x3ee   : > { %6769 = vmatprep.subr.bf16.mxu1 %v6768_v22  ;;  %v1399_v22 = vld [vmem:[%s7426_s22 + $0x23f8] sm:$0xff]  ;;  %v6786_v24 = vpack.c.bf16 %v1366_v14, %v1350_v11  ;;  %v6532_v25 = vpack.c.bf16 %v1397_v16, %v1381_v15  ;;  %v1508_v16 = vld [vmem:[%s7426_s22 + $0x2760] sm:$0xff] }
 0x3ef   : > { %v1527_v11 = vld [vmem:[%s7426_s22 + $0x27f8] sm:$0xff]  ;;  %v1620_v60 = vld [vmem:[%s7426_s22 + $0x2ae0] sm:$0xff] }
 0x3f0   : > { %6515 = vmatpush1.bf16.msra.mxu0 %v6514_v28  ;;  %v1382_v28 = vld [vmem:[%s7426_s22 + $0x2370] sm:$0xff] }
 0x3f1   : > { %6771 = vmatpush1.bf16.msra.mxu1 %v6770_v29  ;;  %6517 = vmatprep.subr.bf16.mxu0 %v6516_v30  ;;  %v6788_v29 = vpack.c.bf16 %v1399_v22, %v1383_v20  ;;  %v1398_v30 = vld [vmem:[%s7426_s22 + $0x23f0] sm:$0xff]  ;;  %v6804_v22 = vpack.c.bf16 %v1527_v11, %v1511_v10 }
 0x3f2   : > { %6773 = vmatprep.subr.bf16.mxu1 %v6772_v34  ;;  %v1431_v34 = vld [vmem:[%s7426_s22 + $0x24f8] sm:$0xff]  ;;  %v6790_v36 = vpack.c.bf16 %v1398_v30, %v1382_v28  ;;  %v1510_v20 = vld [vmem:[%s7426_s22 + $0x2770] sm:$0xff] }
 0x3f3   : > { %v1638_v10 = vld [vmem:[%s7426_s22 + $0x2b70] sm:$0xff] }
 0x3f4   : > { %6519 = vmatpush1.bf16.msra.mxu0 %v6518_v40  ;;  %v1414_v40 = vld [vmem:[%s7426_s22 + $0x2470] sm:$0xff] }
 0x3f5   : > { %6775 = vmatpush1.bf16.msra.mxu1 %v6774_v41  ;;  %6521 = vmatprep.subr.bf16.mxu0 %v6520_v42  ;;  %v6792_v41 = vpack.c.bf16 %v1431_v34, %v1415_v33  ;;  %v1430_v42 = vld [vmem:[%s7426_s22 + $0x24f0] sm:$0xff]  ;;  %v6808_v34 = vpack.c.bf16 %v1559_v27, %v1543_v26 }
 0x3f6   : > { %6777 = vmatprep.subr.bf16.mxu1 %v6776_v46  ;;  %v1463_v46 = vld [vmem:[%s7426_s22 + $0x25f8] sm:$0xff]  ;;  %v6794_v49 = vpack.c.bf16 %v1430_v42, %v1414_v40  ;;  %v1542_v33 = vld [vmem:[%s7426_s22 + $0x2870] sm:$0xff]  ;;  %v6554_v40 = vpack.c.bf16 %v1556_v32, %v1540_v31 }
 0x3f7   : > { %4220 = vmatmul.mubr.f32.vlgmr.msra.gmra.mrb[6].mxu0 %v7053_v3  ;;  %v1670_v26 = vld [vmem:[%s7426_s22 + $0x2c70] sm:$0xff]  ;;  %v1703_v31 = vld [vmem:[%s7426_s22 + $0x2d78] sm:$0xff] }
 0x3f8   : > { %6523 = vmatpush1.bf16.msra.mxu0 %v6522_v56  ;;  %4504 = vmatmul.mubr.f32.vlgmr.msra.gmra.mrb[6].mxu1 %v7053_v3  ;;  %v1446_v56 = vld [vmem:[%s7426_s22 + $0x2570] sm:$0xff]  ;;  %v1476_v3 = vld [vmem:[%s7426_s22 + $0x2660] sm:$0xff]  ;;  %v1719_v32 = vld [vmem:[%s7426_s22 + $0x2df8] sm:$0xff] }
 0x3f9   : > { %6779 = vmatpush1.bf16.msra.mxu1 %v6778_v57  ;;  %6525 = vmatprep.subr.bf16.mxu0 %v6524_v58  ;;  %v6796_v57 = vpack.c.bf16 %v1463_v46, %v1447_v45  ;;  %v1462_v58 = vld [vmem:[%s7426_s22 + $0x25f0] sm:$0xff]  ;;  %v6812_v46 = vpack.c.bf16 %v1591_v39, %v1575_v38  ;;  %v6828_v39 = vpack.c.bf16 %v1719_v32, %v1703_v31 }
 0x3fa   : > { %6781 = vmatprep.subr.bf16.mxu1 %v6780_v62  ;;  %4290 = vmatprep.mubr.f32.mxu0 %v7054_v17  ;;  %v1495_v62 = vld [vmem:[%s7426_s22 + $0x26f8] sm:$0xff]  ;;  %v6798_v0 = vpack.c.bf16 %v1462_v58, %v1446_v56  ;;  %v1574_v45 = vld [vmem:[%s7426_s22 + $0x2970] sm:$0xff]  ;;  %v6558_v56 = vpack.c.bf16 %v1588_v44, %v1572_v43 }
 0x3fb   : > { %4574 = vmatprep.mubr.f32.mxu1 %v7054_v17  ;;  %v1524_v17 = vld [vmem:[%s7426_s22 + $0x27e0] sm:$0xff]  ;;  %v1702_v38 = vld [vmem:[%s7426_s22 + $0x2d70] sm:$0xff]  ;;  %v1735_v43 = vld [vmem:[%s7426_s22 + $0x2e78] sm:$0xff] }
 0x3fc   : > { %6527 = vmatpush1.bf16.msra.mxu0 %v6526_v6  ;;  %v6800_v6 = vpack.c.bf16 %v1495_v62, %v1479_v61  ;;  %v6550_v28 = vpack.c.bf16 %v1524_v17, %v1508_v16  ;;  %v1606_v61 = vld [vmem:[%s7426_s22 + $0x2a70] sm:$0xff]  ;;  %v6816_v62 = vpack.c.bf16 %v1623_v55, %v1607_v53  ;;  %v1671_v16 = vld [vmem:[%s7426_s22 + $0x2c78] sm:$0xff] }
 0x3fd   : > { %6783 = vmatpush1.bf16.msra.mxu1 %v6782_v7  ;;  %6529 = vmatprep.subr.bf16.mxu0 %v6528_v8  ;;  %v1494_v7 = vld [vmem:[%s7426_s22 + $0x26f0] sm:$0xff]  ;;  %v1509_v8 = vld [vmem:[%s7426_s22 + $0x2768] sm:$0xff]  ;;  %v1687_v17 = vld [vmem:[%s7426_s22 + $0x2cf8] sm:$0xff] }
 0x3fe   : > { %6785 = vmatprep.subr.bf16.mxu1 %v6784_v12  ;;  %v6546_v12 = vpack.c.bf16 %v1492_v4, %v1476_v3  ;;  %v6802_v14 = vpack.c.bf16 %v1494_v7, %v1478_v5  ;;  %v6548_v15 = vpack.c.bf16 %v1525_v9, %v1509_v8  ;;  %v1639_v3 = vld [vmem:[%s7426_s22 + $0x2b78] sm:$0xff]  ;;  %v6562_v5 = vpack.c.bf16 %v1620_v60, %v1604_v59  ;;  %v1636_v8 = vld [vmem:[%s7426_s22 + $0x2b60] sm:$0xff]  ;;  %v1734_v53 = vld [vmem:[%s7426_s22 + $0x2e70] sm:$0xff] }
 0x3ff   : > { %v1655_v4 = vld [vmem:[%s7426_s22 + $0x2bf8] sm:$0xff]  ;;  %v1652_v9 = vld [vmem:[%s7426_s22 + $0x2be0] sm:$0xff]  ;;  %v6824_v27 = vpack.c.bf16 %v1687_v17, %v1671_v16  ;;  %v1798_v16 = vld [vmem:[%s7426_s22 + $0x3070] sm:$0xff] }
 0x400   : > { %6531 = vmatpush1.bf16.msra.mxu0 %v6530_v23  ;;  %v1526_v23 = vld [vmem:[%s7426_s22 + $0x27f0] sm:$0xff]  ;;  %v6820_v11 = vpack.c.bf16 %v1655_v4, %v1639_v3  ;;  %v1751_v44 = vld [vmem:[%s7426_s22 + $0x2ef8] sm:$0xff] }
 0x401   : > { %6787 = vmatpush1.bf16.msra.mxu1 %v6786_v24  ;;  %6533 = vmatprep.subr.bf16.mxu0 %v6532_v25  ;;  %v1541_v24 = vld [vmem:[%s7426_s22 + $0x2868] sm:$0xff]  ;;  %v6832_v55 = vpack.c.bf16 %v1751_v44, %v1735_v43  ;;  %v1767_v59 = vld [vmem:[%s7426_s22 + $0x2f78] sm:$0xff]  ;;  %v1766_v3 = vld [vmem:[%s7426_s22 + $0x2f70] sm:$0xff] }
 0x402   : > { %6789 = vmatprep.subr.bf16.mxu1 %v6788_v29  ;;  %v1557_v25 = vld [vmem:[%s7426_s22 + $0x28e8] sm:$0xff]  ;;  %v6806_v29 = vpack.c.bf16 %v1526_v23, %v1510_v20  ;;  %v6566_v20 = vpack.c.bf16 %v1652_v9, %v1636_v8  ;;  %v1783_v60 = vld [vmem:[%s7426_s22 + $0x2ff8] sm:$0xff]  ;;  %v1830_v31 = vld [vmem:[%s7426_s22 + $0x3170] sm:$0xff] }
 0x403   : > { %v6552_v30 = vpack.c.bf16 %v1557_v25, %v1541_v24  ;;  %v1668_v24 = vld [vmem:[%s7426_s22 + $0x2c60] sm:$0xff]  ;;  %v6836_v4 = vpack.c.bf16 %v1783_v60, %v1767_v59  ;;  %v1799_v8 = vld [vmem:[%s7426_s22 + $0x3078] sm:$0xff]  ;;  %v1862_v44 = vld [vmem:[%s7426_s22 + $0x3270] sm:$0xff] }
 0x404   : > { %6535 = vmatpush1.bf16.msra.mxu0 %v6534_v35  ;;  %v1558_v35 = vld [vmem:[%s7426_s22 + $0x28f0] sm:$0xff]  ;;  %v1684_v25 = vld [vmem:[%s7426_s22 + $0x2ce0] sm:$0xff]  ;;  %v1815_v9 = vld [vmem:[%s7426_s22 + $0x30f8] sm:$0xff] }
 0x405   : > { %6791 = vmatpush1.bf16.msra.mxu1 %v6790_v36  ;;  %6537 = vmatprep.subr.bf16.mxu0 %v6536_v37  ;;  %v1573_v36 = vld [vmem:[%s7426_s22 + $0x2968] sm:$0xff]  ;;  %v6840_v17 = vpack.c.bf16 %v1815_v9, %v1799_v8  ;;  %v1876_v43 = vld [vmem:[%s7426_s22 + $0x32e0] sm:$0xff] }
 0x406   : > { %6793 = vmatprep.subr.bf16.mxu1 %v6792_v41  ;;  %v1589_v37 = vld [vmem:[%s7426_s22 + $0x29e8] sm:$0xff]  ;;  %v6810_v41 = vpack.c.bf16 %v1558_v35, %v1542_v33  ;;  %v6570_v33 = vpack.c.bf16 %v1684_v25, %v1668_v24  ;;  %v1831_v24 = vld [vmem:[%s7426_s22 + $0x3178] sm:$0xff]  ;;  %v1892_v59 = vld [vmem:[%s7426_s22 + $0x3360] sm:$0xff] }
 0x407   : > { %v6556_v42 = vpack.c.bf16 %v1589_v37, %v1573_v36  ;;  %v1700_v36 = vld [vmem:[%s7426_s22 + $0x2d60] sm:$0xff]  ;;  %v1847_v25 = vld [vmem:[%s7426_s22 + $0x31f8] sm:$0xff] }
 0x408   : > { %6539 = vmatpush1.bf16.msra.mxu0 %v6538_v48  ;;  %v1590_v48 = vld [vmem:[%s7426_s22 + $0x29f0] sm:$0xff]  ;;  %v1716_v37 = vld [vmem:[%s7426_s22 + $0x2de0] sm:$0xff]  ;;  %v6844_v32 = vpack.c.bf16 %v1847_v25, %v1831_v24 }
 0x409   : > { %6795 = vmatpush1.bf16.msra.mxu1 %v6794_v49  ;;  %6541 = vmatprep.subr.bf16.mxu0 %v6540_v50  ;;  %v1605_v49 = vld [vmem:[%s7426_s22 + $0x2a68] sm:$0xff]  ;;  %v1908_v60 = vld [vmem:[%s7426_s22 + $0x33e0] sm:$0xff] }
 0x40a   : > { %6797 = vmatprep.subr.bf16.mxu1 %v6796_v57  ;;  %v1621_v50 = vld [vmem:[%s7426_s22 + $0x2ae8] sm:$0xff]  ;;  %v6814_v57 = vpack.c.bf16 %v1590_v48, %v1574_v45  ;;  %v6574_v45 = vpack.c.bf16 %v1716_v37, %v1700_v36  ;;  %v7055_v36 = vld [vmem:[#allocation2 + $0x20] sm:$0xff]  ;;  %v1863_v37 = vld [vmem:[%s7426_s22 + $0x3278] sm:$0xff] }
 0x40b   : > { %v6560_v58 = vpack.c.bf16 %v1621_v50, %v1605_v49  ;;  %v1732_v49 = vld [vmem:[%s7426_s22 + $0x2e60] sm:$0xff] }
 0x40c   : > { %6543 = vmatpush1.bf16.msra.mxu0 %v6542_v63  ;;  %v1622_v63 = vld [vmem:[%s7426_s22 + $0x2af0] sm:$0xff]  ;;  %v1748_v50 = vld [vmem:[%s7426_s22 + $0x2ee0] sm:$0xff] }
 0x40d   : > { %6799 = vmatpush1.bf16.msra.mxu1 %v6798_v0  ;;  %6545 = vmatprep.subr.bf16.mxu0 %v6544_v1  ;;  %v1637_v0 = vld [vmem:[%s7426_s22 + $0x2b68] sm:$0xff]  ;;  %v1924_v8 = vld [vmem:[%s7426_s22 + $0x3460] sm:$0xff] }
 0x40e   : > { %6801 = vmatprep.subr.bf16.mxu1 %v6800_v6  ;;  %v1653_v1 = vld [vmem:[%s7426_s22 + $0x2be8] sm:$0xff]  ;;  %v6818_v6 = vpack.c.bf16 %v1622_v63, %v1606_v61  ;;  %v6578_v61 = vpack.c.bf16 %v1748_v50, %v1732_v49  ;;  %v7056_v50 = vld [vmem:[#allocation2 + $0x38] sm:$0xff]  ;;  %v1940_v9 = vld [vmem:[%s7426_s22 + $0x34e0] sm:$0xff] }
 0x40f   : > { %v6564_v7 = vpack.c.bf16 %v1653_v1, %v1637_v0  ;;  %v1764_v0 = vld [vmem:[%s7426_s22 + $0x2f60] sm:$0xff]  ;;  %v1909_v49 = vld [vmem:[%s7426_s22 + $0x33e8] sm:$0xff] }
 0x410   : > { %6547 = vmatpush1.bf16.msra.mxu0 %v6546_v12  ;;  %v1654_v12 = vld [vmem:[%s7426_s22 + $0x2bf0] sm:$0xff]  ;;  %v1780_v1 = vld [vmem:[%s7426_s22 + $0x2fe0] sm:$0xff] }
 0x411   : > { %6803 = vmatpush1.bf16.msra.mxu1 %v6802_v14  ;;  %6549 = vmatprep.subr.bf16.mxu0 %v6548_v15  ;;  %v1669_v14 = vld [vmem:[%s7426_s22 + $0x2c68] sm:$0xff]  ;;  %v1956_v25 = vld [vmem:[%s7426_s22 + $0x3560] sm:$0xff] }
 0x412   : > { %6805 = vmatprep.subr.bf16.mxu1 %v6804_v22  ;;  %v1685_v15 = vld [vmem:[%s7426_s22 + $0x2ce8] sm:$0xff]  ;;  %v6822_v22 = vpack.c.bf16 %v1654_v12, %v1638_v10  ;;  %v6582_v10 = vpack.c.bf16 %v1780_v1, %v1764_v0 }
 0x413   : > { %v6568_v23 = vpack.c.bf16 %v1685_v15, %v1669_v14  ;;  %v1796_v14 = vld [vmem:[%s7426_s22 + $0x3060] sm:$0xff]  ;;  %v1925_v0 = vld [vmem:[%s7426_s22 + $0x3468] sm:$0xff] }
 0x414   : > { %6551 = vmatpush1.bf16.msra.mxu0 %v6550_v28  ;;  %v1686_v28 = vld [vmem:[%s7426_s22 + $0x2cf0] sm:$0xff]  ;;  %v1812_v15 = vld [vmem:[%s7426_s22 + $0x30e0] sm:$0xff]  ;;  %v1941_v1 = vld [vmem:[%s7426_s22 + $0x34e8] sm:$0xff] }
 0x415   : > { %6807 = vmatpush1.bf16.msra.mxu1 %v6806_v29  ;;  %6553 = vmatprep.subr.bf16.mxu0 %v6552_v30  ;;  %v1701_v29 = vld [vmem:[%s7426_s22 + $0x2d68] sm:$0xff] }
 0x416   : > { %6809 = vmatprep.subr.bf16.mxu1 %v6808_v34  ;;  %v1717_v30 = vld [vmem:[%s7426_s22 + $0x2de8] sm:$0xff]  ;;  %v6826_v34 = vpack.c.bf16 %v1686_v28, %v1670_v26  ;;  %v6586_v26 = vpack.c.bf16 %v1812_v15, %v1796_v14 }
 0x417   : > { %v6572_v35 = vpack.c.bf16 %v1717_v30, %v1701_v29  ;;  %v1828_v29 = vld [vmem:[%s7426_s22 + $0x3160] sm:$0xff]  ;;  %v1957_v14 = vld [vmem:[%s7426_s22 + $0x3568] sm:$0xff] }
 0x418   : > { %6555 = vmatpush1.bf16.msra.mxu0 %v6554_v40  ;;  %v1718_v40 = vld [vmem:[%s7426_s22 + $0x2df0] sm:$0xff]  ;;  %v1844_v30 = vld [vmem:[%s7426_s22 + $0x31e0] sm:$0xff]  ;;  %v1973_v15 = vld [vmem:[%s7426_s22 + $0x35e8] sm:$0xff] }
 0x419   : > { %6811 = vmatpush1.bf16.msra.mxu1 %v6810_v41  ;;  %6557 = vmatprep.subr.bf16.mxu0 %v6556_v42  ;;  %v1733_v41 = vld [vmem:[%s7426_s22 + $0x2e68] sm:$0xff]  ;;  %v6604_v24 = vpack.c.bf16 %v1973_v15, %v1957_v14 }
 0x41a   : > { %6813 = vmatprep.subr.bf16.mxu1 %v6812_v46  ;;  %v1749_v42 = vld [vmem:[%s7426_s22 + $0x2ee8] sm:$0xff]  ;;  %v6830_v46 = vpack.c.bf16 %v1718_v40, %v1702_v38  ;;  %v1879_v38 = vld [vmem:[%s7426_s22 + $0x32f8] sm:$0xff] }
 0x41b   : > { %v6576_v48 = vpack.c.bf16 %v1749_v42, %v1733_v41  ;;  %v1860_v42 = vld [vmem:[%s7426_s22 + $0x3260] sm:$0xff] }
 0x41c   : > { %6559 = vmatpush1.bf16.msra.mxu0 %v6558_v56  ;;  %v1750_v56 = vld [vmem:[%s7426_s22 + $0x2ef0] sm:$0xff] }
 0x41d   : > { %6815 = vmatpush1.bf16.msra.mxu1 %v6814_v57  ;;  %6561 = vmatprep.subr.bf16.mxu0 %v6560_v58  ;;  %v1765_v57 = vld [vmem:[%s7426_s22 + $0x2f68] sm:$0xff] }
 0x41e   : > { %6817 = vmatprep.subr.bf16.mxu1 %v6816_v62  ;;  %v1781_v58 = vld [vmem:[%s7426_s22 + $0x2fe8] sm:$0xff]  ;;  %v6834_v62 = vpack.c.bf16 %v1750_v56, %v1734_v53  ;;  %v1895_v53 = vld [vmem:[%s7426_s22 + $0x3378] sm:$0xff]  ;;  %v6594_v56 = vpack.c.bf16 %v1876_v43, %v1860_v42  ;;  %v2006_v43 = vld [vmem:[%s7426_s22 + $0x36f0] sm:$0xff] }
 0x41f   : > { %v6580_v63 = vpack.c.bf16 %v1781_v58, %v1765_v57 }
 0x420   : > { %6563 = vmatpush1.bf16.msra.mxu0 %v6562_v5  ;;  %v1782_v5 = vld [vmem:[%s7426_s22 + $0x2ff0] sm:$0xff] }
 0x421   : > { %6819 = vmatpush1.bf16.msra.mxu1 %v6818_v6  ;;  %6565 = vmatprep.subr.bf16.mxu0 %v6564_v7  ;;  %v1797_v6 = vld [vmem:[%s7426_s22 + $0x3068] sm:$0xff] }
 0x422   : > { %6821 = vmatprep.subr.bf16.mxu1 %v6820_v11  ;;  %v1813_v7 = vld [vmem:[%s7426_s22 + $0x30e8] sm:$0xff]  ;;  %v6838_v11 = vpack.c.bf16 %v1782_v5, %v1766_v3  ;;  %v1927_v3 = vld [vmem:[%s7426_s22 + $0x3478] sm:$0xff]  ;;  %v6598_v5 = vpack.c.bf16 %v1908_v60, %v1892_v59  ;;  %v2020_v60 = vld [vmem:[%s7426_s22 + $0x3760] sm:$0xff] }
 0x423   : > { %v6584_v12 = vpack.c.bf16 %v1813_v7, %v1797_v6  ;;  %v6600_v7 = vpack.c.bf16 %v1941_v1, %v1925_v0 }
 0x424   : > { %6567 = vmatpush1.bf16.msra.mxu0 %v6566_v20  ;;  %v1814_v20 = vld [vmem:[%s7426_s22 + $0x30f0] sm:$0xff] }
 0x425   : > { %6823 = vmatpush1.bf16.msra.mxu1 %v6822_v22  ;;  %6569 = vmatprep.subr.bf16.mxu0 %v6568_v23  ;;  %v1829_v22 = vld [vmem:[%s7426_s22 + $0x3168] sm:$0xff] }
 0x426   : > { %6825 = vmatprep.subr.bf16.mxu1 %v6824_v27  ;;  %v1845_v23 = vld [vmem:[%s7426_s22 + $0x31e8] sm:$0xff]  ;;  %v6842_v27 = vpack.c.bf16 %v1814_v20, %v1798_v16  ;;  %v1959_v16 = vld [vmem:[%s7426_s22 + $0x3578] sm:$0xff]  ;;  %v6602_v20 = vpack.c.bf16 %v1940_v9, %v1924_v8 }
 0x427   : > { %v6588_v28 = vpack.c.bf16 %v1845_v23, %v1829_v22  ;;  %v9441_v22 = vld [vmem:[%s8376_s27 + $0x8] sm:$0xff] }
 0x428   : > { %6571 = vmatpush1.bf16.msra.mxu0 %v6570_v33  ;;  %v1846_v33 = vld [vmem:[%s7426_s22 + $0x31f0] sm:$0xff] }
 0x429   : > { %6827 = vmatpush1.bf16.msra.mxu1 %v6826_v34  ;;  %6573 = vmatprep.subr.bf16.mxu0 %v6572_v35  ;;  %v1861_v34 = vld [vmem:[%s7426_s22 + $0x3268] sm:$0xff]  ;;  %v6846_v40 = vpack.c.bf16 %v1846_v33, %v1830_v31  ;;  %v1991_v33 = vld [vmem:[%s7426_s22 + $0x3678] sm:$0xff] }
 0x42a   : > { %6829 = vmatprep.subr.bf16.mxu1 %v6828_v39  ;;  %v1877_v35 = vld [vmem:[%s7426_s22 + $0x32e8] sm:$0xff]  ;;  %v6590_v39 = vpack.c.bf16 %v1844_v30, %v1828_v29  ;;  %v1974_v29 = vld [vmem:[%s7426_s22 + $0x35f0] sm:$0xff] }
 0x42b   : > { %v6592_v41 = vpack.c.bf16 %v1877_v35, %v1861_v34  ;;  %v1989_v30 = vld [vmem:[%s7426_s22 + $0x3668] sm:$0xff]  ;;  %v2007_v34 = vld [vmem:[%s7426_s22 + $0x36f8] sm:$0xff]  ;;  %v2343_v35 = vrot.slane %v9441_v22, %v2310_v18 }
 0x42c   : > { %6575 = vmatpush1.bf16.msra.mxu0 %v6574_v45  ;;  %v6848_v45 = vpack.c.bf16 %v1879_v38, %v1863_v37  ;;  %v2005_v31 = vld [vmem:[%s7426_s22 + $0x36e8] sm:$0xff]  ;;  %v1988_v38 = vld [vmem:[%s7426_s22 + $0x3660] sm:$0xff] }
 0x42d   : > { %6831 = vmatpush1.bf16.msra.mxu1 %v6830_v46  ;;  %6577 = vmatprep.subr.bf16.mxu0 %v6576_v48  ;;  %v1878_v46 = vld [vmem:[%s7426_s22 + $0x32f0] sm:$0xff]  ;;  %v1893_v48 = vld [vmem:[%s7426_s22 + $0x3368] sm:$0xff]  ;;  %v6608_v42 = vpack.c.bf16 %v2005_v31, %v1989_v30  ;;  %v2087_v30 = vld [vmem:[%s7426_s22 + $0x3978] sm:$0xff] }
 0x42e   : > { %6833 = vmatprep.subr.bf16.mxu1 %v6832_v55  ;;  %v1911_v55 = vld [vmem:[%s7426_s22 + $0x33f8] sm:$0xff]  ;;  %v6850_v57 = vpack.c.bf16 %v1878_v46, %v1862_v44  ;;  %v6596_v58 = vpack.c.bf16 %v1909_v49, %v1893_v48  ;;  %v2021_v18 = vld [vmem:[%s7426_s22 + $0x3768] sm:$0xff] }
 0x42f   : > { %v2037_v44 = vld [vmem:[%s7426_s22 + $0x37e8] sm:$0xff]  ;;  %v2023_v46 = vld [vmem:[%s7426_s22 + $0x3778] sm:$0xff] }
 0x430   : > { %6579 = vmatpush1.bf16.msra.mxu0 %v6578_v61  ;;  %v1894_v61 = vld [vmem:[%s7426_s22 + $0x3370] sm:$0xff]  ;;  %v2039_v48 = vld [vmem:[%s7426_s22 + $0x37f8] sm:$0xff]  ;;  %v6612_v59 = vpack.c.bf16 %v2037_v44, %v2021_v18 }
 0x431   : > { %6835 = vmatpush1.bf16.msra.mxu1 %v6834_v62  ;;  %6581 = vmatprep.subr.bf16.mxu0 %v6580_v63  ;;  %v6852_v62 = vpack.c.bf16 %v1911_v55, %v1895_v53  ;;  %v1910_v63 = vld [vmem:[%s7426_s22 + $0x33f0] sm:$0xff]  ;;  %v6868_v1 = vpack.c.bf16 %v2039_v48, %v2023_v46  ;;  %v2103_v31 = vld [vmem:[%s7426_s22 + $0x39f8] sm:$0xff] }
 0x432   : > { %6837 = vmatprep.subr.bf16.mxu1 %v6836_v4  ;;  %v1943_v4 = vld [vmem:[%s7426_s22 + $0x34f8] sm:$0xff]  ;;  %v6854_v6 = vpack.c.bf16 %v1910_v63, %v1894_v61  ;;  %v2036_v61 = vld [vmem:[%s7426_s22 + $0x37e0] sm:$0xff]  ;;  %v2118_v46 = vld [vmem:[%s7426_s22 + $0x3a70] sm:$0xff] }
 0x433   : > { %v6614_v15 = vpack.c.bf16 %v2036_v61, %v2020_v60  ;;  %v2164_v60 = vld [vmem:[%s7426_s22 + $0x3be0] sm:$0xff]  ;;  %v2150_v61 = vld [vmem:[%s7426_s22 + $0x3b70] sm:$0xff] }
 0x434   : > { %6583 = vmatpush1.bf16.msra.mxu0 %v6582_v10  ;;  %v1926_v10 = vld [vmem:[%s7426_s22 + $0x3470] sm:$0xff] }
 0x435   : > { %6839 = vmatpush1.bf16.msra.mxu1 %v6838_v11  ;;  %6585 = vmatprep.subr.bf16.mxu0 %v6584_v12  ;;  %v6856_v11 = vpack.c.bf16 %v1943_v4, %v1927_v3  ;;  %v1942_v12 = vld [vmem:[%s7426_s22 + $0x34f0] sm:$0xff]  ;;  %v2053_v4 = vld [vmem:[%s7426_s22 + $0x3868] sm:$0xff] }
 0x436   : > { %6841 = vmatprep.subr.bf16.mxu1 %v6840_v17  ;;  %v1975_v17 = vld [vmem:[%s7426_s22 + $0x35f8] sm:$0xff]  ;;  %v6858_v23 = vpack.c.bf16 %v1942_v12, %v1926_v10  ;;  %v2038_v3 = vld [vmem:[%s7426_s22 + $0x37f0] sm:$0xff] }
 0x437   : > { %4291 = vmatmul.mubr.f32.vlgmr.msra.gmra.mrb[6].mxu0 %v7055_v36  ;;  %v2055_v10 = vld [vmem:[%s7426_s22 + $0x3878] sm:$0xff] }
 0x438   : > { %6587 = vmatpush1.bf16.msra.mxu0 %v6586_v26  ;;  %4575 = vmatmul.mubr.f32.vlgmr.msra.gmra.mrb[6].mxu1 %v7055_v36  ;;  %v1972_v26 = vld [vmem:[%s7426_s22 + $0x35e0] sm:$0xff]  ;;  %v2339_v36 = vrot.slane %v9441_v22, %v2306_v19  ;;  %v6864_v19 = vpack.c.bf16 %v2007_v34, %v1991_v33 }
 0x439   : > { %6843 = vmatpush1.bf16.msra.mxu1 %v6842_v27  ;;  %6589 = vmatprep.subr.bf16.mxu0 %v6588_v28  ;;  %v1958_v27 = vld [vmem:[%s7426_s22 + $0x3570] sm:$0xff]  ;;  %v6860_v28 = vpack.c.bf16 %v1975_v17, %v1959_v16  ;;  %v6606_v37 = vpack.c.bf16 %v1972_v26, %v1956_v25 }
 0x43a   : > { %6845 = vmatprep.subr.bf16.mxu1 %v6844_v32  ;;  %4361 = vmatprep.mubr.f32.mxu0 %v7056_v50  ;;  %v2335_v32 = vrot.slane %v9441_v22, %v2302_v13  ;;  %v2347_v13 = vrot.slane %v9441_v22, %v2314_v21  ;;  %v2054_v25 = vld [vmem:[%s7426_s22 + $0x3870] sm:$0xff] }
 0x43b   : > { %4645 = vmatprep.mubr.f32.mxu1 %v7056_v50 }
 0x43c   : > { %6591 = vmatpush1.bf16.msra.mxu0 %v6590_v39  ;;  %v2004_v39 = vld [vmem:[%s7426_s22 + $0x36e0] sm:$0xff] }
 0x43d   : > { %6847 = vmatpush1.bf16.msra.mxu1 %v6846_v40  ;;  %6593 = vmatprep.subr.bf16.mxu0 %v6592_v41  ;;  %v1990_v40 = vld [vmem:[%s7426_s22 + $0x3670] sm:$0xff]  ;;  %v6862_v41 = vpack.c.bf16 %v1974_v29, %v1958_v27  ;;  %v6610_v55 = vpack.c.bf16 %v2004_v39, %v1988_v38  ;;  %v2101_v29 = vld [vmem:[%s7426_s22 + $0x39e8] sm:$0xff]  ;;  %v6876_v38 = vpack.c.bf16 %v2103_v31, %v2087_v30 }
 0x43e   : > { %6849 = vmatprep.subr.bf16.mxu1 %v6848_v45  ;;  %v2070_v27 = vld [vmem:[%s7426_s22 + $0x38f0] sm:$0xff]  ;;  %v2245_v30 = vld [vmem:[%s7426_s22 + $0x3e68] sm:$0xff] }
 0x43f   : > { %v6874_v33 = vpack.c.bf16 %v2070_v27, %v2054_v25  ;;  %v2102_v39 = vld [vmem:[%s7426_s22 + $0x39f0] sm:$0xff]  ;;  %v2212_v25 = vld [vmem:[%s7426_s22 + $0x3d60] sm:$0xff]  ;;  %v2261_v31 = vld [vmem:[%s7426_s22 + $0x3ee8] sm:$0xff] }
 0x440   : > { %6595 = vmatpush1.bf16.msra.mxu0 %v6594_v56  ;;  %v2214_v27 = vld [vmem:[%s7426_s22 + $0x3d70] sm:$0xff] }
 0x441   : > { %6851 = vmatpush1.bf16.msra.mxu1 %v6850_v57  ;;  %6597 = vmatprep.subr.bf16.mxu0 %v6596_v58  ;;  %v6866_v58 = vpack.c.bf16 %v2006_v43, %v1990_v40  ;;  %v2117_v40 = vld [vmem:[%s7426_s22 + $0x3a68] sm:$0xff] }
 0x442   : > { %6853 = vmatprep.subr.bf16.mxu1 %v6852_v62  ;;  %v2022_v62 = vld [vmem:[%s7426_s22 + $0x3770] sm:$0xff] }
 0x443   : > { %v6870_v17 = vpack.c.bf16 %v2038_v3, %v2022_v62  ;;  %v2183_v3 = vld [vmem:[%s7426_s22 + $0x3c78] sm:$0xff] }
 0x444   : > { %6599 = vmatpush1.bf16.msra.mxu0 %v6598_v5  ;;  %v2069_v5 = vld [vmem:[%s7426_s22 + $0x38e8] sm:$0xff] }
 0x445   : > { %6855 = vmatpush1.bf16.msra.mxu1 %v6854_v6  ;;  %6601 = vmatprep.subr.bf16.mxu0 %v6600_v7 }
 0x446   : > { %6857 = vmatprep.subr.bf16.mxu1 %v6856_v11  ;;  %v2071_v11 = vld [vmem:[%s7426_s22 + $0x38f8] sm:$0xff] }
 0x447   : > { %v6872_v26 = vpack.c.bf16 %v2071_v11, %v2055_v10  ;;  %v2182_v10 = vld [vmem:[%s7426_s22 + $0x3c70] sm:$0xff] }
 0x448   : > { %6603 = vmatpush1.bf16.msra.mxu0 %v6602_v20  ;;  %v6616_v20 = vpack.c.bf16 %v2069_v5, %v2053_v4  ;;  %v2199_v4 = vld [vmem:[%s7426_s22 + $0x3cf8] sm:$0xff] }
 0x449   : > { %6859 = vmatpush1.bf16.msra.mxu1 %v6858_v23  ;;  %6605 = vmatprep.subr.bf16.mxu0 %v6604_v24  ;;  %v2052_v23 = vld [vmem:[%s7426_s22 + $0x3860] sm:$0xff]  ;;  %v6888_v11 = vpack.c.bf16 %v2199_v4, %v2183_v3 }
 0x44a   : > { %v3795_v45 = vpop.f32.mrb[4].mxu0  ;;  %6861 = vmatprep.subr.bf16.mxu1 %v6860_v28  ;;  %v2068_v24 = vld [vmem:[%s7426_s22 + $0x38e0] sm:$0xff]  ;;  %v2085_v28 = vld [vmem:[%s7426_s22 + $0x3968] sm:$0xff] }
 0x44b   : > { %v6912_v49 = vadd.f32 %v3795_v45, %v2335_v32  ;;  %v4079_v50 = vpop.f32.mrb[4].mxu1  ;;  %v3797_v53 = vpop.f32.mrb[5].mxu0  ;;  %v6618_v32 = vpack.c.bf16 %v2068_v24, %v2052_v23  ;;  %v6620_v34 = vpack.c.bf16 %v2101_v29, %v2085_v28  ;;  %v2116_v45 = vld [vmem:[%s7426_s22 + $0x3a60] sm:$0xff]  ;;  %v2230_v29 = vld [vmem:[%s7426_s22 + $0x3df0] sm:$0xff] }
 0x44c   : > { %v6914_v21 = vadd.f32 %v4079_v50, %v2343_v35  ;;  %v6913_v56 = vadd.f32 %v3797_v53, %v2339_v36  ;;  %v4081_v57 = vpop.f32.mrb[5].mxu1  ;;  %6607 = vmatpush1.bf16.msra.mxu0 %v6606_v37  ;;  %v2084_v35 = vld [vmem:[%s7426_s22 + $0x3960] sm:$0xff]  ;;  %v2086_v37 = vld [vmem:[%s7426_s22 + $0x3970] sm:$0xff]  ;;  %v2149_v50 = vld [vmem:[%s7426_s22 + $0x3b68] sm:$0xff] }
 0x44d   : > { %vm4660_vm8 = vcmp.gt.f32.partialorder %v6912_v49, 0.0  ;;  %v4676_v63 = vmul.f32 0.2, %v6912_v49  ;;  %v6915_v0 = vadd.f32 %v4081_v57, %v2347_v13  ;;  %6863 = vmatpush1.bf16.msra.mxu1 %v6862_v41  ;;  %6609 = vmatprep.subr.bf16.mxu0 %v6608_v42  ;;  %v2100_v36 = vld [vmem:[%s7426_s22 + $0x39e0] sm:$0xff]  ;;  %v2133_v13 = vld [vmem:[%s7426_s22 + $0x3ae8] sm:$0xff]  ;;  %v2119_v41 = vld [vmem:[%s7426_s22 + $0x3a78] sm:$0xff]  ;;  %v6878_v18 = vpack.c.bf16 %v2102_v39, %v2086_v37 }
 0x44e   : > { %vm4662_vm9 = vcmp.gt.f32.partialorder %v6914_v21, 0.0  ;;  %v4678_v6 = vmul.f32 0.2, %v6914_v21  ;;  %vm4661_vm10 = vcmp.gt.f32.partialorder %v6913_v56, 0.0  ;;  %v4677_v7 = vmul.f32 0.2, %v6913_v56  ;;  %6865 = vmatprep.subr.bf16.mxu1 %v6864_v19 }
 0x44f   : > { %v4692_v8 = vsel %vm4660_vm8, %v6912_v49, %v4676_v63  ;;  %vm4663_vm11 = vcmp.gt.f32.partialorder %v6915_v0, 0.0  ;;  %v4679_v9 = vmul.f32 0.2, %v6915_v0  ;;  %v2135_v42 = vld [vmem:[%s7426_s22 + $0x3af8] sm:$0xff]  ;;  %v6622_v43 = vpack.c.bf16 %v2100_v36, %v2084_v35  ;;  %v2132_v19 = vld [vmem:[%s7426_s22 + $0x3ae0] sm:$0xff]  ;;  %v2134_v49 = vld [vmem:[%s7426_s22 + $0x3af0] sm:$0xff] }
 0x450   : > { %4708 = vst [vmem:[%s8417_s10 + $0x40] sm:$0xff] %v4692_v8  ;;  %v4694_v12 = vsel %vm4662_vm9, %v6914_v21, %v4678_v6  ;;  %v4693_v14 = vsel %vm4661_vm10, %v6913_v56, %v4677_v7  ;;  %6611 = vmatpush1.bf16.msra.mxu0 %v6610_v55  ;;  %v6624_v44 = vpack.c.bf16 %v2133_v13, %v2117_v40  ;;  %v2165_v53 = vld [vmem:[%s7426_s22 + $0x3be8] sm:$0xff]  ;;  %v2151_v55 = vld [vmem:[%s7426_s22 + $0x3b78] sm:$0xff]  ;;  %v2166_v63 = vld [vmem:[%s7426_s22 + $0x3bf0] sm:$0xff] }
 0x451   : > { %4710 = vst [vmem:[%s8417_s10 + $0x50] sm:$0xff] %v4694_v12  ;;  %4709 = vst [vmem:[%s8417_s10 + $0x48] sm:$0xff] %v4693_v14  ;;  %v4695_v16 = vsel %vm4663_vm11, %v6915_v0, %v4679_v9  ;;  %6867 = vmatpush1.bf16.msra.mxu1 %v6866_v58  ;;  %6613 = vmatprep.subr.bf16.mxu0 %v6612_v59  ;;  %v6880_v48 = vpack.c.bf16 %v2135_v42, %v2119_v41  ;;  %v2167_v21 = vld [vmem:[%s7426_s22 + $0x3bf8] sm:$0xff]  ;;  %v2148_v59 = vld [vmem:[%s7426_s22 + $0x3b60] sm:$0xff] }
 0x452   : > { %4711 = vst [vmem:[%s8417_s10 + $0x58] sm:$0xff] %v4695_v16  ;;  %6869 = vmatprep.subr.bf16.mxu1 %v6868_v1  ;;  %v6626_v56 = vpack.c.bf16 %v2132_v19, %v2116_v45  ;;  %v6882_v57 = vpack.c.bf16 %v2134_v49, %v2118_v46  ;;  %v6628_v58 = vpack.c.bf16 %v2165_v53, %v2149_v50  ;;  %v2181_v0 = vld [vmem:[%s7426_s22 + $0x3c68] sm:$0xff]  ;;  %v2180_v8 = vld [vmem:[%s7426_s22 + $0x3c60] sm:$0xff]  ;;  %v2198_v12 = vld [vmem:[%s7426_s22 + $0x3cf0] sm:$0xff] }
 0x453   : > { %v6884_v62 = vpack.c.bf16 %v2167_v21, %v2151_v55  ;;  %v2197_v1 = vld [vmem:[%s7426_s22 + $0x3ce8] sm:$0xff]  ;;  %v6630_v5 = vpack.c.bf16 %v2164_v60, %v2148_v59  ;;  %v6886_v6 = vpack.c.bf16 %v2166_v63, %v2150_v61  ;;  %v2196_v9 = vld [vmem:[%s7426_s22 + $0x3ce0] sm:$0xff]  ;;  %v2215_v16 = vld [vmem:[%s7426_s22 + $0x3d78] sm:$0xff]  ;;  %v6890_v23 = vpack.c.bf16 %v2198_v12, %v2182_v10 }
 0x454   : > { %6615 = vmatpush1.bf16.msra.mxu0 %v6614_v15  ;;  %v6632_v7 = vpack.c.bf16 %v2197_v1, %v2181_v0  ;;  %v2213_v14 = vld [vmem:[%s7426_s22 + $0x3d68] sm:$0xff]  ;;  %v6894_v35 = vpack.c.bf16 %v2230_v29, %v2214_v27  ;;  %v6640_v36 = vpack.c.bf16 %v2261_v31, %v2245_v30  ;;  %v2244_v37 = vld [vmem:[%s7426_s22 + $0x3e60] sm:$0xff]  ;;  %v2246_v39 = vld [vmem:[%s7426_s22 + $0x3e70] sm:$0xff]  ;;  %v2355_v59 = vrot.slane %v9441_v22, %v2322_v52 }
 0x455   : > { %6871 = vmatpush1.bf16.msra.mxu1 %v6870_v17  ;;  %6617 = vmatprep.subr.bf16.mxu0 %v6616_v20  ;;  %v2229_v15 = vld [vmem:[%s7426_s22 + $0x3de8] sm:$0xff]  ;;  %v2231_v17 = vld [vmem:[%s7426_s22 + $0x3df8] sm:$0xff]  ;;  %v6634_v20 = vpack.c.bf16 %v2196_v9, %v2180_v8  ;;  %v2262_v13 = vld [vmem:[%s7426_s22 + $0x3ef0] sm:$0xff]  ;;  %v2363_v60 = vrot.slane %v9441_v22, %v2330_v54 }
 0x456   : > { %6873 = vmatprep.subr.bf16.mxu1 %v6872_v26  ;;  %v6636_v24 = vpack.c.bf16 %v2229_v15, %v2213_v14  ;;  %v2228_v26 = vld [vmem:[%s7426_s22 + $0x3de0] sm:$0xff]  ;;  %v6892_v28 = vpack.c.bf16 %v2231_v17, %v2215_v16  ;;  %v2277_v41 = vld [vmem:[%s7426_s22 + $0x3f68] sm:$0xff]  ;;  %v6898_v45 = vpack.c.bf16 %v2262_v13, %v2246_v39  ;;  %v2278_v50 = vld [vmem:[%s7426_s22 + $0x3f70] sm:$0xff] }
 0x457   : > { %v2293_v42 = vld [vmem:[%s7426_s22 + $0x3fe8] sm:$0xff]  ;;  %v2276_v46 = vld [vmem:[%s7426_s22 + $0x3f60] sm:$0xff]  ;;  %v2294_v53 = vld [vmem:[%s7426_s22 + $0x3ff0] sm:$0xff] }
 0x458   : > { %6619 = vmatpush1.bf16.msra.mxu0 %v6618_v32  ;;  %v2247_v32 = vld [vmem:[%s7426_s22 + $0x3e78] sm:$0xff]  ;;  %v6644_v19 = vpack.c.bf16 %v2293_v42, %v2277_v41  ;;  %v6902_v21 = vpack.c.bf16 %v2294_v53, %v2278_v50 }
 0x459   : > { %6875 = vmatpush1.bf16.msra.mxu1 %v6874_v33  ;;  %6621 = vmatprep.subr.bf16.mxu0 %v6620_v34  ;;  %v2263_v33 = vld [vmem:[%s7426_s22 + $0x3ef8] sm:$0xff]  ;;  %v6638_v34 = vpack.c.bf16 %v2228_v26, %v2212_v25 }
 0x45a   : > { %6877 = vmatprep.subr.bf16.mxu1 %v6876_v38  ;;  %v2260_v38 = vld [vmem:[%s7426_s22 + $0x3ee0] sm:$0xff]  ;;  %v6896_v40 = vpack.c.bf16 %v2263_v33, %v2247_v32 }
 0x45c   : > { %6623 = vmatpush1.bf16.msra.mxu0 %v6622_v43  ;;  %v2279_v43 = vld [vmem:[%s7426_s22 + $0x3f78] sm:$0xff] }
 0x45d   : > { %6879 = vmatpush1.bf16.msra.mxu1 %v6878_v18  ;;  %6625 = vmatprep.subr.bf16.mxu0 %v6624_v44  ;;  %v2295_v18 = vld [vmem:[%s7426_s22 + $0x3ff8] sm:$0xff]  ;;  %v6642_v44 = vpack.c.bf16 %v2260_v38, %v2244_v37 }
 0x45e   : > { %6881 = vmatprep.subr.bf16.mxu1 %v6880_v48  ;;  %v2292_v48 = vld [vmem:[%s7426_s22 + $0x3fe0] sm:$0xff]  ;;  %v6900_v49 = vpack.c.bf16 %v2295_v18, %v2279_v43 }
 0x45f   : > { %v6646_v55 = vpack.c.bf16 %v2292_v48, %v2276_v46 }
 0x460   : > { %6627 = vmatpush1.bf16.msra.mxu0 %v6626_v56  ;;  %v7057_v56 = vld [vmem:[#allocation2 + $0x30] sm:$0xff] }
 0x461   : > { %6883 = vmatpush1.bf16.msra.mxu1 %v6882_v57  ;;  %6629 = vmatprep.subr.bf16.mxu0 %v6628_v58  ;;  %v2351_v57 = vrot.slane %v9441_v22, %v2318_v47  ;;  %v2359_v58 = vrot.slane %v9441_v22, %v2326_v51 }
 0x462   : > { %6885 = vmatprep.subr.bf16.mxu1 %v6884_v62 }
 0x464   : > { %6631 = vmatpush1.bf16.msra.mxu0 %v6630_v5 }
 0x465   : > { %6887 = vmatpush1.bf16.msra.mxu1 %v6886_v6  ;;  %6633 = vmatprep.subr.bf16.mxu0 %v6632_v7 }
 0x466   : > { %6889 = vmatprep.subr.bf16.mxu1 %v6888_v11 }
 0x468   : > { %6635 = vmatpush1.bf16.msra.mxu0 %v6634_v20 }
 0x469   : > { %6891 = vmatpush1.bf16.msra.mxu1 %v6890_v23  ;;  %6637 = vmatprep.subr.bf16.mxu0 %v6636_v24 }
 0x46a   : > { %6893 = vmatprep.subr.bf16.mxu1 %v6892_v28 }
 0x46c   : > { %6639 = vmatpush1.bf16.msra.mxu0 %v6638_v34 }
 0x46d   : > { %6895 = vmatpush1.bf16.msra.mxu1 %v6894_v35  ;;  %6641 = vmatprep.subr.bf16.mxu0 %v6640_v36 }
 0x46e   : > { %6897 = vmatprep.subr.bf16.mxu1 %v6896_v40 }
 0x470   : > { %6643 = vmatpush1.bf16.msra.mxu0 %v6642_v44 }
 0x471   : > { %6899 = vmatpush1.bf16.msra.mxu1 %v6898_v45  ;;  %6645 = vmatprep.subr.bf16.mxu0 %v6644_v19 }
 0x472   : > { %6901 = vmatprep.subr.bf16.mxu1 %v6900_v49 }
 0x474   : > { %6647 = vmatpush1.bf16.msra.mxu0 %v6646_v55 }
 0x475   : > { %6903 = vmatpush1.bf16.msra.mxu1 %v6902_v21 }
 0x477   : > { %4362 = vmatmul.mubr.f32.vlgmr.msra.gmra.mrb[6].mxu0 %v7057_v56 }
 0x478   : > { %4646 = vmatmul.mubr.f32.vlgmr.msra.gmra.mrb[6].mxu1 %v7057_v56 }
 0x54a   : > { %v4363_v61 = vpop.f32.mrb[6].mxu0 }
 0x54b   : > { %v6916_v62 = vadd.f32 %v4363_v61, %v2351_v57  ;;  %v4647_v63 = vpop.f32.mrb[6].mxu1  ;;  %v4365_v0 = vpop.f32.mrb[7].mxu0 }
 0x54c   : > { %v6918_v1 = vadd.f32 %v4647_v63, %v2359_v58  ;;  %v6917_v3 = vadd.f32 %v4365_v0, %v2355_v59  ;;  %v4649_v47 = vpop.f32.mrb[7].mxu1 }
 0x54d   : > { %vm4664_vm12 = vcmp.gt.f32.partialorder %v6916_v62, 0.0  ;;  %v4680_v4 = vmul.f32 0.2, %v6916_v62  ;;  %v6919_v51 = vadd.f32 %v4649_v47, %v2363_v60 }
 0x54e   : > { %vm4666_vm13 = vcmp.gt.f32.partialorder %v6918_v1, 0.0  ;;  %v4682_v2 = vmul.f32 0.2, %v6918_v1  ;;  %vm4665_vm14 = vcmp.gt.f32.partialorder %v6917_v3, 0.0  ;;  %v4681_v52 = vmul.f32 0.2, %v6917_v3 }
 0x54f   : > { %v4696_v54 = vsel %vm4664_vm12, %v6916_v62, %v4680_v4  ;;  %vm4667_vm15 = vcmp.gt.f32.partialorder %v6919_v51, 0.0  ;;  %v4683_v22 = vmul.f32 0.2, %v6919_v51 }
 0x550   : > { %4712 = vst [vmem:[%s8417_s10 + $0x60] sm:$0xff] %v4696_v54  ;;  %v4698_v5 = vsel %vm4666_vm13, %v6918_v1, %v4682_v2  ;;  %v4697_v6 = vsel %vm4665_vm14, %v6917_v3, %v4681_v52 }
 0x551   : > { %4714 = vst [vmem:[%s8417_s10 + $0x70] sm:$0xff] %v4698_v5  ;;  %4713 = vst [vmem:[%s8417_s10 + $0x68] sm:$0xff] %v4697_v6  ;;  %v4699_v7 = vsel %vm4667_vm15, %v6919_v51, %v4683_v22 }
 0x552   : > { %4715 = vst [vmem:[%s8417_s10 + $0x78] sm:$0xff] %v4699_v7 }
 0x553   : > { %7159 = shalt.err (!%p7156_p1)
}
 0x554   : > { %s7160_s17 = scalar_lea.hbm %s9561_s5, 2048  ;;  %s7164_s21 = scalar_lea.hbm %s9611_s3, 4096 }
 0x555   : > { %p7161_p6 = scmp.ne.s32.totalorder %s9561_s5, %s7160_s17  ;;  %p7165_p7 = scmp.lt.u32.totalorder %s9561_s5, %s9611_s3 }
 0x556   : > { %p7166_p9 = scmp.lt.u32.totalorder %s7164_s21, %s7160_s17  ;;  %p7168_p12 = scmp.lt.u32.totalorder %s7160_s17, %s9561_s5 }
 0x557   : > { %p7162_p5 = pnand %p7161_p6, %p9632_p4 }
 0x558   : > { %p7167_p10 = por %p7166_p9, %p7165_p7 }
 0x559   : > { %p7163_p2 = pneg %p7162_p5 }
 0x55a   : > { %p7169_p0 = por %p7168_p12, %p7167_p10 }
 0x55c   : > { %p7170_p11 = pnand %p7169_p0, %p7163_p2 }
 0x55e   : > { %7173 = shalt.err (!%p7170_p11)
}
 0x55f   : > { %6976 = dma.vmem_to_hbm [thread:$0]  (%p9632_p4), %s9563_s23, 2048, %s9561_s5, %s4717_s24  }
 0x560 PF: > { %s4743_s27 = sand.u32 1, %s7204_s12   ;;  %p9633_p13 = scmp.ne.s32.totalorder %s9622_s28, 0 }
 0x561   : > { %p9634_p3 = scmp.ge.s32.totalorder %s7216_s15, 2  ;;  %s4744_s4 = scalar_lea.sflag [#allocation4], %s4743_s27 }
 0x563   : > { %p6990_p8 = pnand %p9634_p3, %p9633_p13 }
 0x565   : > { %7199 = dma.done.wait (!%p6990_p8), %s4744_s4, 2048  }
 0x566   : > { %7201 = vsyncadd (!%p6990_p8), %s4744_s4, 4294965248  ;;  %p17_p1 = scmp.ge.s32.totalorder %s7266_s16, 4   ;;  %s9635_s12 = smov %s7208_s13 }
 0x567   : > { %s9636_s13 = smov %s7212_s14  ;;  %s9637_s14 = smov %s7277_s19 }
 0x568   : > { %s9638_s15 = smov %s7266_s16  ;;  %19 = sbr.rel (!%p17_p1) target bundleno = 6 (0x6), region = 93 }
 0x56f   :  { %4749 = vsyncpa [#allocation3], 1 }
 0x570   :  { %4751 = vsyncpa [#allocation3 + $0x1], 1 }
 0x571   :  { %4752 = vsyncpa [#allocation6], 1 }
 0x572   :  { %4754 = vsyncpa [#allocation6 + $0x1], 1 }
 0x573   :  { %4755 = vsyncpa [#allocation4], 1 }
 0x574   :  { %4757 = vsyncpa [#allocation4 + $0x1], 1 }

</bundles_post_ra>
